<compile_context>
chip_gen: v5e
topology: v5e:2x2
jax: 0.10.0
libtpu: 0.0.40
codegen_flags: <defaults>
</compile_context>

<pallas_src>
import functools

import jax
import jax.numpy as jnp
from jax.experimental import pallas as pl
from jax.experimental.pallas import tpu as pltpu


def _swiglu_mlp_kernel(x_ref, guw_ref, dw_ref, o_ref, acc_ref, *, ti):
    # grid = (T // tm, I // ti); axis 1 (j) is the reduction over intermediate tiles.
    j = pl.program_id(1)

    @pl.when(j == 0)
    def _():
        acc_ref[...] = jnp.zeros_like(acc_ref)

    x = x_ref[...]                                                       # (tm, H)
    # Fused [gate | up] tile: a single matmul replaces two separate ones
    # (one weight DMA stream, one MXU push, x read from VMEM once).
    gu = jnp.dot(x, guw_ref[...], preferred_element_type=jnp.float32)    # (tm, 2*ti)
    g = gu[:, :ti]
    u = gu[:, ti:]
    h = (g * jax.nn.sigmoid(g)) * u                                      # SiLU(gate)*up, f32
    acc_ref[...] += jnp.dot(h.astype(dw_ref.dtype), dw_ref[...],
                            preferred_element_type=jnp.float32)          # (tm, H)

    @pl.when(j == pl.num_programs(1) - 1)
    def _():
        o_ref[...] = acc_ref[...].astype(o_ref.dtype)


def _pick_tile(dim, want, align):
    """Largest tile <= want that divides dim and is a multiple of align (else dim)."""
    t = min(want, dim)
    t -= t % align if t > align else 0
    while t > align and dim % t != 0:
        t -= align
    if t <= 0 or dim % t != 0:
        t = dim
    return t


def swiglu_mlp(x, gate_w, up_w, down_w, *, tm=256, ti=512):
    """x: (T, H); gate_w/up_w: (H, I); down_w: (I, H). Returns (T, H)."""
    T, H = x.shape
    I = gate_w.shape[1]
    assert gate_w.shape == (H, I) and up_w.shape == (H, I) and down_w.shape == (I, H)

    tm = _pick_tile(T, tm, 8)
    ti = _pick_tile(I, ti, 128)
    assert T % tm == 0 and I % ti == 0, (T, tm, I, ti)

    # Per-tile fusion of gate/up so that column block j of gu_w (width 2*ti)
    # is exactly [gate_w[:, j*ti:(j+1)*ti] | up_w[:, j*ti:(j+1)*ti]].
    # TODO(synk): in a real model, pre-fuse the weights once at load time
    # instead of per-call.
    n_i = I // ti
    gu_w = jnp.concatenate(
        [gate_w.reshape(H, n_i, ti), up_w.reshape(H, n_i, ti)], axis=2
    ).reshape(H, 2 * I)

    # VMEM budget: double-buffered blocks + f32 accumulator, with headroom.
    act_bytes = jnp.dtype(x.dtype).itemsize
    w_bytes = jnp.dtype(gate_w.dtype).itemsize
    needed = (2 * tm * H * act_bytes          # x blocks
              + 2 * H * (2 * ti) * w_bytes    # fused gate/up blocks
              + 2 * ti * H * w_bytes          # down blocks
              + 2 * tm * H * act_bytes        # out blocks
              + tm * H * 4)                   # f32 accumulator
    # Cap at 64 MiB: valid on every generation (v7x physical VMEM).
    vmem_limit = int(min(max(needed * 3 // 2, 32 * 1024 * 1024), 64 * 1024 * 1024))

    cost = pl.CostEstimate(
        flops=6 * T * H * I,                 # gate + up + down matmuls
        transcendentals=T * I,               # sigmoid in SiLU
        bytes_accessed=(T * H * act_bytes                       # x read
                        + (T // tm) * 3 * H * I * w_bytes       # weights per i-pass
                        + T * H * act_bytes),                   # output write
    )

    grid = (T // tm, I // ti)
    return pl.pallas_call(
        functools.partial(_swiglu_mlp_kernel, ti=ti),
        out_shape=jax.ShapeDtypeStruct((T, H), x.dtype),
        grid_spec=pltpu.PrefetchScalarGridSpec(
            num_scalar_prefetch=0,
            grid=grid,
            in_specs=[
                pl.BlockSpec((tm, H), lambda i, j: (i, 0)),        # x tile (resident over j)
                pl.BlockSpec((H, 2 * ti), lambda i, j: (0, j)),    # fused [gate|up] tile
                pl.BlockSpec((ti, H), lambda i, j: (j, 0)),        # down_w tile
            ],
            out_specs=pl.BlockSpec((tm, H), lambda i, j: (i, 0)),
            scratch_shapes=[pltpu.VMEM((tm, H), jnp.float32)],
        ),
        compiler_params=pltpu.CompilerParams(
            dimension_semantics=("parallel", "arbitrary"),
            vmem_limit_bytes=vmem_limit,
        ),
        cost_estimate=cost,
    )(x, gu_w, down_w)


def mlp_reference(x, gate_w, up_w, down_w):
    g = x @ gate_w
    u = x @ up_w
    return (jax.nn.silu(g) * u) @ down_w


if __name__ == "__main__":
    # Small shapes consistent with the module (hidden -> intermediate -> hidden SwiGLU),
    # chosen so the grid exercises both the parallel (T) and reduction (I) axes.
    T, H, I = 512, 256, 1024
    key = jax.random.PRNGKey(0)
    kx, kg, ku, kd = jax.random.split(key, 4)

    x32 = jax.random.normal(kx, (T, H), dtype=jnp.float32)
    # Params stored as (in, out), i.e. transposed nn.Linear weights.
    gate_w32 = jax.random.normal(kg, (H, I), dtype=jnp.float32) * (1.0 / H ** 0.5)
    up_w32 = jax.random.normal(ku, (H, I), dtype=jnp.float32) * (1.0 / H ** 0.5)
    down_w32 = jax.random.normal(kd, (I, H), dtype=jnp.float32) * (1.0 / I ** 0.5)

    ref = mlp_reference(x32, gate_w32, up_w32, down_w32)

    # f32 path: tight correctness check.
    out_f32 = jax.block_until_ready(swiglu_mlp(x32, gate_w32, up_w32, down_w32))
    assert out_f32.shape == (T, H)
    assert jnp.allclose(out_f32, ref, atol=1e-3, rtol=1e-3), float(
        jnp.max(jnp.abs(out_f32 - ref)))

    # bf16 path (recommended throughput config on v5e/v6e/v7x): MXU inputs in bf16,
    # f32 accumulation + f32 SiLU inside the kernel.
    bf = jnp.bfloat16
    out_bf16 = jax.block_until_ready(
        swiglu_mlp(x32.astype(bf), gate_w32.astype(bf),
                   up_w32.astype(bf), down_w32.astype(bf)))
    assert out_bf16.shape == (T, H)
    assert jnp.allclose(out_bf16.astype(jnp.float32), ref, atol=1e-1, rtol=1e-1), float(
        jnp.max(jnp.abs(out_bf16.astype(jnp.float32) - ref)))

    print("KERNEL_OK")
</pallas_src>

<mosaic_0001>
module attributes {stable_mosaic.version = 11 : i64} {
  func.func @_swiglu_mlp_kernel(%arg0: i32, %arg1: i32, %arg2: memref<256x256xf32, #tpu.memory_space<vmem>>, %arg3: memref<256x1024xf32, #tpu.memory_space<vmem>>, %arg4: memref<512x256xf32, #tpu.memory_space<vmem>>, %arg5: memref<256x256xf32, #tpu.memory_space<vmem>>, %arg6: memref<256x256xf32, #tpu.memory_space<vmem>>) attributes {dimension_semantics = [#tpu.dimension_semantics<parallel>, #tpu.dimension_semantics<arbitrary>], iteration_bounds = array<i64: 2, 2>, scalar_prefetch = 0 : i64, scratch_operands = 1 : i64, tpu.core_type = #tpu.core_type<tc>, window_params = [{transform_indices = @transform_0, window_bounds = array<i64: 256, 256>}, {transform_indices = @transform_1, window_bounds = array<i64: 256, 1024>}, {transform_indices = @transform_2, window_bounds = array<i64: 512, 256>}, {transform_indices = @transform_3, window_bounds = array<i64: 256, 256>}]} {
    %c0_i32 = arith.constant 0 : i32
    %0 = arith.cmpi eq, %arg1, %c0_i32 : i32
    %1 = arith.extui %0 : i1 to i32
    %c0_i32_0 = arith.constant 0 : i32
    %2 = arith.cmpi ne, %1, %c0_i32_0 : i32
    scf.if %2 {
      %cst_13 = arith.constant 0.000000e+00 : f32
      %23 = vector.broadcast %cst_13 : f32 to vector<256x256xf32>
      %c0_14 = arith.constant 0 : index
      %c0_15 = arith.constant 0 : index
      %24 = vector.load %arg6[%c0_14, %c0_15] : memref<256x256xf32, #tpu.memory_space<vmem>>, vector<256x256xf32>
      tpu.vector_store %arg6[%c0_14, %c0_15], %23 {strides = array<i32>} : memref<256x256xf32, #tpu.memory_space<vmem>>, vector<256x256xf32>,
    } else {
    }
    %c0 = arith.constant 0 : index
    %c0_1 = arith.constant 0 : index
    %3 = vector.load %arg2[%c0, %c0_1] : memref<256x256xf32, #tpu.memory_space<vmem>>, vector<256x256xf32>
    %c0_2 = arith.constant 0 : index
    %c0_3 = arith.constant 0 : index
    %4 = vector.load %arg3[%c0_2, %c0_3] : memref<256x1024xf32, #tpu.memory_space<vmem>>, vector<256x1024xf32>
    %cst = arith.constant dense<0.000000e+00> : vector<256x1024xf32>
    %5 = tpu.matmul %3, %4, %cst {dimension_numbers = #tpu.dot_dimension_numbers<[1], [0], [0], [1], [0, 0, 1, 1], [], []>} : vector<256x256xf32>, vector<256x1024xf32>, vector<256x1024xf32> -> vector<256x1024xf32>
    %6 = vector.extract_strided_slice %5 {offsets = [0, 0], sizes = [256, 512], strides = [1, 1]} : vector<256x1024xf32> to vector<256x512xf32>
    %7 = vector.extract_strided_slice %5 {offsets = [0, 512], sizes = [256, 512], strides = [1, 1]} : vector<256x1024xf32> to vector<256x512xf32>
    %8 = arith.negf %6 : vector<256x512xf32>
    %9 = math.exp %8 : vector<256x512xf32>
    %cst_4 = arith.constant 1.000000e+00 : f32
    %10 = vector.broadcast %cst_4 : f32 to vector<256x512xf32>
    %11 = arith.addf %10, %9 : vector<256x512xf32>
    %12 = arith.divf %10, %11 : vector<256x512xf32>
    %13 = arith.mulf %6, %12 : vector<256x512xf32>
    %14 = arith.mulf %13, %7 : vector<256x512xf32>
    %c0_5 = arith.constant 0 : index
    %c0_6 = arith.constant 0 : index
    %15 = vector.load %arg6[%c0_5, %c0_6] : memref<256x256xf32, #tpu.memory_space<vmem>>, vector<256x256xf32>
    %c0_7 = arith.constant 0 : index
    %c0_8 = arith.constant 0 : index
    %16 = vector.load %arg4[%c0_7, %c0_8] : memref<512x256xf32, #tpu.memory_space<vmem>>, vector<512x256xf32>
    %cst_9 = arith.constant dense<0.000000e+00> : vector<256x256xf32>
    %17 = tpu.matmul %14, %16, %cst_9 {dimension_numbers = #tpu.dot_dimension_numbers<[1], [0], [0], [1], [0, 0, 1, 1], [], []>} : vector<256x512xf32>, vector<512x256xf32>, vector<256x256xf32> -> vector<256x256xf32>
    %18 = arith.addf %15, %17 : vector<256x256xf32>
    %c0_10 = arith.constant 0 : index
    %c0_11 = arith.constant 0 : index
    %19 = vector.load %arg6[%c0_10, %c0_11] : memref<256x256xf32, #tpu.memory_space<vmem>>, vector<256x256xf32>
    tpu.vector_store %arg6[%c0_10, %c0_11], %18 {strides = array<i32>} : memref<256x256xf32, #tpu.memory_space<vmem>>, vector<256x256xf32>,
    %c1_i32 = arith.constant 1 : i32
    %20 = arith.cmpi eq, %arg1, %c1_i32 : i32
    %21 = arith.extui %20 : i1 to i32
    %c0_i32_12 = arith.constant 0 : i32
    %22 = arith.cmpi ne, %21, %c0_i32_12 : i32
    scf.if %22 {
      %c0_13 = arith.constant 0 : index
      %c0_14 = arith.constant 0 : index
      %23 = vector.load %arg6[%c0_13, %c0_14] : memref<256x256xf32, #tpu.memory_space<vmem>>, vector<256x256xf32>
      %c0_15 = arith.constant 0 : index
      %c0_16 = arith.constant 0 : index
      %24 = vector.load %arg5[%c0_15, %c0_16] : memref<256x256xf32, #tpu.memory_space<vmem>>, vector<256x256xf32>
      tpu.vector_store %arg5[%c0_15, %c0_16], %23 {strides = array<i32>} : memref<256x256xf32, #tpu.memory_space<vmem>>, vector<256x256xf32>,
    } else {
    }
    return
  }
  func.func @transform_0(%arg0: i32, %arg1: i32) -> (i32, i32) {
    %c0_i32 = arith.constant 0 : i32
    %c0_i32_0 = arith.constant 0 : i32
    return %arg0, %c0_i32 : i32, i32
  }
  func.func @transform_1(%arg0: i32, %arg1: i32) -> (i32, i32) {
    %c0_i32 = arith.constant 0 : i32
    %c0_i32_0 = arith.constant 0 : i32
    return %c0_i32, %arg1 : i32, i32
  }
  func.func @transform_2(%arg0: i32, %arg1: i32) -> (i32, i32) {
    %c0_i32 = arith.constant 0 : i32
    %c0_i32_0 = arith.constant 0 : i32
    return %arg1, %c0_i32 : i32, i32
  }
  func.func @transform_3(%arg0: i32, %arg1: i32) -> (i32, i32) {
    %c0_i32 = arith.constant 0 : i32
    %c0_i32_0 = arith.constant 0 : i32
    return %arg0, %c0_i32 : i32, i32
  }
}

</mosaic_0001>

<bundles_post_ra>
// kernel: tpu_custom_call.1
= control target key start
LH: loop header
LB: loop body
LE: loop exit
PB: predicated region body
PF: predicated region fallthrough
CT: control target
= control target key end

     0   :  { %s14775_s0 = inlined_call_operand.hbm [shape: f32[512,256], index: 0, kind: input, shape index: {}]   ;;  %s14776_s1 = inlined_call_operand.hbm [shape: f32[256,2048], index: 1, kind: input, shape index: {}]   ;;  %s14777_s2 = inlined_call_operand.hbm [shape: f32[1024,256], index: 2, kind: input, shape index: {}]   ;;  %s14778_s3 = inlined_call_operand.hbm [shape: f32[512,256], index: 3, kind: output, shape index: {}]  }
   0x1   :  { %15059 = sst [smem:[#allocation153_spill]] %s14776_s1 }
   0x2   :  { %15060 = sst [smem:[#allocation154_spill]] %s14778_s3 }
   0x3   :  { %8 = vsyncpa [#allocation4], 0 }
   0x4   :  { %10 = vsyncpa [#allocation4 + $0x1], 0 }
   0x5   :  { %11 = vsyncpa [#allocation7], 0 }
   0x6   :  { %13 = vsyncpa [#allocation7 + $0x1], 0 }
   0x7   :  { %14 = vsyncpa [#allocation5], 0 }
   0x8   :  { %16 = vsyncpa [#allocation5 + $0x1], 0  ;;  %s7843_s12 = smov 0   ;;  %s7845_s13 = smov 0  }
   0x9   :  { %s7847_s14 = smov 0   ;;  %s7849_s15 = smov 0  }
   0xa   :  { %s7851_s16 = smov 0   ;;  %s7853_s17 = smov 0  }
   0xb   :  { %s7855_s18 = smov 0   ;;  %s7857_s19 = smov 0  }
   0xc   :  { %s7859_s20 = smov 0   ;;  %s7861_s21 = smov 0  }
   0xd   :  { %s7863_s22 = smov 0  }
   0xe LB: > { %15061 = sst [smem:[#allocation13_spill]] %s7785_s15  ;;  %s31_s23 = sadd.s32 1, %s7805_s20  ;;  %s7813_s22 = sphi %s7863_s22, %s22_s22   ;;  %s7809_s21 = sphi %s7861_s21, %s16244_s21   ;;  %s7805_s20 = sphi %s7859_s20, %s16251_s20   ;;  %s7801_s19 = sphi %s7857_s19, %s16242_s19   ;;  %s7797_s18 = sphi %s7855_s18, %s16250_s18   ;;  %s7793_s17 = sphi %s7853_s17, %s16241_s17   ;;  %s7789_s16 = sphi %s7851_s16, %s16249_s16   ;;  %s7785_s15 = sphi %s7849_s15, %s16248_s15   ;;  %s7781_s14 = sphi %s7847_s14, %s16247_s14   ;;  %s7777_s13 = sphi %s7845_s13, %s16246_s13   ;;  %s7773_s12 = sphi %s7843_s12, %s16245_s12  }
   0xf   : > { %15062 = sst [smem:[#allocation14_spill]] %s7793_s17  ;;  %p49_p0 = scmp.eq.s32.totalorder %s7813_s22, 0 }
  0x10   : > { %15063 = sst [smem:[#allocation15_spill]] %s7801_s19  ;;  %p7900_p1 = scmp.ge.s32.totalorder %s31_s23, 2 }
  0x11   : > { %15064 = sst [smem:[#allocation16_spill]] %s7809_s21  ;;  %s67_s25 = sadd.s32 1, %s7781_s14 }
  0x12   : > { %p74_p2 = scmp.ne.s32.totalorder %s7781_s14, %s7777_s13  ;;  %p80_p3 = scmp.ne.s32.totalorder %s7777_s13, %s7773_s12 }
  0x13   : > { %s16253_s23 = smov (%p7900_p1, %s31_s23), 0  ;;  %p6859_p5 = scmp.lt.s32.totalorder %s7813_s22, 4 }
  0x14   : > { %15066 = sst [smem:[#allocation17_spill]] %s16253_s23  ;;  %p7915_p4 = por %p74_p2, %p49_p0 }
  0x15   : > { %s64_s27 = ssub.s32 %s7805_s20, %s16253_s23  ;;  %s179_s28 = sand.u32 1, %s7813_s22  }
  0x16   : > { %p65_p6 = scmp.eq.s32.totalorder %s64_s27, 0  ;;  %s14779_s29 = sand.u32 1, %s7781_s14  }
  0x17   : > { %s6682_s4 = sshll.u32 %s14779_s29, 11  ;;  %s6832_s5 = sshll.u32 %s7805_s20, 6 }
  0x18   : > { %s7925_s30 = scalar_select %p65_p6, %s7781_s14, %s67_s25  }
  0x19   : > { %s15069_s1 = sld [smem:[#allocation153_spill]]  ;;  %s183_s10 = scalar_lea.vmem [#allocation6], %s6682_s4 }
  0x1a   : > { %15068 = sst [smem:[#allocation18_spill]] %s7925_s30  ;;  %s191_s11 = sshll.u32 %s183_s10, 4  ;;  %s192_s11 = int_to_ptr.vmem [resolvable:$true] %s191_s11 }
  0x1b   : > { %p7937_p7 = pnand %p6859_p5, %p7915_p4  ;;  %p6689_p8 = scmp.ge.s32.totalorder %s7813_s22, 1 }
  0x1c   : > { %s7942_s27 = scalar_lea.sflag [#allocation7], %s179_s28  ;;  %s7815_s4 = smov 2048  }
  0x1d   : > { %s7817_s6 = smov 64   ;;  %p222_p9 = scmp.lt.s32.totalorder %s7813_s22, 5 }
  0x1e   : > { %s7953_s7 = sadd.s32 4294967295, %s7813_s22   ;;  %s6675_s28 = sadd.s32 4294967294, %s7813_s22  }
  0x1f   : > { %s188_s8 = scalar_lea.hbm %s15069_s1, %s6832_s5  ;;  %s7816_s5 = smov 1024  }
  0x20   : > { %s189_s9 = sshll.u32 %s188_s8, 4  ;;  %p7948_p10 = pnand %p6689_p8, %p222_p9  ;;  %s190_s9 = int_to_ptr.hbm [resolvable:$true] %s189_s9 }
  0x21   : > { %6851 = dma.hbm_to_vmem [thread:$0]  (!%p7937_p7), %s190_s9, 32768, %s192_s11, %s7942_s27, %s7815_s4, %s7816_s5, %s7817_s6  }
  0x22   : > { %s34_s8 = sadd.s32 1, %s7809_s21  ;;  %s41_s10 = sadd.s32 1, %s7793_s17 }
  0x23   : > { %s16255_s8 = smov (!%p7900_p1, %s34_s8), %s7809_s21  ;;  %p48_p11 = scmp.ne.s32.totalorder %s7793_s17, %s7789_s16 }
  0x24   : > { %p54_p12 = scmp.ne.s32.totalorder %s7789_s16, %s7785_s15  ;;  %p36_p13 = scmp.ge.s32.totalorder %s16255_s8, 2 }
  0x25   : > { %p55_p2 = scmp.eq.s32.totalorder %s7953_s7, 0  ;;  %p7968_p4 = por %p49_p0, %p48_p11 }
  0x26   : > { %p130_p6 = scmp.eq.s32.totalorder %s7953_s7, 3  ;;  %s16257_s8 = smov (%p36_p13, %s16255_s8), 0 }
  0x27   : > { %15073 = sst [smem:[#allocation19_spill]] %s16257_s8  ;;  %p7978_p8 = por %p55_p2, %p54_p12 }
  0x28   : > { %p7985_p1 = por %p80_p3, %p55_p2  ;;  %s38_s4 = ssub.s32 %s7809_s21, %s16257_s8 }
  0x29   : > { %p7991_p0 = por %p130_p6, %p48_p11  ;;  %p39_p9 = scmp.eq.s32.totalorder %s38_s4, 0 }
  0x2a   : > { %p136_p13 = scmp.eq.s32.totalorder %s6675_s28, 3  ;;  %s156_s6 = sand.u32 1, %s7793_s17  }
  0x2b   : > { %s15076_s5 = scalar_select %p7991_p0, 1, 0 }
  0x2c   : > { %s6831_s29 = sshll.u32 %s7809_s21, 9  ;;  %p8003_p3 = por %p136_p13, %p54_p12 }
  0x2d   : > { %15077 = sst [smem:[#allocation20_spill]] %s15076_s5  ;;  %s6678_s23 = sshll.u32 %s156_s6, 9 }
  0x2e   : > { %s7998_s1 = scalar_select %p39_p9, %s7793_s17, %s41_s10  }
  0x2f   : > { %s15079_s12 = scalar_select %p8003_p3, 1, 0 }
  0x30   : > { %15078 = sst [smem:[#allocation21_spill]] %s7998_s1  ;;  %s166_s3 = scalar_lea.hbm %s14775_s0, %s6831_s29 }
  0x31   : > { %15080 = sst [smem:[#allocation22_spill]] %s15079_s12  ;;  %s167_s19 = sshll.u32 %s166_s3, 4  ;;  %s168_s19 = int_to_ptr.hbm [resolvable:$true] %s167_s19 }
  0x32   : > { %s160_s5 = scalar_lea.vmem [#allocation3], %s6678_s23  ;;  %p6846_p11 = pnand %p6859_p5, %p7968_p4 }
  0x33   : > { %s169_s28 = sshll.u32 %s160_s5, 4  ;;  %s15081_s10 = sand.u32 1, %s7781_s14   ;;  %s170_s28 = int_to_ptr.vmem [resolvable:$true] %s169_s28 }
  0x34   : > { %s6685_s4 = sshll.u32 %s15081_s10, 10  ;;  %s157_s21 = scalar_lea.sflag [#allocation4], %s156_s6 }
  0x35   : > { %s7818_s1 = smov 256   ;;  %s7819_s17 = smov 16  }
  0x36   : > { %6848 = dma.hbm_to_vmem [thread:$0]  (!%p6846_p11), %s168_s19, 8192, %s170_s28, %s157_s21, %s7818_s1, %s7818_s1, %s7819_s17  }
  0x37   : > { %s6834_s12 = sshll.u32 %s7805_s20, 10  ;;  %s205_s29 = scalar_lea.vmem [#allocation8], %s6685_s4 }
  0x38   : > { %s211_s3 = scalar_lea.hbm %s14777_s2, %s6834_s12  ;;  %s214_s23 = sshll.u32 %s205_s29, 4  ;;  %s215_s23 = int_to_ptr.vmem [resolvable:$true] %s214_s23 }
  0x39   : > { %s212_s8 = sshll.u32 %s211_s3, 4  ;;  %226 = sbr.rel (%p7948_p10) target bundleno = 1965 (0x7ad), region = 32  ;;  %s213_s8 = int_to_ptr.hbm [resolvable:$true] %s212_s8 }
  0x3a   : > { %6854 = dma.hbm_to_vmem [thread:$0]  (!%p7937_p7), %s213_s8, 16384, %s215_s23, %s7942_s27, %s7818_s1, %s7818_s1, %s7819_s17  }
  0x3e   : > { %s8026_s9 = sand.u32 1, %s7789_s16  }
  0x3f   : > { %s6690_s19 = sshll.u32 %s8026_s9, 9  ;;  %s229_s21 = scalar_lea.sflag [#allocation4], %s8026_s9 }
  0x40   : > { %s8030_s15 = scalar_lea.vmem [#allocation3], %s6690_s19 }
  0x41   : > { %7760 = dma.done.wait (%p7978_p8), %s229_s21, 8192  }
  0x42   : > { %7762 = vsyncadd (%p7978_p8), %s229_s21, 4294959104  ;;  %s238_s1 = sand.u32 1, %s7953_s7   ;;  %s240_s17 = sand.u32 1, %s7777_s13  }
  0x43   : > { %s6691_s25 = sshll.u32 %s240_s17, 11  ;;  %s239_s27 = scalar_lea.sflag [#allocation7], %s238_s1 }
  0x44   : > { %s8038_s26 = scalar_lea.vmem [#allocation6], %s6691_s25 }
  0x45   : > { %7764 = dma.done.wait (%p7985_p1), %s239_s27, 49152  }
  0x46   : > { %7766 = vsyncadd (%p7985_p1), %s239_s27, 4294918144  ;;  %s6692_s5 = sshll.u32 %s240_s17, 10  ;;  %s8046_s12 = scalar_lea.vmem [#allocation9], %s6690_s19 }
  0x47   : > { %s8044_s6 = scalar_lea.vmem [#allocation8], %s6692_s5  ;;  %p6694_p5 = scmp.ne.s32.totalorder %s7797_s18, 0 }
  0x49   : > { %293 = sbr.rel (%p6694_p5) target bundleno = 143 (0x8f), region = 48 }
  0x4e   : > { %v7820_v0 = vmov 0.0  }
  0x4f   : > { %294 = vst [vmem:[#allocation2 + $0xb0] sm:$0xff] %v7820_v0 }
  0x50   : > { %295 = vst [vmem:[#allocation2 + $0x1b0] sm:$0xff] %v7820_v0 }
  0x51   : > { %296 = vst [vmem:[#allocation2 + $0xd8] sm:$0xff] %v7820_v0 }
  0x52   : > { %297 = vst [vmem:[#allocation2 + $0x18] sm:$0xff] %v7820_v0 }
  0x53   : > { %298 = vst [vmem:[#allocation2 + $0x50] sm:$0xff] %v7820_v0 }
  0x54   : > { %299 = vst [vmem:[#allocation2 + $0x168] sm:$0xff] %v7820_v0 }
  0x55   : > { %300 = vst [vmem:[#allocation2 + $0x130] sm:$0xff] %v7820_v0 }
  0x56   : > { %301 = vst [vmem:[#allocation2 + $0x48] sm:$0xff] %v7820_v0 }
  0x57   : > { %302 = vst [vmem:[#allocation2 + $0x180] sm:$0xff] %v7820_v0 }
  0x58   : > { %303 = vst [vmem:[#allocation2 + $0x110] sm:$0xff] %v7820_v0 }
  0x59   : > { %304 = vst [vmem:[#allocation2 + $0x118] sm:$0xff] %v7820_v0 }
  0x5a   : > { %305 = vst [vmem:[#allocation2 + $0x98] sm:$0xff] %v7820_v0 }
  0x5b   : > { %306 = vst [vmem:[#allocation2 + $0x120] sm:$0xff] %v7820_v0 }
  0x5c   : > { %307 = vst [vmem:[#allocation2 + $0x150] sm:$0xff] %v7820_v0 }
  0x5d   : > { %308 = vst [vmem:[#allocation2 + $0x108] sm:$0xff] %v7820_v0 }
  0x5e   : > { %309 = vst [vmem:[#allocation2 + $0x60] sm:$0xff] %v7820_v0 }
  0x5f   : > { %310 = vst [vmem:[#allocation2 + $0xe0] sm:$0xff] %v7820_v0 }
  0x60   : > { %311 = vst [vmem:[#allocation2 + $0x188] sm:$0xff] %v7820_v0 }
  0x61   : > { %312 = vst [vmem:[#allocation2 + $0x138] sm:$0xff] %v7820_v0 }
  0x62   : > { %313 = vst [vmem:[#allocation2 + $0x140] sm:$0xff] %v7820_v0 }
  0x63   : > { %314 = vst [vmem:[#allocation2 + $0x80] sm:$0xff] %v7820_v0 }
  0x64   : > { %315 = vst [vmem:[#allocation2 + $0x1a8] sm:$0xff] %v7820_v0 }
  0x65   : > { %316 = vst [vmem:[#allocation2 + $0x1b8] sm:$0xff] %v7820_v0 }
  0x66   : > { %317 = vst [vmem:[#allocation2 + $0x28] sm:$0xff] %v7820_v0 }
  0x67   : > { %318 = vst [vmem:[#allocation2 + $0x1e8] sm:$0xff] %v7820_v0 }
  0x68   : > { %319 = vst [vmem:[#allocation2 + $0xf8] sm:$0xff] %v7820_v0 }
  0x69   : > { %320 = vst [vmem:[#allocation2 + $0x160] sm:$0xff] %v7820_v0 }
  0x6a   : > { %321 = vst [vmem:[#allocation2 + $0x30] sm:$0xff] %v7820_v0 }
  0x6b   : > { %322 = vst [vmem:[#allocation2 + $0x1e0] sm:$0xff] %v7820_v0 }
  0x6c   : > { %323 = vst [vmem:[#allocation2] sm:$0xff] %v7820_v0 }
  0x6d   : > { %324 = vst [vmem:[#allocation2 + $0xf0] sm:$0xff] %v7820_v0 }
  0x6e   : > { %325 = vst [vmem:[#allocation2 + $0x8] sm:$0xff] %v7820_v0 }
  0x6f   : > { %326 = vst [vmem:[#allocation2 + $0x148] sm:$0xff] %v7820_v0 }
  0x70   : > { %327 = vst [vmem:[#allocation2 + $0x1d0] sm:$0xff] %v7820_v0 }
  0x71   : > { %328 = vst [vmem:[#allocation2 + $0x100] sm:$0xff] %v7820_v0 }
  0x72   : > { %329 = vst [vmem:[#allocation2 + $0xc8] sm:$0xff] %v7820_v0 }
  0x73   : > { %330 = vst [vmem:[#allocation2 + $0x40] sm:$0xff] %v7820_v0 }
  0x74   : > { %331 = vst [vmem:[#allocation2 + $0x1f8] sm:$0xff] %v7820_v0 }
  0x75   : > { %332 = vst [vmem:[#allocation2 + $0x20] sm:$0xff] %v7820_v0 }
  0x76   : > { %333 = vst [vmem:[#allocation2 + $0x128] sm:$0xff] %v7820_v0 }
  0x77   : > { %334 = vst [vmem:[#allocation2 + $0x1a0] sm:$0xff] %v7820_v0 }
  0x78   : > { %335 = vst [vmem:[#allocation2 + $0x1f0] sm:$0xff] %v7820_v0 }
  0x79   : > { %336 = vst [vmem:[#allocation2 + $0xe8] sm:$0xff] %v7820_v0 }
  0x7a   : > { %337 = vst [vmem:[#allocation2 + $0x78] sm:$0xff] %v7820_v0 }
  0x7b   : > { %338 = vst [vmem:[#allocation2 + $0x70] sm:$0xff] %v7820_v0 }
  0x7c   : > { %339 = vst [vmem:[#allocation2 + $0x90] sm:$0xff] %v7820_v0 }
  0x7d   : > { %340 = vst [vmem:[#allocation2 + $0x1d8] sm:$0xff] %v7820_v0 }
  0x7e   : > { %341 = vst [vmem:[#allocation2 + $0xd0] sm:$0xff] %v7820_v0 }
  0x7f   : > { %342 = vst [vmem:[#allocation2 + $0xb8] sm:$0xff] %v7820_v0 }
  0x80   : > { %343 = vst [vmem:[#allocation2 + $0x88] sm:$0xff] %v7820_v0 }
  0x81   : > { %344 = vst [vmem:[#allocation2 + $0xa8] sm:$0xff] %v7820_v0 }
  0x82   : > { %345 = vst [vmem:[#allocation2 + $0x1c8] sm:$0xff] %v7820_v0 }
  0x83   : > { %346 = vst [vmem:[#allocation2 + $0x170] sm:$0xff] %v7820_v0 }
  0x84   : > { %347 = vst [vmem:[#allocation2 + $0x178] sm:$0xff] %v7820_v0 }
  0x85   : > { %348 = vst [vmem:[#allocation2 + $0x68] sm:$0xff] %v7820_v0 }
  0x86   : > { %349 = vst [vmem:[#allocation2 + $0x190] sm:$0xff] %v7820_v0 }
  0x87   : > { %350 = vst [vmem:[#allocation2 + $0x198] sm:$0xff] %v7820_v0 }
  0x88   : > { %351 = vst [vmem:[#allocation2 + $0x38] sm:$0xff] %v7820_v0 }
  0x89   : > { %352 = vst [vmem:[#allocation2 + $0xc0] sm:$0xff] %v7820_v0 }
  0x8a   : > { %353 = vst [vmem:[#allocation2 + $0x1c0] sm:$0xff] %v7820_v0 }
  0x8b   : > { %354 = vst [vmem:[#allocation2 + $0x158] sm:$0xff] %v7820_v0 }
  0x8c   : > { %355 = vst [vmem:[#allocation2 + $0x10] sm:$0xff] %v7820_v0 }
  0x8d   : > { %356 = vst [vmem:[#allocation2 + $0x58] sm:$0xff] %v7820_v0 }
  0x8e   : > { %357 = vst [vmem:[#allocation2 + $0xa0] sm:$0xff] %v7820_v0 }
  0x8f PF: > { %v542_v1 = vld [vmem:[%s8038_s26 + $0x3c0] sm:$0xff]  ;;  %v543_v3 = vld [vmem:[%s8038_s26 + $0x3c8] sm:$0xff]  ;;  %p6823_p7 = scmp.ne.s32.totalorder %s7797_s18, 1 }
  0x90   : > { %v670_v2 = vld [vmem:[%s8038_s26 + $0x7c0] sm:$0xff]  ;;  %678 = vmatpush.msra.mxu0 %v542_v1  ;;  %v671_v4 = vld [vmem:[%s8038_s26 + $0x7c8] sm:$0xff]  ;;  %904 = vmatpush.msra.mxu2 %v543_v3  ;;  %v545_v3 = vld [vmem:[%s8038_s26 + $0x3d8] sm:$0xff] }
  0x91   : > { %791 = vmatpush.msra.mxu1 %v670_v2  ;;  %v534_v5 = vld [vmem:[%s8038_s26 + $0x380] sm:$0xff]  ;;  %1017 = vmatpush.msra.mxu3 %v671_v4  ;;  %v535_v7 = vld [vmem:[%s8038_s26 + $0x388] sm:$0xff]  ;;  %v673_v4 = vld [vmem:[%s8038_s26 + $0x7d8] sm:$0xff] }
  0x92   : > { %v662_v6 = vld [vmem:[%s8038_s26 + $0x780] sm:$0xff]  ;;  %v663_v8 = vld [vmem:[%s8038_s26 + $0x788] sm:$0xff]  ;;  %679 = vmatpush.msra.mxu0 %v534_v5  ;;  %905 = vmatpush.msra.mxu2 %v535_v7  ;;  %v544_v5 = vld [vmem:[%s8038_s26 + $0x3d0] sm:$0xff] }
  0x93   : > { %v526_v9 = vld [vmem:[%s8038_s26 + $0x340] sm:$0xff]  ;;  %792 = vmatpush.msra.mxu1 %v662_v6  ;;  %v527_v11 = vld [vmem:[%s8038_s26 + $0x348] sm:$0xff]  ;;  %1018 = vmatpush.msra.mxu3 %v663_v8  ;;  %v672_v6 = vld [vmem:[%s8038_s26 + $0x7d0] sm:$0xff] }
  0x94   : > { %v654_v10 = vld [vmem:[%s8038_s26 + $0x740] sm:$0xff]  ;;  %v655_v12 = vld [vmem:[%s8038_s26 + $0x748] sm:$0xff]  ;;  %680 = vmatpush.msra.mxu0 %v526_v9  ;;  %906 = vmatpush.msra.mxu2 %v527_v11  ;;  %v537_v7 = vld [vmem:[%s8038_s26 + $0x398] sm:$0xff] }
  0x95   : > { %v518_v13 = vld [vmem:[%s8038_s26 + $0x300] sm:$0xff]  ;;  %793 = vmatpush.msra.mxu1 %v654_v10  ;;  %v519_v15 = vld [vmem:[%s8038_s26 + $0x308] sm:$0xff]  ;;  %1019 = vmatpush.msra.mxu3 %v655_v12  ;;  %v665_v8 = vld [vmem:[%s8038_s26 + $0x798] sm:$0xff] }
  0x96   : > { %v646_v14 = vld [vmem:[%s8038_s26 + $0x700] sm:$0xff]  ;;  %v647_v16 = vld [vmem:[%s8038_s26 + $0x708] sm:$0xff]  ;;  %681 = vmatpush.msra.mxu0 %v518_v13  ;;  %907 = vmatpush.msra.mxu2 %v519_v15  ;;  %v536_v9 = vld [vmem:[%s8038_s26 + $0x390] sm:$0xff] }
  0x97   : > { %v510_v17 = vld [vmem:[%s8038_s26 + $0x2c0] sm:$0xff]  ;;  %794 = vmatpush.msra.mxu1 %v646_v14  ;;  %v511_v19 = vld [vmem:[%s8038_s26 + $0x2c8] sm:$0xff]  ;;  %1020 = vmatpush.msra.mxu3 %v647_v16  ;;  %v664_v10 = vld [vmem:[%s8038_s26 + $0x790] sm:$0xff] }
  0x98   : > { %v638_v18 = vld [vmem:[%s8038_s26 + $0x6c0] sm:$0xff]  ;;  %v639_v20 = vld [vmem:[%s8038_s26 + $0x6c8] sm:$0xff]  ;;  %682 = vmatpush.msra.mxu0 %v510_v17  ;;  %908 = vmatpush.msra.mxu2 %v511_v19  ;;  %v529_v11 = vld [vmem:[%s8038_s26 + $0x358] sm:$0xff] }
  0x99   : > { %v502_v21 = vld [vmem:[%s8038_s26 + $0x280] sm:$0xff]  ;;  %795 = vmatpush.msra.mxu1 %v638_v18  ;;  %v503_v23 = vld [vmem:[%s8038_s26 + $0x288] sm:$0xff]  ;;  %1021 = vmatpush.msra.mxu3 %v639_v20  ;;  %v657_v12 = vld [vmem:[%s8038_s26 + $0x758] sm:$0xff] }
  0x9a   : > { %v630_v22 = vld [vmem:[%s8038_s26 + $0x680] sm:$0xff]  ;;  %v631_v24 = vld [vmem:[%s8038_s26 + $0x688] sm:$0xff]  ;;  %683 = vmatpush.msra.mxu0 %v502_v21  ;;  %909 = vmatpush.msra.mxu2 %v503_v23  ;;  %v528_v13 = vld [vmem:[%s8038_s26 + $0x350] sm:$0xff] }
  0x9b   : > { %v494_v25 = vld [vmem:[%s8038_s26 + $0x240] sm:$0xff]  ;;  %796 = vmatpush.msra.mxu1 %v630_v22  ;;  %v495_v27 = vld [vmem:[%s8038_s26 + $0x248] sm:$0xff]  ;;  %1022 = vmatpush.msra.mxu3 %v631_v24  ;;  %v656_v14 = vld [vmem:[%s8038_s26 + $0x750] sm:$0xff] }
  0x9c   : > { %v622_v26 = vld [vmem:[%s8038_s26 + $0x640] sm:$0xff]  ;;  %v623_v28 = vld [vmem:[%s8038_s26 + $0x648] sm:$0xff]  ;;  %684 = vmatpush.msra.mxu0 %v494_v25  ;;  %910 = vmatpush.msra.mxu2 %v495_v27  ;;  %v8200_v15 = vld [vmem:[%s8030_s15 + $0x10] sm:$0xff] }
  0x9d   : > { %v486_v29 = vld [vmem:[%s8038_s26 + $0x200] sm:$0xff]  ;;  %797 = vmatpush.msra.mxu1 %v622_v26  ;;  %v487_v31 = vld [vmem:[%s8038_s26 + $0x208] sm:$0xff]  ;;  %1023 = vmatpush.msra.mxu3 %v623_v28  ;;  %v8203_v16 = vld [vmem:[%s8030_s15 + $0x18] sm:$0xff] }
  0x9e   : > { %v614_v30 = vld [vmem:[%s8038_s26 + $0x600] sm:$0xff]  ;;  %v615_v32 = vld [vmem:[%s8038_s26 + $0x608] sm:$0xff]  ;;  %685 = vmatpush.msra.mxu0 %v486_v29  ;;  %911 = vmatpush.msra.mxu2 %v487_v31  ;;  %v521_v19 = vld [vmem:[%s8038_s26 + $0x318] sm:$0xff] }
  0x9f   : > { %v478_v33 = vld [vmem:[%s8038_s26 + $0x1c0] sm:$0xff]  ;;  %798 = vmatpush.msra.mxu1 %v614_v30  ;;  %v479_v35 = vld [vmem:[%s8038_s26 + $0x1c8] sm:$0xff]  ;;  %1024 = vmatpush.msra.mxu3 %v615_v32  ;;  %v649_v20 = vld [vmem:[%s8038_s26 + $0x718] sm:$0xff] }
  0xa0   : > { %v606_v34 = vld [vmem:[%s8038_s26 + $0x5c0] sm:$0xff]  ;;  %v607_v36 = vld [vmem:[%s8038_s26 + $0x5c8] sm:$0xff]  ;;  %686 = vmatpush.msra.mxu0 %v478_v33  ;;  %912 = vmatpush.msra.mxu2 %v479_v35  ;;  %v520_v21 = vld [vmem:[%s8038_s26 + $0x310] sm:$0xff] }
  0xa1   : > { %v470_v37 = vld [vmem:[%s8038_s26 + $0x180] sm:$0xff]  ;;  %799 = vmatpush.msra.mxu1 %v606_v34  ;;  %v471_v39 = vld [vmem:[%s8038_s26 + $0x188] sm:$0xff]  ;;  %1025 = vmatpush.msra.mxu3 %v607_v36  ;;  %v648_v22 = vld [vmem:[%s8038_s26 + $0x710] sm:$0xff] }
  0xa2   : > { %v598_v38 = vld [vmem:[%s8038_s26 + $0x580] sm:$0xff]  ;;  %v599_v40 = vld [vmem:[%s8038_s26 + $0x588] sm:$0xff]  ;;  %687 = vmatpush.msra.mxu0 %v470_v37  ;;  %913 = vmatpush.msra.mxu2 %v471_v39  ;;  %v8224_v23 = vld [vmem:[%s8030_s15 + $0x30] sm:$0xff] }
  0xa3   : > { %v462_v41 = vld [vmem:[%s8038_s26 + $0x140] sm:$0xff]  ;;  %800 = vmatpush.msra.mxu1 %v598_v38  ;;  %v463_v43 = vld [vmem:[%s8038_s26 + $0x148] sm:$0xff]  ;;  %1026 = vmatpush.msra.mxu3 %v599_v40  ;;  %v8227_v24 = vld [vmem:[%s8030_s15 + $0x38] sm:$0xff] }
  0xa4   : > { %v590_v42 = vld [vmem:[%s8038_s26 + $0x540] sm:$0xff]  ;;  %v591_v44 = vld [vmem:[%s8038_s26 + $0x548] sm:$0xff]  ;;  %688 = vmatpush.msra.mxu0 %v462_v41  ;;  %914 = vmatpush.msra.mxu2 %v463_v43  ;;  %v513_v27 = vld [vmem:[%s8038_s26 + $0x2d8] sm:$0xff] }
  0xa5   : > { %v454_v45 = vld [vmem:[%s8038_s26 + $0x100] sm:$0xff]  ;;  %801 = vmatpush.msra.mxu1 %v590_v42  ;;  %v455_v47 = vld [vmem:[%s8038_s26 + $0x108] sm:$0xff]  ;;  %1027 = vmatpush.msra.mxu3 %v591_v44  ;;  %v641_v28 = vld [vmem:[%s8038_s26 + $0x6d8] sm:$0xff] }
  0xa6   : > { %v582_v46 = vld [vmem:[%s8038_s26 + $0x500] sm:$0xff]  ;;  %v583_v48 = vld [vmem:[%s8038_s26 + $0x508] sm:$0xff]  ;;  %689 = vmatpush.msra.mxu0 %v454_v45  ;;  %915 = vmatpush.msra.mxu2 %v455_v47  ;;  %v512_v29 = vld [vmem:[%s8038_s26 + $0x2d0] sm:$0xff] }
  0xa7   : > { %v446_v49 = vld [vmem:[%s8038_s26 + $0xc0] sm:$0xff]  ;;  %802 = vmatpush.msra.mxu1 %v582_v46  ;;  %v447_v51 = vld [vmem:[%s8038_s26 + $0xc8] sm:$0xff]  ;;  %1028 = vmatpush.msra.mxu3 %v583_v48  ;;  %v640_v30 = vld [vmem:[%s8038_s26 + $0x6d0] sm:$0xff] }
  0xa8   : > { %v574_v50 = vld [vmem:[%s8038_s26 + $0x4c0] sm:$0xff]  ;;  %v575_v52 = vld [vmem:[%s8038_s26 + $0x4c8] sm:$0xff]  ;;  %690 = vmatpush.msra.mxu0 %v446_v49  ;;  %916 = vmatpush.msra.mxu2 %v447_v51  ;;  %v8248_v31 = vld [vmem:[%s8030_s15 + $0x50] sm:$0xff] }
  0xa9   : > { %v438_v53 = vld [vmem:[%s8038_s26 + $0x80] sm:$0xff]  ;;  %803 = vmatpush.msra.mxu1 %v574_v50  ;;  %v439_v55 = vld [vmem:[%s8038_s26 + $0x88] sm:$0xff]  ;;  %1029 = vmatpush.msra.mxu3 %v575_v52  ;;  %v8251_v32 = vld [vmem:[%s8030_s15 + $0x58] sm:$0xff] }
  0xaa   : > { %v566_v54 = vld [vmem:[%s8038_s26 + $0x480] sm:$0xff]  ;;  %v567_v56 = vld [vmem:[%s8038_s26 + $0x488] sm:$0xff]  ;;  %691 = vmatpush.msra.mxu0 %v438_v53  ;;  %917 = vmatpush.msra.mxu2 %v439_v55  ;;  %v505_v35 = vld [vmem:[%s8038_s26 + $0x298] sm:$0xff] }
  0xab   : > { %v430_v57 = vld [vmem:[%s8038_s26 + $0x40] sm:$0xff]  ;;  %804 = vmatpush.msra.mxu1 %v566_v54  ;;  %v431_v59 = vld [vmem:[%s8038_s26 + $0x48] sm:$0xff]  ;;  %1030 = vmatpush.msra.mxu3 %v567_v56  ;;  %v633_v36 = vld [vmem:[%s8038_s26 + $0x698] sm:$0xff] }
  0xac   : > { %v558_v58 = vld [vmem:[%s8038_s26 + $0x440] sm:$0xff]  ;;  %v559_v60 = vld [vmem:[%s8038_s26 + $0x448] sm:$0xff]  ;;  %692 = vmatpush.msra.mxu0 %v430_v57  ;;  %918 = vmatpush.msra.mxu2 %v431_v59  ;;  %v504_v37 = vld [vmem:[%s8038_s26 + $0x290] sm:$0xff] }
  0xad   : > { %v422_v61 = vld [vmem:[%s8038_s26] sm:$0xff]  ;;  %805 = vmatpush.msra.mxu1 %v558_v58  ;;  %v423_v63 = vld [vmem:[%s8038_s26 + $0x8] sm:$0xff]  ;;  %1031 = vmatpush.msra.mxu3 %v559_v60  ;;  %v632_v38 = vld [vmem:[%s8038_s26 + $0x690] sm:$0xff] }
  0xae   : > { %v550_v62 = vld [vmem:[%s8038_s26 + $0x400] sm:$0xff]  ;;  %v551_v0 = vld [vmem:[%s8038_s26 + $0x408] sm:$0xff]  ;;  %693 = vmatpush.msra.mxu0 %v422_v61  ;;  %919 = vmatpush.msra.mxu2 %v423_v63  ;;  %v8272_v39 = vld [vmem:[%s8030_s15 + $0x70] sm:$0xff] }
  0xaf   : > { %v8178_v1 = vld [vmem:[%s8030_s15] sm:$0xff]  ;;  %v8181_v2 = vld [vmem:[%s8030_s15 + $0x8] sm:$0xff]  ;;  %806 = vmatpush.msra.mxu1 %v550_v62  ;;  %1032 = vmatpush.msra.mxu3 %v551_v0  ;;  %v8275_v40 = vld [vmem:[%s8030_s15 + $0x78] sm:$0xff] }
  0xb0   : > { %694 = vmatmul.f32.vlgmr.msra.gmra.mxu0 %v8178_v1  ;;  %807 = vmatmul.f32.vlgmr.msra.gmra.mxu1 %v8181_v2  ;;  %v8210_v17 = vld [vmem:[%s8030_s15 + $0x20] sm:$0xff]  ;;  %v8213_v18 = vld [vmem:[%s8030_s15 + $0x28] sm:$0xff]  ;;  %v497_v43 = vld [vmem:[%s8038_s26 + $0x258] sm:$0xff] }
  0xb1   : > { %920 = vmatmul.f32.vlgmr.msra.gmra.mxu2 %v8178_v1  ;;  %1033 = vmatmul.f32.vlgmr.msra.gmra.mxu3 %v8181_v2  ;;  %v8234_v25 = vld [vmem:[%s8030_s15 + $0x40] sm:$0xff]  ;;  %v8237_v26 = vld [vmem:[%s8030_s15 + $0x48] sm:$0xff]  ;;  %v625_v44 = vld [vmem:[%s8038_s26 + $0x658] sm:$0xff] }
  0xb2   : > { %1356 = vmatpush.msrb.mxu2 %v545_v3  ;;  %1469 = vmatpush.msrb.mxu3 %v673_v4  ;;  %v8258_v33 = vld [vmem:[%s8030_s15 + $0x60] sm:$0xff]  ;;  %v8261_v34 = vld [vmem:[%s8030_s15 + $0x68] sm:$0xff]  ;;  %v496_v45 = vld [vmem:[%s8038_s26 + $0x250] sm:$0xff] }
  0xb3   : > { %1130 = vmatpush.msrb.mxu0 %v544_v5  ;;  %1243 = vmatpush.msrb.mxu1 %v672_v6  ;;  %v8282_v41 = vld [vmem:[%s8030_s15 + $0x80] sm:$0xff]  ;;  %v8285_v42 = vld [vmem:[%s8030_s15 + $0x88] sm:$0xff]  ;;  %v624_v46 = vld [vmem:[%s8038_s26 + $0x650] sm:$0xff] }
  0xb4   : > { %1357 = vmatpush.msrb.mxu2 %v537_v7  ;;  %1470 = vmatpush.msrb.mxu3 %v665_v8  ;;  %v8296_v47 = vld [vmem:[%s8030_s15 + $0x90] sm:$0xff]  ;;  %v8299_v48 = vld [vmem:[%s8030_s15 + $0x98] sm:$0xff]  ;;  %v8306_v49 = vld [vmem:[%s8030_s15 + $0xa0] sm:$0xff] }
  0xb5   : > { %1131 = vmatpush.msrb.mxu0 %v536_v9  ;;  %1244 = vmatpush.msrb.mxu1 %v664_v10  ;;  %v8309_v50 = vld [vmem:[%s8030_s15 + $0xa8] sm:$0xff]  ;;  %v489_v51 = vld [vmem:[%s8038_s26 + $0x218] sm:$0xff]  ;;  %v488_v53 = vld [vmem:[%s8038_s26 + $0x210] sm:$0xff] }
  0xb6   : > { %1358 = vmatpush.msrb.mxu2 %v529_v11  ;;  %1471 = vmatpush.msrb.mxu3 %v657_v12  ;;  %v617_v52 = vld [vmem:[%s8038_s26 + $0x618] sm:$0xff]  ;;  %v616_v54 = vld [vmem:[%s8038_s26 + $0x610] sm:$0xff]  ;;  %v8330_v57 = vld [vmem:[%s8030_s15 + $0xc0] sm:$0xff] }
  0xb7   : > { %1132 = vmatpush.msrb.mxu0 %v528_v13  ;;  %1245 = vmatpush.msrb.mxu1 %v656_v14  ;;  %v8320_v55 = vld [vmem:[%s8030_s15 + $0xb0] sm:$0xff]  ;;  %v8323_v56 = vld [vmem:[%s8030_s15 + $0xb8] sm:$0xff]  ;;  %v8333_v58 = vld [vmem:[%s8030_s15 + $0xc8] sm:$0xff] }
  0xb8   : > { %697 = vmatmul.f32.gmra.mxu0 %v8200_v15  ;;  %810 = vmatmul.f32.gmra.mxu1 %v8203_v16  ;;  %v8340_v59 = vld [vmem:[%s8030_s15 + $0xd0] sm:$0xff]  ;;  %v8343_v60 = vld [vmem:[%s8030_s15 + $0xd8] sm:$0xff]  ;;  %v8350_v61 = vld [vmem:[%s8030_s15 + $0xe0] sm:$0xff] }
  0xb9   : > { %923 = vmatmul.f32.gmra.mxu2 %v8200_v15  ;;  %1036 = vmatmul.f32.gmra.mxu3 %v8203_v16  ;;  %v8353_v62 = vld [vmem:[%s8030_s15 + $0xe8] sm:$0xff]  ;;  %v8360_v63 = vld [vmem:[%s8030_s15 + $0xf0] sm:$0xff]  ;;  %v8363_v0 = vld [vmem:[%s8030_s15 + $0xf8] sm:$0xff] }
  0xba   : > { %1359 = vmatpush.msrb.mxu2 %v521_v19  ;;  %1472 = vmatpush.msrb.mxu3 %v649_v20  ;;  %v481_v3 = vld [vmem:[%s8038_s26 + $0x1d8] sm:$0xff]  ;;  %v8376_v7 = vld [vmem:[%s8030_s15 + $0x100] sm:$0xff]  ;;  %v8379_v8 = vld [vmem:[%s8030_s15 + $0x108] sm:$0xff] }
  0xbb   : > { %1133 = vmatpush.msrb.mxu0 %v520_v21  ;;  %1246 = vmatpush.msrb.mxu1 %v648_v22  ;;  %v609_v4 = vld [vmem:[%s8038_s26 + $0x5d8] sm:$0xff]  ;;  %v480_v9 = vld [vmem:[%s8038_s26 + $0x1d0] sm:$0xff] }
  0xbc   : > { %1360 = vmatpush.msrb.mxu2 %v513_v27  ;;  %1473 = vmatpush.msrb.mxu3 %v641_v28  ;;  %v608_v10 = vld [vmem:[%s8038_s26 + $0x5d0] sm:$0xff]  ;;  %v8397_v21 = vld [vmem:[%s8030_s15 + $0x118] sm:$0xff] }
  0xbd   : > { %1134 = vmatpush.msrb.mxu0 %v512_v29  ;;  %1247 = vmatpush.msrb.mxu1 %v640_v30  ;;  %v8394_v20 = vld [vmem:[%s8030_s15 + $0x110] sm:$0xff] }
  0xbe   : > { %1361 = vmatpush.msrb.mxu2 %v505_v35  ;;  %1474 = vmatpush.msrb.mxu3 %v633_v36  ;;  %v8410_v35 = vld [vmem:[%s8030_s15 + $0x120] sm:$0xff]  ;;  %v8413_v36 = vld [vmem:[%s8030_s15 + $0x128] sm:$0xff] }
  0xbf   : > { %1135 = vmatpush.msrb.mxu0 %v504_v37  ;;  %1248 = vmatpush.msrb.mxu1 %v632_v38  ;;  %v473_v37 = vld [vmem:[%s8038_s26 + $0x198] sm:$0xff] }
  0xc0   : > { %700 = vmatmul.f32.gmra.mxu0 %v8210_v17  ;;  %813 = vmatmul.f32.gmra.mxu1 %v8213_v18  ;;  %v601_v38 = vld [vmem:[%s8038_s26 + $0x598] sm:$0xff] }
  0xc1   : > { %926 = vmatmul.f32.gmra.mxu2 %v8210_v17  ;;  %1039 = vmatmul.f32.gmra.mxu3 %v8213_v18 }
  0xc2   : > { %1362 = vmatpush.msrb.mxu2 %v497_v43  ;;  %1475 = vmatpush.msrb.mxu3 %v625_v44  ;;  %v472_v43 = vld [vmem:[%s8038_s26 + $0x190] sm:$0xff] }
  0xc3   : > { %1136 = vmatpush.msrb.mxu0 %v496_v45  ;;  %1249 = vmatpush.msrb.mxu1 %v624_v46  ;;  %v600_v44 = vld [vmem:[%s8038_s26 + $0x590] sm:$0xff] }
  0xc4   : > { %1363 = vmatpush.msrb.mxu2 %v489_v51  ;;  %1476 = vmatpush.msrb.mxu3 %v617_v52 }
  0xc5   : > { %1137 = vmatpush.msrb.mxu0 %v488_v53  ;;  %1250 = vmatpush.msrb.mxu1 %v616_v54  ;;  %v8430_v54 = vld [vmem:[%s8030_s15 + $0x130] sm:$0xff] }
  0xc6   : > { %1364 = vmatpush.msrb.mxu2 %v481_v3  ;;  %1477 = vmatpush.msrb.mxu3 %v609_v4  ;;  %v8433_v3 = vld [vmem:[%s8030_s15 + $0x138] sm:$0xff] }
  0xc7   : > { %1138 = vmatpush.msrb.mxu0 %v480_v9  ;;  %1251 = vmatpush.msrb.mxu1 %v608_v10 }
  0xc8   : > { %703 = vmatmul.f32.gmra.mxu0 %v8224_v23  ;;  %816 = vmatmul.f32.gmra.mxu1 %v8227_v24 }
  0xc9   : > { %929 = vmatmul.f32.gmra.mxu2 %v8224_v23  ;;  %1042 = vmatmul.f32.gmra.mxu3 %v8227_v24 }
  0xca   : > { %1365 = vmatpush.msrb.mxu2 %v473_v37  ;;  %1478 = vmatpush.msrb.mxu3 %v601_v38  ;;  %v465_v37 = vld [vmem:[%s8038_s26 + $0x158] sm:$0xff] }
  0xcb   : > { %1139 = vmatpush.msrb.mxu0 %v472_v43  ;;  %1252 = vmatpush.msrb.mxu1 %v600_v44  ;;  %v593_v38 = vld [vmem:[%s8038_s26 + $0x558] sm:$0xff] }
  0xcc   : > { %1366 = vmatpush.msrb.mxu2 %v465_v37  ;;  %1479 = vmatpush.msrb.mxu3 %v593_v38  ;;  %v464_v37 = vld [vmem:[%s8038_s26 + $0x150] sm:$0xff] }
  0xcd   : > { %v592_v38 = vld [vmem:[%s8038_s26 + $0x550] sm:$0xff]  ;;  %1140 = vmatpush.msrb.mxu0 %v464_v37  ;;  %v457_v37 = vld [vmem:[%s8038_s26 + $0x118] sm:$0xff] }
  0xce   : > { %1253 = vmatpush.msrb.mxu1 %v592_v38  ;;  %v585_v38 = vld [vmem:[%s8038_s26 + $0x518] sm:$0xff]  ;;  %1367 = vmatpush.msrb.mxu2 %v457_v37 }
  0xcf   : > { %1480 = vmatpush.msrb.mxu3 %v585_v38 }
  0xd0   : > { %706 = vmatmul.f32.gmra.mxu0 %v8234_v25  ;;  %819 = vmatmul.f32.gmra.mxu1 %v8237_v26 }
  0xd1   : > { %932 = vmatmul.f32.gmra.mxu2 %v8234_v25  ;;  %1045 = vmatmul.f32.gmra.mxu3 %v8237_v26 }
  0xd8   : > { %709 = vmatmul.f32.gmra.mxu0 %v8248_v31  ;;  %822 = vmatmul.f32.gmra.mxu1 %v8251_v32 }
  0xd9   : > { %935 = vmatmul.f32.gmra.mxu2 %v8248_v31  ;;  %1048 = vmatmul.f32.gmra.mxu3 %v8251_v32 }
  0xe0   : > { %712 = vmatmul.f32.gmra.mxu0 %v8258_v33  ;;  %825 = vmatmul.f32.gmra.mxu1 %v8261_v34 }
  0xe1   : > { %938 = vmatmul.f32.gmra.mxu2 %v8258_v33  ;;  %1051 = vmatmul.f32.gmra.mxu3 %v8261_v34 }
  0xe8   : > { %715 = vmatmul.f32.gmra.mxu0 %v8272_v39  ;;  %828 = vmatmul.f32.gmra.mxu1 %v8275_v40 }
  0xe9   : > { %941 = vmatmul.f32.gmra.mxu2 %v8272_v39  ;;  %1054 = vmatmul.f32.gmra.mxu3 %v8275_v40 }
  0xf0   : > { %718 = vmatmul.f32.gmra.mxu0 %v8282_v41  ;;  %831 = vmatmul.f32.gmra.mxu1 %v8285_v42 }
  0xf1   : > { %944 = vmatmul.f32.gmra.mxu2 %v8282_v41  ;;  %1057 = vmatmul.f32.gmra.mxu3 %v8285_v42 }
  0xf8   : > { %721 = vmatmul.f32.gmra.mxu0 %v8296_v47  ;;  %834 = vmatmul.f32.gmra.mxu1 %v8299_v48 }
  0xf9   : > { %947 = vmatmul.f32.gmra.mxu2 %v8296_v47  ;;  %1060 = vmatmul.f32.gmra.mxu3 %v8299_v48 }
 0x100   : > { %724 = vmatmul.f32.gmra.mxu0 %v8306_v49  ;;  %837 = vmatmul.f32.gmra.mxu1 %v8309_v50 }
 0x101   : > { %950 = vmatmul.f32.gmra.mxu2 %v8306_v49  ;;  %1063 = vmatmul.f32.gmra.mxu3 %v8309_v50 }
 0x108   : > { %727 = vmatmul.f32.gmra.mxu0 %v8320_v55  ;;  %840 = vmatmul.f32.gmra.mxu1 %v8323_v56 }
 0x109   : > { %953 = vmatmul.f32.gmra.mxu2 %v8320_v55  ;;  %1066 = vmatmul.f32.gmra.mxu3 %v8323_v56 }
 0x110   : > { %730 = vmatmul.f32.gmra.mxu0 %v8330_v57  ;;  %843 = vmatmul.f32.gmra.mxu1 %v8333_v58 }
 0x111   : > { %956 = vmatmul.f32.gmra.mxu2 %v8330_v57  ;;  %1069 = vmatmul.f32.gmra.mxu3 %v8333_v58 }
 0x118   : > { %733 = vmatmul.f32.gmra.mxu0 %v8340_v59  ;;  %846 = vmatmul.f32.gmra.mxu1 %v8343_v60 }
 0x119   : > { %959 = vmatmul.f32.gmra.mxu2 %v8340_v59  ;;  %1072 = vmatmul.f32.gmra.mxu3 %v8343_v60 }
 0x120   : > { %736 = vmatmul.f32.gmra.mxu0 %v8350_v61  ;;  %849 = vmatmul.f32.gmra.mxu1 %v8353_v62 }
 0x121   : > { %962 = vmatmul.f32.gmra.mxu2 %v8350_v61  ;;  %1075 = vmatmul.f32.gmra.mxu3 %v8353_v62 }
 0x128   : > { %739 = vmatmul.f32.gmra.mxu0 %v8360_v63  ;;  %852 = vmatmul.f32.gmra.mxu1 %v8363_v0 }
 0x129   : > { %965 = vmatmul.f32.gmra.mxu2 %v8360_v63  ;;  %1078 = vmatmul.f32.gmra.mxu3 %v8363_v0 }
 0x12d   : > { %v8371_v5 = vpop.f32.mrf.mxu0  ;;  %v8373_v6 = vpop.f32.mrf.mxu1 }
 0x12e   : > { %15082 = vst [vmem:[#allocation23_spill] sm:$0xff] %v8371_v5 }
 0x12f   : > { %15083 = vst [vmem:[#allocation24_spill] sm:$0xff] %v8373_v6 }
 0x130   : > { %742 = vmatmul.f32.gmra.mxu0 %v8376_v7  ;;  %855 = vmatmul.f32.gmra.mxu1 %v8379_v8 }
 0x131   : > { %968 = vmatmul.f32.gmra.mxu2 %v8376_v7  ;;  %1081 = vmatmul.f32.gmra.mxu3 %v8379_v8 }
 0x134   : > { %v921_v11 = vpop.f32.mrf.mxu2  ;;  %v1034_v12 = vpop.f32.mrf.mxu3 }
 0x135   : > { %v8387_v13 = vadd.f32 %v1034_v12, %v921_v11  ;;  %v8389_v14 = vpop.f32.mrf.mxu0  ;;  %v8391_v19 = vpop.f32.mrf.mxu1 }
 0x136   : > { %15085 = vst [vmem:[#allocation26_spill] sm:$0xff] %v8389_v14 }
 0x137   : > { %15084 = vst [vmem:[#allocation25_spill] sm:$0xff] %v8387_v13 }
 0x138   : > { %15086 = vst [vmem:[#allocation27_spill] sm:$0xff] %v8391_v19  ;;  %745 = vmatmul.f32.gmra.mxu0 %v8394_v20  ;;  %858 = vmatmul.f32.gmra.mxu1 %v8397_v21  ;;  %v8526_v19 = vld [vmem:[%s8030_s15 + $0x190] sm:$0xff] }
 0x139   : > { %971 = vmatmul.f32.gmra.mxu2 %v8394_v20  ;;  %1084 = vmatmul.f32.gmra.mxu3 %v8397_v21  ;;  %15114 = vst [vmem:[#allocation55_spill] sm:$0xff] %v8526_v19 }
 0x13c   : > { %v924_v22 = vpop.f32.mrf.mxu2  ;;  %v1037_v27 = vpop.f32.mrf.mxu3 }
 0x13d   : > { %v8403_v28 = vadd.f32 %v1037_v27, %v924_v22  ;;  %v8405_v29 = vpop.f32.mrf.mxu0  ;;  %v8407_v30 = vpop.f32.mrf.mxu1  ;;  %v8446_v22 = vld [vmem:[%s8030_s15 + $0x140] sm:$0xff]  ;;  %v8449_v27 = vld [vmem:[%s8030_s15 + $0x148] sm:$0xff] }
 0x13e   : > { %15088 = vst [vmem:[#allocation29_spill] sm:$0xff] %v8405_v29 }
 0x13f   : > { %15087 = vst [vmem:[#allocation28_spill] sm:$0xff] %v8403_v28 }
 0x140   : > { %15089 = vst [vmem:[#allocation30_spill] sm:$0xff] %v8407_v30  ;;  %748 = vmatmul.f32.gmra.mxu0 %v8410_v35  ;;  %861 = vmatmul.f32.gmra.mxu1 %v8413_v36  ;;  %v584_v30 = vld [vmem:[%s8038_s26 + $0x510] sm:$0xff] }
 0x141   : > { %974 = vmatmul.f32.gmra.mxu2 %v8410_v35  ;;  %1087 = vmatmul.f32.gmra.mxu3 %v8413_v36 }
 0x142   : > { %1254 = vmatpush.msrb.mxu1 %v584_v30 }
 0x144   : > { %v927_v45 = vpop.f32.mrf.mxu2  ;;  %v1040_v46 = vpop.f32.mrf.mxu3 }
 0x145   : > { %v8423_v51 = vadd.f32 %v1040_v46, %v927_v45  ;;  %v8425_v52 = vpop.f32.mrf.mxu0  ;;  %v8427_v53 = vpop.f32.mrf.mxu1 }
 0x146   : > { %15091 = vst [vmem:[#allocation32_spill] sm:$0xff] %v8425_v52  ;;  %v8503_v52 = vld [vmem:[%s8030_s15 + $0x178] sm:$0xff] }
 0x147   : > { %15090 = vst [vmem:[#allocation31_spill] sm:$0xff] %v8423_v51  ;;  %v456_v51 = vld [vmem:[%s8038_s26 + $0x110] sm:$0xff] }
 0x148   : > { %15092 = vst [vmem:[#allocation33_spill] sm:$0xff] %v8427_v53  ;;  %751 = vmatmul.f32.gmra.mxu0 %v8430_v54  ;;  %864 = vmatmul.f32.gmra.mxu1 %v8433_v3 }
 0x149   : > { %977 = vmatmul.f32.gmra.mxu2 %v8430_v54  ;;  %1090 = vmatmul.f32.gmra.mxu3 %v8433_v3  ;;  %15109 = vst [vmem:[#allocation50_spill] sm:$0xff] %v8503_v52 }
 0x14a   : > { %1141 = vmatpush.msrb.mxu0 %v456_v51  ;;  %v8515_v51 = vld [vmem:[%s8030_s15 + $0x188] sm:$0xff] }
 0x14b   : > { %15111 = vst [vmem:[#allocation52_spill] sm:$0xff] %v8515_v51 }
 0x14c   : > { %v930_v4 = vpop.f32.mrf.mxu2  ;;  %v1043_v9 = vpop.f32.mrf.mxu3 }
 0x14d   : > { %v8439_v10 = vadd.f32 %v1043_v9, %v930_v4  ;;  %v8441_v11 = vpop.f32.mrf.mxu0  ;;  %v8443_v12 = vpop.f32.mrf.mxu1  ;;  %v8462_v4 = vld [vmem:[%s8030_s15 + $0x150] sm:$0xff]  ;;  %v8465_v9 = vld [vmem:[%s8030_s15 + $0x158] sm:$0xff] }
 0x14e   : > { %15094 = vst [vmem:[#allocation35_spill] sm:$0xff] %v8441_v11 }
 0x14f   : > { %15093 = vst [vmem:[#allocation34_spill] sm:$0xff] %v8439_v10 }
 0x150   : > { %15095 = vst [vmem:[#allocation36_spill] sm:$0xff] %v8443_v12  ;;  %754 = vmatmul.f32.gmra.mxu0 %v8446_v22  ;;  %867 = vmatmul.f32.gmra.mxu1 %v8449_v27 }
 0x151   : > { %980 = vmatmul.f32.gmra.mxu2 %v8446_v22  ;;  %1093 = vmatmul.f32.gmra.mxu3 %v8449_v27  ;;  %15098 = vst [vmem:[#allocation39_spill] sm:$0xff] %v8465_v9 }
 0x154   : > { %v933_v43 = vpop.f32.mrf.mxu2  ;;  %v1046_v44 = vpop.f32.mrf.mxu3 }
 0x155   : > { %v8457_v45 = vpop.f32.mrf.mxu0  ;;  %v8459_v46 = vpop.f32.mrf.mxu1  ;;  %v8467_v12 = vadd.f32 %v1046_v44, %v933_v43  ;;  %v8480_v44 = vld [vmem:[%s8030_s15 + $0x160] sm:$0xff] }
 0x156   : > { %15096 = vst [vmem:[#allocation37_spill] sm:$0xff] %v8457_v45 }
 0x157   : > { %15097 = vst [vmem:[#allocation38_spill] sm:$0xff] %v8459_v46 }
 0x158   : > { %15099 = vst [vmem:[#allocation40_spill] sm:$0xff] %v8467_v12  ;;  %757 = vmatmul.f32.gmra.mxu0 %v8462_v4  ;;  %870 = vmatmul.f32.gmra.mxu1 %v8465_v9  ;;  %v8483_v12 = vld [vmem:[%s8030_s15 + $0x168] sm:$0xff] }
 0x159   : > { %983 = vmatmul.f32.gmra.mxu2 %v8462_v4  ;;  %1096 = vmatmul.f32.gmra.mxu3 %v8465_v9  ;;  %15102 = vst [vmem:[#allocation43_spill] sm:$0xff] %v8480_v44  ;;  %v553_v9 = vld [vmem:[%s8038_s26 + $0x418] sm:$0xff] }
 0x15a   : > { %15103 = vst [vmem:[#allocation44_spill] sm:$0xff] %v8483_v12 }
 0x15c   : > { %v936_v46 = vpop.f32.mrf.mxu2  ;;  %v1049_v45 = vpop.f32.mrf.mxu3 }
 0x15d   : > { %v8475_v11 = vpop.f32.mrf.mxu0  ;;  %v8477_v43 = vpop.f32.mrf.mxu1  ;;  %v8485_v10 = vadd.f32 %v1049_v45, %v936_v46 }
 0x15e   : > { %15100 = vst [vmem:[#allocation41_spill] sm:$0xff] %v8475_v11 }
 0x15f   : > { %15101 = vst [vmem:[#allocation42_spill] sm:$0xff] %v8477_v43 }
 0x160   : > { %15104 = vst [vmem:[#allocation45_spill] sm:$0xff] %v8485_v10  ;;  %760 = vmatmul.f32.gmra.mxu0 %v8480_v44  ;;  %873 = vmatmul.f32.gmra.mxu1 %v8483_v12  ;;  %v8500_v10 = vld [vmem:[%s8030_s15 + $0x170] sm:$0xff] }
 0x161   : > { %986 = vmatmul.f32.gmra.mxu2 %v8480_v44  ;;  %1099 = vmatmul.f32.gmra.mxu3 %v8483_v12  ;;  %15108 = vst [vmem:[#allocation49_spill] sm:$0xff] %v8500_v10  ;;  %v425_v44 = vld [vmem:[%s8038_s26 + $0x18] sm:$0xff] }
 0x164   : > { %v939_v43 = vpop.f32.mrf.mxu2  ;;  %v1052_v11 = vpop.f32.mrf.mxu3 }
 0x165   : > { %v8493_v53 = vpop.f32.mrf.mxu0  ;;  %v8495_v45 = vpop.f32.mrf.mxu1  ;;  %v8497_v46 = vadd.f32 %v1052_v11, %v939_v43 }
 0x166   : > { %15105 = vst [vmem:[#allocation46_spill] sm:$0xff] %v8493_v53 }
 0x167   : > { %15106 = vst [vmem:[#allocation47_spill] sm:$0xff] %v8495_v45  ;;  %v8512_v45 = vld [vmem:[%s8030_s15 + $0x180] sm:$0xff] }
 0x168   : > { %15107 = vst [vmem:[#allocation48_spill] sm:$0xff] %v8497_v46  ;;  %763 = vmatmul.f32.gmra.mxu0 %v8500_v10  ;;  %876 = vmatmul.f32.gmra.mxu1 %v8503_v52 }
 0x169   : > { %989 = vmatmul.f32.gmra.mxu2 %v8500_v10  ;;  %1102 = vmatmul.f32.gmra.mxu3 %v8503_v52  ;;  %15110 = vst [vmem:[#allocation51_spill] sm:$0xff] %v8512_v45  ;;  %v8603_v52 = vld [vmem:[%s8030_s15 + $0x1e8] sm:$0xff]  ;;  %v432_v10 = vld [vmem:[%s8038_s26 + $0x50] sm:$0xff] }
 0x16c   : > { %v942_v37 = vpop.f32.mrf.mxu2  ;;  %v1055_v11 = vpop.f32.mrf.mxu3 }
 0x16d   : > { %v719_v43 = vpop.f32.mrf.mxu0  ;;  %v832_v38 = vpop.f32.mrf.mxu1  ;;  %v8517_v30 = vadd.f32 %v1055_v11, %v942_v37  ;;  %v8529_v37 = vld [vmem:[%s8030_s15 + $0x198] sm:$0xff] }
 0x16e   : > { %v8521_v53 = vadd.f32 %v832_v38, %v719_v43  ;;  %15115 = vst [vmem:[#allocation56_spill] sm:$0xff] %v8529_v37  ;;  %v449_v11 = vld [vmem:[%s8038_s26 + $0xd8] sm:$0xff]  ;;  %v448_v38 = vld [vmem:[%s8038_s26 + $0xd0] sm:$0xff] }
 0x16f   : > { %15112 = vst [vmem:[#allocation53_spill] sm:$0xff] %v8517_v30  ;;  %v577_v30 = vld [vmem:[%s8038_s26 + $0x4d8] sm:$0xff]  ;;  %1368 = vmatpush.msrb.mxu2 %v449_v11  ;;  %1142 = vmatpush.msrb.mxu0 %v448_v38 }
 0x170   : > { %766 = vmatmul.f32.gmra.mxu0 %v8512_v45  ;;  %879 = vmatmul.f32.gmra.mxu1 %v8515_v51  ;;  %15113 = vst [vmem:[#allocation54_spill] sm:$0xff] %v8521_v53  ;;  %v576_v53 = vld [vmem:[%s8038_s26 + $0x4d0] sm:$0xff] }
 0x171   : > { %992 = vmatmul.f32.gmra.mxu2 %v8512_v45  ;;  %1105 = vmatmul.f32.gmra.mxu3 %v8515_v51  ;;  %v8600_v45 = vld [vmem:[%s8030_s15 + $0x1e0] sm:$0xff] }
 0x172   : > { %1481 = vmatpush.msrb.mxu3 %v577_v30  ;;  %1255 = vmatpush.msrb.mxu1 %v576_v53 }
 0x174   : > { %v945_v46 = vpop.f32.mrf.mxu2  ;;  %v1058_v29 = vpop.f32.mrf.mxu3 }
 0x175   : > { %v722_v28 = vpop.f32.mrf.mxu0  ;;  %v835_v13 = vpop.f32.mrf.mxu1  ;;  %v8537_v43 = vadd.f32 %v1058_v29, %v945_v46  ;;  %v8553_v29 = vld [vmem:[%s8030_s15 + $0x1a8] sm:$0xff]  ;;  %v569_v46 = vld [vmem:[%s8038_s26 + $0x498] sm:$0xff] }
 0x176   : > { %v8545_v5 = vadd.f32 %v835_v13, %v722_v28  ;;  %15122 = vst [vmem:[#allocation63_spill] sm:$0xff] %v8553_v29  ;;  %v441_v28 = vld [vmem:[%s8038_s26 + $0x98] sm:$0xff]  ;;  %1482 = vmatpush.msrb.mxu3 %v569_v46 }
 0x177   : > { %15116 = vst [vmem:[#allocation57_spill] sm:$0xff] %v8537_v43  ;;  %1369 = vmatpush.msrb.mxu2 %v441_v28 }
 0x178   : > { %769 = vmatmul.f32.gmra.mxu0 %v8526_v19  ;;  %882 = vmatmul.f32.gmra.mxu1 %v8529_v37  ;;  %15119 = vst [vmem:[#allocation60_spill] sm:$0xff] %v8545_v5  ;;  %v8567_v5 = vld [vmem:[%s8030_s15 + $0x1b8] sm:$0xff] }
 0x179   : > { %995 = vmatmul.f32.gmra.mxu2 %v8526_v19  ;;  %1108 = vmatmul.f32.gmra.mxu3 %v8529_v37  ;;  %v8550_v37 = vld [vmem:[%s8030_s15 + $0x1a0] sm:$0xff]  ;;  %15125 = vst [vmem:[#allocation66_spill] sm:$0xff] %v8567_v5 }
 0x17a   : > { %15121 = vst [vmem:[#allocation62_spill] sm:$0xff] %v8550_v37 }
 0x17c   : > { %v948_v14 = vpop.f32.mrf.mxu2  ;;  %v1061_v6 = vpop.f32.mrf.mxu3 }
 0x17d   : > { %v8541_v30 = vpop.f32.mrf.mxu0  ;;  %v8543_v11 = vpop.f32.mrf.mxu1  ;;  %v8547_v51 = vadd.f32 %v1061_v6, %v948_v14 }
 0x17e   : > { %15117 = vst [vmem:[#allocation58_spill] sm:$0xff] %v8541_v30 }
 0x17f   : > { %15118 = vst [vmem:[#allocation59_spill] sm:$0xff] %v8543_v11 }
 0x180   : > { %15120 = vst [vmem:[#allocation61_spill] sm:$0xff] %v8547_v51  ;;  %772 = vmatmul.f32.gmra.mxu0 %v8550_v37  ;;  %885 = vmatmul.f32.gmra.mxu1 %v8553_v29  ;;  %v8564_v51 = vld [vmem:[%s8030_s15 + $0x1b0] sm:$0xff] }
 0x181   : > { %998 = vmatmul.f32.gmra.mxu2 %v8550_v37  ;;  %1111 = vmatmul.f32.gmra.mxu3 %v8553_v29  ;;  %15124 = vst [vmem:[#allocation65_spill] sm:$0xff] %v8564_v51 }
 0x184   : > { %v951_v53 = vpop.f32.mrf.mxu2  ;;  %v1064_v13 = vpop.f32.mrf.mxu3 }
 0x185   : > { %v728_v6 = vpop.f32.mrf.mxu0  ;;  %v841_v14 = vpop.f32.mrf.mxu1  ;;  %v8561_v38 = vadd.f32 %v1064_v13, %v951_v53  ;;  %v440_v53 = vld [vmem:[%s8038_s26 + $0x90] sm:$0xff] }
 0x186   : > { %v8569_v11 = vadd.f32 %v841_v14, %v728_v6  ;;  %v568_v13 = vld [vmem:[%s8038_s26 + $0x490] sm:$0xff]  ;;  %1143 = vmatpush.msrb.mxu0 %v440_v53  ;;  %v8578_v6 = vld [vmem:[%s8030_s15 + $0x1c0] sm:$0xff]  ;;  %v8581_v14 = vld [vmem:[%s8030_s15 + $0x1c8] sm:$0xff] }
 0x187   : > { %15123 = vst [vmem:[#allocation64_spill] sm:$0xff] %v8561_v38  ;;  %1256 = vmatpush.msrb.mxu1 %v568_v13 }
 0x188   : > { %15126 = vst [vmem:[#allocation67_spill] sm:$0xff] %v8569_v11  ;;  %775 = vmatmul.f32.gmra.mxu0 %v8564_v51  ;;  %888 = vmatmul.f32.gmra.mxu1 %v8567_v5 }
 0x189   : > { %1001 = vmatmul.f32.gmra.mxu2 %v8564_v51  ;;  %1114 = vmatmul.f32.gmra.mxu3 %v8567_v5  ;;  %15127 = vst [vmem:[#allocation68_spill] sm:$0xff] %v8578_v6  ;;  %v8588_v5 = vld [vmem:[%s8030_s15 + $0x1d0] sm:$0xff]  ;;  %v8591_v51 = vld [vmem:[%s8030_s15 + $0x1d8] sm:$0xff] }
 0x18a   : > { %15128 = vst [vmem:[#allocation69_spill] sm:$0xff] %v8581_v14  ;;  %1144 = vmatpush.msrb.mxu0 %v432_v10 }
 0x18b   : > { %15129 = vst [vmem:[#allocation70_spill] sm:$0xff] %v8588_v5 }
 0x18c   : > { %v954_v28 = vpop.f32.mrf.mxu2  ;;  %v1067_v46 = vpop.f32.mrf.mxu3  ;;  %15130 = vst [vmem:[#allocation71_spill] sm:$0xff] %v8591_v51 }
 0x18d   : > { %v731_v38 = vpop.f32.mrf.mxu0  ;;  %v844_v30 = vpop.f32.mrf.mxu1  ;;  %v8593_v29 = vadd.f32 %v1067_v46, %v954_v28  ;;  %v433_v46 = vld [vmem:[%s8038_s26 + $0x58] sm:$0xff] }
 0x18e   : > { %v8605_v28 = vadd.f32 %v844_v30, %v731_v38  ;;  %1370 = vmatpush.msrb.mxu2 %v433_v46  ;;  %v424_v30 = vld [vmem:[%s8038_s26 + $0x10] sm:$0xff] }
 0x18f   : > { %15131 = vst [vmem:[#allocation72_spill] sm:$0xff] %v8593_v29  ;;  %v561_v29 = vld [vmem:[%s8038_s26 + $0x458] sm:$0xff]  ;;  %v552_v38 = vld [vmem:[%s8038_s26 + $0x410] sm:$0xff]  ;;  %1145 = vmatpush.msrb.mxu0 %v424_v30 }
 0x190   : > { %778 = vmatmul.f32.gmra.mxu0 %v8578_v6  ;;  %891 = vmatmul.f32.gmra.mxu1 %v8581_v14  ;;  %v8634_v46 = vld [vmem:[%s8030_s15 + $0x1f0] sm:$0xff] }
 0x191   : > { %1004 = vmatmul.f32.gmra.mxu2 %v8578_v6  ;;  %1117 = vmatmul.f32.gmra.mxu3 %v8581_v14 }
 0x192   : > { %1483 = vmatpush.msrb.mxu3 %v561_v29  ;;  %1371 = vmatpush.msrb.mxu2 %v425_v44 }
 0x194   : > { %v957_v11 = vpop.f32.mrf.mxu2  ;;  %v1070_v43 = vpop.f32.mrf.mxu3  ;;  %1484 = vmatpush.msrb.mxu3 %v553_v9 }
 0x195   : > { %v734_v53 = vpop.f32.mrf.mxu0  ;;  %v847_v13 = vpop.f32.mrf.mxu1 }
 0x196   : > { %v8613_v12 = vadd.f32 %v847_v13, %v734_v53 }
 0x198   : > { %781 = vmatmul.f32.gmra.mxu0 %v8588_v5  ;;  %894 = vmatmul.f32.gmra.mxu1 %v8591_v51  ;;  %15133 = vst [vmem:[#allocation74_spill] sm:$0xff] %v8613_v12  ;;  %v8637_v12 = vld [vmem:[%s8030_s15 + $0x1f8] sm:$0xff] }
 0x199   : > { %1007 = vmatmul.f32.gmra.mxu2 %v8588_v5  ;;  %1120 = vmatmul.f32.gmra.mxu3 %v8591_v51  ;;  %v560_v51 = vld [vmem:[%s8038_s26 + $0x450] sm:$0xff]  ;;  %v8611_v5 = vadd.f32 %v1070_v43, %v957_v11 }
 0x19a   : > { %1257 = vmatpush.msrb.mxu1 %v560_v51 }
 0x19b   : > { %15132 = vst [vmem:[#allocation73_spill] sm:$0xff] %v8611_v5  ;;  %v674_v5 = vld [vmem:[%s8038_s26 + $0x7e0] sm:$0xff] }
 0x19c   : > { %v960_v14 = vpop.f32.mrf.mxu2  ;;  %v1073_v6 = vpop.f32.mrf.mxu3  ;;  %1258 = vmatpush.msrb.mxu1 %v552_v38 }
 0x19d   : > { %v737_v37 = vpop.f32.mrf.mxu0  ;;  %v850_v19 = vpop.f32.mrf.mxu1  ;;  %v8627_v29 = vadd.f32 %v1073_v6, %v960_v14 }
 0x19e   : > { %v8629_v53 = vadd.f32 %v850_v19, %v737_v37  ;;  %1695 = vmatpush.msra.mxu1 %v674_v5 }
 0x19f   : > { %15136 = vst [vmem:[#allocation77_spill] sm:$0xff] %v8627_v29  ;;  %v546_v29 = vld [vmem:[%s8038_s26 + $0x3e0] sm:$0xff] }
 0x1a0   : > { %784 = vmatmul.f32.gmra.mxu0 %v8600_v45  ;;  %897 = vmatmul.f32.gmra.mxu1 %v8603_v52  ;;  %15137 = vst [vmem:[#allocation78_spill] sm:$0xff] %v8629_v53 }
 0x1a1   : > { %1010 = vmatmul.f32.gmra.mxu2 %v8600_v45  ;;  %1123 = vmatmul.f32.gmra.mxu3 %v8603_v52 }
 0x1a2   : > { %1582 = vmatpush.msra.mxu0 %v546_v29 }
 0x1a4   : > { %v963_v10 = vpop.f32.mrf.mxu2  ;;  %v1076_v51 = vpop.f32.mrf.mxu3 }
 0x1a5   : > { %v8623_v43 = vpop.f32.mrf.mxu0  ;;  %v8625_v11 = vpop.f32.mrf.mxu1  ;;  %v8631_v13 = vadd.f32 %v1076_v51, %v963_v10 }
 0x1a6   : > { %15134 = vst [vmem:[#allocation75_spill] sm:$0xff] %v8623_v43 }
 0x1a7   : > { %15135 = vst [vmem:[#allocation76_spill] sm:$0xff] %v8625_v11 }
 0x1a8   : > { %15138 = vst [vmem:[#allocation79_spill] sm:$0xff] %v8631_v13  ;;  %787 = vmatmul.f32.gmra.mxu0 %v8634_v46  ;;  %900 = vmatmul.f32.gmra.mxu1 %v8637_v12  ;;  %v675_v13 = vld [vmem:[%s8038_s26 + $0x7e8] sm:$0xff] }
 0x1a9   : > { %1013 = vmatmul.f32.gmra.mxu2 %v8634_v46  ;;  %1126 = vmatmul.f32.gmra.mxu3 %v8637_v12 }
 0x1aa   : > { %1921 = vmatpush.msra.mxu3 %v675_v13 }
 0x1ac   : > { %v966_v9 = vpop.f32.mrf.mxu2  ;;  %v1079_v44 = vpop.f32.mrf.mxu3 }
 0x1ad   : > { %v743_v6 = vpop.f32.mrf.mxu0  ;;  %v856_v14 = vpop.f32.mrf.mxu1  ;;  %v8643_v19 = vadd.f32 %v1079_v44, %v966_v9 }
 0x1ae   : > { %v8657_v43 = vadd.f32 %v856_v14, %v743_v6 }
 0x1af   : > { %15139 = vst [vmem:[#allocation80_spill] sm:$0xff] %v8643_v19 }
 0x1b0   : > { %1146 = vmatmul.f32.vlgmr.msrb.gmra.mxu0 %v8178_v1  ;;  %1259 = vmatmul.f32.vlgmr.msrb.gmra.mxu1 %v8181_v2  ;;  %15140 = vst [vmem:[#allocation81_spill] sm:$0xff] %v8657_v43 }
 0x1b1   : > { %1372 = vmatmul.f32.vlgmr.msrb.gmra.mxu2 %v8178_v1  ;;  %1485 = vmatmul.f32.vlgmr.msrb.gmra.mxu3 %v8181_v2 }
 0x1b4   : > { %v969_v37 = vpop.f32.mrf.mxu2  ;;  %v1082_v30 = vpop.f32.mrf.mxu3 }
 0x1b5   : > { %v746_v38 = vpop.f32.mrf.mxu0  ;;  %v859_v10 = vpop.f32.mrf.mxu1  ;;  %v8661_v53 = vadd.f32 %v1082_v30, %v969_v37  ;;  %v539_v30 = vld [vmem:[%s8038_s26 + $0x3a8] sm:$0xff] }
 0x1b7   : > { %15141 = vst [vmem:[#allocation82_spill] sm:$0xff] %v8661_v53 }
 0x1b8   : > { %1149 = vmatmul.f32.gmra.mxu0 %v8200_v15  ;;  %1262 = vmatmul.f32.gmra.mxu1 %v8203_v16 }
 0x1b9   : > { %1375 = vmatmul.f32.gmra.mxu2 %v8200_v15  ;;  %1488 = vmatmul.f32.gmra.mxu3 %v8203_v16  ;;  %v547_v16 = vld [vmem:[%s8038_s26 + $0x3e8] sm:$0xff] }
 0x1ba   : > { %1808 = vmatpush.msra.mxu2 %v547_v16 }
 0x1bc   : > { %v972_v51 = vpop.f32.mrf.mxu2  ;;  %v1085_v9 = vpop.f32.mrf.mxu3  ;;  %1809 = vmatpush.msra.mxu2 %v539_v30  ;;  %v530_v30 = vld [vmem:[%s8038_s26 + $0x360] sm:$0xff] }
 0x1bd   : > { %v749_v44 = vpop.f32.mrf.mxu0  ;;  %v862_v1 = vpop.f32.mrf.mxu1 }
 0x1be   : > { %v8671_v6 = vadd.f32 %v862_v1, %v749_v44 }
 0x1c0   : > { %1152 = vmatmul.f32.gmra.mxu0 %v8210_v17  ;;  %1265 = vmatmul.f32.gmra.mxu1 %v8213_v18  ;;  %15144 = vst [vmem:[#allocation85_spill] sm:$0xff] %v8671_v6 }
 0x1c1   : > { %1378 = vmatmul.f32.gmra.mxu2 %v8210_v17  ;;  %1491 = vmatmul.f32.gmra.mxu3 %v8213_v18  ;;  %v8665_v17 = vadd.f32 %v859_v10, %v746_v38  ;;  %v8669_v18 = vadd.f32 %v1085_v9, %v972_v51  ;;  %v667_v38 = vld [vmem:[%s8038_s26 + $0x7a8] sm:$0xff]  ;;  %v666_v9 = vld [vmem:[%s8038_s26 + $0x7a0] sm:$0xff] }
 0x1c2   : > { %1922 = vmatpush.msra.mxu3 %v667_v38  ;;  %1696 = vmatpush.msra.mxu1 %v666_v9  ;;  %v658_v38 = vld [vmem:[%s8038_s26 + $0x760] sm:$0xff] }
 0x1c3   : > { %15142 = vst [vmem:[#allocation83_spill] sm:$0xff] %v8665_v17  ;;  %v7499_v17 = vld [vmem:[%s8030_s15 + $0xf0] sm:$0xff] }
 0x1c4   : > { %v975_v2 = vpop.f32.mrf.mxu2  ;;  %v1088_v19 = vpop.f32.mrf.mxu3  ;;  %15143 = vst [vmem:[#allocation84_spill] sm:$0xff] %v8669_v18  ;;  %1697 = vmatpush.msra.mxu1 %v658_v38 }
 0x1c5   : > { %v752_v15 = vpop.f32.mrf.mxu0  ;;  %v865_v11 = vpop.f32.mrf.mxu1  ;;  %v8679_v29 = vadd.f32 %v1088_v19, %v975_v2  ;;  %v538_v19 = vld [vmem:[%s8038_s26 + $0x3a0] sm:$0xff] }
 0x1c6   : > { %v8683_v10 = vadd.f32 %v865_v11, %v752_v15  ;;  %1583 = vmatpush.msra.mxu0 %v538_v19 }
 0x1c7   : > { %15147 = vst [vmem:[#allocation88_spill] sm:$0xff] %v8679_v29 }
 0x1c8   : > { %1155 = vmatmul.f32.gmra.mxu0 %v8224_v23  ;;  %1268 = vmatmul.f32.gmra.mxu1 %v8227_v24  ;;  %15148 = vst [vmem:[#allocation89_spill] sm:$0xff] %v8683_v10 }
 0x1c9   : > { %1381 = vmatmul.f32.gmra.mxu2 %v8224_v23  ;;  %1494 = vmatmul.f32.gmra.mxu3 %v8227_v24 }
 0x1ca   : > { %1584 = vmatpush.msra.mxu0 %v530_v30 }
 0x1cc   : > { %v978_v13 = vpop.f32.mrf.mxu2  ;;  %v1091_v14 = vpop.f32.mrf.mxu3 }
 0x1cd   : > { %v8675_v37 = vpop.f32.mrf.mxu0  ;;  %v8677_v5 = vpop.f32.mrf.mxu1  ;;  %v8685_v51 = vadd.f32 %v1091_v14, %v978_v13  ;;  %v531_v14 = vld [vmem:[%s8038_s26 + $0x368] sm:$0xff] }
 0x1ce   : > { %15145 = vst [vmem:[#allocation86_spill] sm:$0xff] %v8675_v37  ;;  %1810 = vmatpush.msra.mxu2 %v531_v14  ;;  %v523_v37 = vld [vmem:[%s8038_s26 + $0x328] sm:$0xff] }
 0x1cf   : > { %15146 = vst [vmem:[#allocation87_spill] sm:$0xff] %v8677_v5 }
 0x1d0   : > { %15149 = vst [vmem:[#allocation90_spill] sm:$0xff] %v8685_v51  ;;  %1158 = vmatmul.f32.gmra.mxu0 %v8234_v25  ;;  %1271 = vmatmul.f32.gmra.mxu1 %v8237_v26  ;;  %v651_v51 = vld [vmem:[%s8038_s26 + $0x728] sm:$0xff] }
 0x1d1   : > { %1384 = vmatmul.f32.gmra.mxu2 %v8234_v25  ;;  %1497 = vmatmul.f32.gmra.mxu3 %v8237_v26 }
 0x1d2   : > { %1811 = vmatpush.msra.mxu2 %v523_v37 }
 0x1d4   : > { %v981_v23 = vpop.f32.mrf.mxu2  ;;  %v1094_v24 = vpop.f32.mrf.mxu3 }
 0x1d5   : > { %v758_v44 = vpop.f32.mrf.mxu0  ;;  %v871_v1 = vpop.f32.mrf.mxu1  ;;  %v8709_v14 = vadd.f32 %v1094_v24, %v981_v23 }
 0x1d7   : > { %15150 = vst [vmem:[#allocation91_spill] sm:$0xff] %v8709_v14 }
 0x1d8   : > { %1161 = vmatmul.f32.gmra.mxu0 %v8248_v31  ;;  %1274 = vmatmul.f32.gmra.mxu1 %v8251_v32 }
 0x1d9   : > { %1387 = vmatmul.f32.gmra.mxu2 %v8248_v31  ;;  %1500 = vmatmul.f32.gmra.mxu3 %v8251_v32  ;;  %v659_v32 = vld [vmem:[%s8038_s26 + $0x768] sm:$0xff] }
 0x1da   : > { %1923 = vmatpush.msra.mxu3 %v659_v32  ;;  %v8711_v32 = vadd.f32 %v871_v1, %v758_v44 }
 0x1dc   : > { %v984_v25 = vpop.f32.mrf.mxu2  ;;  %v1097_v26 = vpop.f32.mrf.mxu3  ;;  %15151 = vst [vmem:[#allocation92_spill] sm:$0xff] %v8711_v32  ;;  %1924 = vmatpush.msra.mxu3 %v651_v51 }
 0x1dd   : > { %v761_v11 = vpop.f32.mrf.mxu0  ;;  %v874_v2 = vpop.f32.mrf.mxu1  ;;  %v8713_v5 = vadd.f32 %v1097_v26, %v984_v25  ;;  %v522_v25 = vld [vmem:[%s8038_s26 + $0x320] sm:$0xff] }
 0x1de   : > { %v650_v26 = vld [vmem:[%s8038_s26 + $0x720] sm:$0xff]  ;;  %1585 = vmatpush.msra.mxu0 %v522_v25 }
 0x1df   : > { %15152 = vst [vmem:[#allocation93_spill] sm:$0xff] %v8713_v5  ;;  %1698 = vmatpush.msra.mxu1 %v650_v26  ;;  %v642_v25 = vld [vmem:[%s8038_s26 + $0x6e0] sm:$0xff] }
 0x1e0   : > { %1164 = vmatmul.f32.gmra.mxu0 %v8258_v33  ;;  %1277 = vmatmul.f32.gmra.mxu1 %v8261_v34 }
 0x1e1   : > { %1390 = vmatmul.f32.gmra.mxu2 %v8258_v33  ;;  %1503 = vmatmul.f32.gmra.mxu3 %v8261_v34 }
 0x1e2   : > { %1699 = vmatpush.msra.mxu1 %v642_v25  ;;  %v498_v25 = vld [vmem:[%s8038_s26 + $0x260] sm:$0xff] }
 0x1e4   : > { %v987_v15 = vpop.f32.mrf.mxu2  ;;  %v1100_v16 = vpop.f32.mrf.mxu3 }
 0x1e5   : > { %v764_v13 = vpop.f32.mrf.mxu0  ;;  %v877_v31 = vpop.f32.mrf.mxu1 }
 0x1e6   : > { %v8725_v44 = vadd.f32 %v877_v31, %v764_v13  ;;  %v643_v13 = vld [vmem:[%s8038_s26 + $0x6e8] sm:$0xff] }
 0x1e7   : > { %1925 = vmatpush.msra.mxu3 %v643_v13 }
 0x1e8   : > { %1167 = vmatmul.f32.gmra.mxu0 %v8272_v39  ;;  %1280 = vmatmul.f32.gmra.mxu1 %v8275_v40  ;;  %15155 = vst [vmem:[#allocation96_spill] sm:$0xff] %v8725_v44 }
 0x1e9   : > { %1393 = vmatmul.f32.gmra.mxu2 %v8272_v39  ;;  %1506 = vmatmul.f32.gmra.mxu3 %v8275_v40  ;;  %v8715_v39 = vadd.f32 %v874_v2, %v761_v11  ;;  %v8717_v40 = vadd.f32 %v1100_v16, %v987_v15  ;;  %v515_v16 = vld [vmem:[%s8038_s26 + $0x2e8] sm:$0xff] }
 0x1ea   : > { %1812 = vmatpush.msra.mxu2 %v515_v16 }
 0x1eb   : > { %15153 = vst [vmem:[#allocation94_spill] sm:$0xff] %v8715_v39  ;;  %v652_v39 = vld [vmem:[%s8038_s26 + $0x730] sm:$0xff] }
 0x1ec   : > { %v990_v33 = vpop.f32.mrf.mxu2  ;;  %v1103_v34 = vpop.f32.mrf.mxu3  ;;  %15154 = vst [vmem:[#allocation95_spill] sm:$0xff] %v8717_v40 }
 0x1ed   : > { %v767_v19 = vpop.f32.mrf.mxu0  ;;  %v880_v9 = vpop.f32.mrf.mxu1  ;;  %v8727_v1 = vadd.f32 %v1103_v34, %v990_v33 }
 0x1ee   : > { %v8731_v11 = vadd.f32 %v880_v9, %v767_v19  ;;  %v514_v9 = vld [vmem:[%s8038_s26 + $0x2e0] sm:$0xff] }
 0x1ef   : > { %15156 = vst [vmem:[#allocation97_spill] sm:$0xff] %v8727_v1  ;;  %1586 = vmatpush.msra.mxu0 %v514_v9  ;;  %v506_v9 = vld [vmem:[%s8038_s26 + $0x2a0] sm:$0xff] }
 0x1f0   : > { %1170 = vmatmul.f32.gmra.mxu0 %v8282_v41  ;;  %1283 = vmatmul.f32.gmra.mxu1 %v8285_v42  ;;  %15157 = vst [vmem:[#allocation98_spill] sm:$0xff] %v8731_v11 }
 0x1f1   : > { %1396 = vmatmul.f32.gmra.mxu2 %v8282_v41  ;;  %1509 = vmatmul.f32.gmra.mxu3 %v8285_v42 }
 0x1f2   : > { %1587 = vmatpush.msra.mxu0 %v506_v9 }
 0x1f4   : > { %v993_v23 = vpop.f32.mrf.mxu2  ;;  %v1106_v24 = vpop.f32.mrf.mxu3  ;;  %1588 = vmatpush.msra.mxu0 %v498_v25  ;;  %v611_v25 = vld [vmem:[%s8038_s26 + $0x5e8] sm:$0xff] }
 0x1f5   : > { %v770_v2 = vpop.f32.mrf.mxu0  ;;  %v883_v41 = vpop.f32.mrf.mxu1  ;;  %v8747_v38 = vadd.f32 %v1106_v24, %v993_v23 }
 0x1f6   : > { %v8749_v19 = vadd.f32 %v883_v41, %v770_v2 }
 0x1f7   : > { %15158 = vst [vmem:[#allocation99_spill] sm:$0xff] %v8747_v38  ;;  %v653_v38 = vld [vmem:[%s8038_s26 + $0x738] sm:$0xff] }
 0x1f8   : > { %1173 = vmatmul.f32.gmra.mxu0 %v8296_v47  ;;  %1286 = vmatmul.f32.gmra.mxu1 %v8299_v48  ;;  %15159 = vst [vmem:[#allocation100_spill] sm:$0xff] %v8749_v19  ;;  %v7489_v19 = vld [vmem:[%s8030_s15 + $0xa0] sm:$0xff] }
 0x1f9   : > { %1399 = vmatmul.f32.gmra.mxu2 %v8296_v47  ;;  %1512 = vmatmul.f32.gmra.mxu3 %v8299_v48 }
 0x1fc   : > { %v996_v42 = vpop.f32.mrf.mxu2  ;;  %v1109_v37 = vpop.f32.mrf.mxu3 }
 0x1fd   : > { %v773_v51 = vpop.f32.mrf.mxu0  ;;  %v886_v15 = vpop.f32.mrf.mxu1  ;;  %v8757_v26 = vadd.f32 %v1109_v37, %v996_v42  ;;  %v634_v37 = vld [vmem:[%s8038_s26 + $0x6a0] sm:$0xff] }
 0x1fe   : > { %v8759_v2 = vadd.f32 %v886_v15, %v773_v51  ;;  %1700 = vmatpush.msra.mxu1 %v634_v37 }
 0x1ff   : > { %15160 = vst [vmem:[#allocation101_spill] sm:$0xff] %v8757_v26 }
 0x200   : > { %1176 = vmatmul.f32.gmra.mxu0 %v8306_v49  ;;  %1289 = vmatmul.f32.gmra.mxu1 %v8309_v50  ;;  %15161 = vst [vmem:[#allocation102_spill] sm:$0xff] %v8759_v2 }
 0x201   : > { %1402 = vmatmul.f32.gmra.mxu2 %v8306_v49  ;;  %1515 = vmatmul.f32.gmra.mxu3 %v8309_v50 }
 0x204   : > { %v999_v31 = vpop.f32.mrf.mxu2  ;;  %v1112_v33 = vpop.f32.mrf.mxu3 }
 0x205   : > { %v776_v47 = vpop.f32.mrf.mxu0  ;;  %v889_v48 = vpop.f32.mrf.mxu1  ;;  %v8761_v41 = vadd.f32 %v1112_v33, %v999_v31 }
 0x206   : > { %v8763_v16 = vadd.f32 %v889_v48, %v776_v47 }
 0x207   : > { %15162 = vst [vmem:[#allocation103_spill] sm:$0xff] %v8761_v41 }
 0x208   : > { %1179 = vmatmul.f32.gmra.mxu0 %v8320_v55  ;;  %1292 = vmatmul.f32.gmra.mxu1 %v8323_v56  ;;  %15163 = vst [vmem:[#allocation104_spill] sm:$0xff] %v8763_v16 }
 0x209   : > { %1405 = vmatmul.f32.gmra.mxu2 %v8320_v55  ;;  %1518 = vmatmul.f32.gmra.mxu3 %v8323_v56 }
 0x20c   : > { %v1002_v49 = vpop.f32.mrf.mxu2  ;;  %v1115_v50 = vpop.f32.mrf.mxu3 }
 0x20d   : > { %v779_v34 = vpop.f32.mrf.mxu0  ;;  %v892_v30 = vpop.f32.mrf.mxu1  ;;  %v8765_v13 = vadd.f32 %v1115_v50, %v1002_v49 }
 0x20e   : > { %v8772_v42 = vadd.f32 %v892_v30, %v779_v34  ;;  %v499_v34 = vld [vmem:[%s8038_s26 + $0x268] sm:$0xff] }
 0x20f   : > { %15164 = vst [vmem:[#allocation105_spill] sm:$0xff] %v8765_v13  ;;  %v627_v30 = vld [vmem:[%s8038_s26 + $0x668] sm:$0xff]  ;;  %v7488_v13 = vld [vmem:[%s8030_s15 + $0x98] sm:$0xff] }
 0x210   : > { %1182 = vmatmul.f32.gmra.mxu0 %v8330_v57  ;;  %1295 = vmatmul.f32.gmra.mxu1 %v8333_v58  ;;  %15165 = vst [vmem:[#allocation106_spill] sm:$0xff] %v8772_v42 }
 0x211   : > { %1408 = vmatmul.f32.gmra.mxu2 %v8330_v57  ;;  %1521 = vmatmul.f32.gmra.mxu3 %v8333_v58  ;;  %v507_v57 = vld [vmem:[%s8038_s26 + $0x2a8] sm:$0xff] }
 0x212   : > { %v635_v58 = vld [vmem:[%s8038_s26 + $0x6a8] sm:$0xff]  ;;  %1813 = vmatpush.msra.mxu2 %v507_v57 }
 0x213   : > { %1926 = vmatpush.msra.mxu3 %v635_v58 }
 0x214   : > { %v1005_v55 = vpop.f32.mrf.mxu2  ;;  %v1118_v56 = vpop.f32.mrf.mxu3  ;;  %1814 = vmatpush.msra.mxu2 %v499_v34  ;;  %v490_v34 = vld [vmem:[%s8038_s26 + $0x220] sm:$0xff] }
 0x215   : > { %v782_v23 = vpop.f32.mrf.mxu0  ;;  %v895_v24 = vpop.f32.mrf.mxu1  ;;  %v8777_v51 = vadd.f32 %v1118_v56, %v1005_v55  ;;  %1927 = vmatpush.msra.mxu3 %v627_v30  ;;  %v618_v30 = vld [vmem:[%s8038_s26 + $0x620] sm:$0xff]  ;;  %1589 = vmatpush.msra.mxu0 %v490_v34  ;;  %v15179_v34 = vld [vmem:[#allocation44_spill] sm:$0xff] }
 0x216   : > { %v8779_v15 = vadd.f32 %v895_v24, %v782_v23 }
 0x217   : > { %15166 = vst [vmem:[#allocation107_spill] sm:$0xff] %v8777_v51 }
 0x218   : > { %1185 = vmatmul.f32.gmra.mxu0 %v8340_v59  ;;  %1298 = vmatmul.f32.gmra.mxu1 %v8343_v60  ;;  %15167 = vst [vmem:[#allocation108_spill] sm:$0xff] %v8779_v15 }
 0x219   : > { %1411 = vmatmul.f32.gmra.mxu2 %v8340_v59  ;;  %1524 = vmatmul.f32.gmra.mxu3 %v8343_v60 }
 0x21c   : > { %v1008_v31 = vpop.f32.mrf.mxu2  ;;  %v1121_v33 = vpop.f32.mrf.mxu3 }
 0x21d   : > { %v785_v47 = vpop.f32.mrf.mxu0  ;;  %v898_v48 = vpop.f32.mrf.mxu1  ;;  %v8801_v24 = vadd.f32 %v1121_v33, %v1008_v31 }
 0x21e   : > { %v8803_v9 = vadd.f32 %v898_v48, %v785_v47 }
 0x21f   : > { %15168 = vst [vmem:[#allocation109_spill] sm:$0xff] %v8801_v24  ;;  %v7487_v24 = vld [vmem:[%s8030_s15 + $0x90] sm:$0xff] }
 0x220   : > { %1188 = vmatmul.f32.gmra.mxu0 %v8350_v61  ;;  %1301 = vmatmul.f32.gmra.mxu1 %v8353_v62  ;;  %15169 = vst [vmem:[#allocation110_spill] sm:$0xff] %v8803_v9 }
 0x221   : > { %1414 = vmatmul.f32.gmra.mxu2 %v8350_v61  ;;  %1527 = vmatmul.f32.gmra.mxu3 %v8353_v62  ;;  %v626_v61 = vld [vmem:[%s8038_s26 + $0x660] sm:$0xff] }
 0x222   : > { %1701 = vmatpush.msra.mxu1 %v626_v61 }
 0x224   : > { %v1011_v59 = vpop.f32.mrf.mxu2  ;;  %v1124_v60 = vpop.f32.mrf.mxu3  ;;  %1702 = vmatpush.msra.mxu1 %v618_v30 }
 0x225   : > { %v788_v49 = vpop.f32.mrf.mxu0  ;;  %v901_v50 = vpop.f32.mrf.mxu1  ;;  %v8807_v37 = vadd.f32 %v1124_v60, %v1011_v59 }
 0x227   : > { %15170 = vst [vmem:[#allocation111_spill] sm:$0xff] %v8807_v37  ;;  %v660_v37 = vld [vmem:[%s8038_s26 + $0x770] sm:$0xff] }
 0x228   : > { %1191 = vmatmul.f32.gmra.mxu0 %v8360_v63  ;;  %1304 = vmatmul.f32.gmra.mxu1 %v8363_v0 }
 0x229   : > { %1417 = vmatmul.f32.gmra.mxu2 %v8360_v63  ;;  %1530 = vmatmul.f32.gmra.mxu3 %v8363_v0 }
 0x22c   : > { %v1014_v55 = vpop.f32.mrf.mxu2  ;;  %v1127_v62 = vpop.f32.mrf.mxu3 }
 0x22d   : > { %v1147_v56 = vpop.f32.mrf.mxu0  ;;  %v1260_v23 = vpop.f32.mrf.mxu1 }
 0x22e   : > { %v8815_v31 = vadd.f32 %v1260_v23, %v1147_v56  ;;  %v610_v56 = vld [vmem:[%s8038_s26 + $0x5e0] sm:$0xff] }
 0x22f   : > { %1703 = vmatpush.msra.mxu1 %v610_v56 }
 0x230   : > { %1194 = vmatmul.f32.gmra.mxu0 %v8376_v7  ;;  %1307 = vmatmul.f32.gmra.mxu1 %v8379_v8  ;;  %15173 = vst [vmem:[#allocation114_spill] sm:$0xff] %v8815_v31  ;;  %v15248_v31 = vld [vmem:[#allocation36_spill] sm:$0xff] }
 0x231   : > { %1420 = vmatmul.f32.gmra.mxu2 %v8376_v7  ;;  %1533 = vmatmul.f32.gmra.mxu3 %v8379_v8  ;;  %v491_v7 = vld [vmem:[%s8038_s26 + $0x228] sm:$0xff] }
 0x232   : > { %v619_v8 = vld [vmem:[%s8038_s26 + $0x628] sm:$0xff]  ;;  %1815 = vmatpush.msra.mxu2 %v491_v7 }
 0x233   : > { %1928 = vmatpush.msra.mxu3 %v619_v8  ;;  %v15178_v8 = vld [vmem:[#allocation43_spill] sm:$0xff] }
 0x234   : > { %v1373_v63 = vpop.f32.mrf.mxu2  ;;  %v1486_v0 = vpop.f32.mrf.mxu3 }
 0x235   : > { %v1150_v57 = vpop.f32.mrf.mxu0  ;;  %v1263_v58 = vpop.f32.mrf.mxu1  ;;  %v8819_v33 = vadd.f32 %v1486_v0, %v1373_v63  ;;  %1929 = vmatpush.msra.mxu3 %v611_v25  ;;  %v15176_v0 = vld [vmem:[#allocation39_spill] sm:$0xff]  ;;  %v603_v25 = vld [vmem:[%s8038_s26 + $0x5a8] sm:$0xff] }
 0x236   : > { %v8821_v47 = vadd.f32 %v1263_v58, %v1150_v57 }
 0x237   : > { %15174 = vst [vmem:[#allocation115_spill] sm:$0xff] %v8819_v33  ;;  %1930 = vmatpush.msra.mxu3 %v603_v25  ;;  %v15247_v33 = vld [vmem:[#allocation35_spill] sm:$0xff] }
 0x238   : > { %1197 = vmatmul.f32.gmra.mxu0 %v8394_v20  ;;  %1310 = vmatmul.f32.gmra.mxu1 %v8397_v21  ;;  %15175 = vst [vmem:[#allocation116_spill] sm:$0xff] %v8821_v47 }
 0x239   : > { %1423 = vmatmul.f32.gmra.mxu2 %v8394_v20  ;;  %1536 = vmatmul.f32.gmra.mxu3 %v8397_v21  ;;  %v8811_v20 = vadd.f32 %v901_v50, %v788_v49  ;;  %v8813_v21 = vadd.f32 %v1127_v62, %v1014_v55  ;;  %v483_v50 = vld [vmem:[%s8038_s26 + $0x1e8] sm:$0xff] }
 0x23a   : > { %1816 = vmatpush.msra.mxu2 %v483_v50 }
 0x23b   : > { %15171 = vst [vmem:[#allocation112_spill] sm:$0xff] %v8811_v20  ;;  %v532_v20 = vld [vmem:[%s8038_s26 + $0x370] sm:$0xff] }
 0x23c   : > { %15172 = vst [vmem:[#allocation113_spill] sm:$0xff] %v8813_v21  ;;  %v1376_v48 = vpop.f32.mrf.mxu2  ;;  %v1489_v59 = vpop.f32.mrf.mxu3  ;;  %v9090_v21 = vadd.f32 %v15248_v31, %v15247_v33 }
 0x23d   : > { %v1153_v60 = vpop.f32.mrf.mxu0  ;;  %v1266_v49 = vpop.f32.mrf.mxu1 }
 0x23e   : > { %v8845_v30 = vadd.f32 %v1266_v49, %v1153_v60  ;;  %v15183_v60 = vld [vmem:[#allocation49_spill] sm:$0xff]  ;;  %v15184_v49 = vld [vmem:[#allocation50_spill] sm:$0xff]  ;;  %v6711_v33 = vmul.f32 -1.442695, %v9090_v21 }
 0x240   : > { %1200 = vmatmul.f32.gmra.mxu0 %v8410_v35  ;;  %1313 = vmatmul.f32.gmra.mxu1 %v8413_v36  ;;  %15180 = vst [vmem:[#allocation43_spill] sm:$0xff] %v8845_v30  ;;  %v7486_v30 = vld [vmem:[%s8030_s15 + $0x88] sm:$0xff] }
 0x241   : > { %1426 = vmatmul.f32.gmra.mxu2 %v8410_v35  ;;  %1539 = vmatmul.f32.gmra.mxu3 %v8413_v36  ;;  %v482_v36 = vld [vmem:[%s8038_s26 + $0x1e0] sm:$0xff] }
 0x242   : > { %1590 = vmatpush.msra.mxu0 %v482_v36 }
 0x244   : > { %v1379_v61 = vpop.f32.mrf.mxu2  ;;  %v1492_v35 = vpop.f32.mrf.mxu3 }
 0x245   : > { %v1156_v55 = vpop.f32.mrf.mxu0  ;;  %v1269_v62 = vpop.f32.mrf.mxu1  ;;  %v8847_v50 = vadd.f32 %v1492_v35, %v1379_v61 }
 0x247   : > { %15181 = vst [vmem:[#allocation44_spill] sm:$0xff] %v8847_v50  ;;  %v7483_v50 = vld [vmem:[%s8030_s15 + $0x70] sm:$0xff] }
 0x248   : > { %1203 = vmatmul.f32.gmra.mxu0 %v8430_v54  ;;  %1316 = vmatmul.f32.gmra.mxu1 %v8433_v3 }
 0x249   : > { %1429 = vmatmul.f32.gmra.mxu2 %v8430_v54  ;;  %1542 = vmatmul.f32.gmra.mxu3 %v8433_v3 }
 0x24c   : > { %v1382_v23 = vpop.f32.mrf.mxu2  ;;  %v1495_v54 = vpop.f32.mrf.mxu3 }
 0x24d   : > { %v1159_v63 = vpop.f32.mrf.mxu0  ;;  %v1272_v3 = vpop.f32.mrf.mxu1  ;;  %v8859_v61 = vadd.f32 %v1495_v54, %v1382_v23 }
 0x24e   : > { %v8861_v35 = vadd.f32 %v1272_v3, %v1159_v63  ;;  %v467_v3 = vld [vmem:[%s8038_s26 + $0x168] sm:$0xff] }
 0x24f   : > { %15185 = vst [vmem:[#allocation49_spill] sm:$0xff] %v8859_v61  ;;  %v669_v61 = vld [vmem:[%s8038_s26 + $0x7b8] sm:$0xff] }
 0x250   : > { %1206 = vmatmul.f32.gmra.mxu0 %v8446_v22  ;;  %1319 = vmatmul.f32.gmra.mxu1 %v8449_v27  ;;  %15186 = vst [vmem:[#allocation50_spill] sm:$0xff] %v8861_v35  ;;  %v7475_v35 = vld [vmem:[%s8030_s15 + $0x30] sm:$0xff] }
 0x251   : > { %1432 = vmatmul.f32.gmra.mxu2 %v8446_v22  ;;  %1545 = vmatmul.f32.gmra.mxu3 %v8449_v27  ;;  %v8841_v27 = vadd.f32 %v1489_v59, %v1376_v48  ;;  %v8853_v48 = vadd.f32 %v1269_v62, %v1156_v55  ;;  %v474_v59 = vld [vmem:[%s8038_s26 + $0x1a0] sm:$0xff] }
 0x252   : > { %1591 = vmatpush.msra.mxu0 %v474_v59 }
 0x253   : > { %15177 = vst [vmem:[#allocation39_spill] sm:$0xff] %v8841_v27 }
 0x254   : > { %v1385_v57 = vpop.f32.mrf.mxu2  ;;  %v1498_v58 = vpop.f32.mrf.mxu3  ;;  %15182 = vst [vmem:[#allocation117_spill] sm:$0xff] %v8853_v48  ;;  %v668_v48 = vld [vmem:[%s8038_s26 + $0x7b0] sm:$0xff] }
 0x255   : > { %v1162_v7 = vpop.f32.mrf.mxu0  ;;  %v1275_v22 = vpop.f32.mrf.mxu1 }
 0x256   : > { %v8865_v55 = vadd.f32 %v1275_v22, %v1162_v7  ;;  %v15193_v7 = vld [vmem:[#allocation52_spill] sm:$0xff] }
 0x258   : > { %1209 = vmatmul.f32.gmra.mxu0 %v8462_v4  ;;  %1322 = vmatmul.f32.gmra.mxu1 %v15176_v0  ;;  %15188 = vst [vmem:[#allocation119_spill] sm:$0xff] %v8865_v55  ;;  %v15208_v55 = vld [vmem:[#allocation68_spill] sm:$0xff] }
 0x259   : > { %1435 = vmatmul.f32.gmra.mxu2 %v8462_v4  ;;  %1548 = vmatmul.f32.gmra.mxu3 %v15176_v0  ;;  %v475_v4 = vld [vmem:[%s8038_s26 + $0x1a8] sm:$0xff]  ;;  %v602_v0 = vld [vmem:[%s8038_s26 + $0x5a0] sm:$0xff] }
 0x25a   : > { %1817 = vmatpush.msra.mxu2 %v475_v4  ;;  %1704 = vmatpush.msra.mxu1 %v602_v0  ;;  %v15196_v0 = vld [vmem:[#allocation55_spill] sm:$0xff] }
 0x25c   : > { %v1388_v36 = vpop.f32.mrf.mxu2  ;;  %v1501_v56 = vpop.f32.mrf.mxu3  ;;  %1818 = vmatpush.msra.mxu2 %v467_v3 }
 0x25d   : > { %v1165_v27 = vpop.f32.mrf.mxu0  ;;  %v1278_v47 = vpop.f32.mrf.mxu1  ;;  %v8869_v62 = vadd.f32 %v1501_v56, %v1388_v36 }
 0x25e   : > { %v8871_v25 = vadd.f32 %v1278_v47, %v1165_v27  ;;  %v466_v47 = vld [vmem:[%s8038_s26 + $0x160] sm:$0xff] }
 0x25f   : > { %15189 = vst [vmem:[#allocation120_spill] sm:$0xff] %v8869_v62  ;;  %v594_v27 = vld [vmem:[%s8038_s26 + $0x560] sm:$0xff]  ;;  %1592 = vmatpush.msra.mxu0 %v466_v47  ;;  %v587_v47 = vld [vmem:[%s8038_s26 + $0x528] sm:$0xff] }
 0x260   : > { %1212 = vmatmul.f32.gmra.mxu0 %v15178_v8  ;;  %1325 = vmatmul.f32.gmra.mxu1 %v15179_v34  ;;  %15190 = vst [vmem:[#allocation121_spill] sm:$0xff] %v8871_v25 }
 0x261   : > { %1438 = vmatmul.f32.gmra.mxu2 %v15178_v8  ;;  %1551 = vmatmul.f32.gmra.mxu3 %v15179_v34  ;;  %v8863_v8 = vadd.f32 %v1498_v58, %v1385_v57  ;;  %v595_v57 = vld [vmem:[%s8038_s26 + $0x568] sm:$0xff]  ;;  %v15192_v58 = vld [vmem:[#allocation51_spill] sm:$0xff] }
 0x262   : > { %1931 = vmatpush.msra.mxu3 %v595_v57  ;;  %1705 = vmatpush.msra.mxu1 %v594_v27  ;;  %v15200_v57 = vld [vmem:[#allocation62_spill] sm:$0xff] }
 0x263   : > { %15187 = vst [vmem:[#allocation118_spill] sm:$0xff] %v8863_v8 }
 0x264   : > { %v1391_v34 = vpop.f32.mrf.mxu2  ;;  %v1504_v4 = vpop.f32.mrf.mxu3  ;;  %1932 = vmatpush.msra.mxu3 %v587_v47 }
 0x265   : > { %v8873_v23 = vadd.f32 %v1504_v4, %v1391_v34  ;;  %v1168_v54 = vpop.f32.mrf.mxu0  ;;  %v1281_v63 = vpop.f32.mrf.mxu1 }
 0x267   : > { %15191 = vst [vmem:[#allocation122_spill] sm:$0xff] %v8873_v23  ;;  %v15202_v23 = vld [vmem:[#allocation65_spill] sm:$0xff] }
 0x268   : > { %1215 = vmatmul.f32.gmra.mxu0 %v15183_v60  ;;  %1328 = vmatmul.f32.gmra.mxu1 %v15184_v49 }
 0x269   : > { %1441 = vmatmul.f32.gmra.mxu2 %v15183_v60  ;;  %1554 = vmatmul.f32.gmra.mxu3 %v15184_v49  ;;  %v15197_v60 = vld [vmem:[#allocation56_spill] sm:$0xff] }
 0x26c   : > { %v1394_v22 = vpop.f32.mrf.mxu2  ;;  %v1507_v36 = vpop.f32.mrf.mxu3 }
 0x26d   : > { %v8883_v56 = vpop.f32.mrf.mxu0  ;;  %v8885_v59 = vpop.f32.mrf.mxu1 }
 0x26e   : > { %15194 = vst [vmem:[#allocation51_spill] sm:$0xff] %v8883_v56 }
 0x26f   : > { %15195 = vst [vmem:[#allocation52_spill] sm:$0xff] %v8885_v59  ;;  %v586_v59 = vld [vmem:[%s8038_s26 + $0x520] sm:$0xff] }
 0x270   : > { %1218 = vmatmul.f32.gmra.mxu0 %v15192_v58  ;;  %1331 = vmatmul.f32.gmra.mxu1 %v15193_v7 }
 0x271   : > { %1444 = vmatmul.f32.gmra.mxu2 %v15192_v58  ;;  %1557 = vmatmul.f32.gmra.mxu3 %v15193_v7  ;;  %v15201_v58 = vld [vmem:[#allocation63_spill] sm:$0xff]  ;;  %v459_v7 = vld [vmem:[%s8038_s26 + $0x128] sm:$0xff] }
 0x272   : > { %1819 = vmatpush.msra.mxu2 %v459_v7  ;;  %1706 = vmatpush.msra.mxu1 %v586_v59  ;;  %v15209_v59 = vld [vmem:[#allocation69_spill] sm:$0xff] }
 0x274   : > { %v1397_v49 = vpop.f32.mrf.mxu2  ;;  %v1510_v34 = vpop.f32.mrf.mxu3 }
 0x275   : > { %v8891_v4 = vpop.f32.mrf.mxu0  ;;  %v8893_v3 = vpop.f32.mrf.mxu1  ;;  %v8911_v7 = vadd.f32 %v1510_v34, %v1397_v49  ;;  %v15210_v34 = vld [vmem:[#allocation70_spill] sm:$0xff] }
 0x276   : > { %15198 = vst [vmem:[#allocation55_spill] sm:$0xff] %v8891_v4 }
 0x277   : > { %15199 = vst [vmem:[#allocation56_spill] sm:$0xff] %v8893_v3  ;;  %v15203_v3 = vld [vmem:[#allocation66_spill] sm:$0xff] }
 0x278   : > { %1221 = vmatmul.f32.gmra.mxu0 %v15196_v0  ;;  %1334 = vmatmul.f32.gmra.mxu1 %v15197_v60  ;;  %15206 = vst [vmem:[#allocation65_spill] sm:$0xff] %v8911_v7 }
 0x279   : > { %1447 = vmatmul.f32.gmra.mxu2 %v15196_v0  ;;  %1560 = vmatmul.f32.gmra.mxu3 %v15197_v60  ;;  %v458_v60 = vld [vmem:[%s8038_s26 + $0x120] sm:$0xff] }
 0x27a   : > { %1593 = vmatpush.msra.mxu0 %v458_v60 }
 0x27c   : > { %v1400_v27 = vpop.f32.mrf.mxu2  ;;  %v1513_v0 = vpop.f32.mrf.mxu3 }
 0x27d   : > { %v1177_v56 = vpop.f32.mrf.mxu0  ;;  %v1290_v4 = vpop.f32.mrf.mxu1  ;;  %v8913_v47 = vadd.f32 %v1513_v0, %v1400_v27  ;;  %v450_v27 = vld [vmem:[%s8038_s26 + $0xe0] sm:$0xff] }
 0x27e   : > { %v578_v0 = vld [vmem:[%s8038_s26 + $0x4e0] sm:$0xff]  ;;  %1594 = vmatpush.msra.mxu0 %v450_v27 }
 0x27f   : > { %15207 = vst [vmem:[#allocation66_spill] sm:$0xff] %v8913_v47  ;;  %1707 = vmatpush.msra.mxu1 %v578_v0  ;;  %v442_v0 = vld [vmem:[%s8038_s26 + $0xa0] sm:$0xff] }
 0x280   : > { %1224 = vmatmul.f32.gmra.mxu0 %v15200_v57  ;;  %1337 = vmatmul.f32.gmra.mxu1 %v15201_v58 }
 0x281   : > { %1450 = vmatmul.f32.gmra.mxu2 %v15200_v57  ;;  %1563 = vmatmul.f32.gmra.mxu3 %v15201_v58  ;;  %v8905_v57 = vadd.f32 %v1281_v63, %v1168_v54  ;;  %v8909_v58 = vadd.f32 %v1507_v36, %v1394_v22  ;;  %v579_v22 = vld [vmem:[%s8038_s26 + $0x4e8] sm:$0xff] }
 0x282   : > { %1933 = vmatpush.msra.mxu3 %v579_v22  ;;  %1595 = vmatpush.msra.mxu0 %v442_v0 }
 0x283   : > { %15204 = vst [vmem:[#allocation62_spill] sm:$0xff] %v8905_v57  ;;  %v563_v57 = vld [vmem:[%s8038_s26 + $0x468] sm:$0xff] }
 0x284   : > { %15205 = vst [vmem:[#allocation63_spill] sm:$0xff] %v8909_v58  ;;  %v1403_v25 = vpop.f32.mrf.mxu2  ;;  %v1516_v62 = vpop.f32.mrf.mxu3 }
 0x285   : > { %v1180_v54 = vpop.f32.mrf.mxu0  ;;  %v1293_v63 = vpop.f32.mrf.mxu1  ;;  %v8937_v27 = vadd.f32 %v1516_v62, %v1403_v25 }
 0x286   : > { %v8943_v58 = vadd.f32 %v1293_v63, %v1180_v54  ;;  %v434_v63 = vld [vmem:[%s8038_s26 + $0x60] sm:$0xff] }
 0x287   : > { %15213 = vst [vmem:[#allocation69_spill] sm:$0xff] %v8937_v27  ;;  %1596 = vmatpush.msra.mxu0 %v434_v63 }
 0x288   : > { %1227 = vmatmul.f32.gmra.mxu0 %v15202_v23  ;;  %1340 = vmatmul.f32.gmra.mxu1 %v15203_v3  ;;  %15214 = vst [vmem:[#allocation70_spill] sm:$0xff] %v8943_v58 }
 0x289   : > { %1453 = vmatmul.f32.gmra.mxu2 %v15202_v23  ;;  %1566 = vmatmul.f32.gmra.mxu3 %v15203_v3  ;;  %v451_v23 = vld [vmem:[%s8038_s26 + $0xe8] sm:$0xff]  ;;  %v15211_v3 = vld [vmem:[#allocation71_spill] sm:$0xff] }
 0x28a   : > { %1820 = vmatpush.msra.mxu2 %v451_v23 }
 0x28c   : > { %v1406_v36 = vpop.f32.mrf.mxu2  ;;  %v1519_v49 = vpop.f32.mrf.mxu3 }
 0x28d   : > { %v1183_v60 = vpop.f32.mrf.mxu0 }
 0x290   : > { %1230 = vmatmul.f32.gmra.mxu0 %v15208_v55  ;;  %1343 = vmatmul.f32.gmra.mxu1 %v15209_v59 }
 0x291   : > { %1456 = vmatmul.f32.gmra.mxu2 %v15208_v55  ;;  %1569 = vmatmul.f32.gmra.mxu3 %v15209_v59  ;;  %v1296_v55 = vpop.f32.mrf.mxu1  ;;  %v8927_v59 = vadd.f32 %v1290_v4, %v1177_v56  ;;  %v443_v56 = vld [vmem:[%s8038_s26 + $0xa8] sm:$0xff] }
 0x292   : > { %v571_v4 = vld [vmem:[%s8038_s26 + $0x4a8] sm:$0xff]  ;;  %1821 = vmatpush.msra.mxu2 %v443_v56  ;;  %v8945_v56 = vadd.f32 %v1519_v49, %v1406_v36  ;;  %v8947_v62 = vadd.f32 %v1296_v55, %v1183_v60  ;;  %v562_v36 = vld [vmem:[%s8038_s26 + $0x460] sm:$0xff] }
 0x293   : > { %15212 = vst [vmem:[#allocation68_spill] sm:$0xff] %v8927_v59  ;;  %1934 = vmatpush.msra.mxu3 %v571_v4  ;;  %v570_v59 = vld [vmem:[%s8038_s26 + $0x4a0] sm:$0xff] }
 0x294   : > { %v1409_v23 = vpop.f32.mrf.mxu2  ;;  %v1522_v22 = vpop.f32.mrf.mxu3  ;;  %1708 = vmatpush.msra.mxu1 %v570_v59  ;;  %15215 = vst [vmem:[#allocation71_spill] sm:$0xff] %v8945_v56 }
 0x295   : > { %v1186_v47 = vpop.f32.mrf.mxu0  ;;  %15216 = vst [vmem:[#allocation123_spill] sm:$0xff] %v8947_v62  ;;  %v8951_v8 = vadd.f32 %v1522_v22, %v1409_v23  ;;  %1935 = vmatpush.msra.mxu3 %v563_v57  ;;  %v427_v23 = vld [vmem:[%s8038_s26 + $0x28] sm:$0xff]  ;;  %v7469_v57 = vld [vmem:[%s8030_s15] sm:$0xff] }
 0x296   : > { %1709 = vmatpush.msra.mxu1 %v562_v36  ;;  %v555_v22 = vld [vmem:[%s8038_s26 + $0x428] sm:$0xff] }
 0x297   : > { %15217 = vst [vmem:[#allocation124_spill] sm:$0xff] %v8951_v8  ;;  %1936 = vmatpush.msra.mxu3 %v555_v22  ;;  %v7472_v22 = vld [vmem:[%s8030_s15 + $0x18] sm:$0xff] }
 0x298   : > { %1233 = vmatmul.f32.gmra.mxu0 %v15210_v34  ;;  %1346 = vmatmul.f32.gmra.mxu1 %v15211_v3 }
 0x299   : > { %1459 = vmatmul.f32.gmra.mxu2 %v15210_v34  ;;  %1572 = vmatmul.f32.gmra.mxu3 %v15211_v3  ;;  %v1299_v7 = vpop.f32.mrf.mxu1 }
 0x29a   : > { %v8953_v0 = vadd.f32 %v1299_v7, %v1186_v47  ;;  %v426_v7 = vld [vmem:[%s8038_s26 + $0x20] sm:$0xff] }
 0x29b   : > { %v554_v47 = vld [vmem:[%s8038_s26 + $0x420] sm:$0xff]  ;;  %1597 = vmatpush.msra.mxu0 %v426_v7 }
 0x29c   : > { %v1412_v34 = vpop.f32.mrf.mxu2  ;;  %v1525_v3 = vpop.f32.mrf.mxu3  ;;  %15218 = vst [vmem:[#allocation125_spill] sm:$0xff] %v8953_v0  ;;  %1710 = vmatpush.msra.mxu1 %v554_v47 }
 0x29d   : > { %v8955_v54 = vadd.f32 %v1525_v3, %v1412_v34  ;;  %v7470_v3 = vld [vmem:[%s8030_s15 + $0x8] sm:$0xff] }
 0x29f   : > { %15219 = vst [vmem:[#allocation126_spill] sm:$0xff] %v8955_v54  ;;  %v7471_v54 = vld [vmem:[%s8030_s15 + $0x10] sm:$0xff] }
 0x2a0   : > { %1236 = vmatmul.f32.gmra.mxu0 %v8600_v45  ;;  %1349 = vmatmul.f32.gmra.mxu1 %v8603_v52 }
 0x2a1   : > { %1462 = vmatmul.f32.gmra.mxu2 %v8600_v45  ;;  %1575 = vmatmul.f32.gmra.mxu3 %v8603_v52  ;;  %v1189_v45 = vpop.f32.mrf.mxu0  ;;  %v1302_v52 = vpop.f32.mrf.mxu1 }
 0x2a2   : > { %v8964_v34 = vadd.f32 %v1302_v52, %v1189_v45 }
 0x2a4   : > { %v1415_v25 = vpop.f32.mrf.mxu2  ;;  %v1528_v4 = vpop.f32.mrf.mxu3  ;;  %15220 = vst [vmem:[#allocation127_spill] sm:$0xff] %v8964_v34  ;;  %v7473_v34 = vld [vmem:[%s8030_s15 + $0x20] sm:$0xff] }
 0x2a8   : > { %1239 = vmatmul.f32.gmra.mxu0 %v8634_v46  ;;  %1352 = vmatmul.f32.gmra.mxu1 %v8637_v12 }
 0x2a9   : > { %1465 = vmatmul.f32.gmra.mxu2 %v8634_v46  ;;  %1578 = vmatmul.f32.gmra.mxu3 %v8637_v12  ;;  %v1192_v46 = vpop.f32.mrf.mxu0  ;;  %v1305_v27 = vpop.f32.mrf.mxu1  ;;  %v435_v12 = vld [vmem:[%s8038_s26 + $0x68] sm:$0xff] }
 0x2aa   : > { %1822 = vmatpush.msra.mxu2 %v435_v12  ;;  %v8973_v0 = vadd.f32 %v1305_v27, %v1192_v46 }
 0x2ac   : > { %v1418_v49 = vpop.f32.mrf.mxu2  ;;  %v1531_v60 = vpop.f32.mrf.mxu3  ;;  %1823 = vmatpush.msra.mxu2 %v427_v23  ;;  %15222 = vst [vmem:[#allocation129_spill] sm:$0xff] %v8973_v0  ;;  %v676_v0 = vld [vmem:[%s8038_s26 + $0x7f0] sm:$0xff] }
 0x2ad   : > { %v8975_v8 = vadd.f32 %v1531_v60, %v1418_v49  ;;  %2147 = vmatpush.msrb.mxu1 %v676_v0  ;;  %v15230_v0 = vld [vmem:[#allocation26_spill] sm:$0xff] }
 0x2af   : > { %15223 = vst [vmem:[#allocation130_spill] sm:$0xff] %v8975_v8  ;;  %v548_v8 = vld [vmem:[%s8038_s26 + $0x3f0] sm:$0xff]  ;;  %2148 = vmatpush.msrb.mxu1 %v668_v48 }
 0x2b0   : > { %1598 = vmatmul.f32.vlgmr.msra.gmra.mxu0 %v7469_v57  ;;  %1711 = vmatmul.f32.vlgmr.msra.gmra.mxu1 %v7470_v3 }
 0x2b1   : > { %v1195_v55 = vpop.f32.mrf.mxu0  ;;  %v1308_v59 = vpop.f32.mrf.mxu1  ;;  %1824 = vmatmul.f32.vlgmr.msra.gmra.mxu2 %v7469_v57  ;;  %1937 = vmatmul.f32.vlgmr.msra.gmra.mxu3 %v7470_v3  ;;  %v8970_v57 = vadd.f32 %v1528_v4, %v1415_v25  ;;  %v7474_v3 = vld [vmem:[%s8030_s15 + $0x28] sm:$0xff]  ;;  %v549_v25 = vld [vmem:[%s8038_s26 + $0x3f8] sm:$0xff] }
 0x2b2   : > { %v677_v4 = vld [vmem:[%s8038_s26 + $0x7f8] sm:$0xff]  ;;  %2260 = vmatpush.msrb.mxu2 %v549_v25  ;;  %2034 = vmatpush.msrb.mxu0 %v548_v8  ;;  %v7479_v25 = vld [vmem:[%s8030_s15 + $0x50] sm:$0xff] }
 0x2b3   : > { %15221 = vst [vmem:[#allocation128_spill] sm:$0xff] %v8970_v57  ;;  %2373 = vmatpush.msrb.mxu3 %v677_v4  ;;  %v7480_v8 = vld [vmem:[%s8030_s15 + $0x58] sm:$0xff]  ;;  %2149 = vmatpush.msrb.mxu1 %v660_v37 }
 0x2b4   : > { %v1421_v12 = vpop.f32.mrf.mxu2  ;;  %v1534_v63 = vpop.f32.mrf.mxu3  ;;  %v541_v57 = vld [vmem:[%s8038_s26 + $0x3b8] sm:$0xff] }
 0x2b5   : > { %v8987_v27 = vadd.f32 %v1534_v63, %v1421_v12  ;;  %v15228_v12 = vld [vmem:[#allocation23_spill] sm:$0xff]  ;;  %v15229_v63 = vld [vmem:[#allocation24_spill] sm:$0xff]  ;;  %2261 = vmatpush.msrb.mxu2 %v541_v57  ;;  %2374 = vmatpush.msrb.mxu3 %v669_v61 }
 0x2b6   : > { %2150 = vmatpush.msrb.mxu1 %v652_v39 }
 0x2b7   : > { %15225 = vst [vmem:[#allocation132_spill] sm:$0xff] %v8987_v27 }
 0x2b8   : > { %1601 = vmatmul.f32.gmra.mxu0 %v7471_v54  ;;  %1714 = vmatmul.f32.gmra.mxu1 %v7472_v22 }
 0x2b9   : > { %v1198_v36 = vpop.f32.mrf.mxu0  ;;  %v1311_v23 = vpop.f32.mrf.mxu1  ;;  %1827 = vmatmul.f32.gmra.mxu2 %v7471_v54  ;;  %1940 = vmatmul.f32.gmra.mxu3 %v7472_v22  ;;  %v8977_v54 = vadd.f32 %v1308_v59, %v1195_v55 }
 0x2ba   : > { %v8989_v46 = vadd.f32 %v1311_v23, %v1198_v36  ;;  %v8999_v36 = vadd.f32 %v15229_v63, %v15228_v12  ;;  %v15232_v12 = vld [vmem:[#allocation25_spill] sm:$0xff] }
 0x2bb   : > { %15224 = vst [vmem:[#allocation131_spill] sm:$0xff] %v8977_v54  ;;  %v7477_v54 = vld [vmem:[%s8030_s15 + $0x40] sm:$0xff]  ;;  %v6696_v63 = vmul.f32 -1.442695, %v15232_v12 }
 0x2bc   : > { %v1424_v7 = vpop.f32.mrf.mxu2  ;;  %v1537_v47 = vpop.f32.mrf.mxu3  ;;  %15226 = vst [vmem:[#allocation133_spill] sm:$0xff] %v8989_v46 }
 0x2bd   : > { %v8991_v49 = vadd.f32 %v1537_v47, %v1424_v7  ;;  %v6695_v47 = vmul.f32 -1.442695, %v8999_v36 }
 0x2bf   : > { %15227 = vst [vmem:[#allocation134_spill] sm:$0xff] %v8991_v49  ;;  %6957 = vpow2.f32 %v6695_v47 }
 0x2c0   : > { %1604 = vmatmul.f32.gmra.mxu0 %v7473_v34  ;;  %1717 = vmatmul.f32.gmra.mxu1 %v7474_v3  ;;  %6959 = vpow2.f32 %v6696_v63  ;;  %v15237_v63 = vld [vmem:[#allocation28_spill] sm:$0xff] }
 0x2c1   : > { %v1201_v45 = vpop.f32.mrf.mxu0  ;;  %v1314_v52 = vpop.f32.mrf.mxu1  ;;  %1830 = vmatmul.f32.gmra.mxu2 %v7473_v34  ;;  %1943 = vmatmul.f32.gmra.mxu3 %v7474_v3  ;;  %v7476_v34 = vld [vmem:[%s8030_s15 + $0x38] sm:$0xff] }
 0x2c2   : > { %v9013_v49 = vadd.f32 %v1314_v52, %v1201_v45  ;;  %v7482_v52 = vld [vmem:[%s8030_s15 + $0x68] sm:$0xff] }
 0x2c4   : > { %v1427_v22 = vpop.f32.mrf.mxu2  ;;  %v1540_v62 = vpop.f32.mrf.mxu3  ;;  %15233 = vst [vmem:[#allocation23_spill] sm:$0xff] %v9013_v49 }
 0x2c5   : > { %v9015_v46 = vadd.f32 %v1540_v62, %v1427_v22  ;;  %v6958_v62 = vpop.eup %6957 }
 0x2c6   : > { %v9036_v48 = vadd.f32 1.0, %v6958_v62 }
 0x2c7   : > { %15234 = vst [vmem:[#allocation24_spill] sm:$0xff] %v9015_v46  ;;  %v15238_v46 = vld [vmem:[#allocation29_spill] sm:$0xff] }
 0x2c8   : > { %1607 = vmatmul.f32.gmra.mxu0 %v7475_v35  ;;  %1720 = vmatmul.f32.gmra.mxu1 %v7476_v34  ;;  %v3009_v51 = vand.u32 2147483648, %v9036_v48  ;;  %vm3003_vm0 = vweird.f32 %v9036_v48 }
 0x2c9   : > { %v8979_v56 = vpop.f32.mrf.mxu0  ;;  %v8981_v58 = vpop.f32.mrf.mxu1  ;;  %1833 = vmatmul.f32.gmra.mxu2 %v7475_v35  ;;  %1946 = vmatmul.f32.gmra.mxu3 %v7476_v34  ;;  %v7478_v35 = vld [vmem:[%s8030_s15 + $0x48] sm:$0xff] }
 0x2ca   : > { %v9034_v57 = vadd.f32 %v8981_v58, %v8979_v56 }
 0x2cc   : > { %v1430_v60 = vpop.f32.mrf.mxu2  ;;  %v1543_v55 = vpop.f32.mrf.mxu3  ;;  %15235 = vst [vmem:[#allocation26_spill] sm:$0xff] %v9034_v57 }
 0x2d0   : > { %1610 = vmatmul.f32.gmra.mxu0 %v7477_v54  ;;  %1723 = vmatmul.f32.gmra.mxu1 %v7478_v35 }
 0x2d1   : > { %v1207_v59 = vpop.f32.mrf.mxu0  ;;  %v1320_v3 = vpop.f32.mrf.mxu1  ;;  %1836 = vmatmul.f32.gmra.mxu2 %v7477_v54  ;;  %1949 = vmatmul.f32.gmra.mxu3 %v7478_v35  ;;  %v15231_v54 = vld [vmem:[#allocation27_spill] sm:$0xff] }
 0x2d2   : > { %v9010_v35 = vadd.f32 %v15231_v54, %v15230_v0  ;;  %v7481_v0 = vld [vmem:[%s8030_s15 + $0x60] sm:$0xff]  ;;  %v6960_v54 = vpop.eup %6959  ;;  %v9049_v58 = vadd.f32 %v1320_v3, %v1207_v59 }
 0x2d4   : > { %v1433_v23 = vpop.f32.mrf.mxu2  ;;  %v1546_v7 = vpop.f32.mrf.mxu3  ;;  %v6699_v27 = vmul.f32 -1.442695, %v9010_v35  ;;  %15240 = vst [vmem:[#allocation25_spill] sm:$0xff] %v9049_v58 }
 0x2d5   : > { %v9051_v56 = vadd.f32 %v1546_v7, %v1433_v23  ;;  %v15242_v23 = vld [vmem:[#allocation31_spill] sm:$0xff] }
 0x2d6   : > { %6961 = vpow2.f32 %v6699_v27  ;;  %v6700_v27 = vmul.f32 -1.442695, %v15237_v63  ;;  %v6704_v7 = vmul.f32 -1.442695, %v15242_v23 }
 0x2d7   : > { %6963 = vrcp.f32 %v9036_v48  ;;  %15241 = vst [vmem:[#allocation28_spill] sm:$0xff] %v9051_v56  ;;  %v661_v56 = vld [vmem:[%s8038_s26 + $0x778] sm:$0xff] }
 0x2d8   : > { %1613 = vmatmul.f32.gmra.mxu0 %v7479_v25  ;;  %1726 = vmatmul.f32.gmra.mxu1 %v7480_v8  ;;  %6965 = vpow2.f32 %v6700_v27 }
 0x2d9   : > { %v9003_v4 = vpop.f32.mrf.mxu0  ;;  %v9005_v34 = vpop.f32.mrf.mxu1  ;;  %1839 = vmatmul.f32.gmra.mxu2 %v7479_v25  ;;  %1952 = vmatmul.f32.gmra.mxu3 %v7480_v8  ;;  %v540_v25 = vld [vmem:[%s8038_s26 + $0x3b0] sm:$0xff]  ;;  %v9038_v8 = vadd.f32 %v1543_v55, %v1430_v60  ;;  %v7484_v60 = vld [vmem:[%s8030_s15 + $0x78] sm:$0xff] }
 0x2da   : > { %2035 = vmatpush.msrb.mxu0 %v540_v25  ;;  %2375 = vmatpush.msrb.mxu3 %v661_v56  ;;  %v15246_v56 = vld [vmem:[#allocation34_spill] sm:$0xff] }
 0x2db   : > { %15236 = vst [vmem:[#allocation27_spill] sm:$0xff] %v9038_v8 }
 0x2dc   : > { %v9023_v47 = vpop.f32.mrf.mxu2  ;;  %v9025_v45 = vpop.f32.mrf.mxu3  ;;  %2036 = vmatpush.msrb.mxu0 %v532_v20  ;;  %2376 = vmatpush.msrb.mxu3 %v653_v38 }
 0x2dd   : > { %v6962_v25 = vpop.eup %6961 }
 0x2de   : > { %v9054_v55 = vadd.f32 1.0, %v6962_v25  ;;  %v15244_v25 = vld [vmem:[#allocation33_spill] sm:$0xff]  ;;  %v9073_v58 = vpop.eup %6963 }
 0x2df   : > { %v6966_v8 = vpop.eup %6965  ;;  %v2999_v57 = vmul.f32 %v9073_v58, %v9036_v48  ;;  %vm3004_vm2 = vweird.f32 %v9073_v58 }
 0x2e0   : > { %1616 = vmatmul.f32.gmra.mxu0 %v7481_v0  ;;  %1729 = vmatmul.f32.gmra.mxu1 %v7482_v52  ;;  %vm9158_vm4 = vmor %vm3003_vm0, %vm3004_vm2  ;;  %vm3063_vm5 = vweird.f32 %v9054_v55 }
 0x2e1   : > { %1842 = vmatmul.f32.gmra.mxu2 %v7481_v0  ;;  %v9028_v22 = vpop.f32.mrf.mxu0  ;;  %v9030_v61 = vpop.f32.mrf.mxu1  ;;  %1955 = vmatmul.f32.gmra.mxu3 %v7482_v52  ;;  %v15239_v0 = vld [vmem:[#allocation30_spill] sm:$0xff]  ;;  %v9047_v52 = vadd.f32 1.0, %v6960_v54  ;;  %v3000_v9 = vsub.f32 1.0, %v2999_v57  ;;  %v3007_v57 = vand.u32 2147483647, %v9036_v48 }
 0x2e2   : > { %v9043_v49 = vadd.f32 %v15239_v0, %v15238_v46  ;;  %v533_v0 = vld [vmem:[%s8038_s26 + $0x378] sm:$0xff] }
 0x2e3   : > { %6967 = vrcp.f32 %v9047_v52  ;;  %2262 = vmatpush.msrb.mxu2 %v533_v0  ;;  %vm9126_vm1 = vcmp.eq.f32.partialorder %v3007_v57, 8.507059e+37  ;;  %vm3018_vm3 = vweird.f32 %v9047_v52 }
 0x2e4   : > { %v9056_v46 = vpop.f32.mrf.mxu2  ;;  %v9058_v62 = vpop.f32.mrf.mxu3  ;;  %v6703_v54 = vmul.f32 -1.442695, %v9043_v49  ;;  %6969 = vrcp.f32 %v9054_v55 }
 0x2e5   : > { %v9173_v11 = vadd.f32 %v9058_v62, %v9056_v46  ;;  %v3067_v46 = vand.u32 2147483647, %v9054_v55  ;;  %v3069_v62 = vand.u32 2147483648, %v9054_v55 }
 0x2e6   : > { %6971 = vpow2.f32 %v6703_v54  ;;  %v6708_v54 = vmul.f32 -1.442695, %v15246_v56 }
 0x2e7   : > { %6973 = vpow2.f32 %v6704_v7  ;;  %v9094_v7 = vadd.f32 1.0, %v6966_v8  ;;  %vm3068_vm11 = vcmp.eq.f32.partialorder %v3067_v46, 8.507059e+37 }
 0x2e8   : > { %1619 = vmatmul.f32.gmra.mxu0 %v7483_v50  ;;  %1732 = vmatmul.f32.gmra.mxu1 %v7484_v60 }
 0x2e9   : > { %1845 = vmatmul.f32.gmra.mxu2 %v7483_v50  ;;  %1958 = vmatmul.f32.gmra.mxu3 %v7484_v60  ;;  %v9062_v59 = vpop.f32.mrf.mxu0  ;;  %v9064_v3 = vpop.f32.mrf.mxu1  ;;  %v15243_v50 = vld [vmem:[#allocation32_spill] sm:$0xff]  ;;  %v7485_v60 = vld [vmem:[%s8030_s15 + $0x80] sm:$0xff]  ;;  %vm3078_vm12 = vweird.f32 %v9094_v7 }
 0x2ea   : > { %v9069_v27 = vadd.f32 %v15244_v25, %v15243_v50  ;;  %v9082_v25 = vadd.f32 %v9005_v34, %v9003_v4  ;;  %v9085_v0 = vpop.eup %6967  ;;  %15257 = vst [vmem:[#allocation32_spill] sm:$0xff] %v9173_v11  ;;  %v524_v11 = vld [vmem:[%s8038_s26 + $0x330] sm:$0xff] }
 0x2eb   : > { %v9096_v4 = vpop.eup %6969  ;;  %v3014_v31 = vmul.f32 %v9085_v0, %v9047_v52  ;;  %vm3019_vm6 = vweird.f32 %v9085_v0  ;;  %2037 = vmatpush.msrb.mxu0 %v524_v11 }
 0x2ec   : > { %v6707_v50 = vmul.f32 -1.442695, %v9069_v27  ;;  %15245 = vst [vmem:[#allocation29_spill] sm:$0xff] %v9082_v25  ;;  %v9098_v34 = vpop.f32.mrf.mxu2  ;;  %v6972_v25 = vpop.eup %6971  ;;  %v3059_v8 = vmul.f32 %v9096_v4, %v9054_v55  ;;  %vm3064_vm7 = vweird.f32 %v9096_v4  ;;  %vm9205_vm8 = vmor %vm3018_vm3, %vm3019_vm6 }
 0x2ed   : > { %v6974_v37 = vpop.eup %6973  ;;  %v9114_v15 = vadd.f32 1.0, %v6972_v25  ;;  %v3015_v42 = vsub.f32 1.0, %v3014_v31  ;;  %vm9226_vm10 = vmor %vm3063_vm5, %vm3064_vm7 }
 0x2ee   : > { %6975 = vpow2.f32 %v6707_v50  ;;  %v9118_v50 = vadd.f32 %v9025_v45, %v9023_v47  ;;  %v9123_v16 = vadd.f32 1.0, %v6974_v37  ;;  %v3060_v2 = vsub.f32 1.0, %v3059_v8  ;;  %v15253_v37 = vld [vmem:[#allocation38_spill] sm:$0xff] }
 0x2ef   : > { %6977 = vpow2.f32 %v6708_v54  ;;  %v3001_v54 = vmul.f32 %v9073_v58, %v3000_v9  ;;  %v3010_v45 = vor.u32 1.1754944e-38, %v3009_v51  ;;  %v3022_v51 = vand.u32 2147483647, %v9047_v52 }
 0x2f0   : > { %1622 = vmatmul.f32.gmra.mxu0 %v7485_v60  ;;  %1735 = vmatmul.f32.gmra.mxu1 %v7486_v30  ;;  %6979 = vrcp.f32 %v9094_v7  ;;  %15249 = vst [vmem:[#allocation30_spill] sm:$0xff] %v9118_v50  ;;  %v3061_v50 = vmul.f32 %v9096_v4, %v3060_v2  ;;  %v9167_v2 = vadd.f32 %v9030_v61, %v9028_v22  ;;  %v15258_v22 = vld [vmem:[#allocation40_spill] sm:$0xff]  ;;  %vm3123_vm15 = vweird.f32 %v9114_v15 }
 0x2f1   : > { %1848 = vmatmul.f32.gmra.mxu2 %v7485_v60  ;;  %1961 = vmatmul.f32.gmra.mxu3 %v7486_v30  ;;  %v9100_v60 = vpop.f32.mrf.mxu3  ;;  %v9105_v30 = vpop.f32.mrf.mxu0  ;;  %6981 = vpow2.f32 %v6711_v33  ;;  %v15252_v33 = vld [vmem:[#allocation37_spill] sm:$0xff]  ;;  %v6712_v61 = vmul.f32 -1.442695, %v15258_v22  ;;  %vm9209_vm9 = vcmp.eq.f32.partialorder %v3022_v51, 8.507059e+37  ;;  %vm3138_vm0 = vweird.f32 %v9123_v16 }
 0x2f2   : > { %v9107_v20 = vpop.f32.mrf.mxu1  ;;  %6983 = vrcp.f32 %v9114_v15  ;;  %v9142_v8 = vadd.f32 %v15253_v37, %v15252_v33  ;;  %15256 = vst [vmem:[#allocation31_spill] sm:$0xff] %v9167_v2  ;;  %v15265_v51 = vld [vmem:[#allocation41_spill] sm:$0xff]  ;;  %v9240_v39 = vadd.f32 %v9100_v60, %v9098_v34  ;;  %v3142_v14 = vand.u32 2147483647, %v9123_v16 }
 0x2f3   : > { %6985 = vrcp.f32 %v9123_v16  ;;  %v9329_v10 = vadd.f32 %v9107_v20, %v9105_v30 }
 0x2f4   : > { %v6976_v41 = vpop.eup %6975  ;;  %v9144_v57 = vpop.f32.mrf.mxu2  ;;  %v6715_v33 = vmul.f32 -1.442695, %v9142_v8  ;;  %15268 = vst [vmem:[#allocation34_spill] sm:$0xff] %v9240_v39  ;;  %v3129_v39 = vand.u32 2147483648, %v9114_v15  ;;  %vm9335_vm5 = vcmp.eq.f32.partialorder %v3142_v14, 8.507059e+37 }
 0x2f5   : > { %v6978_v25 = vpop.eup %6977  ;;  %v9138_v31 = vadd.f32 1.0, %v6976_v41  ;;  %15281 = vst [vmem:[#allocation37_spill] sm:$0xff] %v9329_v10 }
 0x2f6   : > { %v9131_v9 = vpop.eup %6979  ;;  %v9151_v26 = vadd.f32 1.0, %v6978_v25  ;;  %v525_v25 = vld [vmem:[%s8038_s26 + $0x338] sm:$0xff] }
 0x2f7   : > { %v6982_v41 = vpop.eup %6981  ;;  %v3074_v37 = vmul.f32 %v9131_v9, %v9094_v7  ;;  %2263 = vmatpush.msrb.mxu2 %v525_v25  ;;  %6987 = vrcp.f32 %v9138_v31  ;;  %vm3079_vm14 = vweird.f32 %v9131_v9  ;;  %vm3183_vm7 = vweird.f32 %v9138_v31 }
 0x2f8   : > { %1625 = vmatmul.f32.gmra.mxu0 %v7487_v24  ;;  %1738 = vmatmul.f32.gmra.mxu1 %v7488_v13  ;;  %v9185_v2 = vpop.eup %6983  ;;  %6989 = vrcp.f32 %v9151_v26  ;;  %v9195_v38 = vadd.f32 1.0, %v6982_v41 }
 0x2f9   : > { %1851 = vmatmul.f32.gmra.mxu2 %v7487_v24  ;;  %1964 = vmatmul.f32.gmra.mxu3 %v7488_v13  ;;  %v3002_v24 = vadd.f32 %v9073_v58, %v3001_v54  ;;  %v3016_v13 = vmul.f32 %v9085_v0, %v3015_v42  ;;  %v9146_v54 = vpop.f32.mrf.mxu3  ;;  %v3024_v42 = vand.u32 2147483648, %v9047_v52  ;;  %v9175_v48 = vpop.f32.mrf.mxu0  ;;  %v3075_v41 = vsub.f32 1.0, %v3074_v37  ;;  %v15266_v37 = vld [vmem:[#allocation42_spill] sm:$0xff] }
 0x2fa   : > { %v9177_v1 = vpop.f32.mrf.mxu1  ;;  %v3084_v52 = vand.u32 2147483648, %v9094_v7  ;;  %v3119_v47 = vmul.f32 %v9185_v2, %v9114_v15  ;;  %6991 = vpow2.f32 %v6712_v61  ;;  %v15269_v61 = vld [vmem:[#allocation45_spill] sm:$0xff]  ;;  %vm3124_vm2 = vweird.f32 %v9185_v2 }
 0x2fb   : > { %v3006_v44 = vsel %vm9158_vm4, %v9073_v58, %v3002_v24  ;;  %v3017_v40 = vadd.f32 %v9085_v0, %v3016_v13  ;;  %v7490_v58 = vld [vmem:[%s8030_s15 + $0xa8] sm:$0xff]  ;;  %v3062_v24 = vadd.f32 %v9096_v4, %v3061_v50  ;;  %v9197_v13 = vpop.eup %6985  ;;  %6993 = vpow2.f32 %v6715_v33  ;;  %vm9363_vm6 = vmor %vm3123_vm15, %vm3124_vm2 }
 0x2fc   : > { %v3011_v25 = vsel %vm9126_vm1, %v3010_v45, %v3006_v44  ;;  %v3134_v55 = vmul.f32 %v9197_v13, %v9123_v16  ;;  %6995 = vrcp.f32 %v9195_v38  ;;  %v6716_v33 = vmul.f32 -1.442695, %v15269_v61  ;;  %v9253_v60 = vpop.f32.mrf.mxu2  ;;  %vm9301_vm1 = vmor %vm3078_vm12, %vm3079_vm14 }
 0x2fd   : > { %v3021_v44 = vsel %vm9205_vm8, %v9085_v0, %v3017_v40  ;;  %v9232_v40 = vadd.f32 %v15266_v37, %v15265_v51  ;;  %v9236_v0 = vadd.f32 %v9064_v3, %v9062_v59  ;;  %v3066_v11 = vsel %vm9226_vm10, %v9096_v4, %v3062_v24  ;;  %v9250_v51 = vpop.eup %6987 }
 0x2fe   : > { %v3025_v59 = vor.u32 1.1754944e-38, %v3024_v42  ;;  %v3070_v3 = vor.u32 1.1754944e-38, %v3069_v62  ;;  %v3076_v34 = vmul.f32 %v9131_v9, %v3075_v41  ;;  %v9257_v24 = vpop.eup %6989  ;;  %v9260_v45 = vmul.f32 %v3011_v25, %v8999_v36  ;;  %v7492_v25 = vld [vmem:[%s8030_s15 + $0xb8] sm:$0xff] }
 0x2ff   : > { %15267 = vst [vmem:[#allocation33_spill] sm:$0xff] %v9236_v0  ;;  %v3085_v37 = vor.u32 1.1754944e-38, %v3084_v52  ;;  %v3120_v41 = vsub.f32 1.0, %v3119_v47  ;;  %v6719_v0 = vmul.f32 -1.442695, %v9232_v40  ;;  %v3179_v50 = vmul.f32 %v9250_v51, %v9138_v31 }
 0x300   : > { %1628 = vmatmul.f32.gmra.mxu0 %v7489_v19  ;;  %1741 = vmatmul.f32.gmra.mxu1 %v7490_v58  ;;  %15270 = vst [vmem:[#allocation35_spill] sm:$0xff] %v9260_v45  ;;  %v3026_v42 = vsel %vm9209_vm9, %v3025_v59, %v3021_v44  ;;  %v3071_v46 = vsel %vm3068_vm11, %v3070_v3, %v3066_v11  ;;  %v6992_v52 = vpop.eup %6991  ;;  %v3135_v45 = vsub.f32 1.0, %v3134_v55  ;;  %6997 = vpow2.f32 %v6716_v33 }
 0x301   : > { %1854 = vmatmul.f32.gmra.mxu2 %v7489_v19  ;;  %1967 = vmatmul.f32.gmra.mxu3 %v7490_v58  ;;  %v3082_v58 = vand.u32 2147483647, %v9094_v7  ;;  %v7491_v19 = vld [vmem:[%s8030_s15 + $0xb0] sm:$0xff]  ;;  %v9255_v4 = vpop.f32.mrf.mxu3  ;;  %v9271_v5 = vpop.f32.mrf.mxu0  ;;  %v3077_v47 = vadd.f32 %v9131_v9, %v3076_v34  ;;  %v3127_v59 = vand.u32 2147483647, %v9114_v15  ;;  %v3194_v55 = vmul.f32 %v9257_v24, %v9151_v26 }
 0x302   : > { %v9273_v36 = vpop.f32.mrf.mxu1  ;;  %v6994_v11 = vpop.eup %6993  ;;  %v9288_v33 = vmul.f32 %v3026_v42, %v15232_v12  ;;  %v9290_v3 = vor.u32 1.1754944e-38, %v3129_v39  ;;  %v3144_v34 = vand.u32 2147483648, %v9123_v16  ;;  %v3121_v32 = vmul.f32 %v9185_v2, %v3120_v41 }
 0x303   : > { %vm9266_vm13 = vcmp.eq.f32.partialorder %v3082_v58, 8.507059e+37  ;;  %v15273_v58 = vld [vmem:[#allocation48_spill] sm:$0xff]  ;;  %6999 = vpow2.f32 %v6719_v0  ;;  %v3136_v12 = vmul.f32 %v9197_v13, %v3135_v45  ;;  %v3180_v39 = vsub.f32 1.0, %v3179_v50  ;;  %v15279_v50 = vld [vmem:[#allocation46_spill] sm:$0xff] }
 0x304   : > { %v6720_v44 = vmul.f32 -1.442695, %v15273_v58  ;;  %v9306_v42 = vadd.f32 1.0, %v6992_v52  ;;  %v3081_v0 = vsel %vm9301_vm1, %v9131_v9, %v3077_v47  ;;  %v9314_v41 = vadd.f32 1.0, %v6994_v11  ;;  %v517_v9 = vld [vmem:[%s8038_s26 + $0x2f8] sm:$0xff] }
 0x305   : > { %vm9317_vm3 = vcmp.eq.f32.partialorder %v3127_v59, 8.507059e+37  ;;  %v9321_v52 = vor.u32 1.1754944e-38, %v3144_v34  ;;  %v645_v11 = vld [vmem:[%s8038_s26 + $0x6f8] sm:$0xff]  ;;  %v3122_v47 = vadd.f32 %v9185_v2, %v3121_v32  ;;  %vm3139_vm4 = vweird.f32 %v9197_v13  ;;  %2264 = vmatpush.msrb.mxu2 %v517_v9 }
 0x306   : > { %7001 = vpow2.f32 %v6720_v44  ;;  %v15280_v44 = vld [vmem:[#allocation47_spill] sm:$0xff]  ;;  %v3189_v34 = vand.u32 2147483648, %v9138_v31  ;;  %2377 = vmatpush.msrb.mxu3 %v645_v11  ;;  %v3086_v20 = vsel %vm9266_vm13, %v3085_v37, %v3081_v0  ;;  %v3137_v32 = vadd.f32 %v9197_v13, %v3136_v12  ;;  %vm9387_vm8 = vmor %vm3138_vm0, %vm3139_vm4 }
 0x307   : > { %v9325_v29 = vadd.f32 %v15280_v44, %v15279_v50  ;;  %v9341_v50 = vpop.f32.mrf.mxu2  ;;  %v3181_v14 = vmul.f32 %v9250_v51, %v3180_v39  ;;  %7003 = vrcp.f32 %v9306_v42  ;;  %v7494_v44 = vld [vmem:[%s8030_s15 + $0xc8] sm:$0xff]  ;;  %v9375_v0 = vadd.f32 %v9177_v1, %v9175_v48 }
 0x308   : > { %1631 = vmatmul.f32.gmra.mxu0 %v7491_v19  ;;  %1744 = vmatmul.f32.gmra.mxu1 %v7492_v25  ;;  %7005 = vrcp.f32 %v9314_v41  ;;  %v3126_v15 = vsel %vm9363_vm6, %v9185_v2, %v3122_v47  ;;  %vm3184_vm9 = vweird.f32 %v9250_v51  ;;  %v3141_v2 = vsel %vm9387_vm8, %v9197_v13, %v3137_v32  ;;  %v15292_v13 = vld [vmem:[#allocation53_spill] sm:$0xff] }
 0x309   : > { %1857 = vmatmul.f32.gmra.mxu2 %v7491_v19  ;;  %1970 = vmatmul.f32.gmra.mxu3 %v7492_v25  ;;  %v9285_v19 = vpop.eup %6995  ;;  %v9295_v25 = vmul.f32 %v3071_v46, %v9010_v35  ;;  %v7493_v35 = vld [vmem:[%s8030_s15 + $0xc0] sm:$0xff]  ;;  %v3195_v46 = vsub.f32 1.0, %v3194_v55  ;;  %v3187_v55 = vand.u32 2147483647, %v9138_v31  ;;  %v9343_v30 = vpop.f32.mrf.mxu3  ;;  %15287 = vst [vmem:[#allocation40_spill] sm:$0xff] %v9375_v0  ;;  %v3182_v16 = vadd.f32 %v9250_v51, %v3181_v14  ;;  %vm9441_vm13 = vmor %vm3183_vm7, %vm3184_vm9 }
 0x30a   : > { %v3239_v7 = vmul.f32 %v9285_v19, %v9195_v38  ;;  %v9355_v62 = vpop.f32.mrf.mxu0  ;;  %v9357_v37 = vpop.f32.mrf.mxu1  ;;  %vm3199_vm11 = vweird.f32 %v9257_v24  ;;  %v6724_v32 = vmul.f32 -1.442695, %v15292_v13  ;;  %v9420_v14 = vadd.f32 %v9273_v36, %v9271_v5 }
 0x30b   : > { %15274 = vst [vmem:[#allocation36_spill] sm:$0xff] %v9295_v25  ;;  %v6998_v25 = vpop.eup %6997  ;;  %v3196_v9 = vmul.f32 %v9257_v24, %v3195_v46  ;;  %v9378_v46 = vmul.f32 %v3086_v20, %v15237_v63  ;;  %vm9392_vm10 = vcmp.eq.f32.partialorder %v3187_v55, 8.507059e+37  ;;  %v3190_v63 = vor.u32 1.1754944e-38, %v3189_v34  ;;  %v7495_v20 = vld [vmem:[%s8030_s15 + $0xd0] sm:$0xff] }
 0x30c   : > { %v7000_v10 = vpop.eup %6999  ;;  %v3240_v11 = vsub.f32 1.0, %v3239_v7  ;;  %v9353_v6 = vadd.f32 1.0, %v6998_v25  ;;  %v6723_v25 = vmul.f32 -1.442695, %v9325_v29  ;;  %15294 = vst [vmem:[#allocation42_spill] sm:$0xff] %v9420_v14  ;;  %vm3198_vm12 = vweird.f32 %v9151_v26 }
 0x30d   : > { %v7002_v12 = vpop.eup %7001  ;;  %v9403_v48 = vadd.f32 1.0, %v7000_v10  ;;  %v3197_v47 = vadd.f32 %v9257_v24, %v3196_v9  ;;  %v9416_v10 = vadd.f32 %v9255_v4, %v9253_v60  ;;  %v3204_v39 = vand.u32 2147483648, %v9151_v26  ;;  %vm9454_vm14 = vmor %vm3198_vm12, %vm3199_vm11 }
 0x30e   : > { %v3241_v55 = vmul.f32 %v9285_v19, %v3240_v11  ;;  %7007 = vrcp.f32 %v9353_v6  ;;  %v9408_v34 = vadd.f32 1.0, %v7002_v12  ;;  %v3131_v11 = vsel %vm9317_vm3, %v9290_v3, %v3126_v15  ;;  %v7496_v3 = vld [vmem:[%s8030_s15 + $0xd8] sm:$0xff] }
 0x30f   : > { %7009 = vpow2.f32 %v6723_v25  ;;  %15293 = vst [vmem:[#allocation41_spill] sm:$0xff] %v9416_v10  ;;  %v3202_v12 = vand.u32 2147483647, %v9151_v26  ;;  %v9430_v25 = vpop.f32.mrf.mxu2  ;;  %v3146_v5 = vsel %vm9335_vm5, %v9321_v52, %v3141_v2  ;;  %v3247_v36 = vand.u32 2147483647, %v9195_v38 }
 0x310   : > { %1634 = vmatmul.f32.gmra.mxu0 %v7493_v35  ;;  %1747 = vmatmul.f32.gmra.mxu1 %v7494_v44  ;;  %v3249_v26 = vand.u32 2147483648, %v9195_v38  ;;  %7011 = vrcp.f32 %v9403_v48  ;;  %v3186_v45 = vsel %vm9441_vm13, %v9250_v51, %v3182_v16  ;;  %v3242_v52 = vadd.f32 %v9285_v19, %v3241_v55  ;;  %v15300_v55 = vld [vmem:[#allocation54_spill] sm:$0xff] }
 0x311   : > { %1860 = vmatmul.f32.gmra.mxu2 %v7493_v35  ;;  %1973 = vmatmul.f32.gmra.mxu3 %v7494_v44  ;;  %v9371_v35 = vadd.f32 %v9146_v54, %v9144_v57  ;;  %v516_v57 = vld [vmem:[%s8038_s26 + $0x2f0] sm:$0xff]  ;;  %v9411_v44 = vpop.eup %7003  ;;  %v9432_v60 = vpop.f32.mrf.mxu3  ;;  %vm3244_vm15 = vweird.f32 %v9285_v19  ;;  %7013 = vrcp.f32 %v9408_v34  ;;  %v3201_v51 = vsel %vm9454_vm14, %v9257_v24, %v3197_v47 }
 0x312   : > { %v644_v54 = vld [vmem:[%s8038_s26 + $0x6f0] sm:$0xff]  ;;  %2038 = vmatpush.msrb.mxu0 %v516_v57  ;;  %v9422_v9 = vpop.eup %7005  ;;  %v9461_v59 = vpop.f32.mrf.mxu0  ;;  %v3254_v7 = vmul.f32 %v9411_v44, %v9306_v42  ;;  %7015 = vpow2.f32 %v6724_v32  ;;  %v9475_v2 = vmul.f32 %v3131_v11, %v9043_v49  ;;  %v3205_v16 = vor.u32 1.1754944e-38, %v3204_v39 }
 0x313   : > { %15286 = vst [vmem:[#allocation38_spill] sm:$0xff] %v9371_v35  ;;  %2151 = vmatpush.msrb.mxu1 %v644_v54  ;;  %v9463_v15 = vpop.f32.mrf.mxu1  ;;  %v3299_v57 = vmul.f32 %v9422_v9, %v9314_v41  ;;  %vm3243_vm0 = vweird.f32 %v9195_v38  ;;  %v9480_v24 = vmul.f32 %v3146_v5, %v15242_v23  ;;  %v3191_v47 = vsel %vm9392_vm10, %v3190_v63, %v3186_v45  ;;  %v7497_v63 = vld [vmem:[%s8030_s15 + $0xe0] sm:$0xff]  ;;  %v15306_v45 = vld [vmem:[#allocation57_spill] sm:$0xff] }
 0x314   : > { %v9472_v54 = vpop.eup %7007  ;;  %15299 = vst [vmem:[#allocation45_spill] sm:$0xff] %v9475_v2  ;;  %vm3203_vm1 = vcmp.eq.f32.partialorder %v3202_v12, 8.507059e+37  ;;  %vm9486_vm2 = vmor %vm3243_vm0, %vm3244_vm15  ;;  %v3264_v49 = vand.u32 2147483648, %v9306_v42  ;;  %vm9494_vm3 = vcmp.eq.f32.partialorder %v3247_v36, 8.507059e+37  ;;  %v3250_v1 = vor.u32 1.1754944e-38, %v3249_v26 }
 0x315   : > { %v7010_v4 = vpop.eup %7009  ;;  %15301 = vst [vmem:[#allocation48_spill] sm:$0xff] %v9480_v24  ;;  %v3206_v11 = vsel %vm3203_vm1, %v3205_v16, %v3201_v51  ;;  %v3246_v38 = vsel %vm9486_vm2, %v9285_v19, %v3242_v52  ;;  %v3255_v39 = vsub.f32 1.0, %v3254_v7  ;;  %v3300_v5 = vsub.f32 1.0, %v3299_v57 }
 0x316   : > { %v9499_v12 = vpop.eup %7011  ;;  %v6728_v31 = vmul.f32 -1.442695, %v15306_v45  ;;  %v9507_v19 = vmul.f32 %v3191_v47, %v9069_v27  ;;  %v3262_v36 = vand.u32 2147483647, %v9306_v42  ;;  %v9510_v26 = vadd.f32 1.0, %v7010_v4  ;;  %v7498_v47 = vld [vmem:[%s8030_s15 + $0xe8] sm:$0xff] }
 0x317   : > { %v9504_v51 = vpop.eup %7013  ;;  %v9512_v52 = vpop.f32.mrf.mxu2  ;;  %vm3258_vm4 = vweird.f32 %v9306_v42  ;;  %v9517_v16 = vor.u32 1.1754944e-38, %v3264_v49  ;;  %v3307_v32 = vand.u32 2147483647, %v9314_v41  ;;  %v3309_v14 = vand.u32 2147483648, %v9314_v41 }
 0x318   : > { %1637 = vmatmul.f32.gmra.mxu0 %v7495_v20  ;;  %1750 = vmatmul.f32.gmra.mxu1 %v7496_v3  ;;  %15307 = vst [vmem:[#allocation46_spill] sm:$0xff] %v9507_v19  ;;  %v7016_v57 = vpop.eup %7015  ;;  %v3324_v27 = vand.u32 2147483648, %v9353_v6  ;;  %v3251_v4 = vsel %vm9494_vm3, %v3250_v1, %v3246_v38  ;;  %vm3303_vm5 = vweird.f32 %v9314_v41  ;;  %v3322_v49 = vand.u32 2147483647, %v9353_v6  ;;  %v15309_v1 = vld [vmem:[#allocation58_spill] sm:$0xff]  ;;  %v15310_v19 = vld [vmem:[#allocation59_spill] sm:$0xff] }
 0x319   : > { %1863 = vmatmul.f32.gmra.mxu2 %v7495_v20  ;;  %1976 = vmatmul.f32.gmra.mxu3 %v7496_v3  ;;  %v6727_v20 = vmul.f32 -1.442695, %v15300_v55  ;;  %v3314_v3 = vmul.f32 %v9472_v54, %v9353_v6  ;;  %v9514_v7 = vpop.f32.mrf.mxu3  ;;  %v3359_v10 = vmul.f32 %v9499_v12, %v9403_v48  ;;  %v3374_v38 = vmul.f32 %v9504_v51, %v9408_v34 }
 0x31a   : > { %v9532_v0 = vpop.f32.mrf.mxu0  ;;  %v9541_v23 = vadd.f32 1.0, %v7016_v57  ;;  %v9545_v2 = vadd.f32 %v15310_v19, %v15309_v1  ;;  %vm3259_vm6 = vweird.f32 %v9411_v44  ;;  %vm3318_vm7 = vweird.f32 %v9353_v6  ;;  %v15317_v1 = vld [vmem:[#allocation61_spill] sm:$0xff] }
 0x31b   : > { %7017 = vpow2.f32 %v6727_v20  ;;  %v9524_v20 = vmul.f32 %v3206_v11, %v15246_v56  ;;  %v9534_v35 = vpop.f32.mrf.mxu1  ;;  %v3301_v56 = vmul.f32 %v9422_v9, %v3300_v5  ;;  %v3315_v11 = vsub.f32 1.0, %v3314_v3  ;;  %v15311_v5 = vld [vmem:[#allocation60_spill] sm:$0xff]  ;;  %vm9598_vm11 = vmor %vm3258_vm4, %vm3259_vm6 }
 0x31c   : > { %7019 = vpow2.f32 %v6728_v31  ;;  %v6731_v3 = vmul.f32 -1.442695, %v15311_v5  ;;  %v9555_v18 = vmul.f32 %v3251_v4, %v9090_v21  ;;  %vm9557_vm8 = vcmp.eq.f32.partialorder %v3262_v36, 8.507059e+37 }
 0x31d   : > { %15308 = vst [vmem:[#allocation47_spill] sm:$0xff] %v9524_v20  ;;  %7021 = vrcp.f32 %v9510_v26  ;;  %vm3304_vm9 = vweird.f32 %v9422_v9  ;;  %vm9562_vm10 = vcmp.eq.f32.partialorder %v3307_v32, 8.507059e+37  ;;  %v3302_v21 = vadd.f32 %v9422_v9, %v3301_v56 }
 0x31e   : > { %15312 = vst [vmem:[#allocation53_spill] sm:$0xff] %v9555_v18  ;;  %v3316_v36 = vmul.f32 %v9472_v54, %v3315_v11  ;;  %v9573_v32 = vadd.f32 %v9343_v30, %v9341_v50  ;;  %v3375_v4 = vsub.f32 1.0, %v3374_v38  ;;  %7023 = vrcp.f32 %v9541_v23  ;;  %v509_v30 = vld [vmem:[%s8038_s26 + $0x2b8] sm:$0xff]  ;;  %vm9616_vm14 = vmor %vm3303_vm5, %vm3304_vm9 }
 0x31f   : > { %v9579_v18 = vadd.f32 %v9357_v37, %v9355_v62  ;;  %v3367_v11 = vand.u32 2147483647, %v9403_v48  ;;  %v3369_v20 = vand.u32 2147483648, %v9403_v48  ;;  %7025 = vpow2.f32 %v6731_v3  ;;  %v637_v38 = vld [vmem:[%s8038_s26 + $0x6b8] sm:$0xff]  ;;  %2265 = vmatpush.msrb.mxu2 %v509_v30  ;;  %v15326_v30 = vld [vmem:[#allocation64_spill] sm:$0xff] }
 0x320   : > { %1640 = vmatmul.f32.gmra.mxu0 %v7497_v63  ;;  %1753 = vmatmul.f32.gmra.mxu1 %v7498_v47  ;;  %15318 = vst [vmem:[#allocation54_spill] sm:$0xff] %v9573_v32  ;;  %v7500_v32 = vld [vmem:[%s8030_s15 + $0xf8] sm:$0xff]  ;;  %vm3319_vm12 = vweird.f32 %v9472_v54  ;;  %vm3363_vm13 = vweird.f32 %v9403_v48  ;;  %vm9623_vm15 = vcmp.eq.f32.partialorder %v3322_v49, 8.507059e+37  ;;  %vm3378_vm0 = vweird.f32 %v9408_v34  ;;  %v636_v49 = vld [vmem:[%s8038_s26 + $0x6b0] sm:$0xff] }
 0x321   : > { %1866 = vmatmul.f32.gmra.mxu2 %v7497_v63  ;;  %1979 = vmatmul.f32.gmra.mxu3 %v7498_v47  ;;  %v3256_v63 = vmul.f32 %v9411_v44, %v3255_v39  ;;  %v9548_v47 = vor.u32 1.1754944e-38, %v3309_v14  ;;  %v9551_v39 = vor.u32 1.1754944e-38, %v3324_v27  ;;  %v7018_v31 = vpop.eup %7017  ;;  %v3360_v14 = vsub.f32 1.0, %v3359_v10  ;;  %15319 = vst [vmem:[#allocation57_spill] sm:$0xff] %v9579_v18  ;;  %v9583_v43 = vpop.f32.mrf.mxu3  ;;  %vm9650_vm2 = vmor %vm3318_vm7, %vm3319_vm12 }
 0x322   : > { %v6732_v27 = vmul.f32 -1.442695, %v15317_v1  ;;  %v6735_v10 = vmul.f32 -1.442695, %v9545_v2  ;;  %v7020_v56 = vpop.eup %7019  ;;  %v9587_v50 = vadd.f32 1.0, %v7018_v31  ;;  %2378 = vmatpush.msrb.mxu3 %v637_v38  ;;  %v3376_v41 = vmul.f32 %v9504_v51, %v3375_v4  ;;  %2152 = vmatpush.msrb.mxu1 %v636_v49 }
 0x323   : > { %v3257_v53 = vadd.f32 %v9411_v44, %v3256_v63  ;;  %v9581_v63 = vpop.f32.mrf.mxu2  ;;  %v9592_v24 = vpop.eup %7021  ;;  %v3361_v37 = vmul.f32 %v9499_v12, %v3360_v14  ;;  %v9621_v14 = vadd.f32 %v9472_v54, %v3316_v36  ;;  %v6736_v38 = vmul.f32 -1.442695, %v15326_v30  ;;  %v508_v36 = vld [vmem:[%s8038_s26 + $0x2b0] sm:$0xff] }
 0x324   : > { %7027 = vpow2.f32 %v6732_v27  ;;  %v9607_v3 = vpop.f32.mrf.mxu1  ;;  %vm9637_vm1 = vcmp.eq.f32.partialorder %v3367_v11, 8.507059e+37  ;;  %v3370_v18 = vor.u32 1.1754944e-38, %v3369_v20  ;;  %2039 = vmatpush.msrb.mxu0 %v508_v36  ;;  %vm3364_vm3 = vweird.f32 %v9499_v12 }
 0x325   : > { %v3261_v42 = vsel %vm9598_vm11, %v9411_v44, %v3257_v53  ;;  %v3306_v53 = vsel %vm9616_vm14, %v9422_v9, %v3302_v21  ;;  %v9633_v44 = vadd.f32 1.0, %v7020_v56  ;;  %7029 = vpow2.f32 %v6735_v10  ;;  %v9644_v9 = vpop.eup %7023  ;;  %v7501_v56 = vld [vmem:[%s8030_s15 + $0x100] sm:$0xff]  ;;  %vm9682_vm5 = vmor %vm3363_vm13, %vm3364_vm3 }
 0x326   : > { %7031 = vrcp.f32 %v9587_v50  ;;  %v3362_v4 = vadd.f32 %v9499_v12, %v3361_v37  ;;  %v3382_v20 = vand.u32 2147483647, %v9408_v34  ;;  %v3384_v10 = vand.u32 2147483648, %v9408_v34  ;;  %v7026_v11 = vpop.eup %7025 }
 0x327   : > { %v3266_v31 = vsel %vm9557_vm8, %v9517_v16, %v3261_v42  ;;  %v3311_v6 = vsel %vm9562_vm10, %v9548_v47, %v3306_v53  ;;  %v3321_v37 = vsel %vm9650_vm2, %v9472_v54, %v9621_v14  ;;  %7033 = vpow2.f32 %v6736_v38  ;;  %v7502_v14 = vld [vmem:[%s8030_s15 + $0x108] sm:$0xff] }
 0x328   : > { %1643 = vmatmul.f32.gmra.mxu0 %v7499_v17  ;;  %1756 = vmatmul.f32.gmra.mxu1 %v7500_v32  ;;  %v9670_v49 = vadd.f32 %v9504_v51, %v3376_v41  ;;  %vm3379_vm4 = vweird.f32 %v9504_v51  ;;  %7035 = vrcp.f32 %v9633_v44  ;;  %v9676_v16 = vadd.f32 %v9432_v60, %v9430_v25 }
 0x329   : > { %1869 = vmatmul.f32.gmra.mxu2 %v7499_v17  ;;  %v9605_v17 = vpop.f32.mrf.mxu0  ;;  %1982 = vmatmul.f32.gmra.mxu3 %v7500_v32  ;;  %v3419_v32 = vmul.f32 %v9592_v24, %v9510_v26  ;;  %v1576_v57 = vpop.f32.mrf.mxu3  ;;  %v9688_v42 = vadd.f32 %v9463_v15, %v9461_v59  ;;  %v9692_v25 = vadd.f32 %v9514_v7, %v9512_v52  ;;  %vm9702_vm6 = vcmp.eq.f32.partialorder %v3382_v20, 8.507059e+37  ;;  %v501_v52 = vld [vmem:[%s8038_s26 + $0x278] sm:$0xff]  ;;  %vm9729_vm7 = vmor %vm3378_vm0, %vm3379_vm4 }
 0x32a   : > { %v7028_v36 = vpop.eup %7027  ;;  %15331 = vst [vmem:[#allocation58_spill] sm:$0xff] %v9676_v16  ;;  %v9696_v60 = vadd.f32 %v9534_v35, %v9532_v0  ;;  %v3366_v38 = vsel %vm9682_vm5, %v9499_v12, %v3362_v4  ;;  %v3434_v59 = vmul.f32 %v9644_v9, %v9541_v23  ;;  %v9708_v15 = vadd.f32 1.0, %v7026_v11  ;;  %v629_v7 = vld [vmem:[%s8038_s26 + $0x678] sm:$0xff]  ;;  %2266 = vmatpush.msrb.mxu2 %v501_v52 }
 0x32b   : > { %v1463_v47 = vpop.f32.mrf.mxu2  ;;  %v3420_v19 = vsub.f32 1.0, %v3419_v32  ;;  %15334 = vst [vmem:[#allocation59_spill] sm:$0xff] %v9688_v42  ;;  %v7030_v48 = vpop.eup %7029  ;;  %v9715_v32 = vmul.f32 %v3266_v31, %v15258_v22  ;;  %v9718_v12 = vmul.f32 %v3311_v6, %v9142_v8  ;;  %v3385_v21 = vor.u32 1.1754944e-38, %v3384_v10  ;;  %2379 = vmatpush.msrb.mxu3 %v629_v7 }
 0x32c   : > { %15335 = vst [vmem:[#allocation60_spill] sm:$0xff] %v9692_v25  ;;  %v1353_v0 = vpop.f32.mrf.mxu1  ;;  %v9712_v41 = vpop.eup %7031  ;;  %v9720_v4 = vadd.f32 1.0, %v7028_v36  ;;  %v3326_v20 = vsel %vm9623_vm15, %v9551_v39, %v3321_v37  ;;  %v3427_v8 = vand.u32 2147483647, %v9510_v26  ;;  %v3429_v10 = vand.u32 2147483648, %v9510_v26  ;;  %v500_v37 = vld [vmem:[%s8038_s26 + $0x270] sm:$0xff] }
 0x32d   : > { %15336 = vst [vmem:[#allocation61_spill] sm:$0xff] %v9696_v60  ;;  %v7034_v31 = vpop.eup %7033  ;;  %v3371_v27 = vsel %vm9637_vm1, %v3370_v18, %v3366_v38  ;;  %v3381_v34 = vsel %vm9729_vm7, %v9504_v51, %v9670_v49  ;;  %v3421_v39 = vmul.f32 %v9592_v24, %v3420_v19  ;;  %v9743_v6 = vadd.f32 1.0, %v7030_v48  ;;  %v628_v36 = vld [vmem:[%s8038_s26 + $0x670] sm:$0xff]  ;;  %2040 = vmatpush.msrb.mxu0 %v500_v37 }
 0x32e   : > { %15339 = vst [vmem:[#allocation64_spill] sm:$0xff] %v9718_v12  ;;  %v9747_v54 = vpop.eup %7035  ;;  %v3435_v52 = vsub.f32 1.0, %v3434_v59  ;;  %7037 = vrcp.f32 %v9708_v15  ;;  %2153 = vmatpush.msrb.mxu1 %v628_v36  ;;  %v9754_v18 = vadd.f32 %v9583_v43, %v9581_v63  ;;  %v9759_v51 = vadd.f32 %v9607_v3, %v9605_v17  ;;  %v7503_v19 = vld [vmem:[%s8030_s15 + $0x110] sm:$0xff] }
 0x32f   : > { %7039 = vrcp.f32 %v9720_v4  ;;  %v9761_v62 = vadd.f32 %v1576_v57, %v1463_v47  ;;  %v9767_v48 = vmul.f32 %v3326_v20, %v15269_v61  ;;  %vm3423_vm8 = vweird.f32 %v9510_v26  ;;  %v7504_v61 = vld [vmem:[%s8030_s15 + $0x118] sm:$0xff] }
 0x330   : > { %1646 = vmatmul.f32.gmra.mxu0 %v7501_v56  ;;  %1759 = vmatmul.f32.gmra.mxu1 %v7502_v14  ;;  %15344 = vst [vmem:[#allocation135_spill] sm:$0xff] %v9759_v51  ;;  %v9770_v43 = vadd.f32 1.0, %v7034_v31  ;;  %v3386_v17 = vsel %vm9702_vm6, %v3385_v21, %v3381_v34  ;;  %v3442_v3 = vand.u32 2147483647, %v9541_v23  ;;  %v3494_v47 = vmul.f32 %v9747_v54, %v9633_v44 }
 0x331   : > { %v1240_v35 = vpop.f32.mrf.mxu0  ;;  %1872 = vmatmul.f32.gmra.mxu2 %v7501_v56  ;;  %v15342_v56 = vld [vmem:[#allocation67_spill] sm:$0xff]  ;;  %1985 = vmatmul.f32.gmra.mxu3 %v7502_v14  ;;  %v3479_v14 = vmul.f32 %v9712_v41, %v9587_v50  ;;  %15345 = vst [vmem:[#allocation136_spill] sm:$0xff] %v9761_v62  ;;  %v9774_v38 = vpop.f32.mrf.mxu3  ;;  %v9784_v57 = vmul.f32 %v3371_v27, %v9232_v40  ;;  %vm9786_vm9 = vcmp.eq.f32.partialorder %v3427_v8, 8.507059e+37  ;;  %v3444_v53 = vand.u32 2147483648, %v9541_v23 }
 0x332   : > { %v6739_v11 = vmul.f32 -1.442695, %v15342_v56  ;;  %15343 = vst [vmem:[#allocation67_spill] sm:$0xff] %v9754_v18  ;;  %v9763_v49 = vadd.f32 %v1353_v0, %v1240_v35  ;;  %v3436_v7 = vmul.f32 %v9644_v9, %v3435_v52  ;;  %v3422_v21 = vadd.f32 %v9592_v24, %v3421_v39  ;;  %v7506_v18 = vld [vmem:[%s8030_s15 + $0x128] sm:$0xff] }
 0x333   : > { %v9772_v63 = vpop.f32.mrf.mxu2  ;;  %15347 = vst [vmem:[#allocation138_spill] sm:$0xff] %v9784_v57  ;;  %vm3424_vm10 = vweird.f32 %v9592_v24  ;;  %v3430_v20 = vor.u32 1.1754944e-38, %v3429_v10  ;;  %v3480_v40 = vsub.f32 1.0, %v3479_v14  ;;  %v9801_v8 = vmul.f32 %v3386_v17, %v15273_v58 }
 0x334   : > { %15346 = vst [vmem:[#allocation137_spill] sm:$0xff] %v9763_v49  ;;  %7041 = vpow2.f32 %v6739_v11  ;;  %v9794_v0 = vpop.f32.mrf.mxu1  ;;  %v9798_v22 = vpop.eup %7037  ;;  %vm3438_vm11 = vweird.f32 %v9541_v23  ;;  %v15350_v11 = vld [vmem:[#allocation72_spill] sm:$0xff]  ;;  %vm9808_vm12 = vcmp.eq.f32.partialorder %v3442_v3, 8.507059e+37  ;;  %v3487_v10 = vand.u32 2147483647, %v9587_v50  ;;  %vm9818_vm13 = vmor %vm3423_vm8, %vm3424_vm10 }
 0x335   : > { %7043 = vrcp.f32 %v9743_v6  ;;  %v6740_v31 = vmul.f32 -1.442695, %v15350_v11  ;;  %v9806_v27 = vpop.eup %7039  ;;  %v3489_v39 = vand.u32 2147483648, %v9587_v50  ;;  %v3495_v58 = vsub.f32 1.0, %v3494_v47 }
 0x336   : > { %7045 = vrcp.f32 %v9770_v43  ;;  %v3437_v52 = vadd.f32 %v9644_v9, %v3436_v7  ;;  %vm3439_vm14 = vweird.f32 %v9644_v9  ;;  %v3445_v14 = vor.u32 1.1754944e-38, %v3444_v53 }
 0x337   : > { %vm3483_vm15 = vweird.f32 %v9587_v50  ;;  %v3426_v17 = vsel %vm9818_vm13, %v9592_v24, %v3422_v21  ;;  %v3481_v3 = vmul.f32 %v9712_v41, %v3480_v40  ;;  %v3502_v26 = vand.u32 2147483647, %v9633_v44  ;;  %vm9847_vm0 = vmor %vm3438_vm11, %vm3439_vm14  ;;  %v15384_v21 = vld [vmem:[#allocation75_spill] sm:$0xff] }
 0x338   : > { %1649 = vmatmul.f32.gmra.mxu0 %v7503_v19  ;;  %1762 = vmatmul.f32.gmra.mxu1 %v7504_v61  ;;  %v3504_v47 = vand.u32 2147483648, %v9633_v44  ;;  %v3539_v7 = vmul.f32 %v9798_v22, %v9708_v15  ;;  %v3554_v53 = vmul.f32 %v9806_v27, %v9720_v4  ;;  %7047 = vpow2.f32 %v6740_v31 }
 0x339   : > { %v9792_v35 = vpop.f32.mrf.mxu0  ;;  %1875 = vmatmul.f32.gmra.mxu2 %v7503_v19  ;;  %1988 = vmatmul.f32.gmra.mxu3 %v7504_v61  ;;  %v7505_v61 = vld [vmem:[%s8030_s15 + $0x120] sm:$0xff]  ;;  %v6743_v49 = vmul.f32 -1.442695, %v8605_v28  ;;  %v9841_v24 = vpop.f32.mrf.mxu3  ;;  %vm9851_vm1 = vcmp.eq.f32.partialorder %v3487_v10, 8.507059e+37  ;;  %v3490_v62 = vor.u32 1.1754944e-38, %v3489_v39  ;;  %v3496_v31 = vmul.f32 %v9747_v54, %v3495_v58 }
 0x33a   : > { %v7042_v37 = vpop.eup %7041  ;;  %vm3498_vm2 = vweird.f32 %v9633_v44  ;;  %v3441_v23 = vsel %vm9847_vm0, %v9644_v9, %v3437_v52  ;;  %vm3484_vm3 = vweird.f32 %v9712_v41  ;;  %v3549_v10 = vand.u32 2147483648, %v9708_v15 }
 0x33b   : > { %v9825_v19 = vpop.eup %7043  ;;  %v9839_v36 = vpop.f32.mrf.mxu2  ;;  %v9857_v51 = vadd.f32 1.0, %v7042_v37  ;;  %v3431_v37 = vsel %vm9786_vm9, %v3430_v20, %v3426_v17  ;;  %v3482_v42 = vadd.f32 %v9712_v41, %v3481_v3  ;;  %vm9876_vm4 = vcmp.eq.f32.partialorder %v3502_v26, 8.507059e+37  ;;  %vm9896_vm7 = vmor %vm3483_vm15, %vm3484_vm3 }
 0x33c   : > { %v9860_v60 = vpop.eup %7045  ;;  %v3599_v39 = vmul.f32 %v9825_v19, %v9743_v6  ;;  %v9871_v25 = vpop.f32.mrf.mxu1  ;;  %v3505_v9 = vor.u32 1.1754944e-38, %v3504_v47  ;;  %v3547_v52 = vand.u32 2147483647, %v9708_v15  ;;  %vm3499_vm5 = vweird.f32 %v9747_v54 }
 0x33d   : > { %v3540_v16 = vsub.f32 1.0, %v3539_v7  ;;  %v3555_v57 = vsub.f32 1.0, %v3554_v53  ;;  %7049 = vpow2.f32 %v6743_v49  ;;  %v3446_v59 = vsel %vm9808_vm12, %v3445_v14, %v3441_v23  ;;  %v15364_v14 = vld [vmem:[#allocation73_spill] sm:$0xff]  ;;  %vm9917_vm9 = vmor %vm3498_vm2, %vm3499_vm5  ;;  %v15367_v23 = vld [vmem:[#allocation74_spill] sm:$0xff] }
 0x33e   : > { %v3497_v20 = vadd.f32 %v9747_v54, %v3496_v31  ;;  %vm3543_vm6 = vweird.f32 %v9708_v15  ;;  %v3614_v17 = vmul.f32 %v9860_v60, %v9770_v43  ;;  %7051 = vrcp.f32 %v9857_v51  ;;  %v7048_v3 = vpop.eup %7047  ;;  %v7507_v7 = vld [vmem:[%s8030_s15 + $0x130] sm:$0xff] }
 0x33f   : > { %v9890_v26 = vmul.f32 %v3431_v37, %v9325_v29  ;;  %v9900_v49 = vor.u32 1.1754944e-38, %v3549_v10  ;;  %v3600_v34 = vsub.f32 1.0, %v3599_v39  ;;  %v6744_v47 = vmul.f32 -1.442695, %v15364_v14 }
 0x340   : > { %1652 = vmatmul.f32.gmra.mxu0 %v7505_v61  ;;  %1765 = vmatmul.f32.gmra.mxu1 %v7506_v18  ;;  %vm3558_vm8 = vweird.f32 %v9720_v4  ;;  %v3562_v29 = vand.u32 2147483647, %v9720_v4  ;;  %v3564_v50 = vand.u32 2147483648, %v9720_v4  ;;  %v9911_v53 = vmul.f32 %v3446_v59, %v15292_v13 }
 0x341   : > { %v9869_v58 = vpop.f32.mrf.mxu0  ;;  %1878 = vmatmul.f32.gmra.mxu2 %v7505_v61  ;;  %1991 = vmatmul.f32.gmra.mxu3 %v7506_v18  ;;  %15361 = vst [vmem:[#allocation72_spill] sm:$0xff] %v9890_v26  ;;  %v3486_v61 = vsel %vm9896_vm7, %v9712_v41, %v3482_v42  ;;  %v3541_v41 = vmul.f32 %v9798_v22, %v3540_v16  ;;  %v6747_v10 = vmul.f32 -1.442695, %v15367_v23  ;;  %v9926_v37 = vpop.f32.mrf.mxu3  ;;  %vm3544_vm10 = vweird.f32 %v9798_v22  ;;  %v493_v18 = vld [vmem:[%s8038_s26 + $0x238] sm:$0xff] }
 0x342   : > { %v3556_v31 = vmul.f32 %v9806_v27, %v3555_v57  ;;  %v3501_v13 = vsel %vm9917_vm9, %v9747_v54, %v3497_v20  ;;  %v3615_v44 = vsub.f32 1.0, %v3614_v17  ;;  %v9932_v59 = vadd.f32 1.0, %v7048_v3  ;;  %v621_v26 = vld [vmem:[%s8038_s26 + $0x638] sm:$0xff]  ;;  %2267 = vmatpush.msrb.mxu2 %v493_v18  ;;  %vm9973_vm15 = vmor %vm3543_vm6, %vm3544_vm10 }
 0x343   : > { %v9924_v39 = vpop.f32.mrf.mxu2  ;;  %v7508_v16 = vld [vmem:[%s8030_s15 + $0x138] sm:$0xff]  ;;  %v7050_v57 = vpop.eup %7049  ;;  %v3491_v12 = vsel %vm9851_vm1, %v3490_v62, %v3486_v61  ;;  %vm9939_vm11 = vcmp.eq.f32.partialorder %v3547_v52, 8.507059e+37  ;;  %v3601_v42 = vmul.f32 %v9825_v19, %v3600_v34  ;;  %v3607_v54 = vand.u32 2147483647, %v9743_v6  ;;  %2380 = vmatpush.msrb.mxu3 %v621_v26 }
 0x344   : > { %7053 = vpow2.f32 %v6744_v47  ;;  %v9947_v17 = vpop.f32.mrf.mxu1  ;;  %v9949_v3 = vpop.eup %7051  ;;  %vm3559_vm12 = vweird.f32 %v9806_v27  ;;  %vm9952_vm13 = vcmp.eq.f32.partialorder %v3562_v29, 8.507059e+37  ;;  %v3565_v40 = vor.u32 1.1754944e-38, %v3564_v50 }
 0x345   : > { %vm3603_vm14 = vweird.f32 %v9743_v6  ;;  %v3609_v52 = vand.u32 2147483648, %v9743_v6  ;;  %v3506_v26 = vsel %vm9876_vm4, %v3505_v9, %v3501_v13  ;;  %v3542_v34 = vadd.f32 %v9798_v22, %v3541_v41  ;;  %v620_v41 = vld [vmem:[%s8038_s26 + $0x630] sm:$0xff]  ;;  %vm9994_vm2 = vmor %vm3558_vm8, %vm3559_vm12 }
 0x346   : > { %v3557_v47 = vadd.f32 %v9806_v27, %v3556_v31  ;;  %7055 = vpow2.f32 %v6747_v10  ;;  %v9963_v61 = vmul.f32 %v3491_v12, %v15300_v55  ;;  %v3616_v29 = vmul.f32 %v9860_v60, %v3615_v44  ;;  %v15379_v44 = vld [vmem:[#allocation77_spill] sm:$0xff]  ;;  %2154 = vmatpush.msrb.mxu1 %v620_v41  ;;  %v7510_v31 = vld [vmem:[%s8030_s15 + $0x148] sm:$0xff] }
 0x347   : > { %7057 = vrcp.f32 %v9932_v59  ;;  %v9967_v50 = vadd.f32 1.0, %v7050_v57  ;;  %v3602_v9 = vadd.f32 %v9825_v19, %v3601_v42  ;;  %vm3604_vm0 = vweird.f32 %v9825_v19  ;;  %v15380_v57 = vld [vmem:[#allocation78_spill] sm:$0xff] }
 0x348   : > { %1655 = vmatmul.f32.gmra.mxu0 %v7507_v7  ;;  %1768 = vmatmul.f32.gmra.mxu1 %v7508_v16  ;;  %vm9979_vm1 = vcmp.eq.f32.partialorder %v3607_v54, 8.507059e+37  ;;  %v3659_v12 = vmul.f32 %v9949_v3, %v9857_v51  ;;  %v9988_v15 = vmul.f32 %v3506_v26, %v15306_v45  ;;  %v3610_v10 = vor.u32 1.1754944e-38, %v3609_v52  ;;  %v7509_v26 = vld [vmem:[%s8030_s15 + $0x140] sm:$0xff]  ;;  %vm10017_vm4 = vmor %vm3603_vm14, %vm3604_vm0 }
 0x349   : > { %v9945_v20 = vpop.f32.mrf.mxu0  ;;  %1881 = vmatmul.f32.gmra.mxu2 %v7507_v7  ;;  %1994 = vmatmul.f32.gmra.mxu3 %v7508_v16  ;;  %v492_v7 = vld [vmem:[%s8038_s26 + $0x230] sm:$0xff]  ;;  %v3622_v13 = vand.u32 2147483647, %v9770_v43  ;;  %v6748_v18 = vmul.f32 -1.442695, %v15379_v44  ;;  %v3546_v45 = vsel %vm9973_vm15, %v9798_v22, %v3542_v34  ;;  %v3561_v4 = vsel %vm9994_vm2, %v9806_v27, %v3557_v47  ;;  %v10010_v52 = vpop.f32.mrf.mxu3  ;;  %v15383_v34 = vld [vmem:[#allocation79_spill] sm:$0xff] }
 0x34a   : > { %15376 = vst [vmem:[#allocation73_spill] sm:$0xff] %v9988_v15  ;;  %2041 = vmatpush.msrb.mxu0 %v492_v7  ;;  %v7054_v16 = vpop.eup %7053  ;;  %vm3619_vm3 = vweird.f32 %v9860_v60  ;;  %v6751_v42 = vmul.f32 -1.442695, %v15380_v57  ;;  %v10022_v27 = vadd.f32 %v9860_v60, %v3616_v29  ;;  %7059 = vrcp.f32 %v9967_v50  ;;  %v15385_v7 = vld [vmem:[#allocation76_spill] sm:$0xff]  ;;  %v484_v22 = vld [vmem:[%s8038_s26 + $0x1f0] sm:$0xff] }
 0x34b   : > { %v10008_v54 = vpop.f32.mrf.mxu2  ;;  %v6752_v47 = vmul.f32 -1.442695, %v15383_v34  ;;  %v10028_v41 = vadd.f32 %v15385_v7, %v15384_v21  ;;  %v3606_v6 = vsel %vm10017_vm4, %v9825_v19, %v3602_v9  ;;  %vm3618_vm5 = vweird.f32 %v9770_v43 }
 0x34c   : > { %v7056_v15 = vpop.eup %7055  ;;  %v3624_v29 = vand.u32 2147483648, %v9770_v43  ;;  %v3660_v57 = vsub.f32 1.0, %v3659_v12  ;;  %v10038_v44 = vpop.f32.mrf.mxu1  ;;  %v3551_v7 = vsel %vm9939_vm11, %v9900_v49, %v3546_v45  ;;  %vm10047_vm6 = vmor %vm3618_vm5, %vm3619_vm3  ;;  %vm10051_vm7 = vcmp.eq.f32.partialorder %v3622_v13, 8.507059e+37  ;;  %v485_v13 = vld [vmem:[%s8038_s26 + $0x1f8] sm:$0xff]  ;;  %2042 = vmatpush.msrb.mxu0 %v484_v22 }
 0x34d   : > { %15386 = vst [vmem:[#allocation75_spill] sm:$0xff] %v10028_v41  ;;  %v10040_v21 = vpop.eup %7057  ;;  %v10055_v9 = vadd.f32 1.0, %v7054_v16  ;;  %7061 = vpow2.f32 %v6748_v18  ;;  %v3566_v23 = vsel %vm9952_vm13, %v3565_v40, %v3561_v4  ;;  %v3667_v49 = vand.u32 2147483647, %v9857_v51  ;;  %v613_v45 = vld [vmem:[%s8038_s26 + $0x5f8] sm:$0xff]  ;;  %2268 = vmatpush.msrb.mxu2 %v485_v13 }
 0x34e   : > { %7063 = vpow2.f32 %v6751_v42  ;;  %v10062_v12 = vadd.f32 %v9774_v38, %v9772_v63  ;;  %v3611_v18 = vsel %vm9979_vm1, %v3610_v10, %v3606_v6  ;;  %v3621_v62 = vsel %vm10047_vm6, %v9860_v60, %v10022_v27  ;;  %2381 = vmatpush.msrb.mxu3 %v613_v45  ;;  %v612_v63 = vld [vmem:[%s8038_s26 + $0x5f0] sm:$0xff]  ;;  %v477_v38 = vld [vmem:[%s8038_s26 + $0x1b8] sm:$0xff] }
 0x34f   : > { %7065 = vpow2.f32 %v6752_v47  ;;  %v6755_v40 = vmul.f32 -1.442695, %v10028_v41  ;;  %v605_v16 = vld [vmem:[%s8038_s26 + $0x5b8] sm:$0xff]  ;;  %v3661_v55 = vmul.f32 %v9949_v3, %v3660_v57  ;;  %v10080_v10 = vmul.f32 %v10040_v21, %v9932_v59  ;;  %2155 = vmatpush.msrb.mxu1 %v612_v63  ;;  %v476_v42 = vld [vmem:[%s8038_s26 + $0x1b0] sm:$0xff]  ;;  %2269 = vmatpush.msrb.mxu2 %v477_v38 }
 0x350   : > { %1658 = vmatmul.f32.gmra.mxu0 %v7509_v26  ;;  %1771 = vmatmul.f32.gmra.mxu1 %v7510_v31  ;;  %15391 = vst [vmem:[#allocation76_spill] sm:$0xff] %v10062_v12  ;;  %v10082_v4 = vadd.f32 1.0, %v7056_v15  ;;  %v10086_v60 = vadd.f32 %v9794_v0, %v9792_v35  ;;  %v469_v27 = vld [vmem:[%s8038_s26 + $0x178] sm:$0xff]  ;;  %v10091_v47 = vpop.eup %7059  ;;  %7067 = vrcp.f32 %v10055_v9  ;;  %v1939_v57 = vadd.f32 %v9841_v24, %v9839_v36  ;;  %v596_v24 = vld [vmem:[%s8038_s26 + $0x570] sm:$0xff] }
 0x351   : > { %v10036_v34 = vpop.f32.mrf.mxu0  ;;  %1884 = vmatmul.f32.gmra.mxu2 %v7509_v26  ;;  %1997 = vmatmul.f32.gmra.mxu3 %v7510_v31  ;;  %v604_v26 = vld [vmem:[%s8038_s26 + $0x5b0] sm:$0xff]  ;;  %v10098_v15 = vadd.f32 %v9871_v25, %v9869_v58  ;;  %v1942_v35 = vadd.f32 %v9926_v37, %v9924_v39  ;;  %v597_v0 = vld [vmem:[%s8038_s26 + $0x578] sm:$0xff]  ;;  %v10105_v6 = vmul.f32 %v3551_v7, %v15311_v5  ;;  %v3625_v13 = vor.u32 1.1754944e-38, %v3624_v29  ;;  %v10113_v25 = vpop.f32.mrf.mxu3 }
 0x352   : > { %v468_v31 = vld [vmem:[%s8038_s26 + $0x170] sm:$0xff]  ;;  %v10108_v19 = vmul.f32 %v3566_v23, %v15317_v1  ;;  %vm3663_vm8 = vweird.f32 %v9857_v51  ;;  %2382 = vmatpush.msrb.mxu3 %v605_v16  ;;  %2043 = vmatpush.msrb.mxu0 %v476_v42  ;;  %v10117_v39 = vmul.f32 %v3611_v18, %v9545_v2  ;;  %vm3664_vm9 = vweird.f32 %v9949_v3  ;;  %v589_v63 = vld [vmem:[%s8038_s26 + $0x538] sm:$0xff] }
 0x353   : > { %15392 = vst [vmem:[#allocation139_spill] sm:$0xff] %v10098_v15  ;;  %v10111_v36 = vpop.f32.mrf.mxu2  ;;  %v7062_v58 = vpop.eup %7061  ;;  %vm10120_vm10 = vcmp.eq.f32.partialorder %v3667_v49, 8.507059e+37  ;;  %v3669_v1 = vand.u32 2147483648, %v9857_v51  ;;  %2156 = vmatpush.msrb.mxu1 %v604_v26  ;;  %2270 = vmatpush.msrb.mxu2 %v469_v27  ;;  %v3626_v29 = vsel %vm10051_vm7, %v3625_v13, %v3621_v62  ;;  %v3662_v7 = vadd.f32 %v9949_v3, %v3661_v55  ;;  %v7511_v62 = vld [vmem:[%s8030_s15 + $0x150] sm:$0xff]  ;;  %vm10163_vm11 = vmor %vm3663_vm8, %vm3664_vm9 }
 0x354   : > { %15393 = vst [vmem:[#allocation140_spill] sm:$0xff] %v10117_v39  ;;  %v7064_v37 = vpop.eup %7063  ;;  %v3719_v2 = vmul.f32 %v10091_v47, %v9967_v50  ;;  %7069 = vpow2.f32 %v6755_v40  ;;  %v10132_v49 = vpop.f32.mrf.mxu1  ;;  %2383 = vmatpush.msrb.mxu3 %v597_v0  ;;  %2044 = vmatpush.msrb.mxu0 %v468_v31  ;;  %v3675_v43 = vsub.f32 1.0, %v10080_v10  ;;  %v3684_v22 = vand.u32 2147483648, %v9932_v59  ;;  %v461_v40 = vld [vmem:[%s8038_s26 + $0x138] sm:$0xff]  ;;  %v460_v42 = vld [vmem:[%s8038_s26 + $0x130] sm:$0xff]  ;;  %v15401_v31 = vld [vmem:[#allocation48_spill] sm:$0xff] }
 0x355   : > { %v7066_v45 = vpop.eup %7065  ;;  %7071 = vrcp.f32 %v10082_v4  ;;  %v10138_v18 = vmul.f32 %v9288_v33, %v1939_v57  ;;  %2157 = vmatpush.msrb.mxu1 %v596_v24  ;;  %v10143_v38 = vadd.f32 1.0, %v7062_v58  ;;  %v10146_v16 = vmul.f32 %v9378_v46, %v1942_v35  ;;  %v7512_v10 = vld [vmem:[%s8030_s15 + $0x158] sm:$0xff]  ;;  %v588_v26 = vld [vmem:[%s8038_s26 + $0x530] sm:$0xff]  ;;  %2271 = vmatpush.msrb.mxu2 %v461_v40 }
 0x356   : > { %v10150_v55 = vadd.f32 %v9947_v17, %v9945_v20  ;;  %v1945_v33 = vadd.f32 %v10010_v52, %v10008_v54  ;;  %v10157_v27 = vpop.eup %7067  ;;  %v3670_v57 = vor.u32 1.1754944e-38, %v3669_v1  ;;  %vm3678_vm12 = vweird.f32 %v9932_v59  ;;  %v453_v54 = vld [vmem:[%s8038_s26 + $0xf8] sm:$0xff]  ;;  %2384 = vmatpush.msrb.mxu3 %v589_v63  ;;  %2045 = vmatpush.msrb.mxu0 %v460_v42 }
 0x357   : > { %15396 = vst [vmem:[#allocation141_spill] sm:$0xff] %v10138_v18  ;;  %v3729_v20 = vand.u32 2147483648, %v9967_v50  ;;  %v10169_v17 = vadd.f32 1.0, %v7064_v37  ;;  %v581_v52 = vld [vmem:[%s8038_s26 + $0x4f8] sm:$0xff]  ;;  %v3666_v35 = vsel %vm10163_vm11, %v9949_v3, %v3662_v7  ;;  %v3720_v51 = vsub.f32 1.0, %v3719_v2  ;;  %2158 = vmatpush.msrb.mxu1 %v588_v26  ;;  %2272 = vmatpush.msrb.mxu2 %v453_v54 }
 0x358   : > { %1661 = vmatmul.f32.gmra.mxu0 %v7511_v62  ;;  %15397 = vst [vmem:[#allocation142_spill] sm:$0xff] %v10146_v16  ;;  %1774 = vmatmul.f32.gmra.mxu1 %v7512_v10  ;;  %v10176_v0 = vadd.f32 1.0, %v7066_v45  ;;  %v10179_v13 = vmul.f32 %v15401_v31, %v1945_v33  ;;  %v10182_v24 = vmul.f32 %v3626_v29, %v15326_v30  ;;  %v3682_v1 = vand.u32 2147483647, %v9932_v59  ;;  %v7514_v31 = vld [vmem:[%s8030_s15 + $0x168] sm:$0xff]  ;;  %v573_v26 = vld [vmem:[%s8038_s26 + $0x4b8] sm:$0xff] }
 0x359   : > { %v10130_v23 = vpop.f32.mrf.mxu0  ;;  %15398 = vst [vmem:[#allocation143_spill] sm:$0xff] %v10150_v55  ;;  %1887 = vmatmul.f32.gmra.mxu2 %v7511_v62  ;;  %2000 = vmatmul.f32.gmra.mxu3 %v7512_v10  ;;  %v3676_v58 = vmul.f32 %v10040_v21, %v3675_v43  ;;  %v10186_v37 = vor.u32 1.1754944e-38, %v3684_v22  ;;  %v3727_v7 = vand.u32 2147483647, %v9967_v50  ;;  %v3734_v2 = vmul.f32 %v10157_v27, %v10055_v9  ;;  %v1950_v29 = vpop.f32.mrf.mxu3 }
 0x35a   : > { %15402 = vst [vmem:[#allocation48_spill] sm:$0xff] %v10179_v13  ;;  %v7070_v3 = vpop.eup %7069  ;;  %v3744_v45 = vand.u32 2147483648, %v10055_v9  ;;  %7073 = vrcp.f32 %v10143_v38  ;;  %2385 = vmatpush.msrb.mxu3 %v581_v52  ;;  %v3671_v22 = vsel %vm10120_vm10, %v3670_v57, %v3666_v35  ;;  %vm3723_vm13 = vweird.f32 %v9967_v50  ;;  %v15406_v57 = vld [vmem:[#allocation80_spill] sm:$0xff]  ;;  %v557_v13 = vld [vmem:[%s8038_s26 + $0x438] sm:$0xff] }
 0x35b   : > { %v1837_v30 = vpop.f32.mrf.mxu2  ;;  %v10193_v43 = vpop.eup %7071  ;;  %v10198_v62 = vor.u32 1.1754944e-38, %v3729_v20  ;;  %7075 = vrcp.f32 %v10169_v17  ;;  %v3721_v40 = vmul.f32 %v10091_v47, %v3720_v51  ;;  %v10205_v63 = vadd.f32 %v10038_v44, %v10036_v34  ;;  %v7513_v34 = vld [vmem:[%s8030_s15 + $0x160] sm:$0xff]  ;;  %v452_v20 = vld [vmem:[%s8038_s26 + $0xf0] sm:$0xff] }
 0x35c   : > { %7077 = vrcp.f32 %v10176_v0  ;;  %v1948_v5 = vadd.f32 %v10113_v25, %v10111_v36  ;;  %v1727_v10 = vpop.f32.mrf.mxu1  ;;  %v10210_v42 = vadd.f32 %v10040_v21, %v3676_v58  ;;  %vm3679_vm14 = vweird.f32 %v10040_v21  ;;  %v580_v36 = vld [vmem:[%s8038_s26 + $0x4f0] sm:$0xff]  ;;  %2046 = vmatpush.msrb.mxu0 %v452_v20  ;;  %2386 = vmatpush.msrb.mxu3 %v573_v26 }
 0x35d   : > { %15403 = vst [vmem:[#allocation144_spill] sm:$0xff] %v10205_v63  ;;  %vm10213_vm15 = vcmp.eq.f32.partialorder %v3682_v1, 8.507059e+37  ;;  %v3742_v46 = vand.u32 2147483647, %v10055_v9  ;;  %v6756_v44 = vmul.f32 -1.442695, %v15406_v57  ;;  %v10223_v25 = vmul.f32 %v3671_v22, %v15342_v56  ;;  %vm10247_vm2 = vmor %vm3678_vm12, %vm3679_vm14  ;;  %2159 = vmatpush.msrb.mxu1 %v580_v36 }
 0x35e   : > { %vm10225_vm0 = vcmp.eq.f32.partialorder %v3727_v7, 8.507059e+37  ;;  %v3735_v52 = vsub.f32 1.0, %v3734_v2  ;;  %v10229_v35 = vor.u32 1.1754944e-38, %v3744_v45  ;;  %v3779_v51 = vmul.f32 %v10193_v43, %v10082_v4  ;;  %v15410_v56 = vld [vmem:[#allocation47_spill] sm:$0xff]  ;;  %v15414_v20 = vld [vmem:[#allocation81_spill] sm:$0xff]  ;;  %v429_v63 = vld [vmem:[%s8038_s26 + $0x38] sm:$0xff] }
 0x35f   : > { %vm3724_vm1 = vweird.f32 %v10091_v47  ;;  %v10236_v1 = vadd.f32 1.0, %v7070_v3  ;;  %v10239_v7 = vmul.f32 %v15410_v56, %v1948_v5  ;;  %v3722_v22 = vadd.f32 %v10091_v47, %v3721_v40  ;;  %v15416_v40 = vld [vmem:[#allocation82_spill] sm:$0xff] }
 0x360   : > { %1664 = vmatmul.f32.gmra.mxu0 %v7513_v34  ;;  %1777 = vmatmul.f32.gmra.mxu1 %v7514_v31  ;;  %v10241_v2 = vpop.eup %7073  ;;  %v6759_v3 = vmul.f32 -1.442695, %v15414_v20  ;;  %v10255_v5 = vadd.f32 %v10132_v49, %v10130_v23  ;;  %v3681_v59 = vsel %vm10247_vm2, %v10040_v21, %v10210_v42  ;;  %vm3738_vm3 = vweird.f32 %v10055_v9  ;;  %vm10277_vm4 = vmor %vm3723_vm13, %vm3724_vm1 }
 0x361   : > { %v1614_v33 = vpop.f32.mrf.mxu0  ;;  %15409 = vst [vmem:[#allocation80_spill] sm:$0xff] %v10236_v1  ;;  %1890 = vmatmul.f32.gmra.mxu2 %v7513_v34  ;;  %2003 = vmatmul.f32.gmra.mxu3 %v7514_v31  ;;  %v1951_v34 = vadd.f32 %v1950_v29, %v1837_v30  ;;  %v10257_v31 = vpop.eup %7075  ;;  %v3789_v56 = vand.u32 2147483648, %v10082_v4  ;;  %7079 = vpow2.f32 %v6756_v44  ;;  %v6760_v58 = vmul.f32 -1.442695, %v15416_v40  ;;  %v15417_v30 = vld [vmem:[#allocation83_spill] sm:$0xff] }
 0x362   : > { %15411 = vst [vmem:[#allocation47_spill] sm:$0xff] %v10239_v7  ;;  %v10266_v41 = vpop.eup %7077  ;;  %v3736_v23 = vmul.f32 %v10157_v27, %v3735_v52  ;;  %v3780_v49 = vsub.f32 1.0, %v3779_v51  ;;  %v6763_v29 = vmul.f32 -1.442695, %v15417_v30  ;;  %v1953_v45 = vpop.f32.mrf.mxu3  ;;  %v3794_v42 = vmul.f32 %v10241_v2, %v10143_v38 }
 0x363   : > { %15415 = vst [vmem:[#allocation81_spill] sm:$0xff] %v10255_v5  ;;  %v10271_v36 = vmul.f32 %v9715_v32, %v1951_v34  ;;  %v1840_v12 = vpop.f32.mrf.mxu2  ;;  %7081 = vrcp.f32 %v10236_v1  ;;  %v10284_v44 = vadd.f32 %v1727_v10, %v1614_v33  ;;  %v3726_v52 = vsel %vm10277_vm4, %v10091_v47, %v3722_v22  ;;  %v7515_v10 = vld [vmem:[%s8030_s15 + $0x170] sm:$0xff]  ;;  %v15426_v22 = vld [vmem:[#allocation84_spill] sm:$0xff] }
 0x364   : > { %v1954_v32 = vadd.f32 %v1953_v45, %v1840_v12  ;;  %v3804_v51 = vand.u32 2147483648, %v10143_v38  ;;  %v3839_v50 = vmul.f32 %v10257_v31, %v10169_v17  ;;  %7083 = vpow2.f32 %v6759_v3  ;;  %v1730_v39 = vpop.f32.mrf.mxu1  ;;  %v7516_v45 = vld [vmem:[%s8030_s15 + $0x178] sm:$0xff] }
 0x365   : > { %15418 = vst [vmem:[#allocation82_spill] sm:$0xff] %v10271_v36  ;;  %vm10292_vm5 = vcmp.eq.f32.partialorder %v3742_v46, 8.507059e+37  ;;  %vm3783_vm6 = vweird.f32 %v10082_v4  ;;  %v3854_v12 = vmul.f32 %v10266_v41, %v10176_v0  ;;  %7085 = vpow2.f32 %v6760_v58 }
 0x366   : > { %15421 = vst [vmem:[#allocation83_spill] sm:$0xff] %v10284_v44  ;;  %v10300_v47 = vmul.f32 %v9767_v48, %v1954_v32  ;;  %v3686_v46 = vsel %vm10213_vm15, %v10186_v37, %v3681_v59  ;;  %vm3739_vm7 = vweird.f32 %v10157_v27  ;;  %7087 = vpow2.f32 %v6763_v29  ;;  %v445_v37 = vld [vmem:[%s8038_s26 + $0xb8] sm:$0xff]  ;;  %v7522_v44 = vld [vmem:[%s8030_s15 + $0x1a8] sm:$0xff] }
 0x367   : > { %v6764_v3 = vmul.f32 -1.442695, %v15426_v22  ;;  %v7080_v58 = vpop.eup %7079  ;;  %v3731_v48 = vsel %vm10225_vm0, %v10198_v62, %v3726_v52  ;;  %v3781_v21 = vmul.f32 %v10193_v43, %v3780_v49  ;;  %v3795_v32 = vsub.f32 1.0, %v3794_v42  ;;  %2273 = vmatpush.msrb.mxu2 %v445_v37  ;;  %vm10344_vm11 = vmor %vm3738_vm3, %vm3739_vm7 }
 0x368   : > { %15424 = vst [vmem:[#allocation145_spill] sm:$0xff] %v10300_v47  ;;  %1667 = vmatmul.f32.gmra.mxu0 %v7515_v10  ;;  %1780 = vmatmul.f32.gmra.mxu1 %v7516_v45  ;;  %v10318_v59 = vor.u32 1.1754944e-38, %v3789_v56  ;;  %v3802_v29 = vand.u32 2147483647, %v10143_v38  ;;  %v10325_v62 = vmul.f32 %v3686_v46, %v15350_v11  ;;  %vm3784_vm8 = vweird.f32 %v10193_v43  ;;  %v572_v47 = vld [vmem:[%s8038_s26 + $0x4b0] sm:$0xff] }
 0x369   : > { %v1617_v34 = vpop.f32.mrf.mxu0  ;;  %1893 = vmatmul.f32.gmra.mxu2 %v7515_v10  ;;  %2006 = vmatmul.f32.gmra.mxu3 %v7516_v45  ;;  %v10322_v54 = vpop.eup %7081  ;;  %vm3798_vm10 = vweird.f32 %v10143_v38  ;;  %v10335_v56 = vor.u32 1.1754944e-38, %v3804_v51  ;;  %v3855_v42 = vsub.f32 1.0, %v3854_v12  ;;  %vm3843_vm12 = vweird.f32 %v10169_v17  ;;  %vm10388_vm0 = vmor %vm3783_vm6, %vm3784_vm8 }
 0x36a   : > { %v10302_v33 = vadd.f32 %v1730_v39, %v1617_v34  ;;  %v3737_v39 = vadd.f32 %v10157_v27, %v3736_v23  ;;  %v3840_v34 = vsub.f32 1.0, %v3839_v50  ;;  %15427 = vst [vmem:[#allocation84_spill] sm:$0xff] %v10322_v54  ;;  %v15428_v23 = vand.u32 2147483647, %v10082_v4  ;;  %v7084_v52 = vpop.eup %7083  ;;  %v1956_v12 = vpop.f32.mrf.mxu3  ;;  %2160 = vmatpush.msrb.mxu1 %v572_v47  ;;  %v15467_v47 = vld [vmem:[#allocation73_spill] sm:$0xff] }
 0x36b   : > { %v10338_v50 = vmul.f32 %v3731_v48, %v8605_v28  ;;  %v3847_v10 = vand.u32 2147483647, %v10169_v17  ;;  %v10350_v46 = vadd.f32 1.0, %v7080_v58  ;;  %7089 = vpow2.f32 %v6764_v3  ;;  %v1843_v51 = vpop.f32.mrf.mxu2  ;;  %v7086_v45 = vpop.eup %7085 }
 0x36c   : > { %15425 = vst [vmem:[#allocation146_spill] sm:$0xff] %v10302_v33  ;;  %v3849_v33 = vand.u32 2147483648, %v10169_v17  ;;  %vm10330_vm9 = vcmp.eq.f32.partialorder %v15428_v23, 8.507059e+37  ;;  %v3741_v28 = vsel %vm10344_vm11, %v10157_v27, %v3737_v39  ;;  %v3782_v9 = vadd.f32 %v10193_v43, %v3781_v21  ;;  %v7088_v58 = vpop.eup %7087  ;;  %v1733_v21 = vpop.f32.mrf.mxu1 }
 0x36d   : > { %v3796_v48 = vmul.f32 %v10241_v2, %v3795_v32  ;;  %vm3858_vm13 = vweird.f32 %v10176_v0  ;;  %v1957_v37 = vadd.f32 %v1956_v12, %v1843_v51  ;;  %vm3799_vm14 = vweird.f32 %v10241_v2  ;;  %v444_v12 = vld [vmem:[%s8038_s26 + $0xb0] sm:$0xff] }
 0x36e   : > { %v3841_v3 = vmul.f32 %v10257_v31, %v3840_v34  ;;  %v10360_v26 = vor.u32 1.1754944e-38, %v3849_v33  ;;  %v3899_v27 = vmul.f32 %v10322_v54, %v10236_v1  ;;  %vm10364_vm15 = vcmp.eq.f32.partialorder %v3802_v29, 8.507059e+37  ;;  %v7517_v33 = vld [vmem:[%s8030_s15 + $0x180] sm:$0xff]  ;;  %2047 = vmatpush.msrb.mxu0 %v444_v12  ;;  %vm10422_vm4 = vmor %vm3798_vm10, %vm3799_vm14 }
 0x36f   : > { %v3856_v23 = vmul.f32 %v10266_v41, %v3855_v42  ;;  %v10369_v11 = vadd.f32 1.0, %v7084_v52  ;;  %v10372_v51 = vmul.f32 %v9801_v8, %v1957_v37  ;;  %v10382_v29 = vsel %vm10292_vm5, %v10229_v35, %v3741_v28  ;;  %v7518_v35 = vld [vmem:[%s8030_s15 + $0x188] sm:$0xff] }
 0x370   : > { %1670 = vmatmul.f32.gmra.mxu0 %v7517_v33  ;;  %vm10392_vm1 = vcmp.eq.f32.partialorder %v3847_v10, 8.507059e+37  ;;  %v3862_v52 = vand.u32 2147483647, %v10176_v0  ;;  %7091 = vrcp.f32 %v10350_v46  ;;  %v10398_v37 = vadd.f32 1.0, %v7086_v45  ;;  %1783 = vmatmul.f32.gmra.mxu1 %v7518_v35 }
 0x371   : > { %v1620_v39 = vpop.f32.mrf.mxu0  ;;  %15435 = vst [vmem:[#allocation147_spill] sm:$0xff] %v10372_v51  ;;  %v3786_v4 = vsel %vm10388_vm0, %v10193_v43, %v3782_v9  ;;  %v3797_v36 = vadd.f32 %v10241_v2, %v3796_v48  ;;  %v3864_v10 = vand.u32 2147483648, %v10176_v0  ;;  %v10406_v28 = vadd.f32 1.0, %v7088_v58  ;;  %1896 = vmatmul.f32.gmra.mxu2 %v7517_v33  ;;  %2009 = vmatmul.f32.gmra.mxu3 %v7518_v35  ;;  %v15442_v43 = vld [vmem:[#allocation88_spill] sm:$0xff]  ;;  %v7520_v51 = vld [vmem:[%s8030_s15 + $0x198] sm:$0xff] }
 0x372   : > { %v10374_v34 = vadd.f32 %v1733_v21, %v1620_v39  ;;  %v7090_v39 = vpop.eup %7089  ;;  %v3842_v21 = vadd.f32 %v10257_v31, %v3841_v3  ;;  %vm3844_vm2 = vweird.f32 %v10257_v31  ;;  %v3900_v45 = vsub.f32 1.0, %v3899_v27  ;;  %v15447_v3 = vld [vmem:[#allocation89_spill] sm:$0xff]  ;;  %v1959_v33 = vpop.f32.mrf.mxu3 }
 0x373   : > { %v3857_v42 = vadd.f32 %v10266_v41, %v3856_v23  ;;  %vm3859_vm3 = vweird.f32 %v10266_v41  ;;  %7093 = vrcp.f32 %v10369_v11  ;;  %v6768_v9 = vmul.f32 -1.442695, %v15442_v43  ;;  %v1846_v23 = vpop.f32.mrf.mxu2  ;;  %vm10439_vm6 = vmor %vm3843_vm12, %vm3844_vm2 }
 0x374   : > { %15436 = vst [vmem:[#allocation148_spill] sm:$0xff] %v10374_v34  ;;  %v15441_v34 = vld [vmem:[#allocation85_spill] sm:$0xff]  ;;  %v3791_v48 = vsel %vm10330_vm9, %v10318_v59, %v3786_v4  ;;  %vm10426_vm5 = vcmp.eq.f32.partialorder %v3862_v52, 8.507059e+37  ;;  %7095 = vrcp.f32 %v10398_v37  ;;  %v6771_v27 = vmul.f32 -1.442695, %v15447_v3  ;;  %vm10455_vm7 = vmor %vm3858_vm13, %vm3859_vm3 }
 0x375   : > { %v6767_v12 = vmul.f32 -1.442695, %v15441_v34  ;;  %v3801_v59 = vsel %vm10422_vm4, %v10241_v2, %v3797_v36  ;;  %7097 = vrcp.f32 %v10406_v28  ;;  %v10444_v49 = vadd.f32 1.0, %v7090_v39  ;;  %v15452_v36 = vld [vmem:[#allocation90_spill] sm:$0xff] }
 0x376   : > { %v1960_v52 = vadd.f32 %v1959_v33, %v1846_v23  ;;  %v10446_v35 = vpop.eup %7091  ;;  %v3846_v2 = vsel %vm10439_vm6, %v10257_v31, %v3842_v21  ;;  %v3901_v4 = vmul.f32 %v10322_v54, %v3900_v45  ;;  %v6772_v39 = vmul.f32 -1.442695, %v15452_v36  ;;  %v1736_v23 = vpop.f32.mrf.mxu1  ;;  %v7519_v33 = vld [vmem:[%s8030_s15 + $0x190] sm:$0xff] }
 0x377   : > { %7099 = vpow2.f32 %v6767_v12  ;;  %v3861_v31 = vsel %vm10455_vm7, %v10266_v41, %v3857_v42  ;;  %v3806_v45 = vsel %vm10364_vm15, %v10335_v56, %v3801_v59  ;;  %v3865_v12 = vor.u32 1.1754944e-38, %v3864_v10  ;;  %v437_v56 = vld [vmem:[%s8038_s26 + $0x78] sm:$0xff] }
 0x378   : > { %7101 = vpow2.f32 %v6768_v9  ;;  %v10465_v21 = vmul.f32 %v9911_v53, %v1960_v52  ;;  %1673 = vmatmul.f32.gmra.mxu0 %v7519_v33  ;;  %v3909_v38 = vand.u32 2147483648, %v10236_v1  ;;  %1786 = vmatmul.f32.gmra.mxu1 %v7520_v51  ;;  %v3851_v53 = vsel %vm10392_vm1, %v10360_v26, %v3846_v2  ;;  %v565_v10 = vld [vmem:[%s8038_s26 + $0x478] sm:$0xff]  ;;  %v15457_v2 = vld [vmem:[#allocation77_spill] sm:$0xff] }
 0x379   : > { %v1623_v58 = vpop.f32.mrf.mxu0  ;;  %7103 = vpow2.f32 %v6771_v27  ;;  %v10473_v41 = vpop.eup %7093  ;;  %v3914_v42 = vmul.f32 %v10446_v35, %v10350_v46  ;;  %1899 = vmatmul.f32.gmra.mxu2 %v7519_v33  ;;  %2012 = vmatmul.f32.gmra.mxu3 %v7520_v51  ;;  %v3866_v27 = vsel %vm10426_vm5, %v3865_v12, %v3861_v31  ;;  %v10491_v8 = vadd.f32 %v10322_v54, %v3901_v4  ;;  %v15456_v51 = vld [vmem:[#allocation74_spill] sm:$0xff] }
 0x37a   : > { %15453 = vst [vmem:[#allocation85_spill] sm:$0xff] %v10465_v21  ;;  %v1737_v0 = vadd.f32 %v1736_v23, %v1623_v58  ;;  %7105 = vrcp.f32 %v10444_v49  ;;  %v10486_v9 = vpop.eup %7095  ;;  %vm3904_vm8 = vweird.f32 %v10322_v54  ;;  %2274 = vmatpush.msrb.mxu2 %v437_v56  ;;  %2387 = vmatpush.msrb.mxu3 %v565_v10  ;;  %v10501_v59 = vmul.f32 %v3791_v48, %v15456_v51  ;;  %v15458_v4 = vld [vmem:[#allocation78_spill] sm:$0xff]  ;;  %v15460_v48 = vld [vmem:[#allocation79_spill] sm:$0xff] }
 0x37b   : > { %15455 = vst [vmem:[#allocation89_spill] sm:$0xff] %v10491_v8  ;;  %7107 = vpow2.f32 %v6772_v39  ;;  %v10494_v26 = vpop.eup %7097  ;;  %vm3903_vm9 = vweird.f32 %v10236_v1  ;;  %v10506_v17 = vmul.f32 %v3806_v45, %v15457_v2  ;;  %v10509_v39 = vmul.f32 %v3851_v53, %v15458_v4  ;;  %v15465_v51 = vld [vmem:[#allocation87_spill] sm:$0xff] }
 0x37c   : > { %v10482_v32 = vmul.f32 %v9963_v61, %v1737_v0  ;;  %v10498_v61 = vmul.f32 %v10382_v29, %v15364_v14  ;;  %v10511_v58 = vor.u32 1.1754944e-38, %v3909_v38  ;;  %v3924_v23 = vand.u32 2147483648, %v10350_v46  ;;  %v1849_v14 = vpop.f32.mrf.mxu2  ;;  %v1962_v29 = vpop.f32.mrf.mxu3  ;;  %vm10519_vm10 = vmor %vm3903_vm9, %vm3904_vm8  ;;  %v7521_v54 = vld [vmem:[%s8030_s15 + $0x1a0] sm:$0xff]  ;;  %2275 = vmatpush.msrb.mxu2 %v429_v63  ;;  %2388 = vmatpush.msrb.mxu3 %v557_v13 }
 0x37d   : > { %v7100_v52 = vpop.eup %7099  ;;  %v10515_v0 = vmul.f32 %v3866_v27, %v15460_v48  ;;  %v15461_v33 = vmov 0  ;;  %v3915_v45 = vsub.f32 1.0, %v3914_v42  ;;  %v3959_v12 = vmul.f32 %v10473_v41, %v10369_v11  ;;  %v15464_v42 = vld [vmem:[#allocation86_spill] sm:$0xff] }
 0x37e   : > { %15454 = vst [vmem:[#allocation88_spill] sm:$0xff] %v10482_v32  ;;  %v7102_v31 = vpop.eup %7101  ;;  %v15462_v33 = vsel %vm10519_vm10, 4294967295, %v15461_v33  ;;  %v1963_v38 = vadd.f32 %v1962_v29, %v1849_v14  ;;  %v3974_v10 = vmul.f32 %v10486_v9, %v10398_v37  ;;  %v4019_v27 = vmul.f32 %v10494_v26, %v10406_v28  ;;  %v1739_v14 = vpop.f32.mrf.mxu1 }
 0x37f   : > { %15459 = vst [vmem:[#allocation90_spill] sm:$0xff] %v10511_v58  ;;  %v7104_v53 = vpop.eup %7103  ;;  %v10535_v2 = vadd.f32 %v15465_v51, %v15464_v42  ;;  %vm3918_vm11 = vweird.f32 %v10350_v46  ;;  %v3922_v48 = vand.u32 2147483647, %v10350_v46  ;;  %v3969_v56 = vand.u32 2147483648, %v10369_v11  ;;  %v564_v42 = vld [vmem:[%s8038_s26 + $0x470] sm:$0xff] }
 0x380   : > { %15463 = vst [vmem:[#allocation74_spill] sm:$0xff] %v15462_v33  ;;  %v10537_v29 = vpop.eup %7105  ;;  %v10543_v58 = vmul.f32 %v15467_v47, %v1963_v38  ;;  %1676 = vmatmul.f32.gmra.mxu0 %v7521_v54  ;;  %v436_v33 = vld [vmem:[%s8038_s26 + $0x70] sm:$0xff]  ;;  %v10548_v1 = vor.u32 1.1754944e-38, %v3924_v23  ;;  %v3984_v32 = vand.u32 2147483648, %v10398_v37  ;;  %v10552_v21 = vadd.f32 1.0, %v7100_v52  ;;  %1789 = vmatmul.f32.gmra.mxu1 %v7522_v44 }
 0x381   : > { %15466 = vst [vmem:[#allocation77_spill] sm:$0xff] %v10535_v2  ;;  %v1626_v4 = vpop.f32.mrf.mxu0  ;;  %v7108_v51 = vpop.eup %7107  ;;  %v3967_v2 = vand.u32 2147483647, %v10369_v11  ;;  %2048 = vmatpush.msrb.mxu0 %v436_v33  ;;  %v3916_v47 = vmul.f32 %v10446_v35, %v3915_v45  ;;  %v3960_v38 = vsub.f32 1.0, %v3959_v12  ;;  %1902 = vmatmul.f32.gmra.mxu2 %v7521_v54  ;;  %v3975_v23 = vsub.f32 1.0, %v3974_v10 }
 0x382   : > { %15468 = vst [vmem:[#allocation78_spill] sm:$0xff] %v10543_v58  ;;  %v1740_v8 = vadd.f32 %v1739_v14, %v1626_v4  ;;  %v10556_v4 = vadd.f32 1.0, %v7102_v31  ;;  %2015 = vmatmul.f32.gmra.mxu3 %v7522_v44  ;;  %v4020_v58 = vsub.f32 1.0, %v4019_v27  ;;  %v4034_v5 = vmul.f32 %v10537_v29, %v10444_v49  ;;  %2161 = vmatpush.msrb.mxu1 %v564_v42 }
 0x383   : > { %v10563_v52 = vadd.f32 1.0, %v7104_v53  ;;  %vm3919_vm12 = vweird.f32 %v10446_v35  ;;  %vm10566_vm13 = vcmp.eq.f32.partialorder %v3922_v48, 8.507059e+37  ;;  %vm3963_vm14 = vweird.f32 %v10369_v11 }
 0x384   : > { %v10559_v14 = vmul.f32 %v10105_v6, %v1740_v8  ;;  %v10571_v6 = vor.u32 1.1754944e-38, %v3969_v56  ;;  %v3982_v44 = vand.u32 2147483647, %v10398_v37  ;;  %v10574_v54 = vadd.f32 1.0, %v7108_v51  ;;  %v1852_v12 = vpop.f32.mrf.mxu2  ;;  %v1965_v53 = vpop.f32.mrf.mxu3  ;;  %vm10604_vm1 = vmor %vm3918_vm11, %vm3919_vm12 }
 0x385   : > { %vm3978_vm15 = vweird.f32 %v10398_v37  ;;  %v10577_v8 = vor.u32 1.1754944e-38, %v3984_v32  ;;  %v4027_v31 = vand.u32 2147483647, %v10406_v28  ;;  %v4029_v45 = vand.u32 2147483648, %v10406_v28 }
 0x386   : > { %15469 = vst [vmem:[#allocation79_spill] sm:$0xff] %v10559_v14  ;;  %7109 = vrcp.f32 %v10552_v21  ;;  %v3917_v56 = vadd.f32 %v10446_v35, %v3916_v47  ;;  %v3961_v10 = vmul.f32 %v10473_v41, %v3960_v38  ;;  %v1966_v27 = vadd.f32 %v1965_v53, %v1852_v12  ;;  %v1742_v14 = vpop.f32.mrf.mxu1  ;;  %v15474_v47 = vld [vmem:[#allocation91_spill] sm:$0xff]  ;;  %v7524_v53 = vld [vmem:[%s8030_s15 + $0x1b8] sm:$0xff] }
 0x387   : > { %7111 = vrcp.f32 %v10556_v4  ;;  %v3976_v48 = vmul.f32 %v10486_v9, %v3975_v23  ;;  %v4021_v32 = vmul.f32 %v10494_v26, %v4020_v58  ;;  %v4035_v42 = vsub.f32 1.0, %v4034_v5  ;;  %v7523_v58 = vld [vmem:[%s8030_s15 + $0x1b0] sm:$0xff] }
 0x388   : > { %7113 = vrcp.f32 %v10563_v52  ;;  %vm10588_vm0 = vcmp.eq.f32.partialorder %v3967_v2, 8.507059e+37  ;;  %v6776_v38 = vmul.f32 -1.442695, %v15474_v47  ;;  %v10595_v12 = vmul.f32 %v10108_v19, %v1966_v27  ;;  %1679 = vmatmul.f32.gmra.mxu0 %v7523_v58  ;;  %1792 = vmatmul.f32.gmra.mxu1 %v7524_v53 }
 0x389   : > { %v1629_v51 = vpop.f32.mrf.mxu0  ;;  %7115 = vrcp.f32 %v10574_v54  ;;  %vm3964_vm2 = vweird.f32 %v10473_v41  ;;  %vm10609_vm3 = vcmp.eq.f32.partialorder %v3982_v44, 8.507059e+37  ;;  %vm4023_vm4 = vweird.f32 %v10406_v28  ;;  %1905 = vmatmul.f32.gmra.mxu2 %v7523_v58  ;;  %v15485_v58 = vld [vmem:[#allocation94_spill] sm:$0xff] }
 0x38a   : > { %15475 = vst [vmem:[#allocation86_spill] sm:$0xff] %v10595_v12  ;;  %v10597_v23 = vadd.f32 %v1742_v14, %v1629_v51  ;;  %v4042_v19 = vand.u32 2147483647, %v10444_v49  ;;  %v4044_v14 = vand.u32 2147483648, %v10444_v49  ;;  %v3921_v46 = vsel %vm10604_vm1, %v10446_v35, %v3917_v56  ;;  %2018 = vmatmul.f32.gmra.mxu3 %v7524_v53  ;;  %v15484_v56 = vld [vmem:[#allocation93_spill] sm:$0xff]  ;;  %vm10651_vm9 = vmor %vm3963_vm14, %vm3964_vm2 }
 0x38b   : > { %v3962_v27 = vadd.f32 %v10473_v41, %v3961_v10  ;;  %vm10621_vm5 = vcmp.eq.f32.partialorder %v4027_v31, 8.507059e+37  ;;  %v10625_v44 = vor.u32 1.1754944e-38, %v4029_v45  ;;  %vm4038_vm6 = vweird.f32 %v10444_v49 }
 0x38c   : > { %15476 = vst [vmem:[#allocation87_spill] sm:$0xff] %v10597_v23  ;;  %v15483_v23 = vld [vmem:[#allocation92_spill] sm:$0xff]  ;;  %v10631_v55 = vpop.eup %7109  ;;  %v3977_v35 = vadd.f32 %v10486_v9, %v3976_v48  ;;  %vm3979_vm7 = vweird.f32 %v10486_v9  ;;  %v4036_v31 = vmul.f32 %v10537_v29, %v4035_v42  ;;  %v6780_v10 = vmul.f32 -1.442695, %v15484_v56  ;;  %v1855_v42 = vpop.f32.mrf.mxu2 }
 0x38d   : > { %v6779_v12 = vmul.f32 -1.442695, %v15483_v23  ;;  %v10637_v45 = vpop.eup %7111  ;;  %v4022_v5 = vadd.f32 %v10494_v26, %v4021_v32  ;;  %vm4024_vm8 = vweird.f32 %v10494_v26  ;;  %7117 = vpow2.f32 %v6776_v38  ;;  %v1968_v38 = vpop.f32.mrf.mxu3  ;;  %vm10668_vm12 = vmor %vm3978_vm15, %vm3979_vm7 }
 0x38e   : > { %v6783_v53 = vmul.f32 -1.442695, %v15485_v58  ;;  %v10642_v16 = vpop.eup %7113  ;;  %v3926_v48 = vsel %vm10566_vm13, %v10548_v1, %v3921_v46  ;;  %vm4039_vm11 = vweird.f32 %v10537_v29  ;;  %v10656_v63 = vor.u32 1.1754944e-38, %v4044_v14  ;;  %vm10685_vm14 = vmor %vm4023_vm4, %vm4024_vm8  ;;  %v1745_v13 = vpop.f32.mrf.mxu1 }
 0x38f   : > { %v4089_v32 = vand.u32 2147483648, %v10552_v21  ;;  %v10659_v15 = vpop.eup %7115  ;;  %v3966_v1 = vsel %vm10651_vm9, %v10473_v41, %v3962_v27  ;;  %vm10672_vm13 = vcmp.eq.f32.partialorder %v4042_v19, 8.507059e+37  ;;  %v4079_v14 = vmul.f32 %v10631_v55, %v10552_v21  ;;  %vm10726_vm15 = vmor %vm4038_vm6, %vm4039_vm11 }
 0x390   : > { %7119 = vpow2.f32 %v6779_v12  ;;  %v1969_v41 = vadd.f32 %v1968_v38, %v1855_v42  ;;  %v3981_v37 = vsel %vm10668_vm12, %v10486_v9, %v3977_v35  ;;  %v4037_v46 = vadd.f32 %v10537_v29, %v4036_v31  ;;  %v7525_v42 = vld [vmem:[%s8030_s15 + $0x1c0] sm:$0xff]  ;;  %v428_v38 = vld [vmem:[%s8038_s26 + $0x30] sm:$0xff] }
 0x391   : > { %v4094_v27 = vmul.f32 %v10637_v45, %v10556_v4  ;;  %7121 = vpow2.f32 %v6780_v10  ;;  %v1632_v12 = vpop.f32.mrf.mxu0  ;;  %v4026_v9 = vsel %vm10685_vm14, %v10494_v26, %v4022_v5  ;;  %1682 = vmatmul.f32.gmra.mxu0 %v7525_v42  ;;  %v556_v31 = vld [vmem:[%s8038_s26 + $0x430] sm:$0xff]  ;;  %v3971_v11 = vsel %vm10588_vm0, %v10571_v6, %v3966_v1  ;;  %v7526_v5 = vld [vmem:[%s8030_s15 + $0x1c8] sm:$0xff]  ;;  %1908 = vmatmul.f32.gmra.mxu2 %v7525_v42 }
 0x392   : > { %7123 = vpow2.f32 %v6783_v53  ;;  %v10696_v28 = vmul.f32 %v10182_v24, %v1969_v41  ;;  %v1746_v35 = vadd.f32 %v1745_v13, %v1632_v12  ;;  %v4087_v10 = vand.u32 2147483647, %v10552_v21  ;;  %1795 = vmatmul.f32.gmra.mxu1 %v7526_v5  ;;  %2049 = vmatpush.msrb.mxu0 %v428_v38 }
 0x393   : > { %v4139_v18 = vmul.f32 %v10642_v16, %v10563_v52  ;;  %v4154_v26 = vmul.f32 %v10659_v15, %v10574_v54  ;;  %v7118_v24 = vpop.eup %7117  ;;  %v10711_v53 = vmul.f32 %v3926_v48, %v15406_v57  ;;  %v3986_v7 = vsel %vm10609_vm3, %v10577_v8, %v3981_v37  ;;  %2021 = vmatmul.f32.gmra.mxu3 %v7526_v5  ;;  %v15498_v48 = vld [vmem:[#allocation95_spill] sm:$0xff] }
 0x394   : > { %15494 = vst [vmem:[#allocation73_spill] sm:$0xff] %v10696_v28  ;;  %v4080_v6 = vsub.f32 1.0, %v4079_v14  ;;  %v10717_v1 = vmul.f32 %v10223_v25, %v1746_v35  ;;  %v4031_v41 = vsel %vm10621_vm5, %v10625_v44, %v4026_v9  ;;  %v10730_v2 = vor.u32 1.1754944e-38, %v4089_v32  ;;  %2162 = vmatpush.msrb.mxu1 %v556_v31  ;;  %v1858_v12 = vpop.f32.mrf.mxu2  ;;  %v7574_v28 = vld [vmem:[%s8030_s15 + $0x148] sm:$0xff] }
 0x395   : > { %v4095_v8 = vsub.f32 1.0, %v4094_v27  ;;  %v6784_v25 = vmul.f32 -1.442695, %v15498_v48  ;;  %v10734_v37 = vmul.f32 %v3971_v11, %v15414_v20  ;;  %v4041_v51 = vsel %vm10726_vm15, %v10537_v29, %v4037_v46  ;;  %v1971_v13 = vpop.f32.mrf.mxu3 }
 0x396   : > { %15495 = vst [vmem:[#allocation91_spill] sm:$0xff] %v10717_v1  ;;  %v7120_v14 = vpop.eup %7119  ;;  %vm4083_vm0 = vweird.f32 %v10552_v21  ;;  %vm4084_vm1 = vweird.f32 %v10631_v55  ;;  %v4104_v49 = vand.u32 2147483648, %v10556_v4  ;;  %v10743_v32 = vmul.f32 %v3986_v7, %v15416_v40  ;;  %v1748_v11 = vpop.f32.mrf.mxu1 }
 0x397   : > { %v7122_v44 = vpop.eup %7121  ;;  %vm4098_vm2 = vweird.f32 %v10556_v4  ;;  %v4140_v19 = vsub.f32 1.0, %v4139_v18  ;;  %v4155_v27 = vsub.f32 1.0, %v4154_v26  ;;  %v10746_v20 = vadd.f32 1.0, %v7118_v24  ;;  %v7527_v24 = vld [vmem:[%s8030_s15 + $0x1d0] sm:$0xff]  ;;  %vm10803_vm9 = vmor %vm4083_vm0, %vm4084_vm1 }
 0x398   : > { %v7124_v9 = vpop.eup %7123  ;;  %v10749_v29 = vmul.f32 %v4031_v41, %v15417_v30  ;;  %v4081_v46 = vmul.f32 %v10631_v55, %v4080_v6  ;;  %v4102_v35 = vand.u32 2147483647, %v10556_v4  ;;  %v1972_v42 = vadd.f32 %v1971_v13, %v1858_v12  ;;  %v7528_v41 = vld [vmem:[%s8030_s15 + $0x1d8] sm:$0xff]  ;;  %v5268_v13 = vld [vmem:[%s8044_s6 + $0xf0] sm:$0xff] }
 0x399   : > { %v10756_v40 = vsel %vm10672_vm13, %v10656_v63, %v4041_v51  ;;  %v4096_v18 = vmul.f32 %v10637_v45, %v4095_v8  ;;  %v10759_v38 = vadd.f32 1.0, %v7120_v14  ;;  %7125 = vpow2.f32 %v6784_v25  ;;  %v1635_v31 = vpop.f32.mrf.mxu0  ;;  %1685 = vmatmul.f32.gmra.mxu0 %v7527_v24  ;;  %v15504_v8 = vld [vmem:[#allocation96_spill] sm:$0xff]  ;;  %1911 = vmatmul.f32.gmra.mxu2 %v7527_v24  ;;  %v5332_v51 = vld [vmem:[%s8044_s6 + $0x2f0] sm:$0xff] }
 0x39a   : > { %vm10761_vm3 = vcmp.eq.f32.partialorder %v4087_v10, 8.507059e+37  ;;  %v10765_v26 = vor.u32 1.1754944e-38, %v4104_v49  ;;  %v10767_v5 = vadd.f32 1.0, %v7122_v44  ;;  %v10770_v33 = vmul.f32 %v10325_v62, %v1972_v42  ;;  %1798 = vmatmul.f32.gmra.mxu1 %v7528_v41  ;;  %v5364_v49 = vld [vmem:[%s8044_s6 + $0x3f0] sm:$0xff]  ;;  %5592 = vmatpush.msra.mxu2 %v5332_v51 }
 0x39b   : > { %v1749_v63 = vadd.f32 %v1748_v11, %v1635_v31  ;;  %v4141_v7 = vmul.f32 %v10642_v16, %v4140_v19  ;;  %v4156_v6 = vmul.f32 %v10659_v15, %v4155_v27  ;;  %7127 = vrcp.f32 %v10746_v20  ;;  %2024 = vmatmul.f32.gmra.mxu3 %v7528_v41  ;;  %5366 = vmatpush.msra.mxu0 %v5268_v13 }
 0x39c   : > { %15501 = vst [vmem:[#allocation92_spill] sm:$0xff] %v10770_v33  ;;  %v10776_v10 = vadd.f32 1.0, %v7124_v9  ;;  %v4082_v57 = vadd.f32 %v10631_v55, %v4081_v46  ;;  %vm4099_vm4 = vweird.f32 %v10637_v45  ;;  %vm10781_vm5 = vcmp.eq.f32.partialorder %v4102_v35, 8.507059e+37  ;;  %5705 = vmatpush.msra.mxu3 %v5364_v49  ;;  %v15509_v35 = vld [vmem:[#allocation98_spill] sm:$0xff] }
 0x39d   : > { %v6787_v25 = vmul.f32 -1.442695, %v15504_v8  ;;  %v10787_v14 = vmul.f32 %v10338_v50, %v1749_v63  ;;  %v4097_v44 = vadd.f32 %v10637_v45, %v4096_v18  ;;  %vm4143_vm6 = vweird.f32 %v10563_v52  ;;  %v15506_v50 = vld [vmem:[#allocation97_spill] sm:$0xff]  ;;  %v1861_v18 = vpop.f32.mrf.mxu2  ;;  %v1974_v31 = vpop.f32.mrf.mxu3  ;;  %vm10818_vm11 = vmor %vm4098_vm2, %vm4099_vm4 }
 0x39e   : > { %v4149_v19 = vand.u32 2147483648, %v10563_v52  ;;  %7129 = vrcp.f32 %v10759_v38  ;;  %vm4144_vm7 = vweird.f32 %v10642_v16  ;;  %vm4159_vm8 = vweird.f32 %v10659_v15 }
 0x39f   : > { %15505 = vst [vmem:[#allocation93_spill] sm:$0xff] %v10787_v14  ;;  %7131 = vrcp.f32 %v10767_v5  ;;  %v6788_v27 = vmul.f32 -1.442695, %v15506_v50  ;;  %v7126_v12 = vpop.eup %7125  ;;  %v4142_v9 = vadd.f32 %v10642_v16, %v4141_v7  ;;  %v4157_v46 = vadd.f32 %v10659_v15, %v4156_v6  ;;  %vm10832_vm12 = vmor %vm4143_vm6, %vm4144_vm7  ;;  %v5266_v14 = vld [vmem:[%s8044_s6 + $0xe0] sm:$0xff] }
 0x3a0   : > { %7133 = vrcp.f32 %v10776_v10  ;;  %v6791_v42 = vmul.f32 -1.442695, %v15509_v35  ;;  %v4086_v11 = vsel %vm10803_vm9, %v10631_v55, %v4082_v57  ;;  %v4164_v63 = vand.u32 2147483648, %v10574_v54  ;;  %5367 = vmatpush.msra.mxu0 %v5266_v14 }
 0x3a1   : > { %7135 = vpow2.f32 %v6787_v25  ;;  %v1975_v24 = vadd.f32 %v1974_v31, %v1861_v18  ;;  %v10823_v7 = vpop.eup %7127  ;;  %v4101_v55 = vsel %vm10818_vm11, %v10637_v45, %v4097_v44  ;;  %v4147_v6 = vand.u32 2147483647, %v10563_v52  ;;  %v1638_v57 = vpop.f32.mrf.mxu0  ;;  %v7529_v44 = vld [vmem:[%s8030_s15 + $0x1e0] sm:$0xff] }
 0x3a2   : > { %vm4158_vm13 = vweird.f32 %v10574_v54  ;;  %v4162_v41 = vand.u32 2147483647, %v10574_v54  ;;  %v1751_v25 = vpop.f32.mrf.mxu1  ;;  %v10845_v51 = vadd.f32 1.0, %v7126_v12  ;;  %7137 = vpow2.f32 %v6788_v27  ;;  %1688 = vmatmul.f32.gmra.mxu0 %v7529_v44  ;;  %v5300_v54 = vld [vmem:[%s8044_s6 + $0x1f0] sm:$0xff]  ;;  %v7530_v27 = vld [vmem:[%s8030_s15 + $0x1e8] sm:$0xff]  ;;  %1914 = vmatmul.f32.gmra.mxu2 %v7529_v44 }
 0x3a3   : > { %vm10841_vm14 = vmor %vm4158_vm13, %vm4159_vm8  ;;  %v10848_v49 = vmul.f32 %v10498_v61, %v1975_v24  ;;  %v1752_v52 = vadd.f32 %v1751_v25, %v1638_v57  ;;  %v4091_v31 = vsel %vm10761_vm3, %v10730_v2, %v4086_v11  ;;  %v4146_v12 = vsel %vm10832_vm12, %v10642_v16, %v4142_v9  ;;  %1801 = vmatmul.f32.gmra.mxu1 %v7530_v27 }
 0x3a4   : > { %v10853_v18 = vpop.eup %7129  ;;  %v4161_v61 = vsel %vm10841_vm14, %v10659_v15, %v4157_v46  ;;  %7139 = vpow2.f32 %v6791_v42  ;;  %v4150_v24 = vor.u32 1.1754944e-38, %v4149_v19  ;;  %v4165_v57 = vor.u32 1.1754944e-38, %v4164_v63  ;;  %2027 = vmatmul.f32.gmra.mxu3 %v7530_v27  ;;  %5479 = vmatpush.msra.mxu1 %v5300_v54  ;;  %v7531_v27 = vld [vmem:[%s8030_s15 + $0x1f0] sm:$0xff] }
 0x3a5   : > { %15516 = vst [vmem:[#allocation94_spill] sm:$0xff] %v10848_v49  ;;  %v10865_v21 = vpop.eup %7131  ;;  %v4214_v30 = vmul.f32 %v10823_v7, %v10746_v20  ;;  %v10870_v2 = vmul.f32 %v10501_v59, %v1752_v52  ;;  %v10876_v15 = vmul.f32 %v10756_v40, %v15426_v22  ;;  %v4106_v9 = vsel %vm10781_vm5, %v10765_v26, %v4101_v55  ;;  %v1864_v62 = vpop.f32.mrf.mxu2  ;;  %v7533_v49 = vld [vmem:[%s8030_s15] sm:$0xff] }
 0x3a6   : > { %v10872_v16 = vpop.eup %7133  ;;  %vm4148_vm15 = vcmp.eq.f32.partialorder %v4147_v6, 8.507059e+37  ;;  %vm4163_vm0 = vcmp.eq.f32.partialorder %v4162_v41, 8.507059e+37  ;;  %v4259_v59 = vmul.f32 %v10853_v18, %v10759_v38  ;;  %7141 = vrcp.f32 %v10845_v51  ;;  %v1977_v63 = vpop.f32.mrf.mxu3 }
 0x3a7   : > { %15517 = vst [vmem:[#allocation95_spill] sm:$0xff] %v10870_v2  ;;  %v7136_v19 = vpop.eup %7135  ;;  %v4151_v46 = vsel %vm4148_vm15, %v4150_v24, %v4146_v12  ;;  %v4166_v42 = vsel %vm4163_vm0, %v4165_v57, %v4161_v61  ;;  %v10885_v11 = vmul.f32 %v4091_v31, %v15441_v34  ;;  %v4224_v22 = vand.u32 2147483648, %v10746_v20 }
 0x3a8   : > { %v4269_v40 = vand.u32 2147483648, %v10759_v38  ;;  %v4274_v26 = vmul.f32 %v10865_v21, %v10767_v5  ;;  %v7138_v55 = vpop.eup %7137  ;;  %v10892_v4 = vmul.f32 %v4106_v9, %v15442_v43  ;;  %v4215_v6 = vsub.f32 1.0, %v4214_v30  ;;  %v7532_v9 = vld [vmem:[%s8030_s15 + $0x1f8] sm:$0xff] }
 0x3a9   : > { %v4319_v41 = vmul.f32 %v10872_v16, %v10776_v10  ;;  %v1978_v34 = vadd.f32 %v1977_v63, %v1864_v62  ;;  %v10897_v45 = vmul.f32 %v4151_v46, %v15447_v3  ;;  %v10900_v52 = vmul.f32 %v4166_v42, %v15452_v36  ;;  %v1641_v43 = vpop.f32.mrf.mxu0  ;;  %v15520_v63 = vld [vmem:[#allocation99_spill] sm:$0xff] }
 0x3aa   : > { %v7140_v25 = vpop.eup %7139  ;;  %v4222_v44 = vand.u32 2147483647, %v10746_v20  ;;  %v10903_v13 = vadd.f32 1.0, %v7136_v19  ;;  %v1754_v54 = vpop.f32.mrf.mxu1  ;;  %vm4218_vm1 = vweird.f32 %v10746_v20  ;;  %v4260_v31 = vsub.f32 1.0, %v4259_v59  ;;  %1691 = vmatmul.f32.gmra.mxu0 %v7531_v27  ;;  %1917 = vmatmul.f32.gmra.mxu2 %v7531_v27  ;;  %v15533_v20 = vld [vmem:[#allocation102_spill] sm:$0xff] }
 0x3ab   : > { %v4267_v12 = vand.u32 2147483647, %v10759_v38  ;;  %v10908_v61 = vmul.f32 %v10506_v17, %v1978_v34  ;;  %v1755_v3 = vadd.f32 %v1754_v54, %v1641_v43  ;;  %v10911_v36 = vor.u32 1.1754944e-38, %v4224_v22  ;;  %1804 = vmatmul.f32.gmra.mxu1 %v7532_v9  ;;  %v5330_v22 = vld [vmem:[%s8044_s6 + $0x2e0] sm:$0xff]  ;;  %v15523_v43 = vld [vmem:[#allocation100_spill] sm:$0xff] }
 0x3ac   : > { %v10913_v24 = vor.u32 1.1754944e-38, %v4269_v40  ;;  %v4275_v57 = vsub.f32 1.0, %v4274_v26  ;;  %v10915_v30 = vadd.f32 1.0, %v7138_v55  ;;  %v10918_v19 = vpop.eup %7141  ;;  %v4216_v46 = vmul.f32 %v10823_v7, %v4215_v6  ;;  %2030 = vmatmul.f32.gmra.mxu3 %v7532_v9  ;;  %v5362_v40 = vld [vmem:[%s8044_s6 + $0x3e0] sm:$0xff]  ;;  %5593 = vmatpush.msra.mxu2 %v5330_v22 }
 0x3ad   : > { %15518 = vst [vmem:[#allocation96_spill] sm:$0xff] %v10908_v61  ;;  %vm4263_vm2 = vweird.f32 %v10759_v38  ;;  %v4320_v17 = vsub.f32 1.0, %v4319_v41  ;;  %v10922_v42 = vadd.f32 1.0, %v7140_v25  ;;  %v10925_v59 = vmul.f32 %v10509_v39, %v1755_v3  ;;  %5706 = vmatpush.msra.mxu3 %v5362_v40  ;;  %v1867_v3 = vpop.f32.mrf.mxu2 }
 0x3ae   : > { %vm4278_vm3 = vweird.f32 %v10767_v5  ;;  %v4282_v26 = vand.u32 2147483647, %v10767_v5  ;;  %v4284_v62 = vand.u32 2147483648, %v10767_v5  ;;  %7143 = vrcp.f32 %v10903_v13 }
 0x3af   : > { %15519 = vst [vmem:[#allocation97_spill] sm:$0xff] %v10925_v59  ;;  %v6792_v55 = vmul.f32 -1.442695, %v15520_v63  ;;  %vm4219_vm4 = vweird.f32 %v10823_v7  ;;  %vm10935_vm5 = vcmp.eq.f32.partialorder %v4222_v44, 8.507059e+37  ;;  %v4261_v6 = vmul.f32 %v10853_v18, %v4260_v31  ;;  %v1980_v44 = vpop.f32.mrf.mxu3 }
 0x3b0   : > { %vm4323_vm6 = vweird.f32 %v10776_v10  ;;  %v4327_v41 = vand.u32 2147483647, %v10776_v10  ;;  %v4276_v34 = vmul.f32 %v10865_v21, %v4275_v57  ;;  %v4334_v25 = vmul.f32 %v10918_v19, %v10845_v51  ;;  %vm10977_vm11 = vmor %vm4218_vm1, %vm4219_vm4 }
 0x3b1   : > { %7145 = vrcp.f32 %v10915_v30  ;;  %v6795_v54 = vmul.f32 -1.442695, %v15523_v43  ;;  %v4217_v27 = vadd.f32 %v10823_v7, %v4216_v46  ;;  %vm10948_vm7 = vcmp.eq.f32.partialorder %v4267_v12, 8.507059e+37  ;;  %v1644_v46 = vpop.f32.mrf.mxu0 }
 0x3b2   : > { %v4321_v9 = vmul.f32 %v10872_v16, %v4320_v17  ;;  %7147 = vrcp.f32 %v10922_v42  ;;  %v1981_v57 = vadd.f32 %v1980_v44, %v1867_v3  ;;  %vm4264_vm8 = vweird.f32 %v10853_v18  ;;  %v1757_v59 = vpop.f32.mrf.mxu1  ;;  %v15528_v17 = vld [vmem:[#allocation101_spill] sm:$0xff]  ;;  %2050 = vmatmul.f32.vlgmr.msrb.gmra.mxu0 %v7533_v49  ;;  %2276 = vmatmul.f32.vlgmr.msrb.gmra.mxu2 %v7533_v49 }
 0x3b3   : > { %v4329_v22 = vand.u32 2147483648, %v10776_v10  ;;  %v4344_v40 = vand.u32 2147483648, %v10845_v51  ;;  %7149 = vpow2.f32 %v6792_v55  ;;  %v4262_v12 = vadd.f32 %v10853_v18, %v4261_v6  ;;  %v5298_v55 = vld [vmem:[%s8044_s6 + $0x1e0] sm:$0xff]  ;;  %vm10996_vm14 = vmor %vm4263_vm2, %vm4264_vm8 }
 0x3b4   : > { %vm10958_vm9 = vcmp.eq.f32.partialorder %v4282_v26, 8.507059e+37  ;;  %v6796_v2 = vmul.f32 -1.442695, %v15528_v17  ;;  %v10964_v3 = vmul.f32 %v10515_v0, %v1981_v57  ;;  %v10966_v44 = vadd.f32 %v1757_v59, %v1644_v46  ;;  %v10971_v33 = vpop.eup %7143  ;;  %v7534_v59 = vld [vmem:[%s8030_s15 + $0x8] sm:$0xff]  ;;  %5480 = vmatpush.msra.mxu1 %v5298_v55 }
 0x3b5   : > { %v4277_v6 = vadd.f32 %v10865_v21, %v4276_v34  ;;  %vm4279_vm12 = vweird.f32 %v10865_v21  ;;  %v4335_v0 = vsub.f32 1.0, %v4334_v25  ;;  %7151 = vpow2.f32 %v6795_v54  ;;  %2163 = vmatmul.f32.vlgmr.msrb.gmra.mxu1 %v7534_v59  ;;  %2389 = vmatmul.f32.vlgmr.msrb.gmra.mxu3 %v7534_v59  ;;  %v1870_v55 = vpop.f32.mrf.mxu2  ;;  %v15542_v59 = vld [vmem:[#allocation103_spill] sm:$0xff] }
 0x3b6   : > { %15529 = vst [vmem:[#allocation98_spill] sm:$0xff] %v10964_v3  ;;  %v4221_v57 = vsel %vm10977_vm11, %v10823_v7, %v4217_v27  ;;  %v4322_v46 = vadd.f32 %v10872_v16, %v4321_v9  ;;  %vm4324_vm13 = vweird.f32 %v10872_v16  ;;  %v4285_v25 = vor.u32 1.1754944e-38, %v4284_v62  ;;  %vm11014_vm0 = vmor %vm4278_vm3, %vm4279_vm12  ;;  %v5360_v7 = vld [vmem:[%s8044_s6 + $0x3d0] sm:$0xff] }
 0x3b7   : > { %15530 = vst [vmem:[#allocation99_spill] sm:$0xff] %v10966_v44  ;;  %v6799_v44 = vmul.f32 -1.442695, %v15533_v20  ;;  %v10990_v34 = vpop.eup %7145  ;;  %vm11000_vm15 = vcmp.eq.f32.partialorder %v4327_v41, 8.507059e+37  ;;  %v4330_v54 = vor.u32 1.1754944e-38, %v4329_v22  ;;  %v4266_v9 = vsel %vm10996_vm14, %v10853_v18, %v4262_v12  ;;  %vm11033_vm2 = vmor %vm4323_vm6, %vm4324_vm13  ;;  %v1983_v26 = vpop.f32.mrf.mxu3  ;;  %5707 = vmatpush.msra.mxu3 %v5360_v7 }
 0x3b8   : > { %v4342_v27 = vand.u32 2147483647, %v10845_v51  ;;  %v11005_v49 = vpop.eup %7147  ;;  %vm4338_vm1 = vweird.f32 %v10845_v51  ;;  %v11019_v62 = vor.u32 1.1754944e-38, %v4344_v40  ;;  %v4379_v41 = vmul.f32 %v10971_v33, %v10903_v13 }
 0x3b9   : > { %7153 = vpow2.f32 %v6796_v2  ;;  %v7150_v22 = vpop.eup %7149  ;;  %v4226_v18 = vsel %vm10935_vm5, %v10911_v36, %v4221_v57  ;;  %v4281_v5 = vsel %vm11014_vm0, %v10865_v21, %v4277_v6  ;;  %v4336_v12 = vmul.f32 %v10918_v19, %v4335_v0 }
 0x3ba   : > { %v4387_v2 = vand.u32 2147483647, %v10903_v13  ;;  %v4326_v36 = vsel %vm11033_vm2, %v10872_v16, %v4322_v46  ;;  %v4394_v21 = vmul.f32 %v10990_v34, %v10915_v30  ;;  %7155 = vpow2.f32 %v6799_v44  ;;  %v1647_v16 = vpop.f32.mrf.mxu0  ;;  %v1760_v46 = vpop.f32.mrf.mxu1 }
 0x3bb   : > { %v1984_v10 = vadd.f32 %v1983_v26, %v1870_v55  ;;  %v7152_v39 = vpop.eup %7151  ;;  %v4271_v6 = vsel %vm10948_vm7, %v10913_v24, %v4266_v9  ;;  %vm4339_vm3 = vweird.f32 %v10918_v19  ;;  %v4439_v0 = vmul.f32 %v11005_v49, %v10922_v42  ;;  %v7535_v9 = vld [vmem:[%s8030_s15 + $0x10] sm:$0xff]  ;;  %v15546_v26 = vld [vmem:[#allocation104_spill] sm:$0xff] }
 0x3bc   : > { %v6800_v57 = vmul.f32 -1.442695, %v15542_v59  ;;  %vm11051_vm4 = vcmp.eq.f32.partialorder %v4342_v27, 8.507059e+37  ;;  %v4380_v44 = vsub.f32 1.0, %v4379_v41  ;;  %v11055_v38 = vadd.f32 1.0, %v7150_v22  ;;  %2053 = vmatmul.f32.gmra.mxu0 %v7535_v9  ;;  %v7536_v22 = vld [vmem:[%s8030_s15 + $0x18] sm:$0xff]  ;;  %2279 = vmatmul.f32.gmra.mxu2 %v7535_v9  ;;  %vm11096_vm7 = vmor %vm4338_vm1, %vm4339_vm3 }
 0x3bd   : > { %v11058_v31 = vmul.f32 %v10711_v53, %v1984_v10  ;;  %v1761_v24 = vadd.f32 %v1760_v46, %v1647_v16  ;;  %v4286_v40 = vsel %vm10958_vm9, %v4285_v25, %v4281_v5  ;;  %v4331_v27 = vsel %vm11000_vm15, %v4330_v54, %v4326_v36  ;;  %2166 = vmatmul.f32.gmra.mxu1 %v7536_v22  ;;  %v5328_v25 = vld [vmem:[%s8044_s6 + $0x2d0] sm:$0xff] }
 0x3be   : > { %v4389_v55 = vand.u32 2147483648, %v10903_v13  ;;  %v6803_v41 = vmul.f32 -1.442695, %v15546_v26  ;;  %v4337_v53 = vadd.f32 %v10918_v19, %v4336_v12  ;;  %vm4383_vm5 = vweird.f32 %v10903_v13  ;;  %2392 = vmatmul.f32.gmra.mxu3 %v7536_v22  ;;  %5594 = vmatpush.msra.mxu2 %v5328_v25  ;;  %v5296_v22 = vld [vmem:[%s8044_s6 + $0x1d0] sm:$0xff] }
 0x3bf   : > { %15545 = vst [vmem:[#allocation100_spill] sm:$0xff] %v11058_v31  ;;  %v7154_v3 = vpop.eup %7153  ;;  %v4395_v10 = vsub.f32 1.0, %v4394_v21  ;;  %v11070_v16 = vadd.f32 1.0, %v7152_v39  ;;  %v11073_v61 = vmul.f32 %v10734_v37, %v1761_v24  ;;  %v11078_v54 = vmul.f32 %v4226_v18, %v15474_v47  ;;  %v1873_v39 = vpop.f32.mrf.mxu2  ;;  %v15553_v25 = vld [vmem:[#allocation105_spill] sm:$0xff]  ;;  %5481 = vmatpush.msra.mxu1 %v5296_v22 }
 0x3c0   : > { %v11081_v5 = vmul.f32 %v4271_v6, %v15483_v23  ;;  %v4440_v36 = vsub.f32 1.0, %v4439_v0  ;;  %7157 = vpow2.f32 %v6800_v57  ;;  %v7156_v12 = vpop.eup %7155  ;;  %v11084_v21 = vmul.f32 %v4286_v40, %v15484_v56  ;;  %v1986_v6 = vpop.f32.mrf.mxu3 }
 0x3c1   : > { %15547 = vst [vmem:[#allocation101_spill] sm:$0xff] %v11073_v61  ;;  %v4381_v37 = vmul.f32 %v10971_v33, %v4380_v44  ;;  %vm4384_vm6 = vweird.f32 %v10971_v33  ;;  %7159 = vrcp.f32 %v11055_v38  ;;  %v11090_v47 = vmul.f32 %v4331_v27, %v15485_v58 }
 0x3c2   : > { %v11100_v18 = vor.u32 1.1754944e-38, %v4389_v55  ;;  %v11102_v56 = vadd.f32 1.0, %v7154_v3  ;;  %7161 = vpow2.f32 %v6803_v41  ;;  %v4341_v58 = vsel %vm11096_vm7, %v10918_v19, %v4337_v53  ;;  %v1650_v19 = vpop.f32.mrf.mxu0  ;;  %v7537_v55 = vld [vmem:[%s8030_s15 + $0x20] sm:$0xff]  ;;  %v5264_v41 = vld [vmem:[%s8044_s6 + $0xd0] sm:$0xff]  ;;  %vm11145_vm13 = vmor %vm4383_vm5, %vm4384_vm6 }
 0x3c3   : > { %vm11107_vm8 = vcmp.eq.f32.partialorder %v4387_v2, 8.507059e+37  ;;  %v4396_v51 = vmul.f32 %v10990_v34, %v4395_v10  ;;  %7163 = vrcp.f32 %v11070_v16  ;;  %v1987_v3 = vadd.f32 %v1986_v6, %v1873_v39  ;;  %v1763_v2 = vpop.f32.mrf.mxu1  ;;  %5368 = vmatpush.msra.mxu0 %v5264_v41 }
 0x3c4   : > { %vm4398_vm9 = vweird.f32 %v10915_v30  ;;  %v4402_v57 = vand.u32 2147483647, %v10915_v30  ;;  %v4441_v46 = vmul.f32 %v11005_v49, %v4440_v36  ;;  %v11116_v44 = vadd.f32 1.0, %v7156_v12  ;;  %2056 = vmatmul.f32.gmra.mxu0 %v7537_v55  ;;  %v7538_v36 = vld [vmem:[%s8030_s15 + $0x28] sm:$0xff]  ;;  %2282 = vmatmul.f32.gmra.mxu2 %v7537_v55 }
 0x3c5   : > { %v4382_v24 = vadd.f32 %v10971_v33, %v4381_v37  ;;  %v4404_v9 = vand.u32 2147483648, %v10915_v30  ;;  %v11121_v40 = vmul.f32 %v10743_v32, %v1987_v3  ;;  %v1764_v27 = vadd.f32 %v1763_v2, %v1650_v19  ;;  %2169 = vmatmul.f32.gmra.mxu1 %v7538_v36  ;;  %v15559_v3 = vld [vmem:[#allocation106_spill] sm:$0xff]  ;;  %v15569_v30 = vld [vmem:[#allocation108_spill] sm:$0xff] }
 0x3c6   : > { %v7158_v53 = vpop.eup %7157  ;;  %v4346_v10 = vsel %vm11051_vm4, %v11019_v62, %v4341_v58  ;;  %vm4443_vm11 = vweird.f32 %v10922_v42  ;;  %7165 = vrcp.f32 %v11102_v56  ;;  %v6804_v7 = vmul.f32 -1.442695, %v15553_v25  ;;  %2395 = vmatmul.f32.gmra.mxu3 %v7538_v36 }
 0x3c7   : > { %15552 = vst [vmem:[#allocation102_spill] sm:$0xff] %v11121_v40  ;;  %v11133_v32 = vpop.eup %7159  ;;  %v4397_v12 = vadd.f32 %v10990_v34, %v4396_v51  ;;  %vm4399_vm12 = vweird.f32 %v10990_v34  ;;  %v4447_v37 = vand.u32 2147483647, %v10922_v42  ;;  %v11139_v14 = vmul.f32 %v10749_v29, %v1764_v27  ;;  %v5326_v51 = vld [vmem:[%s8044_s6 + $0x2c0] sm:$0xff] }
 0x3c8   : > { %v7162_v62 = vpop.eup %7161  ;;  %v4442_v39 = vadd.f32 %v11005_v49, %v4441_v46  ;;  %vm4444_vm14 = vweird.f32 %v11005_v49  ;;  %v4449_v6 = vand.u32 2147483648, %v10922_v42  ;;  %7167 = vrcp.f32 %v11116_v44  ;;  %vm11170_vm0 = vmor %vm4398_vm9, %vm4399_vm12  ;;  %5595 = vmatpush.msra.mxu2 %v5326_v51 }
 0x3c9   : > { %15554 = vst [vmem:[#allocation103_spill] sm:$0xff] %v11139_v14  ;;  %v11153_v29 = vpop.eup %7163  ;;  %v11156_v58 = vmul.f32 %v4346_v10, %v15498_v48  ;;  %v4386_v13 = vsel %vm11145_vm13, %v10971_v33, %v4382_v24  ;;  %vm11161_vm15 = vcmp.eq.f32.partialorder %v4402_v57, 8.507059e+37  ;;  %v6807_v46 = vmul.f32 -1.442695, %v15559_v3  ;;  %v1876_v33 = vpop.f32.mrf.mxu2  ;;  %vm11185_vm1 = vmor %vm4443_vm11, %vm4444_vm14 }
 0x3ca   : > { %v4405_v48 = vor.u32 1.1754944e-38, %v4404_v9  ;;  %v4454_v2 = vmul.f32 %v11133_v32, %v11055_v38  ;;  %v11176_v27 = vadd.f32 1.0, %v7158_v53  ;;  %7169 = vpow2.f32 %v6804_v7  ;;  %v1989_v57 = vpop.f32.mrf.mxu3  ;;  %v1653_v7 = vpop.f32.mrf.mxu0 }
 0x3cb   : > { %v4401_v24 = vsel %vm11170_vm0, %v10990_v34, %v4397_v12  ;;  %vm11189_vm2 = vcmp.eq.f32.partialorder %v4447_v37, 8.507059e+37  ;;  %v11193_v55 = vadd.f32 1.0, %v7162_v62  ;;  %v1990_v41 = vadd.f32 %v1989_v57, %v1876_v33  ;;  %v1766_v36 = vpop.f32.mrf.mxu1  ;;  %v15566_v12 = vld [vmem:[#allocation107_spill] sm:$0xff] }
 0x3cc   : > { %v11195_v22 = vpop.eup %7165  ;;  %v4391_v34 = vsel %vm11107_vm8, %v11100_v18, %v4386_v13  ;;  %v4446_v42 = vsel %vm11185_vm1, %v11005_v49, %v4442_v39  ;;  %v4450_v53 = vor.u32 1.1754944e-38, %v4449_v6  ;;  %v4499_v10 = vmul.f32 %v11153_v29, %v11070_v16  ;;  %v7539_v18 = vld [vmem:[%s8030_s15 + $0x30] sm:$0xff]  ;;  %v7540_v13 = vld [vmem:[%s8030_s15 + $0x38] sm:$0xff] }
 0x3cd   : > { %7171 = vpow2.f32 %v6807_v46  ;;  %v6808_v37 = vmul.f32 -1.442695, %v15566_v12  ;;  %v11207_v62 = vmul.f32 %v10876_v15, %v1990_v41  ;;  %v1767_v23 = vadd.f32 %v1766_v36, %v1653_v7  ;;  %2059 = vmatmul.f32.gmra.mxu0 %v7539_v18  ;;  %2172 = vmatmul.f32.gmra.mxu1 %v7540_v13 }
 0x3ce   : > { %v11210_v0 = vpop.eup %7167  ;;  %v4406_v49 = vsel %vm11161_vm15, %v4405_v48, %v4401_v24  ;;  %v4455_v39 = vsub.f32 1.0, %v4454_v2  ;;  %v4464_v6 = vand.u32 2147483648, %v11055_v38  ;;  %7173 = vrcp.f32 %v11176_v27  ;;  %2285 = vmatmul.f32.gmra.mxu2 %v7539_v18  ;;  %2398 = vmatmul.f32.gmra.mxu3 %v7540_v13  ;;  %v5358_v48 = vld [vmem:[%s8044_s6 + $0x3c0] sm:$0xff] }
 0x3cf   : > { %15567 = vst [vmem:[#allocation104_spill] sm:$0xff] %v11207_v62  ;;  %v4451_v15 = vsel %vm11189_vm2, %v4450_v53, %v4446_v42  ;;  %v4514_v46 = vmul.f32 %v11195_v22, %v11102_v56  ;;  %7175 = vrcp.f32 %v11193_v55  ;;  %v11223_v19 = vmul.f32 %v10885_v11, %v1767_v23  ;;  %5708 = vmatpush.msra.mxu3 %v5358_v48 }
 0x3d0   : > { %v7170_v2 = vpop.eup %7169  ;;  %v11228_v33 = vmul.f32 %v4391_v34, %v15504_v8  ;;  %v4500_v57 = vsub.f32 1.0, %v4499_v10  ;;  %v4509_v24 = vand.u32 2147483648, %v11070_v16  ;;  %v6811_v9 = vmul.f32 -1.442695, %v15569_v30 }
 0x3d1   : > { %15568 = vst [vmem:[#allocation105_spill] sm:$0xff] %v11223_v19  ;;  %v11233_v41 = vmul.f32 %v4406_v49, %v15506_v50  ;;  %vm4458_vm3 = vweird.f32 %v11055_v38  ;;  %v4462_v11 = vand.u32 2147483647, %v11055_v38  ;;  %v4559_v42 = vmul.f32 %v11210_v0, %v11116_v44  ;;  %v1879_v50 = vpop.f32.mrf.mxu2  ;;  %v5294_v19 = vld [vmem:[%s8044_s6 + $0x1c0] sm:$0xff] }
 0x3d2   : > { %v11240_v8 = vmul.f32 %v4451_v15, %v15509_v35  ;;  %v4456_v34 = vmul.f32 %v11133_v32, %v4455_v39  ;;  %v11243_v53 = vor.u32 1.1754944e-38, %v4464_v6  ;;  %vm4503_vm4 = vweird.f32 %v11070_v16  ;;  %v1992_v7 = vpop.f32.mrf.mxu3  ;;  %v1656_v51 = vpop.f32.mrf.mxu0  ;;  %5482 = vmatpush.msra.mxu1 %v5294_v19 }
 0x3d3   : > { %v4507_v10 = vand.u32 2147483647, %v11070_v16  ;;  %v7172_v36 = vpop.eup %7171  ;;  %v4515_v23 = vsub.f32 1.0, %v4514_v46  ;;  %v11247_v18 = vadd.f32 1.0, %v7170_v2  ;;  %7177 = vpow2.f32 %v6808_v37  ;;  %v1769_v48 = vpop.f32.mrf.mxu1 }
 0x3d4   : > { %v1993_v49 = vadd.f32 %v1992_v7, %v1879_v50  ;;  %v11249_v13 = vpop.eup %7173  ;;  %v4501_v35 = vmul.f32 %v11153_v29, %v4500_v57  ;;  %v11252_v39 = vor.u32 1.1754944e-38, %v4509_v24  ;;  %v4522_v6 = vand.u32 2147483647, %v11102_v56  ;;  %v7541_v50 = vld [vmem:[%s8030_s15 + $0x40] sm:$0xff] }
 0x3d5   : > { %v4524_v15 = vand.u32 2147483648, %v11102_v56  ;;  %v11256_v46 = vpop.eup %7175  ;;  %vm4459_vm5 = vweird.f32 %v11133_v32  ;;  %vm11259_vm6 = vcmp.eq.f32.partialorder %v4462_v11, 8.507059e+37  ;;  %vm4518_vm7 = vweird.f32 %v11102_v56  ;;  %2062 = vmatmul.f32.gmra.mxu0 %v7541_v50  ;;  %v5262_v7 = vld [vmem:[%s8044_s6 + $0xc0] sm:$0xff] }
 0x3d6   : > { %v4560_v2 = vsub.f32 1.0, %v4559_v42  ;;  %v11265_v57 = vmul.f32 %v10892_v4, %v1993_v49  ;;  %v1770_v24 = vadd.f32 %v1769_v48, %v1656_v51  ;;  %v4457_v62 = vadd.f32 %v11133_v32, %v4456_v34  ;;  %v7542_v42 = vld [vmem:[%s8030_s15 + $0x48] sm:$0xff]  ;;  %5369 = vmatpush.msra.mxu0 %v5262_v7  ;;  %2288 = vmatmul.f32.gmra.mxu2 %v7541_v50  ;;  %v15576_v51 = vld [vmem:[#allocation109_spill] sm:$0xff]  ;;  %vm11301_vm12 = vmor %vm4458_vm3, %vm4459_vm5 }
 0x3d7   : > { %vm4504_vm8 = vweird.f32 %v11153_v29  ;;  %vm11272_vm9 = vcmp.eq.f32.partialorder %v4507_v10, 8.507059e+37  ;;  %v4567_v14 = vand.u32 2147483647, %v11116_v44  ;;  %v11277_v40 = vadd.f32 1.0, %v7172_v36  ;;  %2175 = vmatmul.f32.gmra.mxu1 %v7542_v42  ;;  %2401 = vmatmul.f32.gmra.mxu3 %v7542_v42  ;;  %v5292_v50 = vld [vmem:[%s8044_s6 + $0x1b0] sm:$0xff] }
 0x3d8   : > { %15572 = vst [vmem:[#allocation106_spill] sm:$0xff] %v11265_v57  ;;  %v4516_v4 = vmul.f32 %v11195_v22, %v4515_v23  ;;  %vm4563_vm11 = vweird.f32 %v11116_v44  ;;  %v4574_v34 = vmul.f32 %v11249_v13, %v11176_v27  ;;  %7179 = vrcp.f32 %v11247_v18  ;;  %vm11320_vm0 = vmor %vm4503_vm4, %vm4504_vm8  ;;  %5483 = vmatpush.msra.mxu1 %v5292_v50 }
 0x3d9   : > { %v11286_v10 = vmul.f32 %v10897_v45, %v1770_v24  ;;  %v4502_v36 = vadd.f32 %v11153_v29, %v4501_v35  ;;  %v4619_v49 = vmul.f32 %v11256_v46, %v11193_v55  ;;  %7181 = vpow2.f32 %v6811_v9  ;;  %v7178_v48 = vpop.eup %7177 }
 0x3da   : > { %v6812_v23 = vmul.f32 -1.442695, %v15576_v51  ;;  %v11292_v7 = vor.u32 1.1754944e-38, %v4524_v15  ;;  %v4561_v57 = vmul.f32 %v11210_v0, %v4560_v2  ;;  %v4569_v61 = vand.u32 2147483648, %v11116_v44  ;;  %v1882_v15 = vpop.f32.mrf.mxu2  ;;  %v1995_v2 = vpop.f32.mrf.mxu3 }
 0x3db   : > { %15575 = vst [vmem:[#allocation107_spill] sm:$0xff] %v11286_v10  ;;  %v4582_v45 = vand.u32 2147483647, %v11176_v27  ;;  %vm4519_vm13 = vweird.f32 %v11195_v22  ;;  %vm11306_vm14 = vcmp.eq.f32.partialorder %v4522_v6, 8.507059e+37  ;;  %vm4564_vm15 = vweird.f32 %v11210_v0  ;;  %v1659_v16 = vpop.f32.mrf.mxu0  ;;  %v1772_v31 = vpop.f32.mrf.mxu1  ;;  %v15592_v6 = vld [vmem:[#allocation111_spill] sm:$0xff] }
 0x3dc   : > { %v4584_v9 = vand.u32 2147483648, %v11176_v27  ;;  %7183 = vrcp.f32 %v11277_v40  ;;  %v4461_v38 = vsel %vm11301_vm12, %v11133_v32, %v4457_v62  ;;  %v4517_v24 = vadd.f32 %v11195_v22, %v4516_v4  ;;  %v15585_v4 = vld [vmem:[#allocation110_spill] sm:$0xff]  ;;  %vm11352_vm3 = vmor %vm4518_vm7, %vm4519_vm13 }
 0x3dd   : > { %vm11325_vm1 = vcmp.eq.f32.partialorder %v4567_v14, 8.507059e+37  ;;  %v4575_v42 = vsub.f32 1.0, %v4574_v34  ;;  %v1996_v10 = vadd.f32 %v1995_v2, %v1882_v15  ;;  %v4506_v32 = vsel %vm11320_vm0, %v11153_v29, %v4502_v36  ;;  %v7543_v29 = vld [vmem:[%s8030_s15 + $0x50] sm:$0xff]  ;;  %vm11377_vm5 = vmor %vm4563_vm11, %vm4564_vm15 }
 0x3de   : > { %v4620_v62 = vsub.f32 1.0, %v4619_v49  ;;  %v11332_v35 = vadd.f32 1.0, %v7178_v48  ;;  %7185 = vpow2.f32 %v6812_v23  ;;  %v11334_v1 = vpop.eup %7179  ;;  %v4562_v14 = vadd.f32 %v11210_v0, %v4561_v57  ;;  %2065 = vmatmul.f32.gmra.mxu0 %v7543_v29  ;;  %v7544_v23 = vld [vmem:[%s8030_s15 + $0x58] sm:$0xff]  ;;  %2291 = vmatmul.f32.gmra.mxu2 %v7543_v29  ;;  %v5324_v48 = vld [vmem:[%s8044_s6 + $0x2b0] sm:$0xff] }
 0x3df   : > { %vm4578_vm2 = vweird.f32 %v11176_v27  ;;  %v6815_v34 = vmul.f32 -1.442695, %v15585_v4  ;;  %v11340_v15 = vmul.f32 %v10900_v52, %v1996_v10  ;;  %v11342_v2 = vadd.f32 %v1772_v31, %v1659_v16  ;;  %v7182_v36 = vpop.eup %7181  ;;  %2178 = vmatmul.f32.gmra.mxu1 %v7544_v23  ;;  %2404 = vmatmul.f32.gmra.mxu3 %v7544_v23 }
 0x3e0   : > { %v4466_v49 = vsel %vm11259_vm6, %v11243_v53, %v4461_v38  ;;  %v4570_v52 = vor.u32 1.1754944e-38, %v4569_v61  ;;  %v11356_v31 = vor.u32 1.1754944e-38, %v4584_v9  ;;  %v4627_v10 = vand.u32 2147483647, %v11193_v55  ;;  %v5356_v9 = vld [vmem:[%s8044_s6 + $0x3b0] sm:$0xff]  ;;  %5596 = vmatpush.msra.mxu2 %v5324_v48  ;;  %v7545_v48 = vld [vmem:[%s8030_s15 + $0x60] sm:$0xff] }
 0x3e1   : > { %15586 = vst [vmem:[#allocation108_spill] sm:$0xff] %v11340_v15  ;;  %v4511_v37 = vsel %vm11272_vm9, %v11252_v39, %v4506_v32  ;;  %v4521_v53 = vsel %vm11352_vm3, %v11195_v22, %v4517_v24  ;;  %v4576_v56 = vmul.f32 %v11249_v13, %v4575_v42  ;;  %vm4623_vm4 = vweird.f32 %v11193_v55  ;;  %5709 = vmatpush.msra.mxu3 %v5356_v9  ;;  %v5260_v9 = vld [vmem:[%s8044_s6 + $0xb0] sm:$0xff] }
 0x3e2   : > { %15587 = vst [vmem:[#allocation109_spill] sm:$0xff] %v11342_v2  ;;  %v4629_v61 = vand.u32 2147483648, %v11193_v55  ;;  %v11371_v38 = vpop.eup %7183  ;;  %v4621_v22 = vmul.f32 %v11256_v46, %v4620_v62  ;;  %v4634_v11 = vmul.f32 %v11334_v1, %v11247_v18  ;;  %7187 = vrcp.f32 %v11332_v35  ;;  %v1998_v57 = vpop.f32.mrf.mxu3  ;;  %5370 = vmatpush.msra.mxu0 %v5260_v9  ;;  %v15605_v55 = vld [vmem:[#allocation114_spill] sm:$0xff] }
 0x3e3   : > { %v6816_v24 = vmul.f32 -1.442695, %v15592_v6  ;;  %v11387_v42 = vmul.f32 %v4466_v49, %v15520_v63  ;;  %v4566_v44 = vsel %vm11377_vm5, %v11210_v0, %v4562_v14  ;;  %vm11392_vm6 = vcmp.eq.f32.partialorder %v4582_v45, 8.507059e+37  ;;  %v1885_v49 = vpop.f32.mrf.mxu2  ;;  %v7556_v2 = vld [vmem:[%s8030_s15 + $0xb8] sm:$0xff] }
 0x3e4   : > { %v11396_v62 = vadd.f32 1.0, %v7182_v36  ;;  %7189 = vpow2.f32 %v6815_v34  ;;  %v7186_v16 = vpop.eup %7185  ;;  %v11399_v29 = vmul.f32 %v4511_v37, %v15523_v43  ;;  %vm4579_vm7 = vweird.f32 %v11249_v13  ;;  %v1775_v37 = vpop.f32.mrf.mxu1 }
 0x3e5   : > { %vm4624_vm8 = vweird.f32 %v11256_v46  ;;  %v4644_v63 = vand.u32 2147483648, %v11247_v18  ;;  %v4526_v0 = vsel %vm11306_vm14, %v11292_v7, %v4521_v53  ;;  %v4577_v45 = vadd.f32 %v11249_v13, %v4576_v56  ;;  %v1662_v7 = vpop.f32.mrf.mxu0  ;;  %vm11432_vm11 = vmor %vm4578_vm2, %vm4579_vm7 }
 0x3e6   : > { %vm11408_vm9 = vcmp.eq.f32.partialorder %v4627_v10, 8.507059e+37  ;;  %v4679_v43 = vmul.f32 %v11371_v38, %v11277_v40  ;;  %v1999_v34 = vadd.f32 %v1998_v57, %v1885_v49  ;;  %v4571_v36 = vsel %vm11325_vm1, %v4570_v52, %v4566_v44  ;;  %2068 = vmatmul.f32.gmra.mxu0 %v7545_v48  ;;  %v7546_v44 = vld [vmem:[%s8030_s15 + $0x68] sm:$0xff]  ;;  %2294 = vmatmul.f32.gmra.mxu2 %v7545_v48  ;;  %vm11456_vm13 = vmor %vm4623_vm4, %vm4624_vm8 }
 0x3e7   : > { %v4622_v23 = vadd.f32 %v11256_v46, %v4621_v22  ;;  %v4635_v19 = vsub.f32 1.0, %v4634_v11  ;;  %7191 = vpow2.f32 %v6816_v24  ;;  %v11418_v10 = vadd.f32 1.0, %v7186_v16  ;;  %v15600_v11 = vld [vmem:[#allocation112_spill] sm:$0xff]  ;;  %2181 = vmatmul.f32.gmra.mxu1 %v7546_v44  ;;  %2407 = vmatmul.f32.gmra.mxu3 %v7546_v44 }
 0x3e8   : > { %7193 = vrcp.f32 %v11396_v62  ;;  %v11421_v53 = vmul.f32 %v11078_v54, %v1999_v34  ;;  %v1776_v56 = vadd.f32 %v1775_v37, %v1662_v7  ;;  %v11426_v52 = vpop.eup %7187  ;;  %v4630_v22 = vor.u32 1.1754944e-38, %v4629_v61 }
 0x3e9   : > { %vm4638_vm12 = vweird.f32 %v11247_v18  ;;  %v4642_v54 = vand.u32 2147483647, %v11247_v18  ;;  %v6819_v24 = vmul.f32 -1.442695, %v15600_v11  ;;  %v11441_v49 = vmul.f32 %v4526_v0, %v15528_v17 }
 0x3ea   : > { %15597 = vst [vmem:[#allocation110_spill] sm:$0xff] %v11421_v53  ;;  %v7190_v16 = vpop.eup %7189  ;;  %v4581_v27 = vsel %vm11432_vm11, %v11249_v13, %v4577_v45  ;;  %v4680_v57 = vsub.f32 1.0, %v4679_v43  ;;  %v11447_v61 = vmul.f32 %v11081_v5, %v1776_v56  ;;  %v11450_v34 = vmul.f32 %v4571_v36, %v15533_v20  ;;  %v15604_v45 = vld [vmem:[#allocation113_spill] sm:$0xff]  ;;  %v7550_v53 = vld [vmem:[%s8030_s15 + $0x88] sm:$0xff] }
 0x3eb   : > { %v4636_v0 = vmul.f32 %v11334_v1, %v4635_v19  ;;  %v11461_v13 = vor.u32 1.1754944e-38, %v4644_v63  ;;  %v6820_v5 = vmul.f32 -1.442695, %v15604_v45  ;;  %v4626_v20 = vsel %vm11456_vm13, %v11256_v46, %v4622_v23  ;;  %v1888_v46 = vpop.f32.mrf.mxu2  ;;  %v2001_v23 = vpop.f32.mrf.mxu3 }
 0x3ec   : > { %15601 = vst [vmem:[#allocation111_spill] sm:$0xff] %v11447_v61  ;;  %v4694_v43 = vmul.f32 %v11426_v52, %v11332_v35  ;;  %7195 = vrcp.f32 %v11418_v10  ;;  %v6697_v36 = vmul.f32 -1.442695, %v15605_v55  ;;  %v4586_v63 = vsel %vm11392_vm6, %v11356_v31, %v4581_v27 }
 0x3ed   : > { %v7192_v7 = vpop.eup %7191  ;;  %vm11474_vm14 = vcmp.eq.f32.partialorder %v4642_v54, 8.507059e+37  ;;  %vm4683_vm15 = vweird.f32 %v11277_v40  ;;  %v11479_v37 = vadd.f32 1.0, %v7190_v16  ;;  %7197 = vpow2.f32 %v6819_v24  ;;  %v1665_v54 = vpop.f32.mrf.mxu0 }
 0x3ee   : > { %v11481_v56 = vpop.eup %7193  ;;  %v4681_v48 = vmul.f32 %v11371_v38, %v4680_v57  ;;  %v4687_v9 = vand.u32 2147483647, %v11277_v40  ;;  %v4689_v31 = vand.u32 2147483648, %v11277_v40  ;;  %v2002_v32 = vadd.f32 %v2001_v23, %v1888_v46  ;;  %v1778_v24 = vpop.f32.mrf.mxu1  ;;  %v7547_v57 = vld [vmem:[%s8030_s15 + $0x70] sm:$0xff]  ;;  %v5354_v46 = vld [vmem:[%s8044_s6 + $0x3a0] sm:$0xff] }
 0x3ef   : > { %v4631_v50 = vsel %vm11408_vm9, %v4630_v22, %v4626_v20  ;;  %v4637_v39 = vadd.f32 %v11334_v1, %v4636_v0  ;;  %vm4639_vm0 = vweird.f32 %v11334_v1  ;;  %7199 = vpow2.f32 %v6820_v5  ;;  %2071 = vmatmul.f32.gmra.mxu0 %v7547_v57  ;;  %v7548_v0 = vld [vmem:[%s8030_s15 + $0x78] sm:$0xff]  ;;  %2297 = vmatmul.f32.gmra.mxu2 %v7547_v57 }
 0x3f0   : > { %v4695_v44 = vsub.f32 1.0, %v4694_v43  ;;  %7201 = vpow2.f32 %v6697_v36  ;;  %v11491_v16 = vmul.f32 %v11084_v21, %v2002_v32  ;;  %v1779_v27 = vadd.f32 %v1778_v24, %v1665_v54  ;;  %2184 = vmatmul.f32.gmra.mxu1 %v7548_v0  ;;  %vm11507_vm1 = vmor %vm4638_vm12, %vm4639_vm0  ;;  %2410 = vmatmul.f32.gmra.mxu3 %v7548_v0  ;;  %v15614_v54 = vld [vmem:[#allocation115_spill] sm:$0xff] }
 0x3f1   : > { %v4704_v14 = vand.u32 2147483648, %v11332_v35  ;;  %v4739_v22 = vmul.f32 %v11481_v56, %v11396_v62  ;;  %7203 = vrcp.f32 %v11479_v37  ;;  %v11498_v17 = vadd.f32 1.0, %v7192_v7  ;;  %v5322_v7 = vld [vmem:[%s8044_s6 + $0x2a0] sm:$0xff]  ;;  %5710 = vmatpush.msra.mxu3 %v5354_v46 }
 0x3f2   : > { %15608 = vst [vmem:[#allocation112_spill] sm:$0xff] %v11491_v16  ;;  %v11501_v5 = vpop.eup %7195  ;;  %v4682_v20 = vadd.f32 %v11371_v38, %v4681_v48  ;;  %vm4684_vm2 = vweird.f32 %v11371_v38  ;;  %v4702_v43 = vand.u32 2147483647, %v11332_v35  ;;  %v11515_v36 = vmul.f32 %v11090_v47, %v1779_v27  ;;  %5597 = vmatpush.msra.mxu2 %v5322_v7  ;;  %v15619_v7 = vld [vmem:[#allocation116_spill] sm:$0xff] }
 0x3f3   : > { %v7198_v23 = vpop.eup %7197  ;;  %v11520_v18 = vmul.f32 %v4586_v63, %v15542_v59  ;;  %v4641_v32 = vsel %vm11507_vm1, %v11334_v1, %v4637_v39  ;;  %vm11525_vm3 = vcmp.eq.f32.partialorder %v4687_v9, 8.507059e+37  ;;  %v6698_v24 = vmul.f32 -1.442695, %v15614_v54  ;;  %vm11539_vm5 = vmor %vm4683_vm15, %vm4684_vm2  ;;  %v7549_v1 = vld [vmem:[%s8030_s15 + $0x80] sm:$0xff] }
 0x3f4   : > { %15611 = vst [vmem:[#allocation113_spill] sm:$0xff] %v11515_v36  ;;  %v11531_v47 = vmul.f32 %v4631_v50, %v15546_v26  ;;  %v4690_v27 = vor.u32 1.1754944e-38, %v4689_v31  ;;  %v4696_v57 = vmul.f32 %v11426_v52, %v4695_v44  ;;  %vm4698_vm4 = vweird.f32 %v11332_v35  ;;  %v1891_v31 = vpop.f32.mrf.mxu2  ;;  %v2004_v50 = vpop.f32.mrf.mxu3 }
 0x3f5   : > { %v7200_v59 = vpop.eup %7199  ;;  %v11543_v63 = vor.u32 1.1754944e-38, %v4704_v14  ;;  %v4740_v9 = vsub.f32 1.0, %v4739_v22  ;;  %v4754_v26 = vmul.f32 %v11501_v5, %v11418_v10  ;;  %7205 = vrcp.f32 %v11498_v17 }
 0x3f6   : > { %v7202_v39 = vpop.eup %7201  ;;  %v4646_v44 = vsel %vm11474_vm14, %v11461_v13, %v4641_v32  ;;  %v4686_v40 = vsel %vm11539_vm5, %v11371_v38, %v4682_v20  ;;  %vm11554_vm6 = vcmp.eq.f32.partialorder %v4702_v43, 8.507059e+37  ;;  %v11558_v22 = vadd.f32 1.0, %v7198_v23  ;;  %v1668_v38 = vpop.f32.mrf.mxu0 }
 0x3f7   : > { %v2005_v0 = vadd.f32 %v2004_v50, %v1891_v31  ;;  %v11560_v21 = vpop.eup %7203  ;;  %vm4699_vm7 = vweird.f32 %v11426_v52  ;;  %v4747_v13 = vand.u32 2147483647, %v11396_v62  ;;  %v4749_v19 = vand.u32 2147483648, %v11396_v62  ;;  %v1781_v20 = vpop.f32.mrf.mxu1  ;;  %2074 = vmatmul.f32.gmra.mxu0 %v7549_v1  ;;  %v5258_v31 = vld [vmem:[%s8044_s6 + $0xa0] sm:$0xff]  ;;  %2300 = vmatmul.f32.gmra.mxu2 %v7549_v1 }
 0x3f8   : > { %7207 = vpow2.f32 %v6698_v24  ;;  %v4697_v43 = vadd.f32 %v11426_v52, %v4696_v57  ;;  %v6701_v46 = vmul.f32 -1.442695, %v15619_v7  ;;  %v1782_v32 = vadd.f32 %v1781_v20, %v1668_v38  ;;  %v5290_v50 = vld [vmem:[%s8044_s6 + $0x1a0] sm:$0xff]  ;;  %2187 = vmatmul.f32.gmra.mxu1 %v7550_v53  ;;  %5371 = vmatpush.msra.mxu0 %v5258_v31  ;;  %vm11596_vm8 = vmor %vm4698_vm4, %vm4699_vm7 }
 0x3f9   : > { %v11568_v23 = vmul.f32 %v11156_v58, %v2005_v0  ;;  %v4691_v36 = vsel %vm11525_vm3, %v4690_v27, %v4686_v40  ;;  %v4741_v16 = vmul.f32 %v11481_v56, %v4740_v9  ;;  %v4755_v24 = vsub.f32 1.0, %v4754_v26  ;;  %2413 = vmatmul.f32.gmra.mxu3 %v7550_v53  ;;  %5484 = vmatpush.msra.mxu1 %v5290_v50 }
 0x3fa   : > { %v11576_v61 = vadd.f32 1.0, %v7200_v59  ;;  %v4799_v58 = vmul.f32 %v11560_v21, %v11479_v37  ;;  %7209 = vrcp.f32 %v11558_v22  ;;  %v11582_v57 = vadd.f32 1.0, %v7202_v39 }
 0x3fb   : > { %15620 = vst [vmem:[#allocation114_spill] sm:$0xff] %v11568_v23  ;;  %v11585_v0 = vmul.f32 %v11228_v33, %v1782_v32  ;;  %v11587_v48 = vpop.eup %7205  ;;  %v11590_v27 = vmul.f32 %v4646_v44, %v15553_v25  ;;  %vm4743_vm9 = vweird.f32 %v11396_v62  ;;  %v11601_v9 = vor.u32 1.1754944e-38, %v4749_v19 }
 0x3fc   : > { %v4764_v33 = vand.u32 2147483648, %v11418_v10  ;;  %v11605_v53 = vmul.f32 %v4691_v36, %v15559_v3  ;;  %v4701_v25 = vsel %vm11596_vm8, %v11426_v52, %v4697_v43  ;;  %vm11610_vm11 = vcmp.eq.f32.partialorder %v4747_v13, 8.507059e+37  ;;  %v1894_v3 = vpop.f32.mrf.mxu2  ;;  %v2007_v36 = vpop.f32.mrf.mxu3 }
 0x3fd   : > { %15621 = vst [vmem:[#allocation115_spill] sm:$0xff] %v11585_v0  ;;  %v4762_v26 = vand.u32 2147483647, %v11418_v10  ;;  %7211 = vpow2.f32 %v6701_v46  ;;  %v4742_v44 = vadd.f32 %v11481_v56, %v4741_v16  ;;  %vm4744_vm12 = vweird.f32 %v11481_v56 }
 0x3fe   : > { %v7208_v39 = vpop.eup %7207  ;;  %v4756_v40 = vmul.f32 %v11501_v5, %v4755_v24  ;;  %7213 = vrcp.f32 %v11576_v61  ;;  %v4800_v19 = vsub.f32 1.0, %v4799_v58  ;;  %v4814_v52 = vmul.f32 %v11587_v48, %v11498_v17  ;;  %v1671_v43 = vpop.f32.mrf.mxu0  ;;  %vm11635_vm14 = vmor %vm4743_vm9, %vm4744_vm12  ;;  %v7551_v58 = vld [vmem:[%s8030_s15 + $0x90] sm:$0xff] }
 0x3ff   : > { %7215 = vrcp.f32 %v11582_v57  ;;  %v2008_v13 = vadd.f32 %v2007_v36, %v1894_v3  ;;  %v4706_v16 = vsel %vm11554_vm6, %v11543_v63, %v4701_v25  ;;  %vm4758_vm13 = vweird.f32 %v11418_v10  ;;  %v1784_v46 = vpop.f32.mrf.mxu1  ;;  %2077 = vmatmul.f32.gmra.mxu0 %v7551_v58  ;;  %2303 = vmatmul.f32.gmra.mxu2 %v7551_v58  ;;  %v5288_v58 = vld [vmem:[%s8044_s6 + $0x190] sm:$0xff] }
 0x400   : > { %v11626_v38 = vor.u32 1.1754944e-38, %v4764_v33  ;;  %v4809_v20 = vand.u32 2147483648, %v11479_v37  ;;  %v11629_v32 = vpop.eup %7209  ;;  %vm11639_vm15 = vcmp.eq.f32.partialorder %v4762_v26, 8.507059e+37  ;;  %v4824_v14 = vand.u32 2147483648, %v11498_v17  ;;  %v7552_v33 = vld [vmem:[%s8030_s15 + $0x98] sm:$0xff]  ;;  %5485 = vmatpush.msra.mxu1 %v5288_v58 }
 0x401   : > { %v11644_v31 = vadd.f32 1.0, %v7208_v39  ;;  %v11647_v50 = vmul.f32 %v11233_v41, %v2008_v13  ;;  %v1785_v24 = vadd.f32 %v1784_v46, %v1671_v43  ;;  %v4746_v62 = vsel %vm11635_vm14, %v11481_v56, %v4742_v44  ;;  %2190 = vmatmul.f32.gmra.mxu1 %v7552_v33  ;;  %2416 = vmatmul.f32.gmra.mxu3 %v7552_v33  ;;  %v5320_v56 = vld [vmem:[%s8044_s6 + $0x290] sm:$0xff]  ;;  %v15632_v46 = vld [vmem:[#allocation39_spill] sm:$0xff] }
 0x402   : > { %vm4759_vm0 = vweird.f32 %v11501_v5  ;;  %vm4803_vm1 = vweird.f32 %v11479_v37  ;;  %v4807_v59 = vand.u32 2147483647, %v11479_v37  ;;  %v4757_v41 = vadd.f32 %v11501_v5, %v4756_v40  ;;  %v5352_v44 = vld [vmem:[%s8044_s6 + $0x390] sm:$0xff]  ;;  %5598 = vmatpush.msra.mxu2 %v5320_v56 }
 0x403   : > { %15630 = vst [vmem:[#allocation116_spill] sm:$0xff] %v11647_v50  ;;  %v7212_v25 = vpop.eup %7211  ;;  %v4801_v26 = vmul.f32 %v11560_v21, %v4800_v19  ;;  %v4815_v39 = vsub.f32 1.0, %v4814_v52  ;;  %v11660_v3 = vmul.f32 %v11240_v8, %v1785_v24  ;;  %v11667_v13 = vmul.f32 %v4706_v16, %v15566_v12  ;;  %5711 = vmatpush.msra.mxu3 %v5352_v44  ;;  %v15633_v12 = vld [vmem:[#allocation43_spill] sm:$0xff]  ;;  %vm11689_vm3 = vmor %vm4758_vm13, %vm4759_vm0 }
 0x404   : > { %v11664_v36 = vpop.eup %7213  ;;  %v4822_v43 = vand.u32 2147483647, %v11498_v17  ;;  %v4859_v40 = vmul.f32 %v11629_v32, %v11558_v22  ;;  %v6702_v19 = vmul.f32 -1.442695, %v15632_v46  ;;  %v11675_v52 = vor.u32 1.1754944e-38, %v4809_v20  ;;  %v1897_v35 = vpop.f32.mrf.mxu2 }
 0x405   : > { %15631 = vst [vmem:[#allocation149_spill] sm:$0xff] %v11660_v3  ;;  %v11673_v8 = vpop.eup %7215  ;;  %vm4818_vm2 = vweird.f32 %v11498_v17  ;;  %v11678_v1 = vor.u32 1.1754944e-38, %v4824_v14  ;;  %7217 = vrcp.f32 %v11644_v31  ;;  %v6705_v16 = vmul.f32 -1.442695, %v15633_v12 }
 0x406   : > { %v4751_v24 = vsel %vm11610_vm11, %v11601_v9, %v4746_v62  ;;  %vm4804_vm4 = vweird.f32 %v11560_v21  ;;  %vm11694_vm5 = vcmp.eq.f32.partialorder %v4807_v59, 8.507059e+37  ;;  %v4869_v14 = vand.u32 2147483648, %v11558_v22  ;;  %v2010_v9 = vpop.f32.mrf.mxu3  ;;  %v1674_v50 = vpop.f32.mrf.mxu0 }
 0x407   : > { %v11699_v33 = vadd.f32 1.0, %v7212_v25  ;;  %v4761_v10 = vsel %vm11689_vm3, %v11501_v5, %v4757_v41  ;;  %v4802_v62 = vadd.f32 %v11560_v21, %v4801_v26  ;;  %v4816_v59 = vmul.f32 %v11587_v48, %v4815_v39  ;;  %v1787_v0 = vpop.f32.mrf.mxu1  ;;  %v7553_v39 = vld [vmem:[%s8030_s15 + $0xa0] sm:$0xff]  ;;  %vm11736_vm8 = vmor %vm4803_vm1, %vm4804_vm4 }
 0x408   : > { %v2011_v56 = vadd.f32 %v2010_v9, %v1897_v35  ;;  %v4860_v44 = vsub.f32 1.0, %v4859_v40  ;;  %v4874_v3 = vmul.f32 %v11664_v36, %v11576_v61  ;;  %v3029_v25 = vmul.f32 %v11673_v8, %v11582_v57  ;;  %2080 = vmatmul.f32.gmra.mxu0 %v7553_v39  ;;  %v5256_v40 = vld [vmem:[%s8044_s6 + $0x90] sm:$0xff]  ;;  %2306 = vmatmul.f32.gmra.mxu2 %v7553_v39 }
 0x409   : > { %7219 = vpow2.f32 %v6702_v19  ;;  %v4867_v5 = vand.u32 2147483647, %v11558_v22  ;;  %v1788_v26 = vadd.f32 %v1787_v0, %v1674_v50  ;;  %v11718_v35 = vmul.f32 %v4751_v24, %v15569_v30  ;;  %5372 = vmatpush.msra.mxu0 %v5256_v40  ;;  %v15643_v50 = vld [vmem:[#allocation44_spill] sm:$0xff] }
 0x40a   : > { %7221 = vpow2.f32 %v6705_v16  ;;  %v11712_v41 = vmul.f32 %v11387_v42, %v2011_v56  ;;  %v4766_v19 = vsel %vm11639_vm15, %v11626_v38, %v4761_v10  ;;  %vm4819_vm6 = vweird.f32 %v11587_v48  ;;  %v7554_v42 = vld [vmem:[%s8030_s15 + $0xa8] sm:$0xff] }
 0x40b   : > { %vm11724_vm7 = vcmp.eq.f32.partialorder %v4822_v43, 8.507059e+37  ;;  %7223 = vrcp.f32 %v11699_v33  ;;  %2193 = vmatmul.f32.gmra.mxu1 %v7554_v42  ;;  %v11730_v0 = vpop.eup %7217  ;;  %v4817_v38 = vadd.f32 %v11587_v48, %v4816_v59  ;;  %vm4863_vm9 = vweird.f32 %v11558_v22  ;;  %2419 = vmatmul.f32.gmra.mxu3 %v7554_v42  ;;  %vm11762_vm11 = vmor %vm4818_vm2, %vm4819_vm6 }
 0x40c   : > { %15638 = vst [vmem:[#allocation39_spill] sm:$0xff] %v11712_v41  ;;  %v11742_v63 = vor.u32 1.1754944e-38, %v4869_v14  ;;  %v6706_v43 = vmul.f32 -1.442695, %v15643_v50  ;;  %v11746_v16 = vmul.f32 %v11399_v29, %v1788_v26  ;;  %v4806_v37 = vsel %vm11736_vm8, %v11560_v21, %v4802_v62  ;;  %v15645_v29 = vld [vmem:[#allocation117_spill] sm:$0xff] }
 0x40d   : > { %v4861_v24 = vmul.f32 %v11629_v32, %v4860_v44  ;;  %v4875_v10 = vsub.f32 1.0, %v4874_v3  ;;  %v3030_v56 = vsub.f32 1.0, %v3029_v25  ;;  %v11753_v59 = vmul.f32 %v4766_v19, %v15576_v51  ;;  %v1900_v44 = vpop.f32.mrf.mxu2 }
 0x40e   : > { %15644 = vst [vmem:[#allocation43_spill] sm:$0xff] %v11746_v16  ;;  %v4882_v14 = vand.u32 2147483647, %v11576_v61  ;;  %v4884_v40 = vand.u32 2147483648, %v11576_v61  ;;  %v6709_v26 = vmul.f32 -1.442695, %v15645_v29  ;;  %vm4864_vm12 = vweird.f32 %v11629_v32  ;;  %v2013_v25 = vpop.f32.mrf.mxu3 }
 0x40f   : > { %v7220_v39 = vpop.eup %7219  ;;  %vm4878_vm13 = vweird.f32 %v11576_v61  ;;  %v3037_v51 = vand.u32 2147483647, %v11582_v57  ;;  %v3039_v3 = vand.u32 2147483648, %v11582_v57  ;;  %v3044_v62 = vmul.f32 %v11730_v0, %v11644_v31  ;;  %vm11819_vm0 = vmor %vm4863_vm9, %vm4864_vm12 }
 0x410   : > { %v7222_v58 = vpop.eup %7221  ;;  %v4811_v17 = vsel %vm11694_vm5, %v11675_v52, %v4806_v37  ;;  %v4821_v19 = vsel %vm11762_vm11, %v11587_v48, %v4817_v38  ;;  %vm11778_vm14 = vcmp.eq.f32.partialorder %v4867_v5, 8.507059e+37  ;;  %vm3033_vm15 = vweird.f32 %v11582_v57  ;;  %v15650_v37 = vld [vmem:[#allocation49_spill] sm:$0xff]  ;;  %v1677_v38 = vpop.f32.mrf.mxu0 }
 0x411   : > { %7225 = vpow2.f32 %v6706_v43  ;;  %v2014_v30 = vadd.f32 %v2013_v25, %v1900_v44  ;;  %v11783_v16 = vpop.eup %7223  ;;  %v4862_v41 = vadd.f32 %v11629_v32, %v4861_v24  ;;  %v4876_v52 = vmul.f32 %v11664_v36, %v4875_v10  ;;  %v1790_v5 = vpop.f32.mrf.mxu1  ;;  %v7555_v44 = vld [vmem:[%s8030_s15 + $0xb0] sm:$0xff] }
 0x412   : > { %v3031_v20 = vmul.f32 %v11673_v8, %v3030_v56  ;;  %v6710_v48 = vmul.f32 -1.442695, %v15650_v37  ;;  %v11789_v21 = vadd.f32 1.0, %v7220_v39  ;;  %7227 = vpow2.f32 %v6709_v26  ;;  %2083 = vmatmul.f32.gmra.mxu0 %v7555_v44  ;;  %2309 = vmatmul.f32.gmra.mxu2 %v7555_v44 }
 0x413   : > { %v11792_v23 = vmul.f32 %v11441_v49, %v2014_v30  ;;  %v1791_v43 = vadd.f32 %v1790_v5, %v1677_v38  ;;  %v11796_v24 = vmul.f32 %v4811_v17, %v15585_v4  ;;  %v11798_v10 = vor.u32 1.1754944e-38, %v4884_v40  ;;  %2196 = vmatmul.f32.gmra.mxu1 %v7556_v2  ;;  %2422 = vmatmul.f32.gmra.mxu3 %v7556_v2  ;;  %v5318_v4 = vld [vmem:[%s8044_s6 + $0x280] sm:$0xff]  ;;  %v15659_v17 = vld [vmem:[#allocation50_spill] sm:$0xff] }
 0x414   : > { %v3045_v56 = vsub.f32 1.0, %v3044_v62  ;;  %v11800_v25 = vadd.f32 1.0, %v7222_v58  ;;  %v4826_v49 = vsel %vm11724_vm7, %v11678_v1, %v4821_v19  ;;  %v11806_v26 = vor.u32 1.1754944e-38, %v3039_v3  ;;  %v5350_v40 = vld [vmem:[%s8044_s6 + $0x380] sm:$0xff]  ;;  %5599 = vmatpush.msra.mxu2 %v5318_v4 }
 0x415   : > { %15651 = vst [vmem:[#allocation44_spill] sm:$0xff] %v11792_v23  ;;  %v3089_v39 = vmul.f32 %v11783_v16, %v11699_v33  ;;  %v11811_v30 = vmul.f32 %v11450_v34, %v1791_v43  ;;  %v11824_v1 = vadd.f32 %v11664_v36, %v4876_v52  ;;  %vm4879_vm1 = vweird.f32 %v11664_v36  ;;  %5712 = vmatpush.msra.mxu3 %v5350_v40  ;;  %v1903_v52 = vpop.f32.mrf.mxu2  ;;  %v7557_v40 = vld [vmem:[%s8030_s15 + $0xc0] sm:$0xff]  ;;  %v7572_v23 = vld [vmem:[%s8030_s15 + $0x138] sm:$0xff] }
 0x416   : > { %vm11827_vm2 = vcmp.eq.f32.partialorder %v4882_v14, 8.507059e+37  ;;  %vm11831_vm3 = vcmp.eq.f32.partialorder %v3037_v51, 8.507059e+37  ;;  %v3052_v9 = vand.u32 2147483647, %v11644_v31  ;;  %7229 = vpow2.f32 %v6710_v48  ;;  %v2016_v48 = vpop.f32.mrf.mxu3  ;;  %vm11852_vm5 = vmor %vm4878_vm13, %vm4879_vm1  ;;  %v5254_v62 = vld [vmem:[%s8044_s6 + $0x80] sm:$0xff] }
 0x417   : > { %15652 = vst [vmem:[#allocation117_spill] sm:$0xff] %v11811_v30  ;;  %v7226_v22 = vpop.eup %7225  ;;  %v4866_v3 = vsel %vm11819_vm0, %v11629_v32, %v4862_v41  ;;  %v3032_v58 = vadd.f32 %v11673_v8, %v3031_v20  ;;  %vm3034_vm4 = vweird.f32 %v11673_v8  ;;  %7231 = vrcp.f32 %v11789_v21  ;;  %5373 = vmatpush.msra.mxu0 %v5254_v62 }
 0x418   : > { %v11843_v14 = vmul.f32 %v4826_v49, %v15592_v6  ;;  %v3046_v51 = vmul.f32 %v11730_v0, %v3045_v56  ;;  %7233 = vrcp.f32 %v11800_v25  ;;  %v6713_v19 = vmul.f32 -1.442695, %v15659_v17  ;;  %v7228_v38 = vpop.eup %7227  ;;  %vm11869_vm7 = vmor %vm3033_vm15, %vm3034_vm4  ;;  %v15666_v49 = vld [vmem:[#allocation118_spill] sm:$0xff] }
 0x419   : > { %vm3048_vm6 = vweird.f32 %v11644_v31  ;;  %v3054_v6 = vand.u32 2147483648, %v11644_v31  ;;  %v3090_v41 = vsub.f32 1.0, %v3089_v39  ;;  %v2017_v20 = vadd.f32 %v2016_v48, %v1903_v52  ;;  %v1793_v42 = vpop.f32.mrf.mxu1  ;;  %v7558_v52 = vld [vmem:[%s8030_s15 + $0xc8] sm:$0xff] }
 0x41a   : > { %v4871_v5 = vsel %vm11778_vm14, %v11742_v63, %v4866_v3  ;;  %v4881_v61 = vsel %vm11852_vm5, %v11664_v36, %v11824_v1  ;;  %vm11873_vm8 = vcmp.eq.f32.partialorder %v3052_v9, 8.507059e+37  ;;  %v11877_v56 = vadd.f32 1.0, %v7226_v22  ;;  %v1680_v63 = vpop.f32.mrf.mxu0  ;;  %2086 = vmatmul.f32.gmra.mxu0 %v7557_v40  ;;  %v5286_v1 = vld [vmem:[%s8044_s6 + $0x180] sm:$0xff]  ;;  %2312 = vmatmul.f32.gmra.mxu2 %v7557_v40 }
 0x41b   : > { %v3036_v36 = vsel %vm11869_vm7, %v11673_v8, %v3032_v58  ;;  %v6714_v39 = vmul.f32 -1.442695, %v15666_v49  ;;  %v11884_v57 = vmul.f32 %v11520_v18, %v2017_v20  ;;  %v1794_v4 = vadd.f32 %v1793_v42, %v1680_v63  ;;  %2199 = vmatmul.f32.gmra.mxu1 %v7558_v52  ;;  %2425 = vmatmul.f32.gmra.mxu3 %v7558_v52  ;;  %v15677_v52 = vld [vmem:[#allocation120_spill] sm:$0xff] }
 0x41c   : > { %v7230_v9 = vpop.eup %7229  ;;  %v3047_v22 = vadd.f32 %v11730_v0, %v3046_v51  ;;  %vm3049_vm9 = vweird.f32 %v11730_v0  ;;  %v11891_v3 = vadd.f32 1.0, %v7228_v38  ;;  %7235 = vpow2.f32 %v6713_v19  ;;  %v15669_v38 = vld [vmem:[#allocation119_spill] sm:$0xff]  ;;  %5486 = vmatpush.msra.mxu1 %v5286_v1  ;;  %v7559_v1 = vld [vmem:[%s8030_s15 + $0xd0] sm:$0xff] }
 0x41d   : > { %15667 = vst [vmem:[#allocation49_spill] sm:$0xff] %v11884_v57  ;;  %v11894_v8 = vpop.eup %7231  ;;  %v11897_v18 = vmul.f32 %v4871_v5, %v15600_v11  ;;  %v3055_v58 = vor.u32 1.1754944e-38, %v3054_v6  ;;  %v3091_v48 = vmul.f32 %v11783_v16, %v3090_v41  ;;  %v11901_v32 = vmul.f32 %v11531_v47, %v1794_v4  ;;  %vm11919_vm12 = vmor %vm3048_vm6, %vm3049_vm9  ;;  %v1906_v2 = vpop.f32.mrf.mxu2  ;;  %v5316_v6 = vld [vmem:[%s8044_s6 + $0x270] sm:$0xff] }
 0x41e   : > { %v11903_v51 = vpop.eup %7233  ;;  %vm3093_vm11 = vweird.f32 %v11699_v33  ;;  %v3097_v19 = vand.u32 2147483647, %v11699_v33  ;;  %7237 = vrcp.f32 %v11877_v56  ;;  %v6717_v20 = vmul.f32 -1.442695, %v15669_v38  ;;  %v2019_v31 = vpop.f32.mrf.mxu3  ;;  %5600 = vmatpush.msra.mxu2 %v5316_v6  ;;  %v5284_v57 = vld [vmem:[%s8044_s6 + $0x170] sm:$0xff] }
 0x41f   : > { %15668 = vst [vmem:[#allocation50_spill] sm:$0xff] %v11901_v32  ;;  %v4886_v11 = vsel %vm11827_vm2, %v11798_v10, %v4881_v61  ;;  %v3041_v47 = vsel %vm11831_vm3, %v11806_v26, %v3036_v36  ;;  %v11923_v41 = vadd.f32 1.0, %v7230_v9  ;;  %7239 = vpow2.f32 %v6714_v39  ;;  %v5252_v32 = vld [vmem:[%s8044_s6 + $0x70] sm:$0xff]  ;;  %5487 = vmatpush.msra.mxu1 %v5284_v57 }
 0x420   : > { %v3051_v34 = vsel %vm11919_vm12, %v11730_v0, %v3047_v22  ;;  %v3099_v10 = vand.u32 2147483648, %v11699_v33  ;;  %v3104_v26 = vmul.f32 %v11894_v8, %v11789_v21  ;;  %7241 = vrcp.f32 %v11891_v3  ;;  %5374 = vmatpush.msra.mxu0 %v5252_v32 }
 0x421   : > { %v3092_v5 = vadd.f32 %v11783_v16, %v3091_v48  ;;  %vm3094_vm13 = vweird.f32 %v11783_v16  ;;  %v3149_v61 = vmul.f32 %v11903_v51, %v11800_v25  ;;  %v2020_v43 = vadd.f32 %v2019_v31, %v1906_v2  ;;  %v1796_v4 = vpop.f32.mrf.mxu1  ;;  %v7560_v48 = vld [vmem:[%s8030_s15 + $0xd8] sm:$0xff] }
 0x422   : > { %v7236_v63 = vpop.eup %7235  ;;  %v11937_v0 = vmul.f32 %v4886_v11, %v15604_v45  ;;  %v11940_v42 = vmul.f32 %v3041_v47, %v15605_v55  ;;  %vm11942_vm14 = vcmp.eq.f32.partialorder %v3097_v19, 8.507059e+37  ;;  %7243 = vpow2.f32 %v6717_v20  ;;  %v1683_v39 = vpop.f32.mrf.mxu0  ;;  %2089 = vmatmul.f32.gmra.mxu0 %v7559_v1  ;;  %vm11959_vm15 = vmor %vm3093_vm11, %vm3094_vm13  ;;  %2315 = vmatmul.f32.gmra.mxu2 %v7559_v1 }
 0x423   : > { %v3056_v40 = vsel %vm11873_vm8, %v3055_v58, %v3051_v34  ;;  %7245 = vrcp.f32 %v11923_v41  ;;  %v11950_v62 = vmul.f32 %v11590_v27, %v2020_v43  ;;  %v1797_v45 = vadd.f32 %v1796_v4, %v1683_v39  ;;  %2202 = vmatmul.f32.gmra.mxu1 %v7560_v48  ;;  %2428 = vmatmul.f32.gmra.mxu3 %v7560_v48  ;;  %v5348_v34 = vld [vmem:[%s8044_s6 + $0x370] sm:$0xff] }
 0x424   : > { %v11953_v55 = vpop.eup %7237  ;;  %v3100_v44 = vor.u32 1.1754944e-38, %v3099_v10  ;;  %v3105_v22 = vsub.f32 1.0, %v3104_v26  ;;  %v3114_v27 = vand.u32 2147483648, %v11789_v21  ;;  %v11965_v58 = vmul.f32 -1.442695, %v15677_v52  ;;  %5713 = vmatpush.msra.mxu3 %v5348_v34 }
 0x425   : > { %15674 = vst [vmem:[#allocation118_spill] sm:$0xff] %v11950_v62  ;;  %v7240_v19 = vpop.eup %7239  ;;  %v3096_v20 = vsel %vm11959_vm15, %v11783_v16, %v3092_v5  ;;  %v3150_v33 = vsub.f32 1.0, %v3149_v61  ;;  %v11971_v11 = vadd.f32 1.0, %v7236_v63  ;;  %v11974_v47 = vmul.f32 %v11605_v53, %v1797_v45  ;;  %v15679_v16 = vld [vmem:[#allocation121_spill] sm:$0xff]  ;;  %v7561_v62 = vld [vmem:[%s8030_s15 + $0xe0] sm:$0xff] }
 0x426   : > { %v11978_v10 = vpop.eup %7241  ;;  %v11981_v26 = vmul.f32 %v3056_v40, %v15614_v54  ;;  %vm3108_vm0 = vweird.f32 %v11789_v21  ;;  %v3159_v2 = vand.u32 2147483648, %v11800_v25  ;;  %v6721_v31 = vmul.f32 -1.442695, %v15679_v16  ;;  %v1909_v40 = vpop.f32.mrf.mxu2 }
 0x427   : > { %15678 = vst [vmem:[#allocation119_spill] sm:$0xff] %v11974_v47  ;;  %v3112_v53 = vand.u32 2147483647, %v11789_v21  ;;  %vm3153_vm1 = vweird.f32 %v11800_v25  ;;  %v3157_v5 = vand.u32 2147483647, %v11800_v25  ;;  %v3164_v61 = vmul.f32 %v11953_v55, %v11877_v56  ;;  %v2022_v45 = vpop.f32.mrf.mxu3 }
 0x428   : > { %v7244_v43 = vpop.eup %7243  ;;  %v3101_v54 = vsel %vm11942_vm14, %v3100_v44, %v3096_v20  ;;  %v3106_v63 = vmul.f32 %v11894_v8, %v3105_v22  ;;  %v11994_v39 = vor.u32 1.1754944e-38, %v3114_v27  ;;  %v11996_v4 = vadd.f32 1.0, %v7240_v19 }
 0x429   : > { %v11998_v1 = vpop.eup %7245  ;;  %v3151_v9 = vmul.f32 %v11903_v51, %v3150_v33  ;;  %v3209_v48 = vmul.f32 %v11978_v10, %v11891_v3  ;;  %7247 = vrcp.f32 %v11971_v11  ;;  %v2023_v36 = vadd.f32 %v2022_v45, %v1909_v40  ;;  %v1799_v33 = vpop.f32.mrf.mxu1 }
 0x42a   : > { %v12004_v44 = vor.u32 1.1754944e-38, %v3159_v2  ;;  %v3172_v22 = vand.u32 2147483647, %v11877_v56  ;;  %v3174_v27 = vand.u32 2147483648, %v11877_v56  ;;  %v3219_v19 = vand.u32 2147483648, %v11891_v3  ;;  %v1686_v20 = vpop.f32.mrf.mxu0  ;;  %2092 = vmatmul.f32.gmra.mxu0 %v7561_v62  ;;  %2318 = vmatmul.f32.gmra.mxu2 %v7561_v62 }
 0x42b   : > { %vm12009_vm2 = vcmp.eq.f32.partialorder %v3112_v53, 8.507059e+37  ;;  %vm12013_vm3 = vcmp.eq.f32.partialorder %v3157_v5, 8.507059e+37  ;;  %v3165_v40 = vsub.f32 1.0, %v3164_v61  ;;  %v12017_v2 = vadd.f32 1.0, %v7244_v43  ;;  %v7562_v61 = vld [vmem:[%s8030_s15 + $0xe8] sm:$0xff] }
 0x42c   : > { %v12020_v45 = vmul.f32 %v11667_v13, %v2023_v36  ;;  %v1800_v47 = vadd.f32 %v1799_v33, %v1686_v20  ;;  %v3107_v53 = vadd.f32 %v11894_v8, %v3106_v63  ;;  %vm3109_vm4 = vweird.f32 %v11894_v8  ;;  %2205 = vmatmul.f32.gmra.mxu1 %v7562_v61  ;;  %2431 = vmatmul.f32.gmra.mxu3 %v7562_v61 }
 0x42d   : > { %vm3154_vm5 = vweird.f32 %v11903_v51  ;;  %v3224_v5 = vmul.f32 %v11998_v1, %v11923_v41  ;;  %v3152_v13 = vadd.f32 %v11903_v51, %v3151_v9  ;;  %v3210_v43 = vsub.f32 1.0, %v3209_v48  ;;  %vm12048_vm7 = vmor %vm3108_vm0, %vm3109_vm4  ;;  %v15691_v9 = vld [vmem:[#allocation62_spill] sm:$0xff] }
 0x42e   : > { %15684 = vst [vmem:[#allocation120_spill] sm:$0xff] %v12020_v45  ;;  %7249 = vrcp.f32 %v11996_v4  ;;  %v12034_v36 = vmul.f32 %v11718_v35, %v1800_v47  ;;  %v12037_v63 = vmul.f32 %v3101_v54, %v15619_v7  ;;  %vm3168_vm6 = vweird.f32 %v11877_v56  ;;  %vm12065_vm9 = vmor %vm3153_vm1, %vm3154_vm5 }
 0x42f   : > { %v3217_v20 = vand.u32 2147483647, %v11891_v3  ;;  %7251 = vpow2.f32 %v11965_v58  ;;  %v12042_v32 = vpop.eup %7247  ;;  %v3166_v7 = vmul.f32 %v11953_v55, %v3165_v40  ;;  %v12053_v62 = vor.u32 1.1754944e-38, %v3174_v27  ;;  %v15688_v58 = vld [vmem:[#allocation122_spill] sm:$0xff]  ;;  %v1912_v27 = vpop.f32.mrf.mxu2 }
 0x430   : > { %15685 = vst [vmem:[#allocation121_spill] sm:$0xff] %v12034_v36  ;;  %vm3213_vm8 = vweird.f32 %v11891_v3  ;;  %7253 = vrcp.f32 %v12017_v2  ;;  %v6722_v57 = vmul.f32 -1.442695, %v15688_v58  ;;  %v3111_v47 = vsel %vm12048_vm7, %v11894_v8, %v3107_v53  ;;  %v2025_v33 = vpop.f32.mrf.mxu3  ;;  %v5282_v8 = vld [vmem:[%s8044_s6 + $0x160] sm:$0xff] }
 0x431   : > { %v12069_v54 = vor.u32 1.1754944e-38, %v3219_v19  ;;  %7255 = vpow2.f32 %v6721_v31  ;;  %v6725_v48 = vmul.f32 -1.442695, %v15691_v9  ;;  %v3156_v40 = vsel %vm12065_vm9, %v11903_v51, %v3152_v13  ;;  %v1802_v51 = vpop.f32.mrf.mxu1  ;;  %5488 = vmatpush.msra.mxu1 %v5282_v8  ;;  %v15719_v8 = vld [vmem:[#allocation65_spill] sm:$0xff] }
 0x432   : > { %vm12075_vm11 = vcmp.eq.f32.partialorder %v3172_v22, 8.507059e+37  ;;  %v3211_v25 = vmul.f32 %v11978_v10, %v3210_v43  ;;  %v3225_v53 = vsub.f32 1.0, %v3224_v5  ;;  %v2026_v61 = vadd.f32 %v2025_v33, %v1912_v27  ;;  %v1689_v21 = vpop.f32.mrf.mxu0  ;;  %v7563_v33 = vld [vmem:[%s8030_s15 + $0xf0] sm:$0xff] }
 0x433   : > { %vm3169_vm12 = vweird.f32 %v11953_v55  ;;  %v3232_v31 = vand.u32 2147483647, %v11923_v41  ;;  %v3234_v19 = vand.u32 2147483648, %v11923_v41  ;;  %v3269_v35 = vmul.f32 %v12042_v32, %v11971_v11  ;;  %2095 = vmatmul.f32.gmra.mxu0 %v7563_v33  ;;  %2321 = vmatmul.f32.gmra.mxu2 %v7563_v33 }
 0x434   : > { %v12085_v22 = vpop.eup %7249  ;;  %v3167_v13 = vadd.f32 %v11953_v55, %v3166_v7  ;;  %vm12088_vm13 = vcmp.eq.f32.partialorder %v3217_v20, 8.507059e+37  ;;  %vm3228_vm14 = vweird.f32 %v11923_v41  ;;  %7257 = vpow2.f32 %v6722_v57  ;;  %v7564_v57 = vld [vmem:[%s8030_s15 + $0xf8] sm:$0xff]  ;;  %vm12119_vm0 = vmor %vm3168_vm6, %vm3169_vm12 }
 0x435   : > { %v12094_v5 = vmul.f32 %v11753_v59, %v2026_v61  ;;  %v1803_v27 = vadd.f32 %v1802_v51, %v1689_v21  ;;  %v7252_v36 = vpop.eup %7251  ;;  %v3116_v7 = vsel %vm12009_vm2, %v11994_v39, %v3111_v47  ;;  %v3161_v20 = vsel %vm12013_vm3, %v12004_v44, %v3156_v40  ;;  %2208 = vmatmul.f32.gmra.mxu1 %v7564_v57  ;;  %v5314_v39 = vld [vmem:[%s8044_s6 + $0x260] sm:$0xff] }
 0x436   : > { %v3279_v45 = vand.u32 2147483648, %v11971_v11  ;;  %7259 = vpow2.f32 %v6725_v48  ;;  %v12105_v59 = vpop.eup %7253  ;;  %v3212_v61 = vadd.f32 %v11978_v10, %v3211_v25  ;;  %vm3214_vm15 = vweird.f32 %v11978_v10  ;;  %2434 = vmatmul.f32.gmra.mxu3 %v7564_v57  ;;  %v5346_v44 = vld [vmem:[%s8044_s6 + $0x360] sm:$0xff]  ;;  %5601 = vmatpush.msra.mxu2 %v5314_v39 }
 0x437   : > { %15696 = vst [vmem:[#allocation122_spill] sm:$0xff] %v12094_v5  ;;  %v3226_v21 = vmul.f32 %v11998_v1, %v3225_v53  ;;  %v12111_v6 = vmul.f32 %v11796_v24, %v1803_v27  ;;  %v7256_v34 = vpop.eup %7255  ;;  %v12123_v48 = vor.u32 1.1754944e-38, %v3234_v19  ;;  %v3270_v40 = vsub.f32 1.0, %v3269_v35  ;;  %v15700_v25 = vld [vmem:[#allocation63_spill] sm:$0xff]  ;;  %5714 = vmatpush.msra.mxu3 %v5346_v44  ;;  %vm12149_vm3 = vmor %vm3213_vm8, %vm3214_vm15  ;;  %v7571_v5 = vld [vmem:[%s8030_s15 + $0x130] sm:$0xff] }
 0x438   : > { %v3284_v24 = vmul.f32 %v12085_v22, %v11996_v4  ;;  %v6726_v53 = vmul.f32 -1.442695, %v15700_v25  ;;  %v3171_v51 = vsel %vm12119_vm0, %v11953_v55, %v3167_v13  ;;  %vm3229_vm1 = vweird.f32 %v11998_v1  ;;  %v2028_v13 = vpop.f32.mrf.mxu3 }
 0x439   : > { %15697 = vst [vmem:[#allocation62_spill] sm:$0xff] %v12111_v6  ;;  %vm12132_vm2 = vcmp.eq.f32.partialorder %v3232_v31, 8.507059e+37  ;;  %v3277_v19 = vand.u32 2147483647, %v11971_v11  ;;  %v12137_v35 = vadd.f32 1.0, %v7252_v36  ;;  %v12140_v27 = vmul.f32 %v3116_v7, %v15632_v46  ;;  %v1915_v46 = vpop.f32.mrf.mxu2  ;;  %v1805_v6 = vpop.f32.mrf.mxu1  ;;  %vm12186_vm5 = vmor %vm3228_vm14, %vm3229_vm1 }
 0x43a   : > { %v12143_v33 = vmul.f32 %v3161_v20, %v15633_v12  ;;  %vm3273_vm4 = vweird.f32 %v11971_v11  ;;  %v12154_v31 = vor.u32 1.1754944e-38, %v3279_v45  ;;  %v3329_v36 = vmul.f32 %v12105_v59, %v12017_v2  ;;  %v7258_v7 = vpop.eup %7257  ;;  %v1692_v55 = vpop.f32.mrf.mxu0 }
 0x43b   : > { %v3216_v12 = vsel %vm12149_vm3, %v11978_v10, %v3212_v61  ;;  %v3227_v3 = vadd.f32 %v11998_v1, %v3226_v21  ;;  %v12162_v20 = vadd.f32 1.0, %v7256_v34  ;;  %v2029_v57 = vadd.f32 %v2028_v13, %v1915_v46  ;;  %v15705_v10 = vld [vmem:[#allocation51_spill] sm:$0xff]  ;;  %v15706_v61 = vld [vmem:[#allocation52_spill] sm:$0xff] }
 0x43c   : > { %v7260_v45 = vpop.eup %7259  ;;  %v3176_v39 = vsel %vm12075_vm11, %v12053_v62, %v3171_v51  ;;  %v3271_v44 = vmul.f32 %v12042_v32, %v3270_v40  ;;  %v3285_v47 = vsub.f32 1.0, %v3284_v24  ;;  %7261 = vpow2.f32 %v6726_v53  ;;  %v7565_v13 = vld [vmem:[%s8030_s15 + $0x100] sm:$0xff]  ;;  %v7566_v51 = vld [vmem:[%s8030_s15 + $0x108] sm:$0xff] }
 0x43d   : > { %7263 = vrcp.f32 %v12137_v35  ;;  %v12171_v21 = vadd.f32 %v15706_v61, %v15705_v10  ;;  %v12174_v34 = vmul.f32 %v11843_v14, %v2029_v57  ;;  %v1806_v46 = vadd.f32 %v1805_v6, %v1692_v55  ;;  %2098 = vmatmul.f32.gmra.mxu0 %v7565_v13  ;;  %v5250_v62 = vld [vmem:[%s8044_s6 + $0x60] sm:$0xff]  ;;  %2211 = vmatmul.f32.gmra.mxu1 %v7566_v51  ;;  %v15714_v55 = vld [vmem:[#allocation56_spill] sm:$0xff] }
 0x43e   : > { %v3221_v40 = vsel %vm12088_vm13, %v12069_v54, %v3216_v12  ;;  %v3292_v14 = vand.u32 2147483647, %v11996_v4  ;;  %v3330_v53 = vsub.f32 1.0, %v3329_v36  ;;  %v12191_v6 = vadd.f32 1.0, %v7258_v7  ;;  %5375 = vmatpush.msra.mxu0 %v5250_v62  ;;  %2324 = vmatmul.f32.gmra.mxu2 %v7565_v13 }
 0x43f   : > { %15707 = vst [vmem:[#allocation63_spill] sm:$0xff] %v12174_v34  ;;  %v3231_v54 = vsel %vm12186_vm5, %v11998_v1, %v3227_v3  ;;  %vm12197_vm6 = vcmp.eq.f32.partialorder %v3277_v19, 8.507059e+37  ;;  %7265 = vrcp.f32 %v12162_v20  ;;  %v12202_v41 = vadd.f32 1.0, %v7260_v45  ;;  %2437 = vmatmul.f32.gmra.mxu3 %v7566_v51 }
 0x440   : > { %v12205_v12 = vmul.f32 %v11897_v18, %v1806_v46  ;;  %v3272_v36 = vadd.f32 %v12042_v32, %v3271_v44  ;;  %vm3274_vm7 = vweird.f32 %v12042_v32  ;;  %v3286_v7 = vmul.f32 %v12085_v22, %v3285_v47  ;;  %v15713_v47 = vld [vmem:[#allocation55_spill] sm:$0xff] }
 0x441   : > { %vm3288_vm8 = vweird.f32 %v11996_v4  ;;  %v12212_v1 = vmul.f32 %v3176_v39, %v15643_v50  ;;  %v12215_v19 = vmul.f32 %v3221_v40, %v15645_v29  ;;  %v3294_v18 = vand.u32 2147483648, %v11996_v4  ;;  %v1918_v39 = vpop.f32.mrf.mxu2  ;;  %v2031_v29 = vpop.f32.mrf.mxu3  ;;  %vm12234_vm9 = vmor %vm3273_vm4, %vm3274_vm7 }
 0x442   : > { %15712 = vst [vmem:[#allocation51_spill] sm:$0xff] %v12205_v12  ;;  %v6729_v3 = vmul.f32 -1.442695, %v12171_v21  ;;  %v7262_v57 = vpop.eup %7261  ;;  %v3236_v45 = vsel %vm12132_vm2, %v12123_v48, %v3231_v54  ;;  %v3331_v44 = vmul.f32 %v12105_v59, %v3330_v53  ;;  %7267 = vrcp.f32 %v12191_v6  ;;  %v2051_v24 = vpop.f32.mrf.mxu0 }
 0x443   : > { %v12226_v50 = vadd.f32 %v15714_v55, %v15713_v47  ;;  %v12228_v10 = vpop.eup %7263  ;;  %vm12238_vm11 = vcmp.eq.f32.partialorder %v3292_v14, 8.507059e+37  ;;  %v3337_v56 = vand.u32 2147483647, %v12017_v2  ;;  %v3339_v46 = vand.u32 2147483648, %v12017_v2  ;;  %v2164_v14 = vpop.f32.mrf.mxu1 }
 0x444   : > { %7269 = vrcp.f32 %v12202_v41  ;;  %v2032_v13 = vadd.f32 %v2031_v29, %v1918_v39  ;;  %v3276_v11 = vsel %vm12234_vm9, %v12042_v32, %v3272_v36  ;;  %v3287_v62 = vadd.f32 %v12085_v22, %v3286_v7  ;;  %v7567_v32 = vld [vmem:[%s8030_s15 + $0x110] sm:$0xff] }
 0x445   : > { %vm3289_vm12 = vweird.f32 %v12085_v22  ;;  %v6730_v40 = vmul.f32 -1.442695, %v15719_v8  ;;  %v12251_v53 = vpop.eup %7265  ;;  %v12253_v51 = vadd.f32 1.0, %v7262_v57  ;;  %7271 = vpow2.f32 %v6729_v3  ;;  %2101 = vmatmul.f32.gmra.mxu0 %v7567_v32  ;;  %v7568_v57 = vld [vmem:[%s8030_s15 + $0x118] sm:$0xff]  ;;  %v5344_v29 = vld [vmem:[%s8044_s6 + $0x350] sm:$0xff] }
 0x446   : > { %v12256_v54 = vmul.f32 %v11937_v0, %v2032_v13  ;;  %v2165_v47 = vadd.f32 %v2164_v14, %v2051_v24  ;;  %v3332_v36 = vadd.f32 %v12105_v59, %v3331_v44  ;;  %vm3334_vm13 = vweird.f32 %v12105_v59  ;;  %2214 = vmatmul.f32.gmra.mxu1 %v7568_v57  ;;  %2327 = vmatmul.f32.gmra.mxu2 %v7567_v32  ;;  %v5312_v44 = vld [vmem:[%s8044_s6 + $0x250] sm:$0xff]  ;;  %vm12283_vm15 = vmor %vm3288_vm8, %vm3289_vm12 }
 0x447   : > { %v3344_v7 = vmul.f32 %v12228_v10, %v12137_v35  ;;  %v6733_v55 = vmul.f32 -1.442695, %v12226_v50  ;;  %v12266_v3 = vmul.f32 %v3236_v45, %v15650_v37  ;;  %v3295_v0 = vor.u32 1.1754944e-38, %v3294_v18  ;;  %2440 = vmatmul.f32.gmra.mxu3 %v7568_v57  ;;  %5602 = vmatpush.msra.mxu2 %v5312_v44 }
 0x448   : > { %15720 = vst [vmem:[#allocation52_spill] sm:$0xff] %v12256_v54  ;;  %vm3333_vm14 = vweird.f32 %v12017_v2  ;;  %v12270_v39 = vmul.f32 %v11940_v42, %v2165_v47  ;;  %v12274_v61 = vpop.eup %7267  ;;  %v3281_v13 = vsel %vm12197_vm6, %v12154_v31, %v3276_v11  ;;  %vm12287_vm0 = vcmp.eq.f32.partialorder %v3337_v56, 8.507059e+37  ;;  %5715 = vmatpush.msra.mxu3 %v5344_v29  ;;  %v7570_v42 = vld [vmem:[%s8030_s15 + $0x128] sm:$0xff] }
 0x449   : > { %v3389_v18 = vmul.f32 %v12251_v53, %v12162_v20  ;;  %7273 = vpow2.f32 %v6730_v40  ;;  %v3291_v4 = vsel %vm12283_vm15, %v12085_v22, %v3287_v62  ;;  %vm12302_vm1 = vmor %vm3333_vm14, %vm3334_vm13  ;;  %v3340_v45 = vor.u32 1.1754944e-38, %v3339_v46  ;;  %v15728_v22 = vld [vmem:[#allocation66_spill] sm:$0xff]  ;;  %v2277_v24 = vpop.f32.mrf.mxu2  ;;  %v2390_v14 = vpop.f32.mrf.mxu3 }
 0x44a   : > { %15721 = vst [vmem:[#allocation55_spill] sm:$0xff] %v12270_v39  ;;  %v12293_v43 = vpop.eup %7269  ;;  %v3354_v56 = vand.u32 2147483648, %v12137_v35  ;;  %7275 = vrcp.f32 %v12253_v51  ;;  %v3336_v11 = vsel %vm12302_vm1, %v12105_v59, %v3332_v36  ;;  %v3345_v40 = vsub.f32 1.0, %v3344_v7 }
 0x44b   : > { %7277 = vpow2.f32 %v6733_v55  ;;  %v6734_v62 = vmul.f32 -1.442695, %v15728_v22  ;;  %v7272_v2 = vpop.eup %7271  ;;  %v12313_v47 = vmul.f32 %v3281_v13, %v15659_v17  ;;  %v3352_v46 = vand.u32 2147483647, %v12137_v35  ;;  %v2054_v55 = vpop.f32.mrf.mxu0 }
 0x44c   : > { %v3404_v32 = vmul.f32 %v12274_v61, %v12191_v6  ;;  %v2391_v57 = vadd.f32 %v2390_v14, %v2277_v24  ;;  %v3296_v59 = vsel %vm12238_vm11, %v3295_v0, %v3291_v4  ;;  %vm3348_vm2 = vweird.f32 %v12137_v35  ;;  %v2167_v44 = vpop.f32.mrf.mxu1  ;;  %v7569_v0 = vld [vmem:[%s8030_s15 + $0x120] sm:$0xff]  ;;  %v5280_v4 = vld [vmem:[%s8044_s6 + $0x150] sm:$0xff] }
 0x44d   : > { %v3390_v36 = vsub.f32 1.0, %v3389_v18  ;;  %v3399_v7 = vand.u32 2147483648, %v12162_v20  ;;  %v3449_v17 = vmul.f32 %v12293_v43, %v12202_v41  ;;  %v3341_v29 = vsel %vm12287_vm0, %v3340_v45, %v3336_v11  ;;  %2104 = vmatmul.f32.gmra.mxu0 %v7569_v0  ;;  %v5248_v18 = vld [vmem:[%s8044_s6 + $0x50] sm:$0xff]  ;;  %5489 = vmatpush.msra.mxu1 %v5280_v4 }
 0x44e   : > { %v12326_v13 = vor.u32 1.1754944e-38, %v3354_v56  ;;  %v12329_v37 = vmul.f32 %v11981_v26, %v2391_v57  ;;  %v2168_v48 = vadd.f32 %v2167_v44, %v2054_v55  ;;  %v3346_v24 = vmul.f32 %v12228_v10, %v3345_v40  ;;  %2217 = vmatmul.f32.gmra.mxu1 %v7570_v42  ;;  %5376 = vmatpush.msra.mxu0 %v5248_v18 }
 0x44f   : > { %v7274_v31 = vpop.eup %7273  ;;  %v3414_v14 = vand.u32 2147483648, %v12191_v6  ;;  %v12336_v54 = vadd.f32 1.0, %v7272_v2  ;;  %7279 = vpow2.f32 %v6734_v62  ;;  %v12342_v26 = vmul.f32 %v3296_v59, %v15666_v49  ;;  %2330 = vmatmul.f32.gmra.mxu2 %v7569_v0  ;;  %2443 = vmatmul.f32.gmra.mxu3 %v7570_v42  ;;  %v15735_v42 = vld [vmem:[#allocation68_spill] sm:$0xff] }
 0x450   : > { %15729 = vst [vmem:[#allocation56_spill] sm:$0xff] %v12329_v37  ;;  %v12339_v45 = vpop.eup %7275  ;;  %vm3393_vm3 = vweird.f32 %v12162_v20  ;;  %v3397_v56 = vand.u32 2147483647, %v12162_v20  ;;  %v3405_v11 = vsub.f32 1.0, %v3404_v32  ;;  %v12347_v40 = vmul.f32 %v12037_v63, %v2168_v48 }
 0x451   : > { %v7278_v2 = vpop.eup %7277  ;;  %v3391_v62 = vmul.f32 %v12251_v53, %v3390_v36  ;;  %v12350_v57 = vor.u32 1.1754944e-38, %v3399_v7  ;;  %v3412_v55 = vand.u32 2147483647, %v12191_v6  ;;  %v3450_v44 = vsub.f32 1.0, %v3449_v17  ;;  %v2280_v7 = vpop.f32.mrf.mxu2  ;;  %v15753_v17 = vld [vmem:[#allocation70_spill] sm:$0xff] }
 0x452   : > { %15730 = vst [vmem:[#allocation65_spill] sm:$0xff] %v12347_v40  ;;  %v12354_v49 = vmul.f32 %v3341_v29, %v15669_v38  ;;  %vm3349_vm4 = vweird.f32 %v12228_v10  ;;  %vm12357_vm5 = vcmp.eq.f32.partialorder %v3352_v46, 8.507059e+37  ;;  %vm3394_vm6 = vweird.f32 %v12251_v53  ;;  %v2393_v46 = vpop.f32.mrf.mxu3 }
 0x453   : > { %vm3408_vm7 = vweird.f32 %v12191_v6  ;;  %v12363_v63 = vadd.f32 1.0, %v7274_v31  ;;  %v3347_v59 = vadd.f32 %v12228_v10, %v3346_v24  ;;  %v12366_v36 = vor.u32 1.1754944e-38, %v3414_v14  ;;  %v2057_v12 = vpop.f32.mrf.mxu0  ;;  %vm12388_vm11 = vmor %vm3348_vm2, %vm3349_vm4 }
 0x454   : > { %v3464_v38 = vmul.f32 %v12339_v45, %v12253_v51  ;;  %7281 = vrcp.f32 %v12336_v54  ;;  %vm12371_vm8 = vcmp.eq.f32.partialorder %v3397_v56, 8.507059e+37  ;;  %v3406_v29 = vmul.f32 %v12274_v61, %v3405_v11  ;;  %v2170_v11 = vpop.f32.mrf.mxu1  ;;  %vm12423_vm14 = vmor %vm3393_vm3, %vm3394_vm6 }
 0x455   : > { %vm3453_vm9 = vweird.f32 %v12202_v41  ;;  %v3457_v48 = vand.u32 2147483647, %v12202_v41  ;;  %v12378_v0 = vadd.f32 1.0, %v7278_v2  ;;  %v2394_v18 = vadd.f32 %v2393_v46, %v2280_v7  ;;  %v7280_v4 = vpop.eup %7279  ;;  %2107 = vmatmul.f32.gmra.mxu0 %v7571_v5 }
 0x456   : > { %v3392_v31 = vadd.f32 %v12251_v53, %v3391_v62  ;;  %v3451_v24 = vmul.f32 %v12293_v43, %v3450_v44  ;;  %v3459_v14 = vand.u32 2147483648, %v12202_v41  ;;  %v6737_v56 = vmul.f32 -1.442695, %v15735_v42  ;;  %v15740_v62 = vld [vmem:[#allocation69_spill] sm:$0xff]  ;;  %2220 = vmatmul.f32.gmra.mxu1 %v7572_v23 }
 0x457   : > { %vm12392_vm12 = vcmp.eq.f32.partialorder %v3412_v55, 8.507059e+37  ;;  %7283 = vrcp.f32 %v12363_v63  ;;  %v6738_v44 = vmul.f32 -1.442695, %v15740_v62  ;;  %v12399_v46 = vmul.f32 %v12140_v27, %v2394_v18  ;;  %2333 = vmatmul.f32.gmra.mxu2 %v7571_v5  ;;  %2446 = vmatmul.f32.gmra.mxu3 %v7572_v23  ;;  %v5310_v18 = vld [vmem:[%s8044_s6 + $0x240] sm:$0xff] }
 0x458   : > { %v2171_v34 = vadd.f32 %v2170_v11, %v2057_v12  ;;  %v3351_v35 = vsel %vm12388_vm11, %v12228_v10, %v3347_v59  ;;  %vm3409_vm13 = vweird.f32 %v12274_v61  ;;  %v3465_v55 = vsub.f32 1.0, %v3464_v38  ;;  %v5342_v10 = vld [vmem:[%s8044_s6 + $0x340] sm:$0xff]  ;;  %5603 = vmatpush.msra.mxu2 %v5310_v18 }
 0x459   : > { %15741 = vst [vmem:[#allocation66_spill] sm:$0xff] %v12399_v46  ;;  %v3474_v30 = vand.u32 2147483648, %v12253_v51  ;;  %v3407_v15 = vadd.f32 %v12274_v61, %v3406_v29  ;;  %7285 = vrcp.f32 %v12378_v0  ;;  %v12410_v27 = vadd.f32 1.0, %v7280_v4  ;;  %5716 = vmatpush.msra.mxu3 %v5342_v10  ;;  %vm12444_vm1 = vmor %vm3408_vm7, %vm3409_vm13  ;;  %v7573_v38 = vld [vmem:[%s8030_s15 + $0x140] sm:$0xff] }
 0x45a   : > { %v12413_v12 = vmul.f32 %v12143_v33, %v2171_v34  ;;  %v12417_v59 = vpop.eup %7281  ;;  %vm12427_vm15 = vcmp.eq.f32.partialorder %v3457_v48, 8.507059e+37  ;;  %v3460_v33 = vor.u32 1.1754944e-38, %v3459_v14  ;;  %v3472_v5 = vand.u32 2147483647, %v12253_v51 }
 0x45b   : > { %7287 = vpow2.f32 %v6737_v56  ;;  %v3396_v23 = vsel %vm12423_vm14, %v12251_v53, %v3392_v31  ;;  %v3452_v20 = vadd.f32 %v12293_v43, %v3451_v24  ;;  %vm3454_vm0 = vweird.f32 %v12293_v43  ;;  %v2283_v31 = vpop.f32.mrf.mxu2  ;;  %v2396_v24 = vpop.f32.mrf.mxu3 }
 0x45c   : > { %15742 = vst [vmem:[#allocation68_spill] sm:$0xff] %v12413_v12  ;;  %7289 = vpow2.f32 %v6738_v44  ;;  %v3356_v34 = vsel %vm12357_vm5, %v12326_v13, %v3351_v35  ;;  %v3466_v4 = vmul.f32 %v12339_v45, %v3465_v55  ;;  %vm3468_vm2 = vweird.f32 %v12253_v51  ;;  %vm12467_vm3 = vmor %vm3453_vm9, %vm3454_vm0  ;;  %v2173_v2 = vpop.f32.mrf.mxu1  ;;  %v15754_v35 = vld [vmem:[#allocation71_spill] sm:$0xff] }
 0x45d   : > { %v12450_v53 = vor.u32 1.1754944e-38, %v3474_v30  ;;  %v12452_v14 = vpop.eup %7283  ;;  %v3411_v13 = vsel %vm12444_vm1, %v12274_v61, %v3407_v15  ;;  %v3509_v6 = vmul.f32 %v12417_v59, %v12336_v54  ;;  %7291 = vrcp.f32 %v12410_v27  ;;  %2110 = vmatmul.f32.gmra.mxu0 %v7573_v38 }
 0x45e   : > { %v2397_v32 = vadd.f32 %v2396_v24, %v2283_v31  ;;  %v3401_v30 = vsel %vm12371_vm8, %v12350_v57, %v3396_v23  ;;  %vm3469_vm4 = vweird.f32 %v12339_v45  ;;  %vm12472_vm5 = vcmp.eq.f32.partialorder %v3472_v5, 8.507059e+37  ;;  %v2060_v57 = vpop.f32.mrf.mxu0  ;;  %v5246_v5 = vld [vmem:[%s8044_s6 + $0x40] sm:$0xff]  ;;  %2223 = vmatmul.f32.gmra.mxu1 %v7574_v28 }
 0x45f   : > { %v3519_v61 = vand.u32 2147483648, %v12336_v54  ;;  %v6741_v11 = vmul.f32 -1.442695, %v15753_v17  ;;  %v12478_v44 = vpop.eup %7285  ;;  %v3456_v41 = vsel %vm12467_vm3, %v12293_v43, %v3452_v20  ;;  %v6742_v55 = vmul.f32 -1.442695, %v15754_v35  ;;  %v5278_v23 = vld [vmem:[%s8044_s6 + $0x140] sm:$0xff]  ;;  %5377 = vmatpush.msra.mxu0 %v5246_v5  ;;  %2336 = vmatmul.f32.gmra.mxu2 %v7573_v38  ;;  %vm12521_vm6 = vmor %vm3468_vm2, %vm3469_vm4 }
 0x460   : > { %v12485_v18 = vmul.f32 %v12212_v1, %v2397_v32  ;;  %v2174_v10 = vadd.f32 %v2173_v2, %v2060_v57  ;;  %v3416_v31 = vsel %vm12392_vm12, %v12366_v36, %v3411_v13  ;;  %v3467_v24 = vadd.f32 %v12339_v45, %v3466_v4  ;;  %v15756_v20 = vld [vmem:[#allocation123_spill] sm:$0xff]  ;;  %2449 = vmatmul.f32.gmra.mxu3 %v7574_v28  ;;  %v15760_v38 = vld [vmem:[#allocation124_spill] sm:$0xff] }
 0x461   : > { %v7288_v48 = vpop.eup %7287  ;;  %v3524_v43 = vmul.f32 %v12452_v14, %v12363_v63  ;;  %v6745_v56 = vmul.f32 -1.442695, %v15756_v20  ;;  %v12499_v32 = vmul.f32 %v3356_v34, %v15677_v52  ;;  %v12502_v57 = vmul.f32 %v3401_v30, %v15679_v16  ;;  %5490 = vmatpush.msra.mxu1 %v5278_v23 }
 0x462   : > { %15755 = vst [vmem:[#allocation69_spill] sm:$0xff] %v12485_v18  ;;  %v7290_v1 = vpop.eup %7289  ;;  %v3510_v2 = vsub.f32 1.0, %v3509_v6  ;;  %v12505_v36 = vmul.f32 %v12215_v19, %v2174_v10  ;;  %v3461_v7 = vsel %vm12427_vm15, %v3460_v33, %v3456_v41  ;;  %v3517_v4 = vand.u32 2147483647, %v12336_v54 }
 0x463   : > { %v3569_v13 = vmul.f32 %v12478_v44, %v12378_v0  ;;  %7293 = vpow2.f32 %v6741_v11  ;;  %v12512_v52 = vpop.eup %7291  ;;  %v12515_v16 = vmul.f32 %v3416_v31, %v15688_v58  ;;  %vm3513_vm7 = vweird.f32 %v12336_v54  ;;  %v2286_v51 = vpop.f32.mrf.mxu2 }
 0x464   : > { %15757 = vst [vmem:[#allocation70_spill] sm:$0xff] %v12505_v36  ;;  %v12526_v19 = vor.u32 1.1754944e-38, %v3519_v61  ;;  %v12528_v29 = vadd.f32 1.0, %v7288_v48  ;;  %7295 = vpow2.f32 %v6742_v55  ;;  %v3471_v58 = vsel %vm12521_vm6, %v12339_v45, %v3467_v24  ;;  %v2399_v6 = vpop.f32.mrf.mxu3 }
 0x465   : > { %v3525_v33 = vsub.f32 1.0, %v3524_v43  ;;  %v12533_v34 = vadd.f32 1.0, %v7290_v1  ;;  %7297 = vpow2.f32 %v6745_v56  ;;  %v12536_v30 = vmul.f32 %v3461_v7, %v15691_v9  ;;  %v2176_v9 = vpop.f32.mrf.mxu1  ;;  %v7575_v56 = vld [vmem:[%s8030_s15 + $0x150] sm:$0xff]  ;;  %v7576_v7 = vld [vmem:[%s8030_s15 + $0x158] sm:$0xff] }
 0x466   : > { %v3511_v61 = vmul.f32 %v12417_v59, %v3510_v2  ;;  %v3534_v11 = vand.u32 2147483648, %v12363_v63  ;;  %v2400_v41 = vadd.f32 %v2399_v6, %v2286_v51  ;;  %vm3528_vm8 = vweird.f32 %v12363_v63  ;;  %v2063_v23 = vpop.f32.mrf.mxu0  ;;  %2113 = vmatmul.f32.gmra.mxu0 %v7575_v56  ;;  %2226 = vmatmul.f32.gmra.mxu1 %v7576_v7 }
 0x467   : > { %v3532_v55 = vand.u32 2147483647, %v12363_v63  ;;  %v3570_v45 = vsub.f32 1.0, %v3569_v13  ;;  %v3584_v10 = vmul.f32 %v12512_v52, %v12410_v27  ;;  %v6746_v5 = vmul.f32 -1.442695, %v15760_v38  ;;  %2339 = vmatmul.f32.gmra.mxu2 %v7575_v56 }
 0x468   : > { %v3476_v48 = vsel %vm12472_vm5, %v12450_v53, %v3471_v58  ;;  %vm12548_vm9 = vcmp.eq.f32.partialorder %v3517_v4, 8.507059e+37  ;;  %7299 = vrcp.f32 %v12528_v29  ;;  %v12554_v24 = vmul.f32 %v12266_v3, %v2400_v41  ;;  %2452 = vmatmul.f32.gmra.mxu3 %v7576_v7  ;;  %v5308_v58 = vld [vmem:[%s8044_s6 + $0x230] sm:$0xff] }
 0x469   : > { %v2177_v43 = vadd.f32 %v2176_v9, %v2063_v23  ;;  %v7294_v1 = vpop.eup %7293  ;;  %v3526_v2 = vmul.f32 %v12452_v14, %v3525_v33  ;;  %v3577_v15 = vand.u32 2147483647, %v12378_v0  ;;  %v3579_v53 = vand.u32 2147483648, %v12378_v0  ;;  %v5340_v33 = vld [vmem:[%s8044_s6 + $0x330] sm:$0xff]  ;;  %5604 = vmatpush.msra.mxu2 %v5308_v58 }
 0x46a   : > { %15763 = vst [vmem:[#allocation71_spill] sm:$0xff] %v12554_v24  ;;  %7301 = vrcp.f32 %v12533_v34  ;;  %v7296_v4 = vpop.eup %7295  ;;  %v3512_v3 = vadd.f32 %v12417_v59, %v3511_v61  ;;  %vm3514_vm11 = vweird.f32 %v12417_v59  ;;  %v12564_v13 = vor.u32 1.1754944e-38, %v3534_v11  ;;  %v15767_v61 = vld [vmem:[#allocation125_spill] sm:$0xff]  ;;  %5717 = vmatpush.msra.mxu3 %v5340_v33 }
 0x46b   : > { %v12567_v28 = vmul.f32 %v12313_v47, %v2177_v43  ;;  %v7298_v51 = vpop.eup %7297  ;;  %vm12571_vm12 = vcmp.eq.f32.partialorder %v3532_v55, 8.507059e+37  ;;  %v3571_v41 = vmul.f32 %v12478_v44, %v3570_v45  ;;  %v3585_v23 = vsub.f32 1.0, %v3584_v10  ;;  %vm12588_vm15 = vmor %vm3513_vm7, %vm3514_vm11  ;;  %v5276_v55 = vld [vmem:[%s8044_s6 + $0x130] sm:$0xff] }
 0x46c   : > { %7303 = vpow2.f32 %v6746_v5  ;;  %v6749_v9 = vmul.f32 -1.442695, %v15767_v61  ;;  %v12578_v47 = vmul.f32 %v3476_v48, %v15700_v25  ;;  %vm3529_vm13 = vweird.f32 %v12452_v14  ;;  %v2289_v48 = vpop.f32.mrf.mxu2  ;;  %v2402_v43 = vpop.f32.mrf.mxu3  ;;  %5491 = vmatpush.msra.mxu1 %v5276_v55 }
 0x46d   : > { %15764 = vst [vmem:[#allocation123_spill] sm:$0xff] %v12567_v28  ;;  %vm3573_vm14 = vweird.f32 %v12378_v0  ;;  %v12582_v11 = vadd.f32 1.0, %v7294_v1  ;;  %v3527_v45 = vadd.f32 %v12452_v14, %v3526_v2  ;;  %vm12593_vm0 = vcmp.eq.f32.partialorder %v3577_v15, 8.507059e+37  ;;  %vm12616_vm2 = vmor %vm3528_vm8, %vm3529_vm13 }
 0x46e   : > { %v3580_v25 = vor.u32 1.1754944e-38, %v3579_v53  ;;  %v12597_v5 = vadd.f32 1.0, %v7296_v4  ;;  %v12599_v56 = vpop.eup %7299  ;;  %v3516_v54 = vsel %vm12588_vm15, %v12417_v59, %v3512_v3  ;;  %v3592_v1 = vand.u32 2147483647, %v12410_v27  ;;  %v2066_v58 = vpop.f32.mrf.mxu0 }
 0x46f   : > { %v12605_v7 = vadd.f32 1.0, %v7298_v51  ;;  %v2403_v2 = vadd.f32 %v2402_v43, %v2289_v48  ;;  %v3572_v53 = vadd.f32 %v12478_v44, %v3571_v41  ;;  %vm3574_vm1 = vweird.f32 %v12478_v44  ;;  %v2179_v59 = vpop.f32.mrf.mxu1 }
 0x470   : > { %v12607_v15 = vpop.eup %7301  ;;  %v3586_v4 = vmul.f32 %v12512_v52, %v3585_v23  ;;  %7305 = vpow2.f32 %v6749_v9  ;;  %v3594_v33 = vand.u32 2147483648, %v12410_v27  ;;  %v2180_v41 = vadd.f32 %v2179_v59, %v2066_v58  ;;  %v7577_v23 = vld [vmem:[%s8030_s15 + $0x160] sm:$0xff]  ;;  %v5244_v9 = vld [vmem:[%s8044_s6 + $0x30] sm:$0xff]  ;;  %vm12642_vm3 = vmor %vm3573_vm14, %vm3574_vm1 }
 0x471   : > { %7307 = vrcp.f32 %v12582_v11  ;;  %v12623_v51 = vmul.f32 %v12342_v26, %v2403_v2  ;;  %2116 = vmatmul.f32.gmra.mxu0 %v7577_v23  ;;  %v3521_v63 = vsel %vm12548_vm9, %v12526_v19, %v3516_v54  ;;  %v3531_v43 = vsel %vm12616_vm2, %v12452_v14, %v3527_v45  ;;  %v7578_v26 = vld [vmem:[%s8030_s15 + $0x168] sm:$0xff]  ;;  %v15777_v14 = vld [vmem:[#allocation126_spill] sm:$0xff]  ;;  %2342 = vmatmul.f32.gmra.mxu2 %v7577_v23 }
 0x472   : > { %v7304_v48 = vpop.eup %7303  ;;  %v3629_v28 = vmul.f32 %v12599_v56, %v12528_v29  ;;  %7309 = vrcp.f32 %v12597_v5  ;;  %2229 = vmatmul.f32.gmra.mxu1 %v7578_v26  ;;  %5378 = vmatpush.msra.mxu0 %v5244_v9  ;;  %v3644_v19 = vmul.f32 %v12607_v15, %v12533_v34  ;;  %v6750_v31 = vmul.f32 -1.442695, %v15777_v14 }
 0x473   : > { %15774 = vst [vmem:[#allocation124_spill] sm:$0xff] %v12623_v51  ;;  %7311 = vrcp.f32 %v12605_v7  ;;  %v12651_v45 = vmul.f32 %v12354_v49, %v2180_v41  ;;  %2455 = vmatmul.f32.gmra.mxu3 %v7578_v26  ;;  %v3576_v0 = vsel %vm12642_vm3, %v12478_v44, %v3572_v53  ;;  %v3587_v54 = vadd.f32 %v12512_v52, %v3586_v4 }
 0x474   : > { %vm3589_vm4 = vweird.f32 %v12512_v52  ;;  %v3639_v58 = vand.u32 2147483648, %v12528_v29  ;;  %v3536_v59 = vsel %vm12571_vm12, %v12564_v13, %v3531_v43  ;;  %vm3588_vm5 = vweird.f32 %v12410_v27  ;;  %v2292_v9 = vpop.f32.mrf.mxu2  ;;  %v2405_v55 = vpop.f32.mrf.mxu3 }
 0x475   : > { %15778 = vst [vmem:[#allocation125_spill] sm:$0xff] %v12651_v45  ;;  %vm12663_vm6 = vcmp.eq.f32.partialorder %v3592_v1, 8.507059e+37  ;;  %v12667_v3 = vadd.f32 1.0, %v7304_v48  ;;  %v12670_v53 = vmul.f32 %v3521_v63, %v12171_v21  ;;  %v3595_v4 = vor.u32 1.1754944e-38, %v3594_v33  ;;  %vm12679_vm7 = vmor %vm3588_vm5, %vm3589_vm4  ;;  %v15797_v45 = vld [vmem:[#allocation130_spill] sm:$0xff] }
 0x476   : > { %v7306_v44 = vpop.eup %7305  ;;  %v3630_v41 = vsub.f32 1.0, %v3629_v28  ;;  %v3637_v23 = vand.u32 2147483647, %v12528_v29  ;;  %v3581_v27 = vsel %vm12593_vm0, %v3580_v25, %v3576_v0  ;;  %v3645_v1 = vsub.f32 1.0, %v3644_v19  ;;  %v2069_v63 = vpop.f32.mrf.mxu0 }
 0x477   : > { %15781 = vst [vmem:[#allocation126_spill] sm:$0xff] %v12670_v53  ;;  %v12673_v6 = vpop.eup %7307  ;;  %7313 = vpow2.f32 %v6750_v31  ;;  %v2406_v21 = vadd.f32 %v2405_v55, %v2292_v9  ;;  %v12686_v33 = vmul.f32 %v3536_v59, %v15719_v8  ;;  %v3591_v10 = vsel %vm12679_vm7, %v12512_v52, %v3587_v54  ;;  %v2182_v43 = vpop.f32.mrf.mxu1  ;;  %v7579_v52 = vld [vmem:[%s8030_s15 + $0x170] sm:$0xff]  ;;  %v7580_v59 = vld [vmem:[%s8030_s15 + $0x178] sm:$0xff]  ;;  %v15786_v9 = vld [vmem:[#allocation127_spill] sm:$0xff] }
 0x478   : > { %v12683_v28 = vpop.eup %7309  ;;  %vm3633_vm8 = vweird.f32 %v12528_v29  ;;  %v12692_v25 = vor.u32 1.1754944e-38, %v3639_v58  ;;  %v3654_v48 = vand.u32 2147483648, %v12533_v34  ;;  %7315 = vrcp.f32 %v12667_v3 }
 0x479   : > { %v12695_v26 = vpop.eup %7311  ;;  %v12698_v2 = vadd.f32 1.0, %v7306_v44  ;;  %v12701_v8 = vmul.f32 %v12499_v32, %v2406_v21  ;;  %v2183_v19 = vadd.f32 %v2182_v43, %v2069_v63  ;;  %2119 = vmatmul.f32.gmra.mxu0 %v7579_v52  ;;  %v12705_v31 = vmul.f32 %v3581_v27, %v12226_v50  ;;  %2345 = vmatmul.f32.gmra.mxu2 %v7579_v52  ;;  %v5338_v27 = vld [vmem:[%s8044_s6 + $0x320] sm:$0xff] }
 0x47a   : > { %v3631_v0 = vmul.f32 %v12599_v56, %v3630_v41  ;;  %vm3648_vm9 = vweird.f32 %v12533_v34  ;;  %v3652_v54 = vand.u32 2147483647, %v12533_v34  ;;  %v3699_v58 = vand.u32 2147483648, %v12582_v11  ;;  %2232 = vmatmul.f32.gmra.mxu1 %v7580_v59  ;;  %v5306_v41 = vld [vmem:[%s8044_s6 + $0x220] sm:$0xff]  ;;  %5718 = vmatpush.msra.mxu3 %v5338_v27 }
 0x47b   : > { %15784 = vst [vmem:[#allocation150_spill] sm:$0xff] %v12701_v8  ;;  %v3596_v32 = vsel %vm12663_vm6, %v3595_v4, %v3591_v10  ;;  %v3646_v44 = vmul.f32 %v12607_v15, %v3645_v1  ;;  %v6753_v55 = vmul.f32 -1.442695, %v15786_v9  ;;  %v12717_v50 = vmul.f32 %v12502_v57, %v2183_v19  ;;  %2458 = vmatmul.f32.gmra.mxu3 %v7580_v59 }
 0x47c   : > { %15785 = vst [vmem:[#allocation151_spill] sm:$0xff] %v12705_v31  ;;  %vm3634_vm11 = vweird.f32 %v12599_v56  ;;  %vm12722_vm12 = vcmp.eq.f32.partialorder %v3637_v23, 8.507059e+37  ;;  %v3689_v49 = vmul.f32 %v12673_v6, %v12582_v11  ;;  %v3704_v4 = vmul.f32 %v12683_v28, %v12597_v5  ;;  %5605 = vmatpush.msra.mxu2 %v5306_v41  ;;  %v15790_v23 = vld [vmem:[#allocation128_spill] sm:$0xff]  ;;  %v2408_v41 = vpop.f32.mrf.mxu3 }
 0x47d   : > { %15787 = vst [vmem:[#allocation127_spill] sm:$0xff] %v12717_v50  ;;  %v3749_v57 = vmul.f32 %v12695_v26, %v12605_v7  ;;  %v7314_v1 = vpop.eup %7313  ;;  %v12732_v21 = vor.u32 1.1754944e-38, %v3654_v48  ;;  %7317 = vrcp.f32 %v12698_v2  ;;  %v6754_v63 = vmul.f32 -1.442695, %v15790_v23  ;;  %v2295_v48 = vpop.f32.mrf.mxu2  ;;  %vm12758_vm15 = vmor %vm3633_vm8, %vm3634_vm11 }
 0x47e   : > { %v12738_v43 = vmul.f32 %v3596_v32, %v15728_v22  ;;  %v3632_v19 = vadd.f32 %v12599_v56, %v3631_v0  ;;  %vm3649_vm13 = vweird.f32 %v12607_v15  ;;  %vm12742_vm14 = vcmp.eq.f32.partialorder %v3652_v54, 8.507059e+37  ;;  %v12748_v27 = vpop.eup %7315 }
 0x47f   : > { %v12746_v59 = vor.u32 1.1754944e-38, %v3699_v58  ;;  %v3647_v10 = vadd.f32 %v12607_v15, %v3646_v44  ;;  %v3712_v22 = vand.u32 2147483647, %v12597_v5  ;;  %7319 = vpow2.f32 %v6753_v55  ;;  %v2072_v58 = vpop.f32.mrf.mxu0  ;;  %v2185_v50 = vpop.f32.mrf.mxu1  ;;  %v15795_v55 = vld [vmem:[#allocation129_spill] sm:$0xff]  ;;  %vm12785_vm2 = vmor %vm3648_vm9, %vm3649_vm13 }
 0x480   : > { %v2409_v0 = vadd.f32 %v2408_v41, %v2295_v48  ;;  %v3690_v32 = vsub.f32 1.0, %v3689_v49  ;;  %v3705_v54 = vsub.f32 1.0, %v3704_v4  ;;  %v3750_v31 = vsub.f32 1.0, %v3749_v57  ;;  %v5242_v48 = vld [vmem:[%s8044_s6 + $0x20] sm:$0xff] }
 0x481   : > { %v12752_v53 = vadd.f32 1.0, %v7314_v1  ;;  %vm3693_vm0 = vweird.f32 %v12582_v11  ;;  %7321 = vpow2.f32 %v6754_v63  ;;  %v6757_v49 = vmul.f32 -1.442695, %v15795_v55  ;;  %v7581_v1 = vld [vmem:[%s8030_s15 + $0x180] sm:$0xff]  ;;  %5379 = vmatpush.msra.mxu0 %v5242_v48 }
 0x482   : > { %v12765_v4 = vmul.f32 %v12515_v16, %v2409_v0  ;;  %v2186_v57 = vadd.f32 %v2185_v50, %v2072_v58  ;;  %2122 = vmatmul.f32.gmra.mxu0 %v7581_v1  ;;  %v5274_v41 = vld [vmem:[%s8044_s6 + $0x120] sm:$0xff]  ;;  %v3636_v29 = vsel %vm12758_vm15, %v12599_v56, %v3632_v19  ;;  %vm3708_vm1 = vweird.f32 %v12597_v5  ;;  %v7582_v16 = vld [vmem:[%s8030_s15 + $0x188] sm:$0xff]  ;;  %2348 = vmatmul.f32.gmra.mxu2 %v7581_v1 }
 0x483   : > { %v3714_v8 = vand.u32 2147483648, %v12597_v5  ;;  %v3764_v63 = vmul.f32 %v12748_v27, %v12667_v3  ;;  %v6758_v51 = vmul.f32 -1.442695, %v15797_v45  ;;  %2235 = vmatmul.f32.gmra.mxu1 %v7582_v16  ;;  %v12779_v50 = vpop.eup %7317  ;;  %vm3753_vm3 = vweird.f32 %v12605_v7  ;;  %2461 = vmatmul.f32.gmra.mxu3 %v7582_v16 }
 0x484   : > { %15796 = vst [vmem:[#allocation128_spill] sm:$0xff] %v12765_v4  ;;  %v3757_v19 = vand.u32 2147483647, %v12605_v7  ;;  %v3759_v0 = vand.u32 2147483648, %v12605_v7  ;;  %v12793_v58 = vmul.f32 %v12536_v30, %v2186_v57  ;;  %v3651_v44 = vsel %vm12785_vm2, %v12607_v15, %v3647_v10  ;;  %5492 = vmatpush.msra.mxu1 %v5274_v41 }
 0x485   : > { %v3691_v34 = vmul.f32 %v12673_v6, %v3690_v32  ;;  %v3706_v48 = vmul.f32 %v12683_v28, %v3705_v54  ;;  %7323 = vrcp.f32 %v12752_v53  ;;  %v7320_v4 = vpop.eup %7319  ;;  %v3641_v24 = vsel %vm12722_vm12, %v12692_v25, %v3636_v29  ;;  %v2298_v32 = vpop.f32.mrf.mxu2 }
 0x486   : > { %15800 = vst [vmem:[#allocation129_spill] sm:$0xff] %v12793_v58  ;;  %vm3694_vm4 = vweird.f32 %v12673_v6  ;;  %v3751_v30 = vmul.f32 %v12695_v26, %v3750_v31  ;;  %7325 = vpow2.f32 %v6757_v49  ;;  %v3765_v57 = vsub.f32 1.0, %v3764_v63  ;;  %v2411_v54 = vpop.f32.mrf.mxu3  ;;  %v15829_v31 = vld [vmem:[#allocation134_spill] sm:$0xff] }
 0x487   : > { %v3772_v15 = vand.u32 2147483647, %v12667_v3  ;;  %v3809_v10 = vmul.f32 %v12779_v50, %v12698_v2  ;;  %7327 = vpow2.f32 %v6758_v51  ;;  %v7322_v1 = vpop.eup %7321  ;;  %v3656_v13 = vsel %vm12742_vm14, %v12732_v21, %v3651_v44  ;;  %v2075_v63 = vpop.f32.mrf.mxu0  ;;  %vm12843_vm9 = vmor %vm3693_vm0, %vm3694_vm4 }
 0x488   : > { %v15801_v25 = vand.u32 2147483647, %v12582_v11  ;;  %vm3709_vm6 = vweird.f32 %v12683_v28  ;;  %vm12819_vm7 = vcmp.eq.f32.partialorder %v3712_v22, 8.507059e+37  ;;  %v3774_v51 = vand.u32 2147483648, %v12667_v3  ;;  %v2188_v16 = vpop.f32.mrf.mxu1  ;;  %v15806_v22 = vld [vmem:[#allocation131_spill] sm:$0xff] }
 0x489   : > { %v2412_v41 = vadd.f32 %v2411_v54, %v2298_v32  ;;  %v3692_v29 = vadd.f32 %v12673_v6, %v3691_v34  ;;  %v3707_v21 = vadd.f32 %v12683_v28, %v3706_v48  ;;  %vm3754_vm8 = vweird.f32 %v12695_v26  ;;  %v7583_v32 = vld [vmem:[%s8030_s15 + $0x190] sm:$0xff]  ;;  %vm12858_vm11 = vmor %vm3708_vm1, %vm3709_vm6 }
 0x48a   : > { %vm12814_vm5 = vcmp.eq.f32.partialorder %v15801_v25, 8.507059e+37  ;;  %v12827_v52 = vadd.f32 1.0, %v7320_v4  ;;  %v3752_v56 = vadd.f32 %v12695_v26, %v3751_v30  ;;  %v6761_v44 = vmul.f32 -1.442695, %v15806_v22  ;;  %2125 = vmatmul.f32.gmra.mxu0 %v7583_v32  ;;  %2351 = vmatmul.f32.gmra.mxu2 %v7583_v32  ;;  %vm12879_vm14 = vmor %vm3753_vm3, %vm3754_vm8 }
 0x48b   : > { %v12832_v25 = vmul.f32 %v12578_v47, %v2412_v41  ;;  %v12834_v58 = vadd.f32 %v2188_v16, %v2075_v63  ;;  %v12837_v34 = vpop.eup %7323  ;;  %v3715_v48 = vor.u32 1.1754944e-38, %v3714_v8  ;;  %v3766_v47 = vmul.f32 %v12748_v27, %v3765_v57  ;;  %v7584_v41 = vld [vmem:[%s8030_s15 + $0x198] sm:$0xff]  ;;  %v5272_v8 = vld [vmem:[%s8044_s6 + $0x110] sm:$0xff] }
 0x48c   : > { %v3810_v30 = vsub.f32 1.0, %v3809_v10  ;;  %v12848_v54 = vadd.f32 1.0, %v7322_v1  ;;  %2238 = vmatmul.f32.gmra.mxu1 %v7584_v41  ;;  %v7326_v63 = vpop.eup %7325  ;;  %v12852_v16 = vmul.f32 %v3641_v24, %v15735_v42  ;;  %vm12862_vm12 = vcmp.eq.f32.partialorder %v3757_v19, 8.507059e+37  ;;  %2464 = vmatmul.f32.gmra.mxu3 %v7584_v41  ;;  %v5304_v10 = vld [vmem:[%s8044_s6 + $0x210] sm:$0xff] }
 0x48d   : > { %15807 = vst [vmem:[#allocation130_spill] sm:$0xff] %v12832_v25  ;;  %v3760_v57 = vor.u32 1.1754944e-38, %v3759_v0  ;;  %vm3768_vm13 = vweird.f32 %v12667_v3  ;;  %v5336_v42 = vld [vmem:[%s8044_s6 + $0x310] sm:$0xff]  ;;  %v7328_v24 = vpop.eup %7327  ;;  %v12870_v1 = vmul.f32 %v3656_v13, %v15740_v62  ;;  %v3696_v5 = vsel %vm12843_vm9, %v12673_v6, %v3692_v29  ;;  %5606 = vmatpush.msra.mxu2 %v5304_v10  ;;  %5493 = vmatpush.msra.mxu1 %v5272_v8 }
 0x48e   : > { %15808 = vst [vmem:[#allocation131_spill] sm:$0xff] %v12834_v58  ;;  %vm12883_vm15 = vcmp.eq.f32.partialorder %v3772_v15, 8.507059e+37  ;;  %v3775_v32 = vor.u32 1.1754944e-38, %v3774_v51  ;;  %7329 = vrcp.f32 %v12827_v52  ;;  %5719 = vmatpush.msra.mxu3 %v5336_v42  ;;  %v3711_v62 = vsel %vm12858_vm11, %v12683_v28, %v3707_v21  ;;  %v2301_v51 = vpop.f32.mrf.mxu2  ;;  %v2414_v29 = vpop.f32.mrf.mxu3  ;;  %v5240_v42 = vld [vmem:[%s8044_s6 + $0x10] sm:$0xff]  ;;  %v5270_v58 = vld [vmem:[%s8044_s6 + $0x100] sm:$0xff] }
 0x48f   : > { %v3756_v7 = vsel %vm12879_vm14, %v12695_v26, %v3752_v56  ;;  %vm3769_vm0 = vweird.f32 %v12748_v27  ;;  %7331 = vpow2.f32 %v6761_v44  ;;  %v3767_v6 = vadd.f32 %v12748_v27, %v3766_v47  ;;  %5380 = vmatpush.msra.mxu0 %v5240_v42  ;;  %5494 = vmatpush.msra.mxu1 %v5270_v58 }
 0x490   : > { %v3811_v15 = vmul.f32 %v12779_v50, %v3810_v30  ;;  %7333 = vrcp.f32 %v12848_v54  ;;  %v12898_v13 = vadd.f32 1.0, %v7326_v63  ;;  %v3817_v28 = vand.u32 2147483647, %v12698_v2  ;;  %v15819_v30 = vld [vmem:[#allocation132_spill] sm:$0xff]  ;;  %v2078_v63 = vpop.f32.mrf.mxu0  ;;  %v2191_v11 = vpop.f32.mrf.mxu1  ;;  %vm12918_vm1 = vmor %vm3768_vm13, %vm3769_vm0 }
 0x491   : > { %v3824_v21 = vmul.f32 %v12837_v34, %v12752_v53  ;;  %v12903_v26 = vadd.f32 1.0, %v7328_v24  ;;  %v2415_v56 = vadd.f32 %v2414_v29, %v2301_v51  ;;  %v3701_v44 = vsel %vm12814_vm5, %v12746_v59, %v3696_v5  ;;  %v15824_v5 = vld [vmem:[#allocation133_spill] sm:$0xff] }
 0x492   : > { %v3716_v4 = vsel %vm12819_vm7, %v3715_v48, %v3711_v62  ;;  %v3819_v47 = vand.u32 2147483648, %v12698_v2  ;;  %v6762_v41 = vmul.f32 -1.442695, %v15819_v30  ;;  %v3761_v10 = vsel %vm12862_vm12, %v3760_v57, %v3756_v7  ;;  %v7585_v48 = vld [vmem:[%s8030_s15 + $0x1a0] sm:$0xff] }
 0x493   : > { %vm3814_vm2 = vweird.f32 %v12779_v50  ;;  %v12924_v59 = vmul.f32 %v12686_v33, %v2415_v56  ;;  %v12926_v49 = vadd.f32 %v2191_v11, %v2078_v63  ;;  %2128 = vmatmul.f32.gmra.mxu0 %v7585_v48  ;;  %v3771_v3 = vsel %vm12918_vm1, %v12748_v27, %v3767_v6  ;;  %v7586_v33 = vld [vmem:[%s8030_s15 + $0x1a8] sm:$0xff]  ;;  %2354 = vmatmul.f32.gmra.mxu2 %v7585_v48  ;;  %v15833_v7 = vld [vmem:[#allocation23_spill] sm:$0xff] }
 0x494   : > { %v12931_v57 = vpop.eup %7329  ;;  %v3812_v24 = vadd.f32 %v12779_v50, %v3811_v15  ;;  %7335 = vrcp.f32 %v12898_v13  ;;  %v6765_v19 = vmul.f32 -1.442695, %v15824_v5  ;;  %2241 = vmatmul.f32.gmra.mxu1 %v7586_v33  ;;  %vm3813_vm3 = vweird.f32 %v12698_v2  ;;  %2467 = vmatmul.f32.gmra.mxu3 %v7586_v33 }
 0x495   : > { %15822 = vst [vmem:[#allocation132_spill] sm:$0xff] %v12924_v59  ;;  %v7332_v62 = vpop.eup %7331  ;;  %vm12941_vm4 = vcmp.eq.f32.partialorder %v3817_v28, 8.507059e+37  ;;  %v3825_v51 = vsub.f32 1.0, %v3824_v21  ;;  %7337 = vrcp.f32 %v12903_v26  ;;  %v12949_v6 = vmul.f32 %v3701_v44, %v15753_v17  ;;  %vm12964_vm5 = vmor %vm3813_vm3, %vm3814_vm2 }
 0x496   : > { %15823 = vst [vmem:[#allocation152_spill] sm:$0xff] %v12926_v49  ;;  %v12946_v27 = vpop.eup %7333  ;;  %v3820_v15 = vor.u32 1.1754944e-38, %v3819_v47  ;;  %v3834_v29 = vand.u32 2147483648, %v12752_v53  ;;  %7339 = vpow2.f32 %v6762_v41  ;;  %v12953_v28 = vmul.f32 %v3716_v4, %v15754_v35  ;;  %v2304_v0 = vpop.f32.mrf.mxu2 }
 0x497   : > { %v12956_v56 = vmul.f32 %v3761_v10, %v15756_v20  ;;  %v3776_v21 = vsel %vm12883_vm15, %v3775_v32, %v3771_v3  ;;  %v3832_v44 = vand.u32 2147483647, %v12752_v53  ;;  %v3816_v35 = vsel %vm12964_vm5, %v12779_v50, %v3812_v24  ;;  %v2417_v32 = vpop.f32.mrf.mxu3 }
 0x498   : > { %v3869_v20 = vmul.f32 %v12931_v57, %v12827_v52  ;;  %v12974_v4 = vadd.f32 1.0, %v7332_v62  ;;  %7341 = vpow2.f32 %v6765_v19  ;;  %v3826_v2 = vmul.f32 %v12837_v34, %v3825_v51  ;;  %v2081_v42 = vpop.f32.mrf.mxu0  ;;  %v2194_v8 = vpop.f32.mrf.mxu1  ;;  %v7587_v51 = vld [vmem:[%s8030_s15 + $0x1b0] sm:$0xff] }
 0x499   : > { %vm3828_vm6 = vweird.f32 %v12752_v53  ;;  %v3884_v47 = vmul.f32 %v12946_v27, %v12848_v54  ;;  %v2418_v41 = vadd.f32 %v2417_v32, %v2304_v0  ;;  %v12983_v50 = vmul.f32 %v3776_v21, %v15760_v38  ;;  %v5302_v32 = vld [vmem:[%s8044_s6 + $0x200] sm:$0xff] }
 0x49a   : > { %v12980_v63 = vpop.eup %7335  ;;  %v12985_v11 = vor.u32 1.1754944e-38, %v3834_v29  ;;  %v3879_v10 = vand.u32 2147483648, %v12827_v52  ;;  %v6766_v48 = vmul.f32 -1.442695, %v15829_v31  ;;  %v3821_v24 = vsel %vm12941_vm4, %v3820_v15, %v3816_v35  ;;  %5607 = vmatpush.msra.mxu2 %v5302_v32 }
 0x49b   : > { %v12989_v3 = vpop.eup %7337  ;;  %vm12993_vm7 = vcmp.eq.f32.partialorder %v3832_v44, 8.507059e+37  ;;  %v3877_v38 = vand.u32 2147483647, %v12827_v52  ;;  %v12999_v33 = vmul.f32 %v12738_v43, %v2418_v41  ;;  %v2195_v62 = vadd.f32 %v2194_v8, %v2081_v42  ;;  %2131 = vmatmul.f32.gmra.mxu0 %v7587_v51  ;;  %v7588_v44 = vld [vmem:[%s8030_s15 + $0x1b8] sm:$0xff]  ;;  %2357 = vmatmul.f32.gmra.mxu2 %v7587_v51 }
 0x49c   : > { %v7340_v29 = vpop.eup %7339  ;;  %v3870_v21 = vsub.f32 1.0, %v3869_v20  ;;  %v3894_v17 = vand.u32 2147483648, %v12848_v54  ;;  %7343 = vrcp.f32 %v12974_v4  ;;  %v6769_v15 = vmul.f32 -1.442695, %v15833_v7  ;;  %2244 = vmatmul.f32.gmra.mxu1 %v7588_v44  ;;  %2470 = vmatmul.f32.gmra.mxu3 %v7588_v44  ;;  %v5334_v20 = vld [vmem:[%s8044_s6 + $0x300] sm:$0xff] }
 0x49d   : > { %15832 = vst [vmem:[#allocation133_spill] sm:$0xff] %v12999_v33  ;;  %v3827_v35 = vadd.f32 %v12837_v34, %v3826_v2  ;;  %vm3829_vm8 = vweird.f32 %v12837_v34  ;;  %v3885_v43 = vsub.f32 1.0, %v3884_v47  ;;  %v13009_v0 = vmul.f32 %v12852_v16, %v2195_v62  ;;  %5720 = vmatpush.msra.mxu3 %v5334_v20  ;;  %v15837_v33 = vld [vmem:[#allocation24_spill] sm:$0xff] }
 0x49e   : > { %v7342_v41 = vpop.eup %7341  ;;  %v13014_v42 = vmul.f32 %v3821_v24, %v15767_v61  ;;  %vm3873_vm9 = vweird.f32 %v12827_v52  ;;  %v13017_v8 = vor.u32 1.1754944e-38, %v3879_v10  ;;  %v3929_v2 = vmul.f32 %v12980_v63, %v12898_v13  ;;  %vm13032_vm13 = vmor %vm3828_vm6, %vm3829_vm8  ;;  %v2307_v51 = vpop.f32.mrf.mxu2 }
 0x49f   : > { %15834 = vst [vmem:[#allocation134_spill] sm:$0xff] %v13009_v0  ;;  %7345 = vpow2.f32 %v6766_v48  ;;  %vm3874_vm11 = vweird.f32 %v12931_v57  ;;  %vm3888_vm12 = vweird.f32 %v12848_v54  ;;  %v3892_v16 = vand.u32 2147483647, %v12848_v54  ;;  %v2420_v44 = vpop.f32.mrf.mxu3 }
 0x4a0   : > { %v3944_v61 = vmul.f32 %v12989_v3, %v12903_v26  ;;  %v13026_v47 = vadd.f32 1.0, %v7340_v29  ;;  %v3871_v48 = vmul.f32 %v12931_v57, %v3870_v21  ;;  %v13037_v24 = vor.u32 1.1754944e-38, %v3894_v17  ;;  %v2084_v59 = vpop.f32.mrf.mxu0  ;;  %v2197_v10 = vpop.f32.mrf.mxu1  ;;  %vm13088_vm3 = vmor %vm3873_vm9, %vm3874_vm11 }
 0x4a1   : > { %v3937_v62 = vand.u32 2147483647, %v12898_v13  ;;  %7347 = vpow2.f32 %v6769_v15  ;;  %v3831_v29 = vsel %vm13032_vm13, %v12837_v34, %v3827_v35  ;;  %v3886_v32 = vmul.f32 %v12946_v27, %v3885_v43 }
 0x4a2   : > { %v13044_v53 = vadd.f32 1.0, %v7342_v41  ;;  %v2421_v20 = vadd.f32 %v2420_v44, %v2307_v51  ;;  %v13046_v0 = vpop.eup %7343  ;;  %v3930_v21 = vsub.f32 1.0, %v3929_v2  ;;  %v3939_v17 = vand.u32 2147483648, %v12898_v13  ;;  %v7589_v51 = vld [vmem:[%s8030_s15 + $0x1c0] sm:$0xff] }
 0x4a3   : > { %v3954_v15 = vand.u32 2147483648, %v12903_v26  ;;  %v6770_v49 = vmul.f32 -1.442695, %v15837_v33  ;;  %vm13051_vm14 = vcmp.eq.f32.partialorder %v3877_v38, 8.507059e+37  ;;  %vm13055_vm15 = vcmp.eq.f32.partialorder %v3892_v16, 8.507059e+37  ;;  %2134 = vmatmul.f32.gmra.mxu0 %v7589_v51  ;;  %v5238_v44 = vld [vmem:[%s8044_s6] sm:$0xff]  ;;  %2360 = vmatmul.f32.gmra.mxu2 %v7589_v51 }
 0x4a4   : > { %v3945_v43 = vsub.f32 1.0, %v3944_v61  ;;  %7349 = vrcp.f32 %v13026_v47  ;;  %v13061_v41 = vmul.f32 %v12870_v1, %v2421_v20  ;;  %v2198_v2 = vadd.f32 %v2197_v10, %v2084_v59  ;;  %v7590_v1 = vld [vmem:[%s8030_s15 + $0x1c8] sm:$0xff]  ;;  %5381 = vmatpush.msra.mxu0 %v5238_v44 }
 0x4a5   : > { %v7346_v38 = vpop.eup %7345  ;;  %v3836_v25 = vsel %vm12993_vm7, %v12985_v11, %v3831_v29  ;;  %v3872_v16 = vadd.f32 %v12931_v57, %v3871_v48  ;;  %vm3889_vm0 = vweird.f32 %v12946_v27  ;;  %vm3933_vm1 = vweird.f32 %v12898_v13  ;;  %2247 = vmatmul.f32.gmra.mxu1 %v7590_v1  ;;  %2473 = vmatmul.f32.gmra.mxu3 %v7590_v1  ;;  %v15844_v29 = vld [vmem:[#allocation26_spill] sm:$0xff]  ;;  %v15853_v1 = vld [vmem:[#allocation27_spill] sm:$0xff] }
 0x4a6   : > { %15842 = vst [vmem:[#allocation23_spill] sm:$0xff] %v13061_v41  ;;  %v3952_v61 = vand.u32 2147483647, %v12903_v26  ;;  %v3887_v59 = vadd.f32 %v12946_v27, %v3886_v32  ;;  %v3989_v20 = vmul.f32 %v13046_v0, %v12974_v4  ;;  %7351 = vrcp.f32 %v13044_v53  ;;  %vm13109_vm4 = vmor %vm3888_vm12, %vm3889_vm0 }
 0x4a7   : > { %v13079_v11 = vmul.f32 %v12949_v6, %v2198_v2  ;;  %v7348_v19 = vpop.eup %7347  ;;  %v3931_v48 = vmul.f32 %v12980_v63, %v3930_v21  ;;  %vm3948_vm2 = vweird.f32 %v12903_v26  ;;  %7353 = vpow2.f32 %v6770_v49 }
 0x4a8   : > { %v6773_v10 = vmul.f32 -1.442695, %v15844_v29  ;;  %v13092_v6 = vor.u32 1.1754944e-38, %v3939_v17  ;;  %v3946_v2 = vmul.f32 %v12989_v3, %v3945_v43  ;;  %v13095_v51 = vor.u32 1.1754944e-38, %v3954_v15  ;;  %v2423_v15 = vpop.f32.mrf.mxu3  ;;  %v2200_v52 = vpop.f32.mrf.mxu1 }
 0x4a9   : > { %15843 = vst [vmem:[#allocation24_spill] sm:$0xff] %v13079_v11  ;;  %v13097_v21 = vadd.f32 1.0, %v7346_v38  ;;  %v13100_v49 = vmul.f32 %v3836_v25, %v15777_v14  ;;  %v3876_v58 = vsel %vm13088_vm3, %v12931_v57, %v3872_v16  ;;  %vm3934_vm5 = vweird.f32 %v12980_v63  ;;  %v2310_v25 = vpop.f32.mrf.mxu2  ;;  %v2087_v11 = vpop.f32.mrf.mxu0 }
 0x4aa   : > { %vm13114_vm6 = vcmp.eq.f32.partialorder %v3937_v62, 8.507059e+37  ;;  %v3997_v14 = vand.u32 2147483647, %v12974_v4  ;;  %v13119_v43 = vpop.eup %7349  ;;  %v3891_v54 = vsel %vm13109_vm4, %v12946_v27, %v3887_v59  ;;  %vm13124_vm7 = vcmp.eq.f32.partialorder %v3952_v61, 8.507059e+37  ;;  %vm13155_vm9 = vmor %vm3933_vm1, %vm3934_vm5 }
 0x4ab   : > { %v3990_v44 = vsub.f32 1.0, %v3989_v20  ;;  %v13128_v62 = vadd.f32 1.0, %v7348_v19  ;;  %v2424_v38 = vadd.f32 %v2423_v15, %v2310_v25  ;;  %v3932_v16 = vadd.f32 %v12980_v63, %v3931_v48  ;;  %v7591_v19 = vld [vmem:[%s8030_s15 + $0x1d0] sm:$0xff]  ;;  %v7592_v15 = vld [vmem:[%s8030_s15 + $0x1d8] sm:$0xff] }
 0x4ac   : > { %vm3949_vm8 = vweird.f32 %v12989_v3  ;;  %7355 = vpow2.f32 %v6773_v10  ;;  %v6774_v32 = vmul.f32 -1.442695, %v15853_v1  ;;  %v13133_v27 = vpop.eup %7351  ;;  %v3947_v61 = vadd.f32 %v12989_v3, %v3946_v2  ;;  %2137 = vmatmul.f32.gmra.mxu0 %v7591_v19  ;;  %2363 = vmatmul.f32.gmra.mxu2 %v7591_v19 }
 0x4ad   : > { %7357 = vrcp.f32 %v13097_v21  ;;  %v13138_v59 = vmul.f32 %v12953_v28, %v2424_v38  ;;  %v2201_v20 = vadd.f32 %v2200_v52, %v2087_v11  ;;  %v7354_v48 = vpop.eup %7353  ;;  %v3881_v10 = vsel %vm13051_vm14, %v13017_v8, %v3876_v58  ;;  %2250 = vmatmul.f32.gmra.mxu1 %v7592_v15  ;;  %2476 = vmatmul.f32.gmra.mxu3 %v7592_v15  ;;  %v5333_v58 = vld [vmem:[%s8044_s6 + $0x2f8] sm:$0xff]  ;;  %vm13174_vm11 = vmor %vm3948_vm2, %vm3949_vm8 }
 0x4ae   : > { %v3896_v25 = vsel %vm13055_vm15, %v13037_v24, %v3891_v54  ;;  %v3999_v2 = vand.u32 2147483648, %v12974_v4  ;;  %v4004_v28 = vmul.f32 %v13119_v43, %v13026_v47  ;;  %v3991_v8 = vmul.f32 %v13046_v0, %v3990_v44  ;;  %v15856_v24 = vld [vmem:[#allocation25_spill] sm:$0xff]  ;;  %v5365_v54 = vld [vmem:[%s8044_s6 + $0x3f8] sm:$0xff]  ;;  %6044 = vmatpush.msrb.mxu2 %v5333_v58 }
 0x4af   : > { %7359 = vrcp.f32 %v13128_v62  ;;  %v6777_v34 = vmul.f32 -1.442695, %v15856_v24  ;;  %v13163_v35 = vmul.f32 %v12956_v56, %v2201_v20  ;;  %v3936_v13 = vsel %vm13155_vm9, %v12980_v63, %v3932_v16  ;;  %6157 = vmatpush.msrb.mxu3 %v5365_v54  ;;  %v5301_v58 = vld [vmem:[%s8044_s6 + $0x1f8] sm:$0xff] }
 0x4b0   : > { %vm3993_vm12 = vweird.f32 %v12974_v4  ;;  %v4049_v56 = vmul.f32 %v13133_v27, %v13044_v53  ;;  %7361 = vpow2.f32 %v6774_v32  ;;  %v13182_v38 = vmul.f32 %v3881_v10, %v15786_v9  ;;  %v2426_v10 = vpop.f32.mrf.mxu3  ;;  %5931 = vmatpush.msrb.mxu1 %v5301_v58 }
 0x4b1   : > { %v3951_v63 = vsel %vm13174_vm11, %v12989_v3, %v3947_v61  ;;  %vm13187_vm13 = vcmp.eq.f32.partialorder %v3997_v14, 8.507059e+37  ;;  %v13191_v16 = vadd.f32 1.0, %v7354_v48  ;;  %v13194_v20 = vmul.f32 %v3896_v25, %v15790_v23  ;;  %v2313_v9 = vpop.f32.mrf.mxu2  ;;  %v2090_v17 = vpop.f32.mrf.mxu0 }
 0x4b2   : > { %v7356_v52 = vpop.eup %7355  ;;  %vm3994_vm14 = vweird.f32 %v13046_v0  ;;  %v4000_v32 = vor.u32 1.1754944e-38, %v3999_v2  ;;  %v4005_v19 = vsub.f32 1.0, %v4004_v28  ;;  %v3941_v3 = vsel %vm13114_vm6, %v13092_v6, %v3936_v13  ;;  %v2203_v6 = vpop.f32.mrf.mxu1 }
 0x4b3   : > { %v13197_v15 = vpop.eup %7357  ;;  %v3992_v14 = vadd.f32 %v13046_v0, %v3991_v8  ;;  %7363 = vpow2.f32 %v6777_v34  ;;  %v2427_v61 = vadd.f32 %v2426_v10, %v2313_v9  ;;  %v3956_v23 = vsel %vm13124_vm7, %v13095_v51, %v3951_v63  ;;  %v7593_v8 = vld [vmem:[%s8030_s15 + $0x1e0] sm:$0xff]  ;;  %v5269_v34 = vld [vmem:[%s8044_s6 + $0xf8] sm:$0xff]  ;;  %vm13227_vm0 = vmor %vm3993_vm12, %vm3994_vm14 }
 0x4b4   : > { %vm4008_vm15 = vweird.f32 %v13026_v47  ;;  %v4012_v48 = vand.u32 2147483647, %v13026_v47  ;;  %v4014_v25 = vand.u32 2147483648, %v13026_v47  ;;  %v4050_v2 = vsub.f32 1.0, %v4049_v56  ;;  %2140 = vmatmul.f32.gmra.mxu0 %v7593_v8  ;;  %v15864_v63 = vld [vmem:[#allocation28_spill] sm:$0xff]  ;;  %2366 = vmatmul.f32.gmra.mxu2 %v7593_v8  ;;  %v5361_v8 = vld [vmem:[%s8044_s6 + $0x3d8] sm:$0xff] }
 0x4b5   : > { %v13209_v28 = vpop.eup %7359  ;;  %7365 = vrcp.f32 %v13191_v16  ;;  %v13212_v11 = vadd.f32 1.0, %v7356_v52  ;;  %v13215_v57 = vmul.f32 %v12983_v50, %v2427_v61  ;;  %v2204_v51 = vadd.f32 %v2203_v6, %v2090_v17  ;;  %v7594_v9 = vld [vmem:[%s8030_s15 + $0x1e8] sm:$0xff]  ;;  %5818 = vmatpush.msrb.mxu0 %v5269_v34 }
 0x4b6   : > { %v7362_v54 = vpop.eup %7361  ;;  %v13221_v13 = vmul.f32 %v3941_v3, %v15795_v55  ;;  %v4006_v50 = vmul.f32 %v13119_v43, %v4005_v19  ;;  %v4064_v56 = vmul.f32 %v13197_v15, %v13097_v21  ;;  %v6778_v52 = vmul.f32 -1.442695, %v15864_v63  ;;  %2253 = vmatmul.f32.gmra.mxu1 %v7594_v9  ;;  %2479 = vmatmul.f32.gmra.mxu3 %v7594_v9 }
 0x4b7   : > { %15861 = vst [vmem:[#allocation26_spill] sm:$0xff] %v13215_v57  ;;  %v3996_v55 = vsel %vm13227_vm0, %v13046_v0, %v3992_v14  ;;  %v4057_v4 = vand.u32 2147483647, %v13044_v53  ;;  %v4059_v10 = vand.u32 2147483648, %v13044_v53  ;;  %v13242_v3 = vmul.f32 %v13014_v42, %v2204_v51  ;;  %v7596_v57 = vld [vmem:[%s8030_s15 + $0x1f8] sm:$0xff] }
 0x4b8   : > { %v13245_v19 = vmul.f32 %v3956_v23, %v15797_v45  ;;  %vm13247_vm1 = vcmp.eq.f32.partialorder %v4012_v48, 8.507059e+37  ;;  %v4015_v17 = vor.u32 1.1754944e-38, %v4014_v25  ;;  %v4051_v6 = vmul.f32 %v13133_v27, %v4050_v2  ;;  %v2429_v2 = vpop.f32.mrf.mxu3 }
 0x4b9   : > { %15865 = vst [vmem:[#allocation27_spill] sm:$0xff] %v13242_v3  ;;  %v4109_v0 = vmul.f32 %v13209_v28, %v13128_v62  ;;  %v7364_v14 = vpop.eup %7363  ;;  %vm4009_vm2 = vweird.f32 %v13119_v43  ;;  %vm4053_vm3 = vweird.f32 %v13044_v53  ;;  %7367 = vrcp.f32 %v13212_v11  ;;  %v2316_v25 = vpop.f32.mrf.mxu2 }
 0x4ba   : > { %v13257_v45 = vadd.f32 1.0, %v7362_v54  ;;  %v4001_v42 = vsel %vm13187_vm13, %v4000_v32, %v3996_v55  ;;  %v4007_v23 = vadd.f32 %v13119_v43, %v4006_v50  ;;  %v4065_v48 = vsub.f32 1.0, %v4064_v56  ;;  %v2093_v56 = vpop.f32.mrf.mxu0  ;;  %vm13279_vm7 = vmor %vm4008_vm15, %vm4009_vm2  ;;  %v15872_v55 = vld [vmem:[#allocation29_spill] sm:$0xff] }
 0x4bb   : > { %7369 = vpow2.f32 %v6778_v52  ;;  %v13262_v51 = vpop.eup %7365  ;;  %vm13264_vm4 = vcmp.eq.f32.partialorder %v4057_v4, 8.507059e+37  ;;  %v4060_v34 = vor.u32 1.1754944e-38, %v4059_v10  ;;  %v4072_v58 = vand.u32 2147483647, %v13097_v21  ;;  %v2206_v52 = vpop.f32.mrf.mxu1 }
 0x4bc   : > { %v4074_v54 = vand.u32 2147483648, %v13097_v21  ;;  %v2430_v26 = vadd.f32 %v2429_v2, %v2316_v25  ;;  %v4052_v32 = vadd.f32 %v13133_v27, %v4051_v6  ;;  %vm4054_vm5 = vweird.f32 %v13133_v27  ;;  %v15874_v2 = vld [vmem:[#allocation30_spill] sm:$0xff] }
 0x4bd   : > { %vm4068_vm6 = vweird.f32 %v13097_v21  ;;  %v4110_v44 = vsub.f32 1.0, %v4109_v0  ;;  %v13273_v50 = vadd.f32 1.0, %v7364_v14  ;;  %7371 = vrcp.f32 %v13257_v45  ;;  %v7595_v0 = vld [vmem:[%s8030_s15 + $0x1f0] sm:$0xff]  ;;  %vm13314_vm9 = vmor %vm4053_vm3, %vm4054_vm5  ;;  %v5299_v21 = vld [vmem:[%s8044_s6 + $0x1e8] sm:$0xff] }
 0x4be   : > { %v6781_v4 = vmul.f32 -1.442695, %v15872_v55  ;;  %v13286_v10 = vmul.f32 %v13100_v49, %v2430_v26  ;;  %v2207_v6 = vadd.f32 %v2206_v52, %v2093_v56  ;;  %2143 = vmatmul.f32.gmra.mxu0 %v7595_v0  ;;  %v4011_v47 = vsel %vm13279_vm7, %v13119_v43, %v4007_v23  ;;  %2256 = vmatmul.f32.gmra.mxu1 %v7596_v57  ;;  %v5331_v23 = vld [vmem:[%s8044_s6 + $0x2e8] sm:$0xff] }
 0x4bf   : > { %v4066_v14 = vmul.f32 %v13197_v15, %v4065_v48  ;;  %v4124_v25 = vmul.f32 %v13262_v51, %v13191_v16  ;;  %v6782_v3 = vmul.f32 -1.442695, %v15874_v2  ;;  %v13297_v49 = vpop.eup %7367  ;;  %v13300_v26 = vmul.f32 %v4001_v42, %v15806_v22  ;;  %2369 = vmatmul.f32.gmra.mxu2 %v7595_v0  ;;  %2482 = vmatmul.f32.gmra.mxu3 %v7596_v57  ;;  %v5363_v48 = vld [vmem:[%s8044_s6 + $0x3e8] sm:$0xff] }
 0x4c0   : > { %15873 = vst [vmem:[#allocation25_spill] sm:$0xff] %v13286_v10  ;;  %vm4069_vm8 = vweird.f32 %v13197_v15  ;;  %v13303_v56 = vor.u32 1.1754944e-38, %v4074_v54  ;;  %v13306_v43 = vmul.f32 %v13182_v38, %v2207_v6  ;;  %vm13318_vm11 = vcmp.eq.f32.partialorder %v4072_v58, 8.507059e+37  ;;  %6045 = vmatpush.msrb.mxu2 %v5331_v23  ;;  %6158 = vmatpush.msrb.mxu3 %v5363_v48  ;;  %v2432_v23 = vpop.f32.mrf.mxu3  ;;  %v15887_v10 = vld [vmem:[#allocation141_spill] sm:$0xff] }
 0x4c1   : > { %v7370_v52 = vpop.eup %7369  ;;  %vm4113_vm12 = vweird.f32 %v13128_v62  ;;  %v4117_v38 = vand.u32 2147483647, %v13128_v62  ;;  %v4119_v57 = vand.u32 2147483648, %v13128_v62  ;;  %7373 = vrcp.f32 %v13273_v50  ;;  %vm13356_vm15 = vmor %vm4068_vm6, %vm4069_vm8  ;;  %5932 = vmatpush.msrb.mxu1 %v5299_v21 }
 0x4c2   : > { %15875 = vst [vmem:[#allocation28_spill] sm:$0xff] %v13306_v43  ;;  %v4016_v53 = vsel %vm13247_vm1, %v4015_v17, %v4011_v47  ;;  %v4056_v42 = vsel %vm13314_vm9, %v13133_v27, %v4052_v32  ;;  %v4111_v58 = vmul.f32 %v13209_v28, %v4110_v44  ;;  %7375 = vpow2.f32 %v6781_v4  ;;  %v2319_v43 = vpop.f32.mrf.mxu2  ;;  %v15880_v27 = vld [vmem:[#allocation35_spill] sm:$0xff]  ;;  %6159 = vmatpush.msrb.mxu3 %v5361_v8 }
 0x4c3   : > { %v4067_v54 = vadd.f32 %v13197_v15, %v4066_v14  ;;  %v4125_v6 = vsub.f32 1.0, %v4124_v25  ;;  %v4169_v0 = vmul.f32 %v13297_v49, %v13212_v11  ;;  %7377 = vpow2.f32 %v6782_v3  ;;  %v13335_v48 = vpop.eup %7371  ;;  %v2096_v14 = vpop.f32.mrf.mxu0 }
 0x4c4   : > { %v4134_v61 = vand.u32 2147483648, %v13191_v16  ;;  %v13338_v17 = vadd.f32 1.0, %v7370_v52  ;;  %v13342_v32 = vmul.f32 %v15880_v27, %v10086_v60  ;;  %v2433_v44 = vadd.f32 %v2432_v23, %v2319_v43  ;;  %v2209_v25 = vpop.f32.mrf.mxu1 }
 0x4c5   : > { %v13345_v4 = vmul.f32 %v4016_v53, %v15819_v30  ;;  %v4061_v3 = vsel %vm13264_vm4, %v4060_v34, %v4056_v42  ;;  %vm4114_vm13 = vweird.f32 %v13209_v28  ;;  %vm4128_vm14 = vweird.f32 %v13191_v16  ;;  %v15886_v34 = vld [vmem:[#allocation31_spill] sm:$0xff]  ;;  %v5267_v53 = vld [vmem:[%s8044_s6 + $0xe8] sm:$0xff] }
 0x4c6   : > { %15881 = vst [vmem:[#allocation29_spill] sm:$0xff] %v13342_v32  ;;  %v4132_v47 = vand.u32 2147483647, %v13191_v16  ;;  %v4112_v30 = vadd.f32 %v13209_v28, %v4111_v58  ;;  %vm13361_vm0 = vcmp.eq.f32.partialorder %v4117_v38, 8.507059e+37  ;;  %v6785_v43 = vmul.f32 -1.442695, %v15886_v34  ;;  %5382 = vmatmul.f32.vlgmr.msra.gmra.mxu0 %v13342_v32  ;;  %5495 = vmatmul.f32.vlgmr.msra.gmra.mxu1 %v15887_v10  ;;  %vm13396_vm1 = vmor %vm4113_vm12, %vm4114_vm13 }
 0x4c7   : > { %v13367_v52 = vmul.f32 %v13194_v20, %v2433_v44  ;;  %v2210_v9 = vadd.f32 %v2209_v25, %v2096_v14  ;;  %v13372_v42 = vpop.eup %7373  ;;  %v4071_v58 = vsel %vm13356_vm15, %v13197_v15, %v4067_v54  ;;  %v4126_v38 = vmul.f32 %v13262_v51, %v4125_v6  ;;  %5819 = vmatpush.msrb.mxu0 %v5267_v53 }
 0x4c8   : > { %v4170_v23 = vsub.f32 1.0, %v4169_v0  ;;  %v4184_v27 = vmul.f32 %v13335_v48, %v13257_v45  ;;  %v7376_v20 = vpop.eup %7375  ;;  %v4120_v44 = vor.u32 1.1754944e-38, %v4119_v57  ;;  %v13381_v14 = vor.u32 1.1754944e-38, %v4134_v61  ;;  %5608 = vmatmul.f32.vlgmr.msra.gmra.mxu2 %v12270_v39  ;;  %5721 = vmatmul.f32.vlgmr.msra.gmra.mxu3 %v12329_v37  ;;  %v15892_v0 = vld [vmem:[#allocation32_spill] sm:$0xff]  ;;  %v2435_v21 = vpop.f32.mrf.mxu3 }
 0x4c9   : > { %7379 = vrcp.f32 %v13338_v17  ;;  %v13385_v25 = vmul.f32 %v13221_v13, %v2210_v9  ;;  %v7378_v15 = vpop.eup %7377  ;;  %v13390_v54 = vmul.f32 %v4061_v3, %v15824_v5  ;;  %vm13400_vm2 = vcmp.eq.f32.partialorder %v4132_v47, 8.507059e+37  ;;  %v15894_v57 = vld [vmem:[#allocation36_spill] sm:$0xff] }
 0x4ca   : > { %vm4173_vm3 = vweird.f32 %v13212_v11  ;;  %v4177_v13 = vand.u32 2147483647, %v13212_v11  ;;  %v6786_v61 = vmul.f32 -1.442695, %v15892_v0  ;;  %v4076_v5 = vsel %vm13318_vm11, %v13303_v56, %v4071_v58  ;;  %v2322_v53 = vpop.f32.mrf.mxu2  ;;  %v15893_v58 = vld [vmem:[#allocation139_spill] sm:$0xff] }
 0x4cb   : > { %v4116_v62 = vsel %vm13396_vm1, %v13209_v28, %v4112_v30  ;;  %vm4129_vm4 = vweird.f32 %v13262_v51  ;;  %7381 = vpow2.f32 %v6785_v43  ;;  %v4127_v3 = vadd.f32 %v13262_v51, %v4126_v38 }
 0x4cc   : > { %v4171_v47 = vmul.f32 %v13297_v49, %v4170_v23  ;;  %v4185_v60 = vsub.f32 1.0, %v4184_v27  ;;  %v13416_v9 = vadd.f32 1.0, %v7376_v20  ;;  %v4229_v22 = vmul.f32 %v13372_v42, %v13273_v50  ;;  %v2099_v27 = vpop.f32.mrf.mxu0  ;;  %v2212_v20 = vpop.f32.mrf.mxu1  ;;  %vm13437_vm5 = vmor %vm4128_vm14, %vm4129_vm4 }
 0x4cd   : > { %v13420_v56 = vadd.f32 1.0, %v7378_v15  ;;  %v13424_v28 = vmul.f32 %v15894_v57, %v15893_v58  ;;  %v2436_v30 = vadd.f32 %v2435_v21, %v2322_v53  ;;  %v13427_v43 = vmul.f32 %v4076_v5, %v15829_v31  ;;  %v15900_v58 = vld [vmem:[#allocation142_spill] sm:$0xff] }
 0x4ce   : > { %v4179_v38 = vand.u32 2147483648, %v13212_v11  ;;  %v4192_v23 = vand.u32 2147483647, %v13257_v45  ;;  %7383 = vpow2.f32 %v6786_v61  ;;  %vm4174_vm6 = vweird.f32 %v13297_v49  ;;  %5498 = vmatmul.f32.gmra.mxu1 %v15900_v58 }
 0x4cf   : > { %15895 = vst [vmem:[#allocation30_spill] sm:$0xff] %v13424_v28  ;;  %v13431_v37 = vpop.eup %7379  ;;  %vm13442_vm7 = vcmp.eq.f32.partialorder %v4177_v13, 8.507059e+37  ;;  %v4194_v61 = vand.u32 2147483648, %v13257_v45  ;;  %v13448_v5 = vmul.f32 %v13245_v19, %v2436_v30  ;;  %v2213_v53 = vadd.f32 %v2212_v20, %v2099_v27  ;;  %5385 = vmatmul.f32.gmra.mxu0 %v13424_v28  ;;  %vm13482_vm9 = vmor %vm4173_vm3, %vm4174_vm6 }
 0x4d0   : > { %v4121_v16 = vsel %vm13361_vm0, %v4120_v44, %v4116_v62  ;;  %v4131_v13 = vsel %vm13437_vm5, %v13262_v51, %v4127_v3  ;;  %v4172_v21 = vadd.f32 %v13297_v49, %v4171_v47  ;;  %7385 = vrcp.f32 %v13416_v9  ;;  %5611 = vmatmul.f32.gmra.mxu2 %v12347_v40  ;;  %5724 = vmatmul.f32.gmra.mxu3 %v12399_v46  ;;  %v5329_v51 = vld [vmem:[%s8044_s6 + $0x2d8] sm:$0xff]  ;;  %v15901_v3 = vld [vmem:[#allocation33_spill] sm:$0xff] }
 0x4d1   : > { %v7382_v57 = vpop.eup %7381  ;;  %v4186_v19 = vmul.f32 %v13335_v48, %v4185_v60  ;;  %v4230_v30 = vsub.f32 1.0, %v4229_v22  ;;  %7387 = vrcp.f32 %v13420_v56  ;;  %v13462_v27 = vmul.f32 %v13300_v26, %v2213_v53  ;;  %6046 = vmatpush.msrb.mxu2 %v5329_v51  ;;  %v2438_v53 = vpop.f32.mrf.mxu3 }
 0x4d2   : > { %v4180_v44 = vor.u32 1.1754944e-38, %v4179_v38  ;;  %vm4188_vm8 = vweird.f32 %v13257_v45  ;;  %v4244_v62 = vmul.f32 %v13431_v37, %v13338_v17  ;;  %v6789_v47 = vmul.f32 -1.442695, %v15901_v3  ;;  %v2325_v15 = vpop.f32.mrf.mxu2  ;;  %v5263_v38 = vld [vmem:[%s8044_s6 + $0xc8] sm:$0xff] }
 0x4d3   : > { %v13473_v60 = vmul.f32 %v4121_v16, %v15833_v7  ;;  %v4136_v26 = vsel %vm13400_vm2, %v13381_v14, %v4131_v13  ;;  %vm13486_vm11 = vcmp.eq.f32.partialorder %v4192_v23, 8.507059e+37  ;;  %v4195_v20 = vor.u32 1.1754944e-38, %v4194_v61  ;;  %v15906_v61 = vld [vmem:[#allocation143_spill] sm:$0xff]  ;;  %v15907_v13 = vld [vmem:[#allocation45_spill] sm:$0xff] }
 0x4d4   : > { %vm4233_vm12 = vweird.f32 %v13273_v50  ;;  %v7384_v7 = vpop.eup %7383  ;;  %v4176_v14 = vsel %vm13482_vm9, %v13297_v49, %v4172_v21  ;;  %vm4189_vm13 = vweird.f32 %v13335_v48  ;;  %v4237_v11 = vand.u32 2147483647, %v13273_v50  ;;  %v2102_v46 = vpop.f32.mrf.mxu0 }
 0x4d5   : > { %v13496_v6 = vadd.f32 1.0, %v7382_v57  ;;  %v4187_v23 = vadd.f32 %v13335_v48, %v4186_v19  ;;  %v4231_v16 = vmul.f32 %v13372_v42, %v4230_v30  ;;  %v13502_v51 = vmul.f32 %v15907_v13, %v15906_v61  ;;  %v2215_v19 = vpop.f32.mrf.mxu1  ;;  %vm13527_vm14 = vmor %vm4188_vm8, %vm4189_vm13 }
 0x4d6   : > { %v2439_v8 = vadd.f32 %v2438_v53, %v2325_v15  ;;  %v13504_v49 = vpop.eup %7385  ;;  %v13507_v21 = vmul.f32 %v4136_v26, %v15837_v33  ;;  %v4239_v57 = vand.u32 2147483648, %v13273_v50  ;;  %v4245_v22 = vsub.f32 1.0, %v4244_v62  ;;  %v5265_v33 = vld [vmem:[%s8044_s6 + $0xd8] sm:$0xff]  ;;  %v15920_v50 = vld [vmem:[#allocation144_spill] sm:$0xff] }
 0x4d7   : > { %15908 = vst [vmem:[#allocation35_spill] sm:$0xff] %v13502_v51  ;;  %7389 = vpow2.f32 %v6789_v47  ;;  %v13510_v40 = vpop.eup %7387  ;;  %v4254_v30 = vand.u32 2147483648, %v13338_v17  ;;  %v13513_v58 = vadd.f32 1.0, %v7384_v7  ;;  %v2216_v15 = vadd.f32 %v2215_v19, %v2102_v46  ;;  %5388 = vmatmul.f32.gmra.mxu0 %v13502_v51  ;;  %v5297_v26 = vld [vmem:[%s8044_s6 + $0x1d8] sm:$0xff]  ;;  %v15911_v46 = vld [vmem:[#allocation48_spill] sm:$0xff] }
 0x4d8   : > { %v13516_v61 = vmul.f32 %v13345_v4, %v2439_v8  ;;  %v4181_v62 = vsel %vm13442_vm7, %v4180_v44, %v4176_v14  ;;  %vm4234_vm15 = vweird.f32 %v13372_v42  ;;  %v4252_v4 = vand.u32 2147483647, %v13338_v17  ;;  %5501 = vmatmul.f32.gmra.mxu1 %v15911_v46  ;;  %5820 = vmatpush.msrb.mxu0 %v5265_v33  ;;  %v15914_v7 = vld [vmem:[#allocation34_spill] sm:$0xff] }
 0x4d9   : > { %7391 = vrcp.f32 %v13496_v6  ;;  %v4191_v31 = vsel %vm13527_vm14, %v13335_v48, %v4187_v23  ;;  %v4232_v44 = vadd.f32 %v13372_v42, %v4231_v16  ;;  %vm13539_vm0 = vcmp.eq.f32.partialorder %v4237_v11, 8.507059e+37  ;;  %5614 = vmatmul.f32.gmra.mxu2 %v12413_v12  ;;  %5727 = vmatmul.f32.gmra.mxu3 %v12485_v18  ;;  %vm13568_vm2 = vmor %vm4233_vm12, %vm4234_vm15  ;;  %v15923_v51 = vld [vmem:[#allocation38_spill] sm:$0xff] }
 0x4da   : > { %v6790_v14 = vmul.f32 -1.442695, %v15914_v7  ;;  %v13545_v53 = vmul.f32 %v13390_v54, %v2216_v15  ;;  %v4240_v13 = vor.u32 1.1754944e-38, %v4239_v57  ;;  %v4246_v8 = vmul.f32 %v13431_v37, %v4245_v22  ;;  %5933 = vmatpush.msrb.mxu1 %v5297_v26  ;;  %v15915_v54 = vld [vmem:[#allocation37_spill] sm:$0xff]  ;;  %v2328_v33 = vpop.f32.mrf.mxu2  ;;  %v2441_v26 = vpop.f32.mrf.mxu3  ;;  %5821 = vmatpush.msrb.mxu0 %v5263_v38 }
 0x4db   : > { %v4289_v48 = vmul.f32 %v13504_v49, %v13416_v9  ;;  %v4304_v11 = vmul.f32 %v13510_v40, %v13420_v56  ;;  %vm4248_vm1 = vweird.f32 %v13338_v17  ;;  %v13555_v23 = vor.u32 1.1754944e-38, %v4254_v30 }
 0x4dc   : > { %7393 = vrcp.f32 %v13513_v58  ;;  %v6793_v16 = vmul.f32 -1.442695, %v15915_v54  ;;  %v13560_v57 = vmul.f32 %v4181_v62, %v15844_v29  ;;  %v4196_v22 = vsel %vm13486_vm11, %v4195_v20, %v4191_v31  ;;  %v15921_v20 = vld [vmem:[#allocation46_spill] sm:$0xff]  ;;  %v2105_v15 = vpop.f32.mrf.mxu0 }
 0x4dd   : > { %v7390_v19 = vpop.eup %7389  ;;  %vm4249_vm3 = vweird.f32 %v13431_v37  ;;  %v4299_v30 = vand.u32 2147483648, %v13416_v9  ;;  %v4236_v29 = vsel %vm13568_vm2, %v13372_v42, %v4232_v44  ;;  %vm13577_vm4 = vcmp.eq.f32.partialorder %v4252_v4, 8.507059e+37  ;;  %v2218_v42 = vpop.f32.mrf.mxu1 }
 0x4de   : > { %7395 = vpow2.f32 %v6790_v14  ;;  %v13583_v62 = vmul.f32 %v15921_v20, %v15920_v50  ;;  %v2442_v47 = vadd.f32 %v2441_v26, %v2328_v33  ;;  %v4247_v18 = vadd.f32 %v13431_v37, %v4246_v8  ;;  %v15926_v26 = vld [vmem:[#allocation47_spill] sm:$0xff]  ;;  %v5327_v20 = vld [vmem:[%s8044_s6 + $0x2c8] sm:$0xff]  ;;  %vm13622_vm7 = vmor %vm4248_vm1, %vm4249_vm3 }
 0x4df   : > { %v13585_v31 = vpop.eup %7391  ;;  %v4290_v12 = vsub.f32 1.0, %v4289_v48  ;;  %v4305_v46 = vsub.f32 1.0, %v4304_v11  ;;  %v6794_v28 = vmul.f32 -1.442695, %v15923_v51  ;;  %v13589_v4 = vadd.f32 1.0, %v7390_v19  ;;  %v15925_v11 = vld [vmem:[#allocation40_spill] sm:$0xff]  ;;  %6047 = vmatpush.msrb.mxu2 %v5327_v20 }
 0x4e0   : > { %15922 = vst [vmem:[#allocation31_spill] sm:$0xff] %v13583_v62  ;;  %7397 = vpow2.f32 %v6793_v16  ;;  %v13592_v44 = vmul.f32 %v13427_v43, %v2442_v47  ;;  %v2219_v14 = vadd.f32 %v2218_v42, %v2105_v15  ;;  %5391 = vmatmul.f32.gmra.mxu0 %v13583_v62  ;;  %vm4293_vm5 = vweird.f32 %v13416_v9  ;;  %5504 = vmatmul.f32.gmra.mxu1 %v15926_v26  ;;  %v5359_v47 = vld [vmem:[%s8044_s6 + $0x3c8] sm:$0xff] }
 0x4e1   : > { %v4297_v8 = vand.u32 2147483647, %v13416_v9  ;;  %v13597_v48 = vor.u32 1.1754944e-38, %v4299_v30  ;;  %v6797_v33 = vmul.f32 -1.442695, %v15925_v11  ;;  %v13604_v16 = vmul.f32 %v4196_v22, %v15853_v1  ;;  %5617 = vmatmul.f32.gmra.mxu2 %v12505_v36  ;;  %v15928_v30 = vld [vmem:[#allocation71_spill] sm:$0xff]  ;;  %6160 = vmatpush.msrb.mxu3 %v5359_v47 }
 0x4e2   : > { %15924 = vst [vmem:[#allocation32_spill] sm:$0xff] %v13592_v44  ;;  %v13601_v19 = vpop.eup %7393  ;;  %vm4308_vm6 = vweird.f32 %v13420_v56  ;;  %v4349_v43 = vmul.f32 %v13585_v31, %v13496_v6  ;;  %v13610_v50 = vmul.f32 %v13473_v60, %v2219_v14  ;;  %5730 = vmatmul.f32.gmra.mxu3 %v15928_v30  ;;  %v4241_v15 = vsel %vm13539_vm0, %v4240_v13, %v4236_v29  ;;  %v2331_v20 = vpop.f32.mrf.mxu2 }
 0x4e3   : > { %v4312_v60 = vand.u32 2147483647, %v13420_v56  ;;  %v4314_v22 = vand.u32 2147483648, %v13420_v56  ;;  %7399 = vpow2.f32 %v6794_v28  ;;  %v4251_v45 = vsel %vm13622_vm7, %v13431_v37, %v4247_v18  ;;  %v15931_v28 = vld [vmem:[#allocation41_spill] sm:$0xff]  ;;  %v2444_v47 = vpop.f32.mrf.mxu3 }
 0x4e4   : > { %15927 = vst [vmem:[#allocation139_spill] sm:$0xff] %v13610_v50  ;;  %v7396_v42 = vpop.eup %7395  ;;  %v4291_v13 = vmul.f32 %v13504_v49, %v4290_v12  ;;  %v4306_v17 = vmul.f32 %v13510_v40, %v4305_v46  ;;  %7401 = vrcp.f32 %v13589_v4  ;;  %vm4294_vm8 = vweird.f32 %v13504_v49  ;;  %v15934_v18 = vld [vmem:[#allocation81_spill] sm:$0xff]  ;;  %v2108_v39 = vpop.f32.mrf.mxu0  ;;  %v15938_v50 = vld [vmem:[#allocation82_spill] sm:$0xff] }
 0x4e5   : > { %v4364_v29 = vmul.f32 %v13601_v19, %v13513_v58  ;;  %7403 = vpow2.f32 %v6797_v33  ;;  %v6798_v14 = vmul.f32 -1.442695, %v15931_v28  ;;  %vm13638_vm9 = vcmp.eq.f32.partialorder %v4297_v8, 8.507059e+37  ;;  %v15935_v46 = vld [vmem:[#allocation53_spill] sm:$0xff]  ;;  %vm13672_vm12 = vmor %vm4293_vm5, %vm4294_vm8 }
 0x4e6   : > { %v7398_v30 = vpop.eup %7397  ;;  %v4350_v37 = vsub.f32 1.0, %v4349_v43  ;;  %v4357_v12 = vand.u32 2147483647, %v13496_v6  ;;  %v13645_v36 = vmul.f32 %v15935_v46, %v15934_v18  ;;  %v2445_v26 = vadd.f32 %v2444_v47, %v2331_v20  ;;  %v2221_v43 = vpop.f32.mrf.mxu1 }
 0x4e7   : > { %v4256_v33 = vsel %vm13577_vm4, %v13555_v23, %v4251_v45  ;;  %vm4309_vm11 = vweird.f32 %v13510_v40  ;;  %v4359_v8 = vand.u32 2147483648, %v13496_v6  ;;  %v13652_v62 = vadd.f32 1.0, %v7396_v42  ;;  %v5295_v23 = vld [vmem:[%s8044_s6 + $0x1c8] sm:$0xff] }
 0x4e8   : > { %15936 = vst [vmem:[#allocation36_spill] sm:$0xff] %v13645_v36  ;;  %v4292_v10 = vadd.f32 %v13504_v49, %v4291_v13  ;;  %v4307_v32 = vadd.f32 %v13510_v40, %v4306_v17  ;;  %v13657_v18 = vmul.f32 %v13507_v21, %v2445_v26  ;;  %v2222_v20 = vadd.f32 %v2221_v43, %v2108_v39  ;;  %v15945_v17 = vld [vmem:[#allocation124_spill] sm:$0xff]  ;;  %vm13693_vm14 = vmor %vm4308_vm6, %vm4309_vm11  ;;  %v15953_v39 = vld [vmem:[#allocation42_spill] sm:$0xff] }
 0x4e9   : > { %5394 = vmatmul.f32.gmra.mxu0 %v13645_v36  ;;  %v7400_v45 = vpop.eup %7399  ;;  %v5000_v47 = vmul.f32 %v4241_v15, %v15856_v24  ;;  %v4365_v46 = vsub.f32 1.0, %v4364_v29  ;;  %v13663_v42 = vadd.f32 1.0, %v7398_v30  ;;  %7405 = vpow2.f32 %v6798_v14  ;;  %5507 = vmatmul.f32.gmra.mxu1 %v15938_v50  ;;  %v15944_v15 = vld [vmem:[#allocation123_spill] sm:$0xff]  ;;  %v15951_v43 = vld [vmem:[#allocation64_spill] sm:$0xff]  ;;  %v5261_v50 = vld [vmem:[%s8044_s6 + $0xb8] sm:$0xff] }
 0x4ea   : > { %15937 = vst [vmem:[#allocation33_spill] sm:$0xff] %v13657_v18  ;;  %v13666_v13 = vpop.eup %7401  ;;  %vm13676_vm13 = vcmp.eq.f32.partialorder %v4312_v60, 8.507059e+37  ;;  %v4315_v24 = vor.u32 1.1754944e-38, %v4314_v22  ;;  %v4351_v26 = vmul.f32 %v13585_v31, %v4350_v37  ;;  %v13682_v30 = vmul.f32 %v13560_v57, %v2222_v20  ;;  %5620 = vmatmul.f32.gmra.mxu2 %v15944_v15  ;;  %5733 = vmatmul.f32.gmra.mxu3 %v15945_v17  ;;  %v5293_v36 = vld [vmem:[%s8044_s6 + $0x1b8] sm:$0xff] }
 0x4eb   : > { %v7404_v29 = vpop.eup %7403  ;;  %v13687_v9 = vmul.f32 %v4256_v33, %v15864_v63  ;;  %vm4353_vm15 = vweird.f32 %v13496_v6  ;;  %v4360_v57 = vor.u32 1.1754944e-38, %v4359_v8  ;;  %7407 = vrcp.f32 %v13652_v62  ;;  %5934 = vmatpush.msrb.mxu1 %v5295_v23  ;;  %v2447_v8 = vpop.f32.mrf.mxu3  ;;  %5822 = vmatpush.msrb.mxu0 %v5261_v50 }
 0x4ec   : > { %15943 = vst [vmem:[#allocation143_spill] sm:$0xff] %v13682_v30  ;;  %v4296_v22 = vsel %vm13672_vm12, %v13504_v49, %v4292_v10  ;;  %v4311_v63 = vsel %vm13693_vm14, %v13510_v40, %v4307_v32  ;;  %vm4354_vm0 = vweird.f32 %v13585_v31  ;;  %vm13706_vm1 = vcmp.eq.f32.partialorder %v4357_v12, 8.507059e+37  ;;  %v2334_v49 = vpop.f32.mrf.mxu2  ;;  %v15950_v12 = vld [vmem:[#allocation83_spill] sm:$0xff]  ;;  %v2111_v17 = vpop.f32.mrf.mxu0 }
 0x4ed   : > { %v4372_v14 = vand.u32 2147483647, %v13513_v58  ;;  %v4366_v37 = vmul.f32 %v13601_v19, %v4365_v46  ;;  %v4409_v33 = vmul.f32 %v13666_v13, %v13589_v4  ;;  %7409 = vrcp.f32 %v13663_v42  ;;  %vm13748_vm5 = vmor %vm4353_vm15, %vm4354_vm0  ;;  %5935 = vmatpush.msrb.mxu1 %v5293_v36 }
 0x4ee   : > { %v13715_v10 = vadd.f32 1.0, %v7400_v45  ;;  %v4352_v40 = vadd.f32 %v13585_v31, %v4351_v26  ;;  %v13718_v32 = vadd.f32 1.0, %v7404_v29  ;;  %v13722_v20 = vmul.f32 %v15951_v43, %v15950_v12  ;;  %v2224_v26 = vpop.f32.mrf.mxu1  ;;  %v15962_v43 = vld [vmem:[#allocation150_spill] sm:$0xff]  ;;  %v15975_v29 = vld [vmem:[#allocation127_spill] sm:$0xff] }
 0x4ef   : > { %v2448_v38 = vadd.f32 %v2447_v8, %v2334_v49  ;;  %v7406_v23 = vpop.eup %7405  ;;  %v4301_v46 = vsel %vm13638_vm9, %v13597_v48, %v4296_v22  ;;  %vm4368_vm2 = vweird.f32 %v13513_v58  ;;  %v4374_v45 = vand.u32 2147483648, %v13513_v58 }
 0x4f0   : > { %15952 = vst [vmem:[#allocation45_spill] sm:$0xff] %v13722_v20  ;;  %v6801_v60 = vmul.f32 -1.442695, %v15953_v39  ;;  %vm4369_vm3 = vweird.f32 %v13601_v19  ;;  %vm13731_vm4 = vcmp.eq.f32.partialorder %v4372_v14, 8.507059e+37  ;;  %v4419_v49 = vand.u32 2147483648, %v13589_v4  ;;  %v15966_v14 = vld [vmem:[#allocation146_spill] sm:$0xff] }
 0x4f1   : > { %v13737_v8 = vmul.f32 %v13604_v16, %v2448_v38  ;;  %v2225_v48 = vadd.f32 %v2224_v26, %v2111_v17  ;;  %5397 = vmatmul.f32.gmra.mxu0 %v13722_v20  ;;  %v13740_v1 = vpop.eup %7407  ;;  %v4316_v22 = vsel %vm13676_vm13, %v4315_v24, %v4311_v63  ;;  %v4367_v16 = vadd.f32 %v13601_v19, %v4366_v37  ;;  %v15959_v17 = vld [vmem:[#allocation145_spill] sm:$0xff]  ;;  %v5325_v37 = vld [vmem:[%s8044_s6 + $0x2b8] sm:$0xff]  ;;  %vm13778_vm7 = vmor %vm4368_vm2, %vm4369_vm3 }
 0x4f2   : > { %v4410_v12 = vsub.f32 1.0, %v4409_v33  ;;  %7411 = vrcp.f32 %v13715_v10  ;;  %5510 = vmatmul.f32.gmra.mxu1 %v15959_v17  ;;  %v4356_v21 = vsel %vm13748_vm5, %v13585_v31, %v4352_v40  ;;  %v13759_v24 = vadd.f32 1.0, %v7406_v23  ;;  %v15961_v63 = vld [vmem:[#allocation125_spill] sm:$0xff]  ;;  %5736 = vmatmul.f32.gmra.mxu3 %v15962_v43  ;;  %v5357_v33 = vld [vmem:[%s8044_s6 + $0x3b8] sm:$0xff] }
 0x4f3   : > { %15956 = vst [vmem:[#allocation34_spill] sm:$0xff] %v13737_v8  ;;  %7413 = vrcp.f32 %v13718_v32  ;;  %v13761_v6 = vmul.f32 %v5000_v47, %v2225_v48  ;;  %5623 = vmatmul.f32.gmra.mxu2 %v15961_v63  ;;  %v13767_v38 = vpop.eup %7409  ;;  %v5004_v26 = vmul.f32 %v4301_v46, %v15872_v55  ;;  %v4375_v17 = vor.u32 1.1754944e-38, %v4374_v45  ;;  %6161 = vmatpush.msrb.mxu3 %v5357_v33  ;;  %v15965_v45 = vld [vmem:[#allocation54_spill] sm:$0xff] }
 0x4f4   : > { %vm4413_vm6 = vweird.f32 %v13589_v4  ;;  %7415 = vpow2.f32 %v6801_v60  ;;  %6048 = vmatpush.msrb.mxu2 %v5325_v37  ;;  %v13772_v31 = vmul.f32 %v4316_v22, %v15874_v2  ;;  %v4417_v40 = vand.u32 2147483647, %v13589_v4  ;;  %v2337_v48 = vpop.f32.mrf.mxu2  ;;  %v2450_v22 = vpop.f32.mrf.mxu3  ;;  %v15967_v37 = vld [vmem:[#allocation138_spill] sm:$0xff] }
 0x4f5   : > { %15960 = vst [vmem:[#allocation37_spill] sm:$0xff] %v13761_v6  ;;  %v13783_v55 = vor.u32 1.1754944e-38, %v4419_v49  ;;  %v4424_v23 = vmul.f32 %v13740_v1, %v13652_v62  ;;  %v4361_v46 = vsel %vm13706_vm1, %v4360_v57, %v4356_v21  ;;  %v4371_v2 = vsel %vm13778_vm7, %v13601_v19, %v4367_v16  ;;  %v15969_v21 = vld [vmem:[#allocation57_spill] sm:$0xff]  ;;  %v2114_v43 = vpop.f32.mrf.mxu0 }
 0x4f6   : > { %v4411_v58 = vmul.f32 %v13666_v13, %v4410_v12  ;;  %v6802_v60 = vmul.f32 -1.442695, %v15965_v45  ;;  %v4469_v49 = vmul.f32 %v13767_v38, %v13663_v42  ;;  %7417 = vrcp.f32 %v13759_v24  ;;  %v2227_v63 = vpop.f32.mrf.mxu1 }
 0x4f7   : > { %v13799_v33 = vmul.f32 %v15967_v37, %v15966_v14  ;;  %v2451_v57 = vadd.f32 %v2450_v22, %v2337_v48  ;;  %v4432_v19 = vand.u32 2147483647, %v13652_v62  ;;  %v4434_v16 = vand.u32 2147483648, %v13652_v62  ;;  %v15992_v48 = vld [vmem:[#allocation130_spill] sm:$0xff] }
 0x4f8   : > { %v13801_v56 = vpop.eup %7411  ;;  %v4479_v12 = vand.u32 2147483648, %v13663_v42  ;;  %v6805_v47 = vmul.f32 -1.442695, %v15969_v21  ;;  %v13810_v14 = vmul.f32 %v4361_v46, %v15886_v34  ;;  %vm13812_vm8 = vcmp.eq.f32.partialorder %v4417_v40, 8.507059e+37  ;;  %v15973_v40 = vld [vmem:[#allocation147_spill] sm:$0xff] }
 0x4f9   : > { %15968 = vst [vmem:[#allocation144_spill] sm:$0xff] %v13799_v33  ;;  %v13807_v20 = vpop.eup %7413  ;;  %v4425_v22 = vsub.f32 1.0, %v4424_v23  ;;  %v13817_v37 = vmul.f32 %v13687_v9, %v2451_v57  ;;  %v2228_v15 = vadd.f32 %v2227_v63, %v2114_v43  ;;  %5400 = vmatmul.f32.gmra.mxu0 %v13799_v33  ;;  %v4376_v8 = vsel %vm13731_vm4, %v4375_v17, %v4371_v2  ;;  %v15976_v17 = vld [vmem:[#allocation128_spill] sm:$0xff] }
 0x4fa   : > { %v7416_v6 = vpop.eup %7415  ;;  %v4412_v34 = vadd.f32 %v13666_v13, %v4411_v58  ;;  %vm4414_vm9 = vweird.f32 %v13666_v13  ;;  %7419 = vpow2.f32 %v6802_v60  ;;  %5513 = vmatmul.f32.gmra.mxu1 %v15973_v40  ;;  %vm4428_vm11 = vweird.f32 %v13652_v62  ;;  %5739 = vmatmul.f32.gmra.mxu3 %v15976_v17  ;;  %v15982_v17 = vld [vmem:[#allocation148_spill] sm:$0xff] }
 0x4fb   : > { %15972 = vst [vmem:[#allocation46_spill] sm:$0xff] %v13817_v37  ;;  %v4470_v9 = vsub.f32 1.0, %v4469_v49  ;;  %v4477_v63 = vand.u32 2147483647, %v13663_v42  ;;  %v4484_v43 = vmul.f32 %v13801_v56, %v13715_v10  ;;  %v13831_v23 = vmul.f32 %v5004_v26, %v2228_v15  ;;  %5626 = vmatmul.f32.gmra.mxu2 %v15975_v29  ;;  %vm13850_vm12 = vmor %vm4413_vm6, %vm4414_vm9  ;;  %v15983_v29 = vld [vmem:[#allocation72_spill] sm:$0xff]  ;;  %v15985_v37 = vld [vmem:[#allocation59_spill] sm:$0xff] }
 0x4fc   : > { %v13835_v46 = vor.u32 1.1754944e-38, %v4434_v16  ;;  %v13837_v2 = vor.u32 1.1754944e-38, %v4479_v12  ;;  %v4529_v50 = vmul.f32 %v13807_v20, %v13718_v32  ;;  %7421 = vpow2.f32 %v6805_v47  ;;  %v13841_v58 = vpop.eup %7417  ;;  %v2340_v16 = vpop.f32.mrf.mxu2  ;;  %v16007_v47 = vld [vmem:[#allocation88_spill] sm:$0xff] }
 0x4fd   : > { %15974 = vst [vmem:[#allocation38_spill] sm:$0xff] %v13831_v23  ;;  %v13844_v60 = vmul.f32 %v4376_v8, %v15892_v0  ;;  %v4426_v26 = vmul.f32 %v13740_v1, %v4425_v22  ;;  %vm4473_vm13 = vweird.f32 %v13663_v42  ;;  %v4492_v49 = vand.u32 2147483647, %v13715_v10  ;;  %v15979_v8 = vld [vmem:[#allocation58_spill] sm:$0xff]  ;;  %v2453_v12 = vpop.f32.mrf.mxu3  ;;  %v2117_v30 = vpop.f32.mrf.mxu0 }
 0x4fe   : > { %v13857_v36 = vadd.f32 1.0, %v7416_v6  ;;  %v4416_v0 = vsel %vm13850_vm12, %v13666_v13, %v4412_v34  ;;  %vm4429_vm14 = vweird.f32 %v13740_v1  ;;  %v4494_v4 = vand.u32 2147483648, %v13715_v10  ;;  %v2230_v18 = vpop.f32.mrf.mxu1 }
 0x4ff   : > { %v6806_v57 = vmul.f32 -1.442695, %v15979_v8  ;;  %vm13865_vm15 = vcmp.eq.f32.partialorder %v4432_v19, 8.507059e+37  ;;  %v4471_v22 = vmul.f32 %v13767_v38, %v4470_v9  ;;  %v4485_v6 = vsub.f32 1.0, %v4484_v43  ;;  %vm13910_vm3 = vmor %vm4428_vm11, %vm4429_vm14 }
 0x500   : > { %v13872_v40 = vmul.f32 %v15983_v29, %v15982_v17  ;;  %v2454_v13 = vadd.f32 %v2453_v12, %v2340_v16  ;;  %v7420_v34 = vpop.eup %7419  ;;  %v4530_v15 = vsub.f32 1.0, %v4529_v50  ;;  %v4539_v33 = vand.u32 2147483648, %v13718_v32 }
 0x501   : > { %v4544_v23 = vmul.f32 %v13841_v58, %v13759_v24  ;;  %v6809_v19 = vmul.f32 -1.442695, %v15985_v37  ;;  %v4427_v44 = vadd.f32 %v13740_v1, %v4426_v26  ;;  %vm13879_vm0 = vcmp.eq.f32.partialorder %v4477_v63, 8.507059e+37  ;;  %v15989_v26 = vld [vmem:[#allocation85_spill] sm:$0xff] }
 0x502   : > { %15984 = vst [vmem:[#allocation40_spill] sm:$0xff] %v13872_v40  ;;  %vm4488_vm1 = vweird.f32 %v13715_v10  ;;  %7423 = vrcp.f32 %v13857_v36  ;;  %v13886_v43 = vmul.f32 %v13772_v31, %v2454_v13  ;;  %v2231_v29 = vadd.f32 %v2230_v18, %v2117_v30  ;;  %5403 = vmatmul.f32.gmra.mxu0 %v13872_v40  ;;  %v7422_v17 = vpop.eup %7421  ;;  %5516 = vmatmul.f32.gmra.mxu1 %v15989_v26  ;;  %v15991_v30 = vld [vmem:[#allocation129_spill] sm:$0xff]  ;;  %v16020_v10 = vld [vmem:[#allocation151_spill] sm:$0xff]  ;;  %v5289_v26 = vld [vmem:[%s8044_s6 + $0x198] sm:$0xff] }
 0x503   : > { %v4421_v63 = vsel %vm13812_vm8, %v13783_v55, %v4416_v0  ;;  %vm4474_vm2 = vweird.f32 %v13767_v38  ;;  %v4537_v50 = vand.u32 2147483647, %v13718_v32  ;;  %7425 = vpow2.f32 %v6806_v57  ;;  %5629 = vmatmul.f32.gmra.mxu2 %v15991_v30  ;;  %5742 = vmatmul.f32.gmra.mxu3 %v15992_v48  ;;  %v5323_v55 = vld [vmem:[%s8044_s6 + $0x2a8] sm:$0xff]  ;;  %v16002_v57 = vld [vmem:[#allocation61_spill] sm:$0xff] }
 0x504   : > { %15988 = vst [vmem:[#allocation41_spill] sm:$0xff] %v13886_v43  ;;  %v4472_v16 = vadd.f32 %v13767_v38, %v4471_v22  ;;  %v4486_v31 = vmul.f32 %v13801_v56, %v4485_v6  ;;  %v13897_v12 = vadd.f32 1.0, %v7420_v34  ;;  %v13900_v18 = vmul.f32 %v13810_v14, %v2231_v29  ;;  %v5355_v0 = vld [vmem:[%s8044_s6 + $0x3a8] sm:$0xff]  ;;  %6049 = vmatpush.msrb.mxu2 %v5323_v55  ;;  %vm13932_vm6 = vmor %vm4473_vm13, %vm4474_vm2 }
 0x505   : > { %v13914_v22 = vor.u32 1.1754944e-38, %v4494_v4  ;;  %v4531_v6 = vmul.f32 %v13807_v20, %v4530_v15  ;;  %v4545_v14 = vsub.f32 1.0, %v4544_v23  ;;  %7427 = vpow2.f32 %v6809_v19  ;;  %6162 = vmatpush.msrb.mxu3 %v5355_v0  ;;  %v2120_v23 = vpop.f32.mrf.mxu0 }
 0x506   : > { %15990 = vst [vmem:[#allocation81_spill] sm:$0xff] %v13900_v18  ;;  %v4431_v13 = vsel %vm13910_vm3, %v13740_v1, %v4427_v44  ;;  %vm13920_vm4 = vcmp.eq.f32.partialorder %v4492_v49, 8.507059e+37  ;;  %vm4533_vm5 = vweird.f32 %v13718_v32  ;;  %v4540_v62 = vor.u32 1.1754944e-38, %v4539_v33  ;;  %v16001_v1 = vld [vmem:[#allocation60_spill] sm:$0xff]  ;;  %v2343_v49 = vpop.f32.mrf.mxu2 }
 0x507   : > { %v13925_v29 = vadd.f32 1.0, %v7422_v17  ;;  %v5012_v4 = vmul.f32 %v4421_v63, %v15901_v3  ;;  %vm4489_vm7 = vweird.f32 %v13801_v56  ;;  %vm4534_vm8 = vweird.f32 %v13807_v20  ;;  %v2456_v3 = vpop.f32.mrf.mxu3 }
 0x508   : > { %vm13938_vm9 = vcmp.eq.f32.partialorder %v4537_v50, 8.507059e+37  ;;  %v6810_v33 = vmul.f32 -1.442695, %v16001_v1  ;;  %v13943_v15 = vpop.eup %7423  ;;  %v4476_v42 = vsel %vm13932_vm6, %v13767_v38, %v4472_v16  ;;  %v4487_v19 = vadd.f32 %v13801_v56, %v4486_v31  ;;  %v2233_v38 = vpop.f32.mrf.mxu1  ;;  %v16003_v16 = vld [vmem:[#allocation131_spill] sm:$0xff]  ;;  %v16004_v31 = vld [vmem:[#allocation126_spill] sm:$0xff]  ;;  %vm13974_vm11 = vmor %vm4488_vm1, %vm4489_vm7 }
 0x509   : > { %7429 = vrcp.f32 %v13897_v12  ;;  %v2457_v17 = vadd.f32 %v2456_v3, %v2343_v49  ;;  %v7426_v63 = vpop.eup %7425  ;;  %v4436_v50 = vsel %vm13865_vm15, %v13835_v46, %v4431_v13  ;;  %v4532_v55 = vadd.f32 %v13807_v20, %v4531_v6  ;;  %v5259_v46 = vld [vmem:[%s8044_s6 + $0xa8] sm:$0xff]  ;;  %vm13989_vm12 = vmor %vm4533_vm5, %vm4534_vm8 }
 0x50a   : > { %v4546_v0 = vmul.f32 %v13841_v58, %v4545_v14  ;;  %v6813_v48 = vmul.f32 -1.442695, %v16002_v57  ;;  %7431 = vrcp.f32 %v13925_v29  ;;  %v13959_v30 = vmul.f32 %v16004_v31, %v16003_v16  ;;  %5406 = vmatmul.f32.gmra.mxu0 %v16007_v47  ;;  %v5291_v6 = vld [vmem:[%s8044_s6 + $0x1a8] sm:$0xff]  ;;  %v5257_v47 = vld [vmem:[%s8044_s6 + $0x98] sm:$0xff] }
 0x50b   : > { %v13962_v49 = vmul.f32 %v13844_v60, %v2457_v17  ;;  %v2234_v3 = vadd.f32 %v2233_v38, %v2120_v23  ;;  %v7428_v13 = vpop.eup %7427  ;;  %v4481_v14 = vsel %vm13879_vm0, %v13837_v2, %v4476_v42  ;;  %v4554_v60 = vand.u32 2147483648, %v13759_v24  ;;  %v16010_v23 = vld [vmem:[#allocation78_spill] sm:$0xff]  ;;  %5823 = vmatpush.msrb.mxu0 %v5259_v46  ;;  %v16014_v42 = vld [vmem:[#allocation132_spill] sm:$0xff]  ;;  %5936 = vmatpush.msrb.mxu1 %v5291_v6 }
 0x50c   : > { %16005 = vst [vmem:[#allocation53_spill] sm:$0xff] %v13959_v30  ;;  %v4589_v17 = vmul.f32 %v13943_v15, %v13857_v36  ;;  %7433 = vpow2.f32 %v6810_v33  ;;  %5519 = vmatmul.f32.gmra.mxu1 %v16010_v23  ;;  %v4491_v2 = vsel %vm13974_vm11, %v13801_v56, %v4487_v19  ;;  %vm4548_vm13 = vweird.f32 %v13759_v24  ;;  %5632 = vmatmul.f32.gmra.mxu2 %v13959_v30  ;;  %v16024_v30 = vld [vmem:[#allocation86_spill] sm:$0xff]  ;;  %v16025_v23 = vld [vmem:[#allocation77_spill] sm:$0xff] }
 0x50d   : > { %16006 = vst [vmem:[#allocation83_spill] sm:$0xff] %v13962_v49  ;;  %v13994_v9 = vadd.f32 1.0, %v7426_v63  ;;  %v13996_v33 = vmul.f32 %v5012_v4, %v2234_v3  ;;  %5745 = vmatmul.f32.gmra.mxu3 %v16014_v42  ;;  %v4536_v56 = vsel %vm13989_vm12, %v13807_v20, %v4532_v55  ;;  %v4547_v32 = vadd.f32 %v13841_v58, %v4546_v0  ;;  %v16015_v3 = vld [vmem:[#allocation67_spill] sm:$0xff] }
 0x50e   : > { %vm4549_vm14 = vweird.f32 %v13841_v58  ;;  %7435 = vpow2.f32 %v6813_v48  ;;  %v5013_v63 = vmul.f32 %v4436_v50, %v15914_v7  ;;  %v5016_v4 = vmul.f32 %v4481_v14, %v15915_v54  ;;  %v2346_v48 = vpop.f32.mrf.mxu2  ;;  %5824 = vmatpush.msrb.mxu0 %v5257_v47  ;;  %5937 = vmatpush.msrb.mxu1 %v5289_v26 }
 0x50f   : > { %16013 = vst [vmem:[#allocation64_spill] sm:$0xff] %v13996_v33  ;;  %v14005_v19 = vpop.eup %7429  ;;  %v4552_v38 = vand.u32 2147483647, %v13759_v24  ;;  %v14010_v31 = vadd.f32 1.0, %v7428_v13  ;;  %v4496_v20 = vsel %vm13920_vm4, %v13914_v22, %v4491_v2  ;;  %v4555_v55 = vor.u32 1.1754944e-38, %v4554_v60  ;;  %v2459_v6 = vpop.f32.mrf.mxu3  ;;  %vm14024_vm15 = vmor %vm4548_vm13, %vm4549_vm14  ;;  %v16018_v24 = vld [vmem:[#allocation135_spill] sm:$0xff] }
 0x510   : > { %v4590_v0 = vsub.f32 1.0, %v4589_v17  ;;  %v6814_v46 = vmul.f32 -1.442695, %v16015_v3  ;;  %v14016_v16 = vpop.eup %7431  ;;  %v4541_v7 = vsel %vm13938_vm9, %v4540_v62, %v4536_v56  ;;  %v4597_v22 = vand.u32 2147483647, %v13857_v36  ;;  %v2123_v60 = vpop.f32.mrf.mxu0  ;;  %v16019_v2 = vld [vmem:[#allocation152_spill] sm:$0xff] }
 0x511   : > { %7437 = vrcp.f32 %v13994_v9  ;;  %v2460_v34 = vadd.f32 %v2459_v6, %v2346_v48  ;;  %v4551_v13 = vsel %vm14024_vm15, %v13841_v58, %v4547_v32  ;;  %v4599_v62 = vand.u32 2147483648, %v13857_v36  ;;  %v2236_v17 = vpop.f32.mrf.mxu1  ;;  %v16023_v32 = vld [vmem:[#allocation79_spill] sm:$0xff]  ;;  %v16038_v33 = vld [vmem:[#allocation73_spill] sm:$0xff] }
 0x512   : > { %v7434_v50 = vpop.eup %7433  ;;  %v4604_v44 = vmul.f32 %v14005_v19, %v13897_v12  ;;  %v6817_v14 = vmul.f32 -1.442695, %v16018_v24  ;;  %7439 = vrcp.f32 %v14010_v31  ;;  %v14040_v56 = vmul.f32 %v16020_v10, %v16019_v2  ;;  %5409 = vmatmul.f32.gmra.mxu0 %v16023_v32 }
 0x513   : > { %v14042_v48 = vmul.f32 %v5013_v63, %v2460_v34  ;;  %v2237_v58 = vadd.f32 %v2236_v17, %v2123_v60  ;;  %vm4553_vm0 = vcmp.eq.f32.partialorder %v4552_v38, 8.507059e+37  ;;  %v4591_v54 = vmul.f32 %v13943_v15, %v4590_v0  ;;  %v16027_v60 = vld [vmem:[#allocation133_spill] sm:$0xff]  ;;  %v5321_v38 = vld [vmem:[%s8044_s6 + $0x298] sm:$0xff] }
 0x514   : > { %16021 = vst [vmem:[#allocation42_spill] sm:$0xff] %v14040_v56  ;;  %v7436_v6 = vpop.eup %7435  ;;  %v4649_v42 = vmul.f32 %v14016_v16, %v13925_v29  ;;  %7441 = vpow2.f32 %v6814_v46  ;;  %5522 = vmatmul.f32.gmra.mxu1 %v16024_v30  ;;  %v14050_v2 = vmul.f32 -1.442695, %v16025_v23  ;;  %v4556_v10 = vsel %vm4553_vm0, %v4555_v55, %v4551_v13  ;;  %5635 = vmatmul.f32.gmra.mxu2 %v14040_v56  ;;  %v5353_v0 = vld [vmem:[%s8044_s6 + $0x398] sm:$0xff] }
 0x515   : > { %16022 = vst [vmem:[#allocation54_spill] sm:$0xff] %v14042_v48  ;;  %v14052_v63 = vadd.f32 1.0, %v7434_v50  ;;  %v14054_v34 = vmul.f32 %v5016_v4, %v2237_v58  ;;  %5748 = vmatmul.f32.gmra.mxu3 %v16027_v60  ;;  %v5017_v17 = vmul.f32 %v4496_v20, %v15923_v51  ;;  %v5020_v46 = vmul.f32 %v4541_v7, %v15925_v11  ;;  %v16032_v58 = vld [vmem:[#allocation140_spill] sm:$0xff] }
 0x516   : > { %v4605_v32 = vsub.f32 1.0, %v4604_v44  ;;  %7443 = vpow2.f32 %v6817_v14  ;;  %6050 = vmatpush.msrb.mxu2 %v5321_v38  ;;  %6163 = vmatpush.msrb.mxu3 %v5353_v0  ;;  %vm4593_vm1 = vweird.f32 %v13857_v36  ;;  %vm14065_vm2 = vcmp.eq.f32.partialorder %v4597_v22, 8.507059e+37  ;;  %v2349_v20 = vpop.f32.mrf.mxu2  ;;  %v16030_v22 = vld [vmem:[#allocation136_spill] sm:$0xff]  ;;  %v16031_v14 = vld [vmem:[#allocation87_spill] sm:$0xff] }
 0x517   : > { %16026 = vst [vmem:[#allocation146_spill] sm:$0xff] %v14054_v34  ;;  %v14062_v30 = vpop.eup %7437  ;;  %v4600_v55 = vor.u32 1.1754944e-38, %v4599_v62  ;;  %v14069_v50 = vadd.f32 1.0, %v7436_v6  ;;  %v14072_v13 = vmul.f32 %v4556_v10, %v15931_v28  ;;  %v4592_v51 = vadd.f32 %v13943_v15, %v4591_v54  ;;  %v2462_v7 = vpop.f32.mrf.mxu3 }
 0x518   : > { %vm4594_vm3 = vweird.f32 %v13943_v15  ;;  %vm4608_vm4 = vweird.f32 %v13897_v12  ;;  %v4650_v11 = vsub.f32 1.0, %v4649_v42  ;;  %v14077_v44 = vpop.eup %7439  ;;  %7445 = vrcp.f32 %v14052_v63  ;;  %v2126_v60 = vpop.f32.mrf.mxu0 }
 0x519   : > { %v6818_v62 = vmul.f32 -1.442695, %v16030_v22  ;;  %v14083_v28 = vmul.f32 %v16032_v58, %v16031_v14  ;;  %v2463_v6 = vadd.f32 %v2462_v7, %v2349_v20  ;;  %v4606_v10 = vmul.f32 %v14005_v19, %v4605_v32  ;;  %v2239_v56 = vpop.f32.mrf.mxu1  ;;  %vm14094_vm5 = vmor %vm4593_vm1, %vm4594_vm3  ;;  %v16036_v32 = vld [vmem:[#allocation137_spill] sm:$0xff] }
 0x51a   : > { %v7442_v54 = vpop.eup %7441  ;;  %v4612_v42 = vand.u32 2147483647, %v13897_v12  ;;  %v4614_v38 = vand.u32 2147483648, %v13897_v12  ;;  %v4664_v0 = vmul.f32 %v14062_v30, %v13994_v9  ;;  %7447 = vrcp.f32 %v14069_v50 }
 0x51b   : > { %16033 = vst [vmem:[#allocation138_spill] sm:$0xff] %v14083_v28  ;;  %v6821_v20 = vmul.f32 -1.442695, %v16036_v32  ;;  %v14100_v7 = vmul.f32 %v5017_v17, %v2463_v6  ;;  %v2240_v58 = vadd.f32 %v2239_v56, %v2126_v60  ;;  %5412 = vmatmul.f32.gmra.mxu0 %v14083_v28  ;;  %v4596_v36 = vsel %vm14094_vm5, %v13943_v15, %v4592_v51  ;;  %v16039_v6 = vld [vmem:[#allocation134_spill] sm:$0xff] }
 0x51c   : > { %v7444_v40 = vpop.eup %7443  ;;  %v4651_v34 = vmul.f32 %v14016_v16, %v4650_v11  ;;  %vm4653_vm6 = vweird.f32 %v13925_v29  ;;  %v4657_v48 = vand.u32 2147483647, %v13925_v29  ;;  %5525 = vmatmul.f32.gmra.mxu1 %v16038_v33  ;;  %v4709_v56 = vmul.f32 %v14077_v44, %v14010_v31  ;;  %5638 = vmatmul.f32.gmra.mxu2 %v16039_v6 }
 0x51d   : > { %16037 = vst [vmem:[#allocation57_spill] sm:$0xff] %v14100_v7  ;;  %v14114_v60 = vadd.f32 1.0, %v7442_v54  ;;  %7449 = vpow2.f32 %v6818_v62  ;;  %v14116_v17 = vmul.f32 %v5020_v46, %v2240_v58  ;;  %5751 = vmatmul.f32.gmra.mxu3 %v13061_v41  ;;  %v4607_v15 = vadd.f32 %v14005_v19, %v4606_v10 }
 0x51e   : > { %vm4609_vm7 = vweird.f32 %v14005_v19  ;;  %vm14122_vm8 = vcmp.eq.f32.partialorder %v4612_v42, 8.507059e+37  ;;  %v4659_v47 = vand.u32 2147483648, %v13925_v29  ;;  %v14127_v11 = vpop.eup %7445  ;;  %v4601_v46 = vsel %vm14065_vm2, %v4600_v55, %v4596_v36  ;;  %v2352_v58 = vpop.f32.mrf.mxu2 }
 0x51f   : > { %v4665_v62 = vsub.f32 1.0, %v4664_v0  ;;  %v14131_v54 = vadd.f32 1.0, %v7444_v40  ;;  %7451 = vpow2.f32 %v6821_v20  ;;  %v4615_v14 = vor.u32 1.1754944e-38, %v4614_v38  ;;  %v2465_v26 = vpop.f32.mrf.mxu3  ;;  %vm14145_vm12 = vmor %vm4608_vm4, %vm4609_vm7 }
 0x520   : > { %v4652_v10 = vadd.f32 %v14016_v16, %v4651_v34  ;;  %vm4654_vm9 = vweird.f32 %v14016_v16  ;;  %vm14135_vm11 = vcmp.eq.f32.partialorder %v4657_v48, 8.507059e+37  ;;  %v14139_v41 = vpop.eup %7447  ;;  %v4710_v4 = vsub.f32 1.0, %v4709_v56  ;;  %v16046_v34 = vld [vmem:[#allocation76_spill] sm:$0xff]  ;;  %v2129_v36 = vpop.f32.mrf.mxu0 }
 0x521   : > { %7453 = vrcp.f32 %v14114_v60  ;;  %v6822_v48 = vmul.f32 -1.442695, %v16046_v34  ;;  %v2466_v55 = vadd.f32 %v2465_v26, %v2352_v58  ;;  %v5024_v38 = vmul.f32 %v4601_v46, %v15953_v39  ;;  %v2242_v6 = vpop.f32.mrf.mxu1  ;;  %v16048_v46 = vld [vmem:[#allocation91_spill] sm:$0xff]  ;;  %vm14168_vm13 = vmor %vm4653_vm6, %vm4654_vm9 }
 0x522   : > { %v4611_v0 = vsel %vm14145_vm12, %v14005_v19, %v4607_v15  ;;  %v4672_v20 = vand.u32 2147483647, %v13994_v9  ;;  %v4724_v12 = vmul.f32 %v14127_v11, %v14052_v63  ;;  %v4666_v56 = vmul.f32 %v14062_v30, %v4665_v62 }
 0x523   : > { %v7450_v33 = vpop.eup %7449  ;;  %7455 = vrcp.f32 %v14131_v54  ;;  %v14161_v58 = vmul.f32 %v14072_v13, %v2466_v55  ;;  %v2243_v39 = vadd.f32 %v2242_v6, %v2129_v36  ;;  %5415 = vmatmul.f32.gmra.mxu0 %v16048_v46  ;;  %v4660_v15 = vor.u32 1.1754944e-38, %v4659_v47  ;;  %v16051_v6 = vld [vmem:[#allocation92_spill] sm:$0xff] }
 0x524   : > { %vm4668_vm14 = vweird.f32 %v13994_v9  ;;  %v4674_v62 = vand.u32 2147483648, %v13994_v9  ;;  %v4769_v13 = vmul.f32 %v14139_v41, %v14069_v50  ;;  %5528 = vmatmul.f32.gmra.mxu1 %v16051_v6  ;;  %v4656_v40 = vsel %vm14168_vm13, %v14016_v16, %v4652_v10  ;;  %v16052_v47 = vld [vmem:[#allocation24_spill] sm:$0xff] }
 0x525   : > { %16047 = vst [vmem:[#allocation58_spill] sm:$0xff] %v14161_v58  ;;  %v7452_v26 = vpop.eup %7451  ;;  %v4711_v29 = vmul.f32 %v14077_v44, %v4710_v4  ;;  %7457 = vpow2.f32 %v6822_v48  ;;  %v14181_v55 = vmul.f32 %v5024_v38, %v2243_v39  ;;  %5641 = vmatmul.f32.gmra.mxu2 %v16052_v47  ;;  %5754 = vmatmul.f32.gmra.mxu3 %v13138_v59  ;;  %v5319_v36 = vld [vmem:[%s8044_s6 + $0x288] sm:$0xff]  ;;  %vm4713_vm15 = vweird.f32 %v14010_v31 }
 0x526   : > { %v5351_v46 = vld [vmem:[%s8044_s6 + $0x388] sm:$0xff]  ;;  %v4616_v28 = vsel %vm14122_vm8, %v4615_v14, %v4611_v0  ;;  %v4725_v6 = vsub.f32 1.0, %v4724_v12  ;;  %v14190_v58 = vadd.f32 1.0, %v7450_v33  ;;  %6051 = vmatpush.msrb.mxu2 %v5319_v36  ;;  %v4667_v10 = vadd.f32 %v14062_v30, %v4666_v56  ;;  %v2355_v0 = vpop.f32.mrf.mxu2 }
 0x527   : > { %6164 = vmatpush.msrb.mxu3 %v5351_v46  ;;  %v14192_v16 = vpop.eup %7453  ;;  %vm4669_vm0 = vweird.f32 %v14062_v30  ;;  %vm14196_vm1 = vcmp.eq.f32.partialorder %v4672_v20, 8.507059e+37  ;;  %v4717_v51 = vand.u32 2147483647, %v14010_v31  ;;  %v4661_v14 = vsel %vm14135_vm11, %v4660_v15, %v4656_v40  ;;  %v2468_v12 = vpop.f32.mrf.mxu3 }
 0x528   : > { %v4719_v33 = vand.u32 2147483648, %v14010_v31  ;;  %v4770_v48 = vsub.f32 1.0, %v4769_v13  ;;  %v14204_v38 = vadd.f32 1.0, %v7452_v26  ;;  %v5025_v56 = vmul.f32 %v4616_v28, %v15965_v45  ;;  %vm14213_vm3 = vmor %vm4668_vm14, %vm4669_vm0  ;;  %v2132_v45 = vpop.f32.mrf.mxu0 }
 0x529   : > { %v14206_v39 = vpop.eup %7455  ;;  %v4712_v20 = vadd.f32 %v14077_v44, %v4711_v29  ;;  %vm4714_vm2 = vweird.f32 %v14077_v44  ;;  %v2469_v46 = vadd.f32 %v2468_v12, %v2355_v0  ;;  %v4675_v19 = vor.u32 1.1754944e-38, %v4674_v62  ;;  %v2245_v28 = vpop.f32.mrf.mxu1  ;;  %v16058_v62 = vld [vmem:[#allocation93_spill] sm:$0xff]  ;;  %v5287_v0 = vld [vmem:[%s8044_s6 + $0x188] sm:$0xff] }
 0x52a   : > { %v4726_v15 = vmul.f32 %v14127_v11, %v4725_v6  ;;  %v4784_v13 = vmul.f32 %v14192_v16, %v14114_v60  ;;  %7459 = vrcp.f32 %v14190_v58  ;;  %v5028_v40 = vmul.f32 %v4661_v14, %v15969_v21  ;;  %v5255_v6 = vld [vmem:[%s8044_s6 + $0x88] sm:$0xff]  ;;  %vm14234_vm4 = vmor %vm4713_vm15, %vm4714_vm2  ;;  %5938 = vmatpush.msrb.mxu1 %v5287_v0 }
 0x52b   : > { %v7458_v26 = vpop.eup %7457  ;;  %v4671_v9 = vsel %vm14213_vm3, %v14062_v30, %v4667_v10  ;;  %v14225_v29 = vmul.f32 %v5025_v56, %v2469_v46  ;;  %v2246_v36 = vadd.f32 %v2245_v28, %v2132_v45  ;;  %5418 = vmatmul.f32.gmra.mxu0 %v16058_v62  ;;  %v4734_v21 = vand.u32 2147483648, %v14052_v63  ;;  %v16061_v10 = vld [vmem:[#allocation94_spill] sm:$0xff]  ;;  %v16062_v56 = vld [vmem:[#allocation80_spill] sm:$0xff] }
 0x52c   : > { %v4771_v14 = vmul.f32 %v14139_v41, %v4770_v48  ;;  %v4829_v30 = vmul.f32 %v14206_v39, %v14131_v54  ;;  %7461 = vrcp.f32 %v14204_v38  ;;  %5531 = vmatmul.f32.gmra.mxu1 %v16061_v10  ;;  %5825 = vmatpush.msrb.mxu0 %v5255_v6  ;;  %v16063_v46 = vand.u32 2147483647, %v16062_v56  ;;  %v16067_v28 = vld [vmem:[#allocation26_spill] sm:$0xff] }
 0x52d   : > { %16057 = vst [vmem:[#allocation148_spill] sm:$0xff] %v14225_v29  ;;  %v4716_v42 = vsel %vm14234_vm4, %v14077_v44, %v4712_v20  ;;  %v4720_v45 = vor.u32 1.1754944e-38, %v4719_v33  ;;  %vm4729_vm6 = vweird.f32 %v14127_v11  ;;  %v14254_v48 = vmul.f32 %v5028_v40, %v2246_v36  ;;  %5644 = vmatmul.f32.gmra.mxu2 %v13163_v35  ;;  %5757 = vmatmul.f32.gmra.mxu3 %v16067_v28 }
 0x52e   : > { %vm14246_vm5 = vcmp.eq.f32.partialorder %v16063_v46, 8.507059e+37  ;;  %v4676_v6 = vsel %vm14196_vm1, %v4675_v19, %v4671_v9  ;;  %v4727_v56 = vadd.f32 %v14127_v11, %v4726_v15  ;;  %v4785_v46 = vsub.f32 1.0, %v4784_v13  ;;  %v2358_v19 = vpop.f32.mrf.mxu2 }
 0x52f   : > { %16066 = vst [vmem:[#allocation72_spill] sm:$0xff] %v14254_v48  ;;  %v14261_v10 = vadd.f32 1.0, %v7458_v26  ;;  %vm4718_vm7 = vcmp.eq.f32.partialorder %v4717_v51, 8.507059e+37  ;;  %vm4728_vm8 = vweird.f32 %v14052_v63  ;;  %v4732_v44 = vand.u32 2147483647, %v14052_v63  ;;  %v2471_v15 = vpop.f32.mrf.mxu3 }
 0x530   : > { %v4779_v33 = vand.u32 2147483648, %v14069_v50  ;;  %v14266_v20 = vpop.eup %7459  ;;  %v4721_v40 = vsel %vm4718_vm7, %v4720_v45, %v4716_v42  ;;  %v4772_v36 = vadd.f32 %v14139_v41, %v4771_v14  ;;  %vm4774_vm9 = vweird.f32 %v14139_v41  ;;  %vm14273_vm11 = vmor %vm4728_vm8, %vm4729_vm6  ;;  %v2135_v14 = vpop.f32.mrf.mxu0 }
 0x531   : > { %v4830_v4 = vsub.f32 1.0, %v4829_v30  ;;  %v5029_v13 = vmul.f32 %v4676_v6, %v15979_v8  ;;  %v4735_v63 = vor.u32 1.1754944e-38, %v4734_v21  ;;  %vm4773_vm12 = vweird.f32 %v14069_v50  ;;  %v2248_v30 = vpop.f32.mrf.mxu1  ;;  %v16073_v6 = vld [vmem:[#allocation95_spill] sm:$0xff] }
 0x532   : > { %v2472_v26 = vadd.f32 %v2471_v15, %v2358_v19  ;;  %v14278_v9 = vpop.eup %7461  ;;  %v4731_v0 = vsel %vm14273_vm11, %v14127_v11, %v4727_v56  ;;  %v4777_v8 = vand.u32 2147483647, %v14069_v50  ;;  %v4786_v12 = vmul.f32 %v14192_v16, %v4785_v46  ;;  %vm14289_vm13 = vmor %vm4773_vm12, %vm4774_vm9  ;;  %v5317_v56 = vld [vmem:[%s8044_s6 + $0x278] sm:$0xff]  ;;  %v16074_v15 = vld [vmem:[#allocation96_spill] sm:$0xff] }
 0x533   : > { %7463 = vrcp.f32 %v14261_v10  ;;  %v5032_v21 = vmul.f32 %v4721_v40, %v15985_v37  ;;  %v4844_v45 = vmul.f32 %v14266_v20, %v14190_v58  ;;  %v2249_v50 = vadd.f32 %v2248_v30, %v2135_v14  ;;  %5421 = vmatmul.f32.gmra.mxu0 %v16073_v6  ;;  %v5349_v46 = vld [vmem:[%s8044_s6 + $0x378] sm:$0xff]  ;;  %6052 = vmatpush.msrb.mxu2 %v5317_v56  ;;  %v16076_v30 = vld [vmem:[#allocation27_spill] sm:$0xff] }
 0x534   : > { %v14295_v11 = vmul.f32 %v5029_v13, %v2472_v26  ;;  %vm4733_vm14 = vcmp.eq.f32.partialorder %v4732_v44, 8.507059e+37  ;;  %v4776_v37 = vsel %vm14289_vm13, %v14139_v41, %v4772_v36  ;;  %v4780_v40 = vor.u32 1.1754944e-38, %v4779_v33  ;;  %5534 = vmatmul.f32.gmra.mxu1 %v16074_v15  ;;  %v16077_v44 = vld [vmem:[#allocation25_spill] sm:$0xff]  ;;  %v16079_v41 = vld [vmem:[#allocation84_spill] sm:$0xff]  ;;  %6165 = vmatpush.msrb.mxu3 %v5349_v46 }
 0x535   : > { %v4831_v19 = vmul.f32 %v14206_v39, %v4830_v4  ;;  %v4736_v51 = vsel %vm4733_vm14, %v4735_v63, %v4731_v0  ;;  %v4794_v13 = vand.u32 2147483648, %v14114_v60  ;;  %v4889_v26 = vmul.f32 %v14278_v9, %v14204_v38  ;;  %5647 = vmatmul.f32.gmra.mxu2 %v16076_v30  ;;  %5760 = vmatmul.f32.gmra.mxu3 %v16077_v44  ;;  %v16080_v33 = vld [vmem:[#allocation89_spill] sm:$0xff]  ;;  %v16082_v4 = vld [vmem:[#allocation90_spill] sm:$0xff] }
 0x536   : > { %16072 = vst [vmem:[#allocation59_spill] sm:$0xff] %v14295_v11  ;;  %v14308_v14 = vmul.f32 %v5032_v21, %v2249_v50  ;;  %v16081_v36 = vsel %vm10519_vm10, %v16079_v41, %v16080_v33  ;;  %vm4778_vm15 = vcmp.eq.f32.partialorder %v4777_v8, 8.507059e+37  ;;  %v4787_v0 = vadd.f32 %v14192_v16, %v4786_v12  ;;  %v2361_v8 = vpop.f32.mrf.mxu2 }
 0x537   : > { %v3911_v63 = vsel %vm14246_vm5, %v16082_v4, %v16081_v36  ;;  %vm4789_vm0 = vweird.f32 %v14192_v16  ;;  %7465 = vpow2.f32 %v14050_v2  ;;  %v4781_v21 = vsel %vm4778_vm15, %v4780_v40, %v4776_v37  ;;  %v2474_v12 = vpop.f32.mrf.mxu3 }
 0x538   : > { %16075 = vst [vmem:[#allocation60_spill] sm:$0xff] %v14308_v14  ;;  %vm4788_vm1 = vweird.f32 %v14114_v60  ;;  %v4845_v50 = vsub.f32 1.0, %v4844_v45  ;;  %v5033_v42 = vmul.f32 %v4736_v51, %v16001_v1  ;;  %v4792_v41 = vand.u32 2147483647, %v14114_v60 }
 0x539   : > { %v14324_v56 = vpop.eup %7463  ;;  %v4832_v31 = vadd.f32 %v14206_v39, %v4831_v19  ;;  %vm4834_vm10 = vweird.f32 %v14206_v39  ;;  %vm14330_vm2 = vmor %vm4788_vm1, %vm4789_vm0  ;;  %v4795_v2 = vor.u32 1.1754944e-38, %v4794_v13  ;;  %v4839_v37 = vand.u32 2147483648, %v14131_v54  ;;  %v2138_v19 = vpop.f32.mrf.mxu0 }
 0x53a   : > { %v4890_v45 = vsub.f32 1.0, %v4889_v26  ;;  %v2475_v40 = vadd.f32 %v2474_v12, %v2361_v8  ;;  %v5036_v33 = vmul.f32 %v4781_v21, %v16002_v57  ;;  %v4791_v1 = vsel %vm14330_vm2, %v14192_v16, %v4787_v0  ;;  %v2251_v51 = vpop.f32.mrf.mxu1  ;;  %v16088_v21 = vld [vmem:[#allocation97_spill] sm:$0xff]  ;;  %v16089_v16 = vld [vmem:[#allocation98_spill] sm:$0xff] }
 0x53b   : > { %vm4833_vm3 = vweird.f32 %v14131_v54  ;;  %v4837_v60 = vand.u32 2147483647, %v14131_v54  ;;  %v4846_v13 = vmul.f32 %v14266_v20, %v4845_v50  ;;  %v4904_v26 = vmul.f32 %v14324_v56, %v14261_v10  ;;  %5424 = vmatmul.f32.gmra.mxu0 %v16088_v21 }
 0x53c   : > { %vm14341_vm4 = vmor %vm4833_vm3, %vm4834_vm10  ;;  %v14348_v57 = vmul.f32 %v5033_v42, %v2475_v40  ;;  %v2252_v4 = vadd.f32 %v2251_v51, %v2138_v19  ;;  %vm4793_vm5 = vcmp.eq.f32.partialorder %v4792_v41, 8.507059e+37  ;;  %5537 = vmatmul.f32.gmra.mxu1 %v16089_v16  ;;  %v4840_v50 = vor.u32 1.1754944e-38, %v4839_v37  ;;  %v16091_v42 = vld [vmem:[#allocation28_spill] sm:$0xff]  ;;  %v16092_v41 = vld [vmem:[#allocation75_spill] sm:$0xff] }
 0x53d   : > { %v4836_v54 = vsel %vm14341_vm4, %v14206_v39, %v4832_v31  ;;  %v7466_v0 = vpop.eup %7465  ;;  %v4796_v8 = vsel %vm4793_vm5, %v4795_v2, %v4791_v1  ;;  %v4891_v12 = vmul.f32 %v14278_v9, %v4890_v45  ;;  %5650 = vmatmul.f32.gmra.mxu2 %v16091_v42  ;;  %5763 = vmatmul.f32.gmra.mxu3 %v13367_v52  ;;  %vm4838_vm6 = vcmp.eq.f32.partialorder %v4837_v60, 8.507059e+37  ;;  %v5253_v51 = vld [vmem:[%s8044_s6 + $0x78] sm:$0xff]  ;;  %v16093_v60 = vld [vmem:[#allocation99_spill] sm:$0xff] }
 0x53e   : > { %16087 = vst [vmem:[#allocation61_spill] sm:$0xff] %v14348_v57  ;;  %v14356_v46 = vmul.f32 %v5036_v33, %v2252_v4  ;;  %v4978_v40 = vmul.f32 %v3911_v63, %v16092_v41  ;;  %v4841_v19 = vsel %vm4838_vm6, %v4840_v50, %v4836_v54  ;;  %v4847_v39 = vadd.f32 %v14266_v20, %v4846_v13  ;;  %v5285_v2 = vld [vmem:[%s8044_s6 + $0x178] sm:$0xff]  ;;  %v2364_v1 = vpop.f32.mrf.mxu2 }
 0x53f   : > { %vm4849_vm7 = vweird.f32 %v14266_v20  ;;  %v4905_v31 = vsub.f32 1.0, %v4904_v26  ;;  %v5037_v37 = vmul.f32 %v4796_v8, %v16015_v3  ;;  %vm4848_vm8 = vweird.f32 %v14190_v58  ;;  %v2477_v36 = vpop.f32.mrf.mxu3  ;;  %5826 = vmatpush.msrb.mxu0 %v5253_v51  ;;  %5939 = vmatpush.msrb.mxu1 %v5285_v2  ;;  %v16099_v2 = vld [vmem:[#allocation100_spill] sm:$0xff] }
 0x540   : > { %16090 = vst [vmem:[#allocation131_spill] sm:$0xff] %v14356_v46  ;;  %v4852_v45 = vand.u32 2147483647, %v14190_v58  ;;  %v4854_v33 = vand.u32 2147483648, %v14190_v58  ;;  %v4892_v63 = vadd.f32 %v14278_v9, %v4891_v12  ;;  %vm4894_vm9 = vweird.f32 %v14278_v9  ;;  %vm14377_vm11 = vmor %vm4848_vm8, %vm4849_vm7 }
 0x541   : > { %v14372_v13 = vmul.f32 %v4978_v40, %v16093_v60  ;;  %v2478_v26 = vadd.f32 %v2477_v36, %v2364_v1  ;;  %v5040_v3 = vmul.f32 %v4841_v19, %v16018_v24  ;;  %vm4893_vm12 = vweird.f32 %v14204_v38  ;;  %v2141_v8 = vpop.f32.mrf.mxu0  ;;  %v5347_v1 = vld [vmem:[%s8044_s6 + $0x368] sm:$0xff] }
 0x542   : > { %v4897_v58 = vand.u32 2147483647, %v14204_v38  ;;  %v4899_v54 = vand.u32 2147483648, %v14204_v38  ;;  %v2254_v50 = vpop.f32.mrf.mxu1  ;;  %v4851_v12 = vsel %vm14377_vm11, %v14266_v20, %v4847_v39  ;;  %v4906_v24 = vmul.f32 %v14324_v56, %v4905_v31  ;;  %vm14395_vm13 = vmor %vm4893_vm12, %vm4894_vm9  ;;  %6166 = vmatpush.msrb.mxu3 %v5347_v1 }
 0x543   : > { %v14388_v41 = vmul.f32 %v5037_v37, %v2478_v26  ;;  %v2255_v40 = vadd.f32 %v2254_v50, %v2141_v8  ;;  %5427 = vmatmul.f32.gmra.mxu0 %v14372_v13  ;;  %v14391_v19 = vadd.f32 1.0, %v7466_v0  ;;  %v4855_v51 = vor.u32 1.1754944e-38, %v4854_v33  ;;  %v5315_v33 = vld [vmem:[%s8044_s6 + $0x268] sm:$0xff] }
 0x544   : > { %5540 = vmatmul.f32.gmra.mxu1 %v16099_v2  ;;  %vm4853_vm14 = vcmp.eq.f32.partialorder %v4852_v45, 8.507059e+37  ;;  %v4896_v20 = vsel %vm14395_vm13, %v14278_v9, %v4892_v63  ;;  %v4900_v31 = vor.u32 1.1754944e-38, %v4899_v54  ;;  %vm4898_vm15 = vcmp.eq.f32.partialorder %v4897_v58, 8.507059e+37  ;;  %6053 = vmatpush.msrb.mxu2 %v5315_v33 }
 0x545   : > { %16096 = vst [vmem:[#allocation126_spill] sm:$0xff] %v14388_v41  ;;  %v14403_v39 = vmul.f32 %v5040_v3, %v2255_v40  ;;  %5653 = vmatmul.f32.gmra.mxu2 %v13385_v25  ;;  %5766 = vmatmul.f32.gmra.mxu3 %v13448_v5  ;;  %v4856_v0 = vsel %vm4853_vm14, %v4855_v51, %v4851_v12  ;;  %vm4909_vm0 = vweird.f32 %v14324_v56  ;;  %7467 = vrcp.f32 %v14391_v19  ;;  %v16105_v40 = vld [vmem:[#allocation102_spill] sm:$0xff] }
 0x546   : > { %v4907_v37 = vadd.f32 %v14324_v56, %v4906_v24  ;;  %v4901_v45 = vsel %vm4898_vm15, %v4900_v31, %v4896_v20  ;;  %v4914_v9 = vand.u32 2147483648, %v14261_v10  ;;  %v2367_v36 = vpop.f32.mrf.mxu2  ;;  %v5041_v60 = vmul.f32 %v4856_v0, %v16030_v22  ;;  %v16104_v24 = vld [vmem:[#allocation101_spill] sm:$0xff]  ;;  %v5251_v20 = vld [vmem:[%s8044_s6 + $0x68] sm:$0xff] }
 0x547   : > { %16100 = vst [vmem:[#allocation67_spill] sm:$0xff] %v14403_v39  ;;  %v2480_v63 = vpop.f32.mrf.mxu3  ;;  %vm4908_vm1 = vweird.f32 %v14261_v10  ;;  %v4912_v26 = vand.u32 2147483647, %v14261_v10  ;;  %v5044_v8 = vmul.f32 %v4901_v45, %v16036_v32  ;;  %v5283_v0 = vld [vmem:[%s8044_s6 + $0x168] sm:$0xff]  ;;  %5827 = vmatpush.msrb.mxu0 %v5251_v20  ;;  %vm4203_vm4 = vweird.f32 %v14391_v19 }
 0x548   : > { %v2481_v3 = vadd.f32 %v2480_v63, %v2367_v36  ;;  %vm14416_vm10 = vmor %vm4908_vm1, %vm4909_vm0  ;;  %v4915_v10 = vor.u32 1.1754944e-38, %v4914_v9  ;;  %5940 = vmatpush.msrb.mxu1 %v5283_v0  ;;  %v16108_v63 = vld [vmem:[#allocation103_spill] sm:$0xff] }
 0x549   : > { %v2144_v58 = vpop.f32.mrf.mxu0  ;;  %v4911_v50 = vsel %vm14416_vm10, %v14324_v56, %v4907_v37  ;;  %vm4913_vm2 = vcmp.eq.f32.partialorder %v4912_v26, 8.507059e+37 }
 0x54a   : > { %v2257_v54 = vpop.f32.mrf.mxu1  ;;  %v14424_v22 = vmul.f32 %v5041_v60, %v2481_v3  ;;  %v4916_v38 = vsel %vm4913_vm2, %v4915_v10, %v4911_v50  ;;  %v16109_v60 = vld [vmem:[#allocation104_spill] sm:$0xff]  ;;  %v5174_v10 = vld [vmem:[#allocation2 + $0xb0] sm:$0xff] }
 0x54b   : > { %v2258_v12 = vadd.f32 %v2257_v54, %v2144_v58  ;;  %5430 = vmatmul.f32.gmra.mxu0 %v16104_v24  ;;  %v7468_v32 = vpop.eup %7467  ;;  %v5045_v33 = vmul.f32 %v4916_v38, %v16046_v34  ;;  %v16110_v3 = vld [vmem:[#allocation32_spill] sm:$0xff]  ;;  %v5313_v58 = vld [vmem:[%s8044_s6 + $0x258] sm:$0xff] }
 0x54c   : > { %16103 = vst [vmem:[#allocation135_spill] sm:$0xff] %v14424_v22  ;;  %5543 = vmatmul.f32.gmra.mxu1 %v16105_v40  ;;  %v4199_v37 = vmul.f32 %v7468_v32, %v14391_v19  ;;  %v5345_v54 = vld [vmem:[%s8044_s6 + $0x358] sm:$0xff]  ;;  %6054 = vmatpush.msrb.mxu2 %v5313_v58  ;;  %vm4204_vm3 = vweird.f32 %v7468_v32 }
 0x54d   : > { %v14428_v51 = vmul.f32 %v5044_v8, %v2258_v12  ;;  %5656 = vmatmul.f32.gmra.mxu2 %v13462_v27  ;;  %5769 = vmatmul.f32.gmra.mxu3 %v13516_v61  ;;  %v5249_v58 = vld [vmem:[%s8044_s6 + $0x58] sm:$0xff]  ;;  %vm4205_vm5 = vmor %vm4203_vm4, %vm4204_vm3 }
 0x54e   : > { %v2370_v56 = vpop.f32.mrf.mxu2  ;;  %v4200_v26 = vsub.f32 1.0, %v4199_v37  ;;  %6167 = vmatpush.msrb.mxu3 %v5345_v54  ;;  %v5281_v54 = vld [vmem:[%s8044_s6 + $0x158] sm:$0xff]  ;;  %5828 = vmatpush.msrb.mxu0 %v5249_v58 }
 0x54f   : > { %16106 = vst [vmem:[#allocation152_spill] sm:$0xff] %v14428_v51  ;;  %v2483_v31 = vpop.f32.mrf.mxu3  ;;  %5941 = vmatpush.msrb.mxu1 %v5281_v54  ;;  %v16118_v58 = vld [vmem:[#allocation34_spill] sm:$0xff] }
 0x550   : > { %v2484_v1 = vadd.f32 %v2483_v31, %v2370_v56  ;;  %v4201_v34 = vmul.f32 %v7468_v32, %v4200_v26  ;;  %v16111_v56 = vld [vmem:[#allocation105_spill] sm:$0xff]  ;;  %v16112_v31 = vld [vmem:[#allocation106_spill] sm:$0xff]  ;;  %v4207_v26 = vand.u32 2147483647, %v14391_v19 }
 0x551   : > { %v5383_v45 = vpop.f32.mrf.mxu0 }
 0x552   : > { %v5496_v9 = vpop.f32.mrf.mxu1  ;;  %v14436_v36 = vmul.f32 %v5045_v33, %v2484_v1  ;;  %v4202_v37 = vadd.f32 %v7468_v32, %v4201_v34  ;;  %v16113_v1 = vld [vmem:[#allocation139_spill] sm:$0xff]  ;;  %vm4208_vm6 = vcmp.eq.f32.partialorder %v4207_v26, 8.507059e+37  ;;  %v16119_v26 = vld [vmem:[#allocation109_spill] sm:$0xff] }
 0x553   : > { %5433 = vmatmul.f32.gmra.mxu0 %v16108_v63  ;;  %v5497_v4 = vadd.f32 %v5496_v9, %v5383_v45  ;;  %v16114_v45 = vld [vmem:[#allocation33_spill] sm:$0xff]  ;;  %v4209_v9 = vand.u32 2147483648, %v14391_v19  ;;  %v16115_v19 = vld [vmem:[#allocation107_spill] sm:$0xff] }
 0x554   : > { %16107 = vst [vmem:[#allocation151_spill] sm:$0xff] %v14436_v36  ;;  %5546 = vmatmul.f32.gmra.mxu1 %v16109_v60  ;;  %v4206_v34 = vsel %vm4205_vm5, %v7468_v32, %v4202_v37 }
 0x555   : > { %5659 = vmatmul.f32.gmra.mxu2 %v13545_v53  ;;  %5772 = vmatmul.f32.gmra.mxu3 %v16110_v3 }
 0x556   : > { %v5609_v8 = vpop.f32.mrf.mxu2 }
 0x557   : > { %v5722_v50 = vpop.f32.mrf.mxu3  ;;  %v5610_v12 = vadd.f32 %v5609_v8, %v5497_v4 }
 0x559   : > { %v5386_v38 = vpop.f32.mrf.mxu0  ;;  %v5723_v0 = vadd.f32 %v5722_v50, %v5610_v12 }
 0x55a   : > { %v5499_v20 = vpop.f32.mrf.mxu1 }
 0x55b   : > { %5436 = vmatmul.f32.gmra.mxu0 %v16111_v56  ;;  %v6270_v33 = vadd.f32 %v5723_v0, %v5174_v10  ;;  %v5500_v4 = vadd.f32 %v5499_v20, %v5386_v38  ;;  %v4210_v10 = vor.u32 1.1754944e-38, %v4209_v9  ;;  %v5176_v0 = vld [vmem:[#allocation2 + $0xd8] sm:$0xff]  ;;  %v16116_v20 = vld [vmem:[#allocation108_spill] sm:$0xff]  ;;  %v16117_v56 = vld [vmem:[#allocation143_spill] sm:$0xff] }
 0x55c   : > { %5549 = vmatmul.f32.gmra.mxu1 %v16112_v31  ;;  %v5311_v9 = vld [vmem:[%s8044_s6 + $0x248] sm:$0xff] }
 0x55d   : > { %5662 = vmatmul.f32.gmra.mxu2 %v16113_v1  ;;  %5775 = vmatmul.f32.gmra.mxu3 %v16114_v45  ;;  %6334 = vst [vmem:[#allocation2 + $0xb0] sm:$0xff] %v6270_v33  ;;  %v4211_v38 = vsel %vm4208_vm6, %v4210_v10, %v4206_v34  ;;  %v5178_v34 = vld [vmem:[#allocation2 + $0x50] sm:$0xff] }
 0x55e   : > { %v5612_v8 = vpop.f32.mrf.mxu2  ;;  %v4998_v32 = vmul.f32 %v4211_v38, %v16025_v23  ;;  %6055 = vmatpush.msrb.mxu2 %v5311_v9  ;;  %v16120_v23 = vld [vmem:[#allocation110_spill] sm:$0xff]  ;;  %v5247_v9 = vld [vmem:[%s8044_s6 + $0x48] sm:$0xff] }
 0x55f   : > { %v5725_v50 = vpop.f32.mrf.mxu3  ;;  %v5613_v12 = vadd.f32 %v5612_v8, %v5500_v4  ;;  %v5343_v4 = vld [vmem:[%s8044_s6 + $0x348] sm:$0xff]  ;;  %v16122_v38 = vld [vmem:[#allocation46_spill] sm:$0xff]  ;;  %5829 = vmatpush.msrb.mxu0 %v5247_v9 }
 0x560   : > { %6168 = vmatpush.msrb.mxu3 %v5343_v4  ;;  %v5279_v4 = vld [vmem:[%s8044_s6 + $0x148] sm:$0xff] }
 0x561   : > { %v5389_v45 = vpop.f32.mrf.mxu0  ;;  %v5726_v31 = vadd.f32 %v5725_v50, %v5613_v12  ;;  %v14461_v50 = vmul.f32 %v4998_v32, %v16119_v26  ;;  %5942 = vmatpush.msrb.mxu1 %v5279_v4 }
 0x562   : > { %v5502_v1 = vpop.f32.mrf.mxu1 }
 0x563   : > { %5439 = vmatmul.f32.gmra.mxu0 %v16115_v19  ;;  %v6272_v33 = vadd.f32 %v5726_v31, %v5176_v0  ;;  %v5503_v37 = vadd.f32 %v5502_v1, %v5389_v45  ;;  %v16121_v45 = vld [vmem:[#allocation37_spill] sm:$0xff] }
 0x564   : > { %5552 = vmatmul.f32.gmra.mxu1 %v16116_v20 }
 0x565   : > { %5665 = vmatmul.f32.gmra.mxu2 %v16117_v56  ;;  %5778 = vmatmul.f32.gmra.mxu3 %v16118_v58  ;;  %6336 = vst [vmem:[#allocation2 + $0xd8] sm:$0xff] %v6272_v33 }
 0x566   : > { %v5615_v54 = vpop.f32.mrf.mxu2 }
 0x567   : > { %v5728_v8 = vpop.f32.mrf.mxu3  ;;  %v5616_v31 = vadd.f32 %v5615_v54, %v5503_v37 }
 0x569   : > { %v5392_v12 = vpop.f32.mrf.mxu0  ;;  %v5729_v0 = vadd.f32 %v5728_v8, %v5616_v31  ;;  %v5180_v8 = vld [vmem:[#allocation2 + $0x130] sm:$0xff] }
 0x56a   : > { %v5505_v10 = vpop.f32.mrf.mxu1 }
 0x56b   : > { %5442 = vmatmul.f32.gmra.mxu0 %v14461_v50  ;;  %v6274_v1 = vadd.f32 %v5729_v0, %v5178_v34  ;;  %v5506_v33 = vadd.f32 %v5505_v10, %v5392_v12  ;;  %v16123_v34 = vld [vmem:[#allocation111_spill] sm:$0xff]  ;;  %v16124_v0 = vld [vmem:[#allocation112_spill] sm:$0xff]  ;;  %v5309_v10 = vld [vmem:[%s8044_s6 + $0x238] sm:$0xff] }
 0x56c   : > { %5555 = vmatmul.f32.gmra.mxu1 %v16120_v23  ;;  %6056 = vmatpush.msrb.mxu2 %v5309_v10 }
 0x56d   : > { %5668 = vmatmul.f32.gmra.mxu2 %v16121_v45  ;;  %5781 = vmatmul.f32.gmra.mxu3 %v16122_v38  ;;  %6338 = vst [vmem:[#allocation2 + $0x50] sm:$0xff] %v6274_v1  ;;  %v16125_v1 = vld [vmem:[#allocation38_spill] sm:$0xff] }
 0x56e   : > { %v5618_v32 = vpop.f32.mrf.mxu2  ;;  %v5341_v45 = vld [vmem:[%s8044_s6 + $0x338] sm:$0xff] }
 0x56f   : > { %v5731_v37 = vpop.f32.mrf.mxu3  ;;  %v5619_v54 = vadd.f32 %v5618_v32, %v5506_v33  ;;  %6169 = vmatpush.msrb.mxu3 %v5341_v45  ;;  %v5182_v32 = vld [vmem:[#allocation2 + $0x180] sm:$0xff] }
 0x571   : > { %v5395_v26 = vpop.f32.mrf.mxu0  ;;  %v5732_v23 = vadd.f32 %v5731_v37, %v5619_v54 }
 0x572   : > { %v5508_v31 = vpop.f32.mrf.mxu1 }
 0x573   : > { %5445 = vmatmul.f32.gmra.mxu0 %v16123_v34  ;;  %v6276_v38 = vadd.f32 %v5732_v23, %v5180_v8  ;;  %v5509_v12 = vadd.f32 %v5508_v31, %v5395_v26  ;;  %v16126_v23 = vld [vmem:[#allocation113_spill] sm:$0xff]  ;;  %v16127_v8 = vld [vmem:[#allocation114_spill] sm:$0xff] }
 0x574   : > { %5558 = vmatmul.f32.gmra.mxu1 %v16124_v0  ;;  %v5245_v26 = vld [vmem:[%s8044_s6 + $0x38] sm:$0xff] }
 0x575   : > { %5671 = vmatmul.f32.gmra.mxu2 %v16125_v1  ;;  %5784 = vmatmul.f32.gmra.mxu3 %v13886_v43  ;;  %6340 = vst [vmem:[#allocation2 + $0x130] sm:$0xff] %v6276_v38  ;;  %v5277_v31 = vld [vmem:[%s8044_s6 + $0x138] sm:$0xff] }
 0x576   : > { %v5621_v9 = vpop.f32.mrf.mxu2  ;;  %5830 = vmatpush.msrb.mxu0 %v5245_v26  ;;  %5943 = vmatpush.msrb.mxu1 %v5277_v31 }
 0x577   : > { %v5734_v33 = vpop.f32.mrf.mxu3  ;;  %v5622_v4 = vadd.f32 %v5621_v9, %v5509_v12  ;;  %v5184_v9 = vld [vmem:[#allocation2 + $0x118] sm:$0xff] }
 0x579   : > { %v5398_v37 = vpop.f32.mrf.mxu0  ;;  %v5735_v0 = vadd.f32 %v5734_v33, %v5622_v4 }
 0x57a   : > { %v5511_v54 = vpop.f32.mrf.mxu1 }
 0x57b   : > { %5448 = vmatmul.f32.gmra.mxu0 %v16126_v23  ;;  %v6278_v43 = vadd.f32 %v5735_v0, %v5182_v32  ;;  %v5512_v38 = vadd.f32 %v5511_v54, %v5398_v37  ;;  %v16128_v0 = vld [vmem:[#allocation115_spill] sm:$0xff]  ;;  %v16129_v32 = vld [vmem:[#allocation116_spill] sm:$0xff]  ;;  %v16131_v37 = vld [vmem:[#allocation54_spill] sm:$0xff] }
 0x57c   : > { %5561 = vmatmul.f32.gmra.mxu1 %v16127_v8  ;;  %v5339_v23 = vld [vmem:[%s8044_s6 + $0x328] sm:$0xff] }
 0x57d   : > { %5674 = vmatmul.f32.gmra.mxu2 %v13900_v18  ;;  %5787 = vmatmul.f32.gmra.mxu3 %v13962_v49  ;;  %6342 = vst [vmem:[#allocation2 + $0x180] sm:$0xff] %v6278_v43  ;;  %v16130_v43 = vld [vmem:[#allocation64_spill] sm:$0xff] }
 0x57e   : > { %v5624_v10 = vpop.f32.mrf.mxu2  ;;  %v5307_v18 = vld [vmem:[%s8044_s6 + $0x228] sm:$0xff]  ;;  %6170 = vmatpush.msrb.mxu3 %v5339_v23 }
 0x57f   : > { %v5737_v45 = vpop.f32.mrf.mxu3  ;;  %v5625_v12 = vadd.f32 %v5624_v10, %v5512_v38  ;;  %6057 = vmatpush.msrb.mxu2 %v5307_v18  ;;  %v5186_v10 = vld [vmem:[#allocation2 + $0x120] sm:$0xff] }
 0x581   : > { %v5401_v33 = vpop.f32.mrf.mxu0  ;;  %v5738_v8 = vadd.f32 %v5737_v45, %v5625_v12 }
 0x582   : > { %v5514_v4 = vpop.f32.mrf.mxu1 }
 0x583   : > { %5451 = vmatmul.f32.gmra.mxu0 %v16128_v0  ;;  %v6280_v49 = vadd.f32 %v5738_v8, %v5184_v9  ;;  %v5515_v54 = vadd.f32 %v5514_v4, %v5401_v33  ;;  %v16132_v8 = vld [vmem:[#allocation149_spill] sm:$0xff]  ;;  %v16133_v9 = vld [vmem:[#allocation39_spill] sm:$0xff]  ;;  %v5243_v4 = vld [vmem:[%s8044_s6 + $0x28] sm:$0xff] }
 0x584   : > { %5564 = vmatmul.f32.gmra.mxu1 %v16129_v32  ;;  %5831 = vmatpush.msrb.mxu0 %v5243_v4 }
 0x585   : > { %5677 = vmatmul.f32.gmra.mxu2 %v16130_v43  ;;  %5790 = vmatmul.f32.gmra.mxu3 %v16131_v37  ;;  %6344 = vst [vmem:[#allocation2 + $0x118] sm:$0xff] %v6280_v49  ;;  %v16134_v49 = vld [vmem:[#allocation146_spill] sm:$0xff]  ;;  %v5275_v43 = vld [vmem:[%s8044_s6 + $0x128] sm:$0xff] }
 0x586   : > { %v5627_v26 = vpop.f32.mrf.mxu2  ;;  %5944 = vmatpush.msrb.mxu1 %v5275_v43 }
 0x587   : > { %v5740_v38 = vpop.f32.mrf.mxu3  ;;  %v5628_v31 = vadd.f32 %v5627_v26, %v5515_v54  ;;  %v5188_v26 = vld [vmem:[#allocation2 + $0x108] sm:$0xff] }
 0x589   : > { %v5404_v45 = vpop.f32.mrf.mxu0  ;;  %v5741_v32 = vadd.f32 %v5740_v38, %v5628_v31 }
 0x58a   : > { %v5517_v12 = vpop.f32.mrf.mxu1 }
 0x58b   : > { %5454 = vmatmul.f32.gmra.mxu0 %v16132_v8  ;;  %v6282_v37 = vadd.f32 %v5741_v32, %v5186_v10  ;;  %v5518_v33 = vadd.f32 %v5517_v12, %v5404_v45  ;;  %v16135_v32 = vld [vmem:[#allocation43_spill] sm:$0xff]  ;;  %v16136_v10 = vld [vmem:[#allocation44_spill] sm:$0xff]  ;;  %v5305_v12 = vld [vmem:[%s8044_s6 + $0x218] sm:$0xff] }
 0x58c   : > { %5567 = vmatmul.f32.gmra.mxu1 %v16133_v9  ;;  %6058 = vmatpush.msrb.mxu2 %v5305_v12 }
 0x58d   : > { %5680 = vmatmul.f32.gmra.mxu2 %v16134_v49  ;;  %5793 = vmatmul.f32.gmra.mxu3 %v14100_v7  ;;  %6346 = vst [vmem:[#allocation2 + $0x120] sm:$0xff] %v6282_v37  ;;  %v16137_v37 = vld [vmem:[#allocation58_spill] sm:$0xff] }
 0x58e   : > { %v5630_v18 = vpop.f32.mrf.mxu2  ;;  %v5337_v49 = vld [vmem:[%s8044_s6 + $0x318] sm:$0xff] }
 0x58f   : > { %v5743_v23 = vpop.f32.mrf.mxu3  ;;  %v5631_v54 = vadd.f32 %v5630_v18, %v5518_v33  ;;  %6171 = vmatpush.msrb.mxu3 %v5337_v49  ;;  %v5190_v18 = vld [vmem:[#allocation2 + $0xe0] sm:$0xff] }
 0x591   : > { %v5407_v38 = vpop.f32.mrf.mxu0  ;;  %v5744_v9 = vadd.f32 %v5743_v23, %v5631_v54 }
 0x592   : > { %v5520_v31 = vpop.f32.mrf.mxu1 }
 0x593   : > { %5457 = vmatmul.f32.gmra.mxu0 %v16135_v32  ;;  %v6284_v7 = vadd.f32 %v5744_v9, %v5188_v26  ;;  %v5521_v45 = vadd.f32 %v5520_v31, %v5407_v38  ;;  %v16138_v9 = vld [vmem:[#allocation117_spill] sm:$0xff]  ;;  %v5241_v38 = vld [vmem:[%s8044_s6 + $0x18] sm:$0xff] }
 0x594   : > { %5570 = vmatmul.f32.gmra.mxu1 %v16136_v10  ;;  %v16139_v26 = vld [vmem:[#allocation49_spill] sm:$0xff]  ;;  %v5273_v31 = vld [vmem:[%s8044_s6 + $0x118] sm:$0xff]  ;;  %5832 = vmatpush.msrb.mxu0 %v5241_v38 }
 0x595   : > { %5683 = vmatmul.f32.gmra.mxu2 %v14116_v17  ;;  %5796 = vmatmul.f32.gmra.mxu3 %v16137_v37  ;;  %6348 = vst [vmem:[#allocation2 + $0x108] sm:$0xff] %v6284_v7 }
 0x596   : > { %v5633_v4 = vpop.f32.mrf.mxu2  ;;  %5945 = vmatpush.msrb.mxu1 %v5273_v31 }
 0x597   : > { %v5746_v43 = vpop.f32.mrf.mxu3  ;;  %v5634_v33 = vadd.f32 %v5633_v4, %v5521_v45  ;;  %v5192_v4 = vld [vmem:[#allocation2 + $0x138] sm:$0xff] }
 0x599   : > { %v5410_v23 = vpop.f32.mrf.mxu0  ;;  %v5747_v10 = vadd.f32 %v5746_v43, %v5634_v33 }
 0x59a   : > { %v5523_v54 = vpop.f32.mrf.mxu1 }
 0x59b   : > { %5460 = vmatmul.f32.gmra.mxu0 %v16138_v9  ;;  %v6286_v37 = vadd.f32 %v5747_v10, %v5190_v18  ;;  %v5524_v7 = vadd.f32 %v5523_v54, %v5410_v23  ;;  %v16140_v10 = vld [vmem:[#allocation50_spill] sm:$0xff]  ;;  %v5303_v23 = vld [vmem:[%s8044_s6 + $0x208] sm:$0xff] }
 0x59c   : > { %5573 = vmatmul.f32.gmra.mxu1 %v16139_v26  ;;  %v16141_v18 = vld [vmem:[#allocation118_spill] sm:$0xff]  ;;  %v5335_v54 = vld [vmem:[%s8044_s6 + $0x308] sm:$0xff]  ;;  %6059 = vmatpush.msrb.mxu2 %v5303_v23 }
 0x59d   : > { %5686 = vmatmul.f32.gmra.mxu2 %v14181_v55  ;;  %5799 = vmatmul.f32.gmra.mxu3 %v14225_v29  ;;  %6350 = vst [vmem:[#allocation2 + $0xe0] sm:$0xff] %v6286_v37 }
 0x59e   : > { %v5636_v12 = vpop.f32.mrf.mxu2  ;;  %6172 = vmatpush.msrb.mxu3 %v5335_v54 }
 0x59f   : > { %v5749_v49 = vpop.f32.mrf.mxu3  ;;  %v5637_v45 = vadd.f32 %v5636_v12, %v5524_v7  ;;  %v5194_v12 = vld [vmem:[#allocation2 + $0x80] sm:$0xff] }
 0x5a1   : > { %v5413_v43 = vpop.f32.mrf.mxu0  ;;  %v5750_v26 = vadd.f32 %v5749_v49, %v5637_v45 }
 0x5a2   : > { %v5526_v33 = vpop.f32.mrf.mxu1 }
 0x5a3   : > { %5463 = vmatmul.f32.gmra.mxu0 %v16140_v10  ;;  %v6288_v29 = vadd.f32 %v5750_v26, %v5192_v4  ;;  %v5527_v37 = vadd.f32 %v5526_v33, %v5413_v43  ;;  %v16142_v26 = vld [vmem:[#allocation119_spill] sm:$0xff]  ;;  %v16143_v4 = vld [vmem:[#allocation120_spill] sm:$0xff] }
 0x5a4   : > { %5576 = vmatmul.f32.gmra.mxu1 %v16141_v18  ;;  %v5239_v43 = vld [vmem:[%s8044_s6 + $0x8] sm:$0xff] }
 0x5a5   : > { %5689 = vmatmul.f32.gmra.mxu2 %v14254_v48  ;;  %5802 = vmatmul.f32.gmra.mxu3 %v14295_v11  ;;  %6352 = vst [vmem:[#allocation2 + $0x138] sm:$0xff] %v6288_v29  ;;  %v5271_v33 = vld [vmem:[%s8044_s6 + $0x108] sm:$0xff]  ;;  %v16144_v48 = vld [vmem:[#allocation121_spill] sm:$0xff] }
 0x5a6   : > { %v5639_v38 = vpop.f32.mrf.mxu2  ;;  %5833 = vmatpush.msrb.mxu0 %v5239_v43  ;;  %5946 = vmatpush.msrb.mxu1 %v5271_v33  ;;  %v5198_v33 = vld [vmem:[#allocation2 + $0x1e8] sm:$0xff] }
 0x5a7   : > { %v5752_v7 = vpop.f32.mrf.mxu3  ;;  %v5640_v31 = vadd.f32 %v5639_v38, %v5527_v37  ;;  %v5196_v38 = vld [vmem:[#allocation2 + $0x1b8] sm:$0xff] }
 0x5a9   : > { %v5416_v49 = vpop.f32.mrf.mxu0  ;;  %v5753_v18 = vadd.f32 %v5752_v7, %v5640_v31 }
 0x5aa   : > { %v5529_v45 = vpop.f32.mrf.mxu1 }
 0x5ab   : > { %5466 = vmatmul.f32.gmra.mxu0 %v16142_v26  ;;  %v6290_v11 = vadd.f32 %v5753_v18, %v5194_v12  ;;  %v5530_v29 = vadd.f32 %v5529_v45, %v5416_v49  ;;  %v16145_v18 = vld [vmem:[#allocation122_spill] sm:$0xff] }
 0x5ac   : > { %5579 = vmatmul.f32.gmra.mxu1 %v16143_v4 }
 0x5ad   : > { %5692 = vmatmul.f32.gmra.mxu2 %v14308_v14  ;;  %5805 = vmatmul.f32.gmra.mxu3 %v14348_v57  ;;  %6354 = vst [vmem:[#allocation2 + $0x80] sm:$0xff] %v6290_v11  ;;  %v16146_v14 = vld [vmem:[#allocation62_spill] sm:$0xff] }
 0x5ae   : > { %v5642_v23 = vpop.f32.mrf.mxu2 }
 0x5af   : > { %v5755_v54 = vpop.f32.mrf.mxu3  ;;  %v5643_v37 = vadd.f32 %v5642_v23, %v5530_v29 }
 0x5b1   : > { %v5419_v7 = vpop.f32.mrf.mxu0  ;;  %v5756_v26 = vadd.f32 %v5755_v54, %v5643_v37  ;;  %v16147_v54 = vld [vmem:[#allocation63_spill] sm:$0xff] }
 0x5b2   : > { %v5532_v31 = vpop.f32.mrf.mxu1 }
 0x5b3   : > { %5469 = vmatmul.f32.gmra.mxu0 %v16144_v48  ;;  %v6292_v12 = vadd.f32 %v5756_v26, %v5196_v38  ;;  %v5533_v11 = vadd.f32 %v5532_v31, %v5419_v7 }
 0x5b4   : > { %5582 = vmatmul.f32.gmra.mxu1 %v16145_v18 }
 0x5b5   : > { %5695 = vmatmul.f32.gmra.mxu2 %v14356_v46  ;;  %5808 = vmatmul.f32.gmra.mxu3 %v14388_v41  ;;  %6356 = vst [vmem:[#allocation2 + $0x1b8] sm:$0xff] %v6292_v12  ;;  %v5200_v12 = vld [vmem:[#allocation2 + $0x160] sm:$0xff] }
 0x5b6   : > { %v5645_v49 = vpop.f32.mrf.mxu2  ;;  %v16148_v46 = vld [vmem:[#allocation51_spill] sm:$0xff] }
 0x5b7   : > { %v5758_v45 = vpop.f32.mrf.mxu3  ;;  %v5646_v43 = vadd.f32 %v5645_v49, %v5533_v11 }
 0x5b9   : > { %v5422_v29 = vpop.f32.mrf.mxu0  ;;  %v5759_v57 = vadd.f32 %v5758_v45, %v5646_v43  ;;  %v16149_v45 = vld [vmem:[#allocation52_spill] sm:$0xff] }
 0x5ba   : > { %v5535_v23 = vpop.f32.mrf.mxu1 }
 0x5bb   : > { %5472 = vmatmul.f32.gmra.mxu0 %v16146_v14  ;;  %v6294_v37 = vadd.f32 %v5759_v57, %v5198_v33  ;;  %v5536_v26 = vadd.f32 %v5535_v23, %v5422_v29 }
 0x5bc   : > { %5585 = vmatmul.f32.gmra.mxu1 %v16147_v54 }
 0x5bd   : > { %5698 = vmatmul.f32.gmra.mxu2 %v14403_v39  ;;  %5811 = vmatmul.f32.gmra.mxu3 %v14424_v22  ;;  %6358 = vst [vmem:[#allocation2 + $0x1e8] sm:$0xff] %v6294_v37  ;;  %v5202_v37 = vld [vmem:[#allocation2 + $0x1e0] sm:$0xff]  ;;  %v16150_v39 = vld [vmem:[#allocation29_spill] sm:$0xff] }
 0x5be   : > { %v5648_v38 = vpop.f32.mrf.mxu2 }
 0x5bf   : > { %v5761_v7 = vpop.f32.mrf.mxu3  ;;  %v5649_v31 = vadd.f32 %v5648_v38, %v5536_v26 }
 0x5c1   : > { %v5425_v11 = vpop.f32.mrf.mxu0  ;;  %v5762_v41 = vadd.f32 %v5761_v7, %v5649_v31  ;;  %v16151_v7 = vld [vmem:[#allocation141_spill] sm:$0xff] }
 0x5c2   : > { %v5538_v49 = vpop.f32.mrf.mxu1 }
 0x5c3   : > { %5475 = vmatmul.f32.gmra.mxu0 %v16148_v46  ;;  %v6296_v43 = vadd.f32 %v5762_v41, %v5200_v12  ;;  %v5539_v57 = vadd.f32 %v5538_v49, %v5425_v11  ;;  %v16153_v41 = vld [vmem:[#allocation56_spill] sm:$0xff]  ;;  %v16154_v46 = vld [vmem:[#allocation30_spill] sm:$0xff] }
 0x5c4   : > { %5588 = vmatmul.f32.gmra.mxu1 %v16149_v45  ;;  %v16152_v45 = vld [vmem:[#allocation55_spill] sm:$0xff] }
 0x5c5   : > { %5701 = vmatmul.f32.gmra.mxu2 %v14428_v51  ;;  %5814 = vmatmul.f32.gmra.mxu3 %v14436_v36  ;;  %6360 = vst [vmem:[#allocation2 + $0x160] sm:$0xff] %v6296_v43  ;;  %v5204_v36 = vld [vmem:[#allocation2 + $0xf0] sm:$0xff] }
 0x5c6   : > { %v5651_v33 = vpop.f32.mrf.mxu2 }
 0x5c7   : > { %v5764_v29 = vpop.f32.mrf.mxu3  ;;  %v5652_v23 = vadd.f32 %v5651_v33, %v5539_v57 }
 0x5c9   : > { %v5428_v26 = vpop.f32.mrf.mxu0  ;;  %v5765_v22 = vadd.f32 %v5764_v29, %v5652_v23  ;;  %v16155_v29 = vld [vmem:[#allocation142_spill] sm:$0xff]  ;;  %v16156_v23 = vld [vmem:[#allocation65_spill] sm:$0xff] }
 0x5ca   : > { %v5541_v38 = vpop.f32.mrf.mxu1 }
 0x5cb   : > { %5834 = vmatmul.f32.vlgmr.msrb.gmra.mxu0 %v16150_v39  ;;  %v6298_v31 = vadd.f32 %v5765_v22, %v5202_v37  ;;  %v5542_v12 = vadd.f32 %v5541_v38, %v5428_v26  ;;  %v16157_v22 = vld [vmem:[#allocation66_spill] sm:$0xff] }
 0x5cc   : > { %5947 = vmatmul.f32.vlgmr.msrb.gmra.mxu1 %v16151_v7  ;;  %v5206_v7 = vld [vmem:[#allocation2 + $0x148] sm:$0xff] }
 0x5cd   : > { %6060 = vmatmul.f32.vlgmr.msrb.gmra.mxu2 %v16152_v45  ;;  %6173 = vmatmul.f32.vlgmr.msrb.gmra.mxu3 %v16153_v41  ;;  %6362 = vst [vmem:[#allocation2 + $0x1e0] sm:$0xff] %v6298_v31 }
 0x5ce   : > { %v5654_v43 = vpop.f32.mrf.mxu2 }
 0x5cf   : > { %v5767_v11 = vpop.f32.mrf.mxu3  ;;  %v5655_v49 = vadd.f32 %v5654_v43, %v5542_v12  ;;  %v16158_v43 = vld [vmem:[#allocation35_spill] sm:$0xff] }
 0x5d1   : > { %v5431_v57 = vpop.f32.mrf.mxu0  ;;  %v5768_v51 = vadd.f32 %v5767_v11, %v5655_v49  ;;  %v16159_v11 = vld [vmem:[#allocation48_spill] sm:$0xff] }
 0x5d2   : > { %v5544_v33 = vpop.f32.mrf.mxu1  ;;  %v16160_v49 = vld [vmem:[#allocation68_spill] sm:$0xff] }
 0x5d3   : > { %5837 = vmatmul.f32.gmra.mxu0 %v16154_v46  ;;  %v6300_v39 = vadd.f32 %v5768_v51, %v5204_v36  ;;  %v5545_v45 = vadd.f32 %v5544_v33, %v5431_v57  ;;  %v16161_v51 = vld [vmem:[#allocation69_spill] sm:$0xff] }
 0x5d4   : > { %5950 = vmatmul.f32.gmra.mxu1 %v16155_v29 }
 0x5d5   : > { %6063 = vmatmul.f32.gmra.mxu2 %v16156_v23  ;;  %6176 = vmatmul.f32.gmra.mxu3 %v16157_v22  ;;  %6364 = vst [vmem:[#allocation2 + $0xf0] sm:$0xff] %v6300_v39  ;;  %v5208_v39 = vld [vmem:[#allocation2 + $0x100] sm:$0xff] }
 0x5d6   : > { %v5657_v37 = vpop.f32.mrf.mxu2 }
 0x5d7   : > { %v5770_v26 = vpop.f32.mrf.mxu3  ;;  %v5658_v38 = vadd.f32 %v5657_v37, %v5545_v45  ;;  %v16162_v37 = vld [vmem:[#allocation31_spill] sm:$0xff] }
 0x5d9   : > { %v5434_v31 = vpop.f32.mrf.mxu0  ;;  %v5771_v12 = vadd.f32 %v5770_v26, %v5658_v38  ;;  %v16163_v26 = vld [vmem:[#allocation47_spill] sm:$0xff] }
 0x5da   : > { %v5547_v41 = vpop.f32.mrf.mxu1 }
 0x5db   : > { %5840 = vmatmul.f32.gmra.mxu0 %v16158_v43  ;;  %v6302_v46 = vadd.f32 %v5771_v12, %v5206_v7  ;;  %v5548_v36 = vadd.f32 %v5547_v41, %v5434_v31  ;;  %v16164_v43 = vld [vmem:[#allocation70_spill] sm:$0xff]  ;;  %v16165_v7 = vld [vmem:[#allocation71_spill] sm:$0xff] }
 0x5dc   : > { %5953 = vmatmul.f32.gmra.mxu1 %v16159_v11 }
 0x5dd   : > { %6066 = vmatmul.f32.gmra.mxu2 %v16160_v49  ;;  %6179 = vmatmul.f32.gmra.mxu3 %v16161_v51  ;;  %6366 = vst [vmem:[#allocation2 + $0x148] sm:$0xff] %v6302_v46  ;;  %v5210_v46 = vld [vmem:[#allocation2 + $0x40] sm:$0xff] }
 0x5de   : > { %v5660_v29 = vpop.f32.mrf.mxu2 }
 0x5df   : > { %v5773_v57 = vpop.f32.mrf.mxu3  ;;  %v5661_v33 = vadd.f32 %v5660_v29, %v5548_v36  ;;  %v16166_v29 = vld [vmem:[#allocation36_spill] sm:$0xff] }
 0x5e1   : > { %v5437_v23 = vpop.f32.mrf.mxu0  ;;  %v5774_v45 = vadd.f32 %v5773_v57, %v5661_v33  ;;  %v16167_v57 = vld [vmem:[#allocation82_spill] sm:$0xff] }
 0x5e2   : > { %v5550_v22 = vpop.f32.mrf.mxu1 }
 0x5e3   : > { %5843 = vmatmul.f32.gmra.mxu0 %v16162_v37  ;;  %v6304_v38 = vadd.f32 %v5774_v45, %v5208_v39  ;;  %v5551_v12 = vadd.f32 %v5550_v22, %v5437_v23  ;;  %v16168_v37 = vld [vmem:[#allocation123_spill] sm:$0xff]  ;;  %v16169_v39 = vld [vmem:[#allocation124_spill] sm:$0xff] }
 0x5e4   : > { %5956 = vmatmul.f32.gmra.mxu1 %v16163_v26 }
 0x5e5   : > { %6069 = vmatmul.f32.gmra.mxu2 %v16164_v43  ;;  %6182 = vmatmul.f32.gmra.mxu3 %v16165_v7  ;;  %6368 = vst [vmem:[#allocation2 + $0x100] sm:$0xff] %v6304_v38  ;;  %v5212_v38 = vld [vmem:[#allocation2 + $0x20] sm:$0xff] }
 0x5e6   : > { %v5663_v11 = vpop.f32.mrf.mxu2 }
 0x5e7   : > { %v5776_v31 = vpop.f32.mrf.mxu3  ;;  %v5664_v41 = vadd.f32 %v5663_v11, %v5551_v12  ;;  %v16170_v11 = vld [vmem:[#allocation45_spill] sm:$0xff] }
 0x5e9   : > { %v5440_v49 = vpop.f32.mrf.mxu0  ;;  %v5777_v36 = vadd.f32 %v5776_v31, %v5664_v41  ;;  %v16171_v31 = vld [vmem:[#allocation145_spill] sm:$0xff] }
 0x5ea   : > { %v5553_v51 = vpop.f32.mrf.mxu1 }
 0x5eb   : > { %5846 = vmatmul.f32.gmra.mxu0 %v16166_v29  ;;  %v6306_v33 = vadd.f32 %v5777_v36, %v5210_v46  ;;  %v5554_v45 = vadd.f32 %v5553_v51, %v5440_v49  ;;  %v16172_v29 = vld [vmem:[#allocation125_spill] sm:$0xff]  ;;  %v16173_v46 = vld [vmem:[#allocation150_spill] sm:$0xff] }
 0x5ec   : > { %5959 = vmatmul.f32.gmra.mxu1 %v16167_v57 }
 0x5ed   : > { %6072 = vmatmul.f32.gmra.mxu2 %v16168_v37  ;;  %6185 = vmatmul.f32.gmra.mxu3 %v16169_v39  ;;  %6370 = vst [vmem:[#allocation2 + $0x40] sm:$0xff] %v6306_v33  ;;  %v5214_v33 = vld [vmem:[#allocation2 + $0x1a0] sm:$0xff] }
 0x5ee   : > { %v5666_v26 = vpop.f32.mrf.mxu2 }
 0x5ef   : > { %v5779_v23 = vpop.f32.mrf.mxu3  ;;  %v5667_v22 = vadd.f32 %v5666_v26, %v5554_v45  ;;  %v16174_v26 = vld [vmem:[#allocation144_spill] sm:$0xff] }
 0x5f1   : > { %v5443_v43 = vpop.f32.mrf.mxu0  ;;  %v5780_v12 = vadd.f32 %v5779_v23, %v5667_v22  ;;  %v16175_v23 = vld [vmem:[#allocation147_spill] sm:$0xff] }
 0x5f2   : > { %v5556_v7 = vpop.f32.mrf.mxu1 }
 0x5f3   : > { %5849 = vmatmul.f32.gmra.mxu0 %v16170_v11  ;;  %v6308_v41 = vadd.f32 %v5780_v12, %v5212_v38  ;;  %v5557_v36 = vadd.f32 %v5556_v7, %v5443_v43  ;;  %v16176_v11 = vld [vmem:[#allocation127_spill] sm:$0xff]  ;;  %v16177_v38 = vld [vmem:[#allocation128_spill] sm:$0xff] }
 0x5f4   : > { %5962 = vmatmul.f32.gmra.mxu1 %v16171_v31 }
 0x5f5   : > { %6075 = vmatmul.f32.gmra.mxu2 %v16172_v29  ;;  %6188 = vmatmul.f32.gmra.mxu3 %v16173_v46  ;;  %6372 = vst [vmem:[#allocation2 + $0x20] sm:$0xff] %v6308_v41  ;;  %v5216_v41 = vld [vmem:[#allocation2 + $0xe8] sm:$0xff] }
 0x5f6   : > { %v5669_v57 = vpop.f32.mrf.mxu2 }
 0x5f7   : > { %v5782_v49 = vpop.f32.mrf.mxu3  ;;  %v5670_v51 = vadd.f32 %v5669_v57, %v5557_v36  ;;  %v16178_v57 = vld [vmem:[#allocation40_spill] sm:$0xff] }
 0x5f9   : > { %v5446_v37 = vpop.f32.mrf.mxu0  ;;  %v5783_v45 = vadd.f32 %v5782_v49, %v5670_v51  ;;  %v16179_v49 = vld [vmem:[#allocation85_spill] sm:$0xff] }
 0x5fa   : > { %v5559_v39 = vpop.f32.mrf.mxu1 }
 0x5fb   : > { %5852 = vmatmul.f32.gmra.mxu0 %v16174_v26  ;;  %v6310_v22 = vadd.f32 %v5783_v45, %v5214_v33  ;;  %v5560_v12 = vadd.f32 %v5559_v39, %v5446_v37  ;;  %v16180_v26 = vld [vmem:[#allocation129_spill] sm:$0xff]  ;;  %v16181_v33 = vld [vmem:[#allocation130_spill] sm:$0xff] }
 0x5fc   : > { %5965 = vmatmul.f32.gmra.mxu1 %v16175_v23 }
 0x5fd   : > { %6078 = vmatmul.f32.gmra.mxu2 %v16176_v11  ;;  %6191 = vmatmul.f32.gmra.mxu3 %v16177_v38  ;;  %6374 = vst [vmem:[#allocation2 + $0x1a0] sm:$0xff] %v6310_v22  ;;  %v5218_v22 = vld [vmem:[#allocation2 + $0x70] sm:$0xff] }
 0x5fe   : > { %v5672_v31 = vpop.f32.mrf.mxu2 }
 0x5ff   : > { %v5785_v43 = vpop.f32.mrf.mxu3  ;;  %v5673_v7 = vadd.f32 %v5672_v31, %v5560_v12  ;;  %v16182_v31 = vld [vmem:[#allocation88_spill] sm:$0xff] }
 0x601   : > { %v5449_v29 = vpop.f32.mrf.mxu0  ;;  %v5786_v36 = vadd.f32 %v5785_v43, %v5673_v7  ;;  %v16183_v43 = vld [vmem:[#allocation78_spill] sm:$0xff] }
 0x602   : > { %v5562_v46 = vpop.f32.mrf.mxu1 }
 0x603   : > { %5855 = vmatmul.f32.gmra.mxu0 %v16178_v57  ;;  %v6312_v51 = vadd.f32 %v5786_v36, %v5216_v41  ;;  %v5563_v45 = vadd.f32 %v5562_v46, %v5449_v29  ;;  %v16184_v57 = vld [vmem:[#allocation53_spill] sm:$0xff]  ;;  %v16185_v41 = vld [vmem:[#allocation132_spill] sm:$0xff] }
 0x604   : > { %5968 = vmatmul.f32.gmra.mxu1 %v16179_v49 }
 0x605   : > { %6081 = vmatmul.f32.gmra.mxu2 %v16180_v26  ;;  %6194 = vmatmul.f32.gmra.mxu3 %v16181_v33  ;;  %6376 = vst [vmem:[#allocation2 + $0xe8] sm:$0xff] %v6312_v51  ;;  %v5220_v51 = vld [vmem:[#allocation2 + $0x1d8] sm:$0xff] }
 0x606   : > { %v5675_v23 = vpop.f32.mrf.mxu2 }
 0x607   : > { %v5788_v37 = vpop.f32.mrf.mxu3  ;;  %v5676_v39 = vadd.f32 %v5675_v23, %v5563_v45  ;;  %v16186_v23 = vld [vmem:[#allocation79_spill] sm:$0xff] }
 0x609   : > { %v5452_v11 = vpop.f32.mrf.mxu0  ;;  %v5789_v12 = vadd.f32 %v5788_v37, %v5676_v39  ;;  %v16187_v37 = vld [vmem:[#allocation86_spill] sm:$0xff] }
 0x60a   : > { %v5565_v38 = vpop.f32.mrf.mxu1 }
 0x60b   : > { %5858 = vmatmul.f32.gmra.mxu0 %v16182_v31  ;;  %v6314_v7 = vadd.f32 %v5789_v12, %v5218_v22  ;;  %v5566_v36 = vadd.f32 %v5565_v38, %v5452_v11  ;;  %v16188_v31 = vld [vmem:[#allocation42_spill] sm:$0xff]  ;;  %v16189_v22 = vld [vmem:[#allocation133_spill] sm:$0xff] }
 0x60c   : > { %5971 = vmatmul.f32.gmra.mxu1 %v16183_v43 }
 0x60d   : > { %6084 = vmatmul.f32.gmra.mxu2 %v16184_v57  ;;  %6197 = vmatmul.f32.gmra.mxu3 %v16185_v41  ;;  %6378 = vst [vmem:[#allocation2 + $0x70] sm:$0xff] %v6314_v7  ;;  %v5222_v7 = vld [vmem:[#allocation2 + $0xb8] sm:$0xff] }
 0x60e   : > { %v5678_v49 = vpop.f32.mrf.mxu2 }
 0x60f   : > { %v5791_v29 = vpop.f32.mrf.mxu3  ;;  %v5679_v46 = vadd.f32 %v5678_v49, %v5566_v36  ;;  %v16190_v49 = vld [vmem:[#allocation138_spill] sm:$0xff] }
 0x611   : > { %v5455_v26 = vpop.f32.mrf.mxu0  ;;  %v5792_v45 = vadd.f32 %v5791_v29, %v5679_v46  ;;  %v16191_v29 = vld [vmem:[#allocation73_spill] sm:$0xff] }
 0x612   : > { %v5568_v33 = vpop.f32.mrf.mxu1 }
 0x613   : > { %5861 = vmatmul.f32.gmra.mxu0 %v16186_v23  ;;  %v6316_v39 = vadd.f32 %v5792_v45, %v5220_v51  ;;  %v5569_v12 = vadd.f32 %v5568_v33, %v5455_v26  ;;  %v16192_v23 = vld [vmem:[#allocation134_spill] sm:$0xff]  ;;  %v16193_v51 = vld [vmem:[#allocation23_spill] sm:$0xff] }
 0x614   : > { %5974 = vmatmul.f32.gmra.mxu1 %v16187_v37 }
 0x615   : > { %6087 = vmatmul.f32.gmra.mxu2 %v16188_v31  ;;  %6200 = vmatmul.f32.gmra.mxu3 %v16189_v22  ;;  %6380 = vst [vmem:[#allocation2 + $0x1d8] sm:$0xff] %v6316_v39  ;;  %v5224_v39 = vld [vmem:[#allocation2 + $0xa8] sm:$0xff] }
 0x616   : > { %v5681_v43 = vpop.f32.mrf.mxu2 }
 0x617   : > { %v5794_v11 = vpop.f32.mrf.mxu3  ;;  %v5682_v38 = vadd.f32 %v5681_v43, %v5569_v12  ;;  %v16194_v43 = vld [vmem:[#allocation91_spill] sm:$0xff] }
 0x619   : > { %v5458_v57 = vpop.f32.mrf.mxu0  ;;  %v5795_v36 = vadd.f32 %v5794_v11, %v5682_v38  ;;  %v16195_v11 = vld [vmem:[#allocation92_spill] sm:$0xff] }
 0x61a   : > { %v5571_v41 = vpop.f32.mrf.mxu1 }
 0x61b   : > { %5864 = vmatmul.f32.gmra.mxu0 %v16190_v49  ;;  %v6318_v46 = vadd.f32 %v5795_v36, %v5222_v7  ;;  %v5572_v45 = vadd.f32 %v5571_v41, %v5458_v57  ;;  %v5226_v49 = vld [vmem:[#allocation2 + $0x170] sm:$0xff] }
 0x61c   : > { %5977 = vmatmul.f32.gmra.mxu1 %v16191_v29 }
 0x61d   : > { %6090 = vmatmul.f32.gmra.mxu2 %v16192_v23  ;;  %6203 = vmatmul.f32.gmra.mxu3 %v16193_v51  ;;  %6382 = vst [vmem:[#allocation2 + $0xb8] sm:$0xff] %v6318_v46  ;;  %v16196_v51 = vld [vmem:[#allocation94_spill] sm:$0xff] }
 0x61e   : > { %v5684_v37 = vpop.f32.mrf.mxu2 }
 0x61f   : > { %v5797_v26 = vpop.f32.mrf.mxu3  ;;  %v5685_v33 = vadd.f32 %v5684_v37, %v5572_v45 }
 0x621   : > { %v5461_v31 = vpop.f32.mrf.mxu0  ;;  %v5798_v12 = vadd.f32 %v5797_v26, %v5685_v33  ;;  %v5228_v33 = vld [vmem:[#allocation2 + $0x68] sm:$0xff] }
 0x622   : > { %v5574_v22 = vpop.f32.mrf.mxu1 }
 0x623   : > { %5867 = vmatmul.f32.gmra.mxu0 %v16194_v43  ;;  %v6320_v38 = vadd.f32 %v5798_v12, %v5224_v39  ;;  %v5575_v7 = vadd.f32 %v5574_v22, %v5461_v31 }
 0x624   : > { %5980 = vmatmul.f32.gmra.mxu1 %v16195_v11  ;;  %v5230_v11 = vld [vmem:[#allocation2 + $0x198] sm:$0xff] }
 0x625   : > { %6093 = vmatmul.f32.gmra.mxu2 %v16052_v47  ;;  %6206 = vmatmul.f32.gmra.mxu3 %v13138_v59  ;;  %6384 = vst [vmem:[#allocation2 + $0xa8] sm:$0xff] %v6320_v38 }
 0x626   : > { %v5687_v36 = vpop.f32.mrf.mxu2 }
 0x627   : > { %v5800_v57 = vpop.f32.mrf.mxu3  ;;  %v5688_v41 = vadd.f32 %v5687_v36, %v5575_v7 }
 0x629   : > { %v5464_v29 = vpop.f32.mrf.mxu0  ;;  %v5801_v23 = vadd.f32 %v5800_v57, %v5688_v41  ;;  %v5232_v41 = vld [vmem:[#allocation2 + $0xc0] sm:$0xff] }
 0x62a   : > { %v5577_v46 = vpop.f32.mrf.mxu1 }
 0x62b   : > { %5870 = vmatmul.f32.gmra.mxu0 %v16058_v62  ;;  %v6322_v45 = vadd.f32 %v5801_v23, %v5226_v49  ;;  %v5578_v59 = vadd.f32 %v5577_v46, %v5464_v29 }
 0x62c   : > { %5983 = vmatmul.f32.gmra.mxu1 %v16196_v51  ;;  %v5234_v51 = vld [vmem:[#allocation2 + $0x158] sm:$0xff] }
 0x62d   : > { %6096 = vmatmul.f32.gmra.mxu2 %v13163_v35  ;;  %6209 = vmatmul.f32.gmra.mxu3 %v16067_v28  ;;  %6386 = vst [vmem:[#allocation2 + $0x170] sm:$0xff] %v6322_v45 }
 0x62e   : > { %v5690_v47 = vpop.f32.mrf.mxu2 }
 0x62f   : > { %v5803_v37 = vpop.f32.mrf.mxu3  ;;  %v5691_v26 = vadd.f32 %v5690_v47, %v5578_v59 }
 0x631   : > { %v5467_v39 = vpop.f32.mrf.mxu0  ;;  %v5804_v22 = vadd.f32 %v5803_v37, %v5691_v26  ;;  %v5236_v26 = vld [vmem:[#allocation2 + $0x58] sm:$0xff] }
 0x632   : > { %v5580_v31 = vpop.f32.mrf.mxu1 }
 0x633   : > { %5873 = vmatmul.f32.gmra.mxu0 %v16073_v6  ;;  %v6324_v62 = vadd.f32 %v5804_v22, %v5228_v33  ;;  %v5581_v35 = vadd.f32 %v5580_v31, %v5467_v39 }
 0x634   : > { %5986 = vmatmul.f32.gmra.mxu1 %v16074_v15 }
 0x635   : > { %6099 = vmatmul.f32.gmra.mxu2 %v16076_v30  ;;  %6212 = vmatmul.f32.gmra.mxu3 %v16077_v44  ;;  %6388 = vst [vmem:[#allocation2 + $0x68] sm:$0xff] %v6324_v62  ;;  %v5175_v62 = vld [vmem:[#allocation2 + $0x1b0] sm:$0xff] }
 0x636   : > { %v5693_v28 = vpop.f32.mrf.mxu2 }
 0x637   : > { %v5806_v12 = vpop.f32.mrf.mxu3  ;;  %v5694_v43 = vadd.f32 %v5693_v28, %v5581_v35 }
 0x639   : > { %v5470_v38 = vpop.f32.mrf.mxu0  ;;  %v5807_v36 = vadd.f32 %v5806_v12, %v5694_v43  ;;  %v16197_v43 = vld [vmem:[#allocation105_spill] sm:$0xff] }
 0x63a   : > { %v5583_v7 = vpop.f32.mrf.mxu1 }
 0x63b   : > { %5876 = vmatmul.f32.gmra.mxu0 %v16088_v21  ;;  %v6326_v6 = vadd.f32 %v5807_v36, %v5230_v11  ;;  %v5584_v15 = vadd.f32 %v5583_v7, %v5470_v38  ;;  %v16198_v11 = vld [vmem:[#allocation106_spill] sm:$0xff]  ;;  %v16200_v38 = vld [vmem:[#allocation33_spill] sm:$0xff] }
 0x63c   : > { %5989 = vmatmul.f32.gmra.mxu1 %v16089_v16 }
 0x63d   : > { %6102 = vmatmul.f32.gmra.mxu2 %v16091_v42  ;;  %6215 = vmatmul.f32.gmra.mxu3 %v13367_v52  ;;  %6390 = vst [vmem:[#allocation2 + $0x198] sm:$0xff] %v6326_v6  ;;  %v5177_v6 = vld [vmem:[#allocation2 + $0x18] sm:$0xff] }
 0x63e   : > { %v5696_v30 = vpop.f32.mrf.mxu2 }
 0x63f   : > { %v5809_v44 = vpop.f32.mrf.mxu3  ;;  %v5697_v57 = vadd.f32 %v5696_v30, %v5584_v15 }
 0x641   : > { %v5473_v49 = vpop.f32.mrf.mxu0  ;;  %v5810_v46 = vadd.f32 %v5809_v44, %v5697_v57 }
 0x642   : > { %v5586_v29 = vpop.f32.mrf.mxu1 }
 0x643   : > { %5879 = vmatmul.f32.gmra.mxu0 %v14372_v13  ;;  %v6328_v21 = vadd.f32 %v5810_v46, %v5232_v41  ;;  %v5587_v52 = vadd.f32 %v5586_v29, %v5473_v49 }
 0x644   : > { %5992 = vmatmul.f32.gmra.mxu1 %v16099_v2 }
 0x645   : > { %6105 = vmatmul.f32.gmra.mxu2 %v13385_v25  ;;  %6218 = vmatmul.f32.gmra.mxu3 %v13448_v5  ;;  %6392 = vst [vmem:[#allocation2 + $0xc0] sm:$0xff] %v6328_v21  ;;  %v5179_v21 = vld [vmem:[#allocation2 + $0x168] sm:$0xff] }
 0x646   : > { %v5699_v16 = vpop.f32.mrf.mxu2 }
 0x647   : > { %v5812_v42 = vpop.f32.mrf.mxu3  ;;  %v5700_v23 = vadd.f32 %v5699_v16, %v5587_v52 }
 0x649   : > { %v5476_v45 = vpop.f32.mrf.mxu0  ;;  %v5813_v47 = vadd.f32 %v5812_v42, %v5700_v23  ;;  %v16201_v23 = vld [vmem:[#allocation110_spill] sm:$0xff] }
 0x64a   : > { %v5589_v59 = vpop.f32.mrf.mxu1 }
 0x64b   : > { %5882 = vmatmul.f32.gmra.mxu0 %v16104_v24  ;;  %v6330_v13 = vadd.f32 %v5813_v47, %v5234_v51  ;;  %v5590_v25 = vadd.f32 %v5589_v59, %v5476_v45  ;;  %v16203_v51 = vld [vmem:[#allocation46_spill] sm:$0xff]  ;;  %v5181_v47 = vld [vmem:[#allocation2 + $0x48] sm:$0xff] }
 0x64c   : > { %5995 = vmatmul.f32.gmra.mxu1 %v16105_v40 }
 0x64d   : > { %6108 = vmatmul.f32.gmra.mxu2 %v13462_v27  ;;  %6221 = vmatmul.f32.gmra.mxu3 %v13516_v61  ;;  %6394 = vst [vmem:[#allocation2 + $0x158] sm:$0xff] %v6330_v13 }
 0x64e   : > { %v5702_v5 = vpop.f32.mrf.mxu2 }
 0x64f   : > { %v5815_v2 = vpop.f32.mrf.mxu3  ;;  %v5703_v37 = vadd.f32 %v5702_v5, %v5590_v25 }
 0x651   : > { %v5835_v33 = vpop.f32.mrf.mxu0  ;;  %v5816_v31 = vadd.f32 %v5815_v2, %v5703_v37  ;;  %v16204_v2 = vld [vmem:[#allocation112_spill] sm:$0xff]  ;;  %v16205_v37 = vld [vmem:[#allocation41_spill] sm:$0xff] }
 0x652   : > { %v5948_v39 = vpop.f32.mrf.mxu1 }
 0x653   : > { %5885 = vmatmul.f32.gmra.mxu0 %v16108_v63  ;;  %v6332_v24 = vadd.f32 %v5816_v31, %v5236_v26  ;;  %v5949_v27 = vadd.f32 %v5948_v39, %v5835_v33 }
 0x654   : > { %5998 = vmatmul.f32.gmra.mxu1 %v16109_v60  ;;  %v16199_v60 = vld [vmem:[#allocation139_spill] sm:$0xff] }
 0x655   : > { %6111 = vmatmul.f32.gmra.mxu2 %v13545_v53  ;;  %6224 = vmatmul.f32.gmra.mxu3 %v16110_v3  ;;  %6396 = vst [vmem:[#allocation2 + $0x58] sm:$0xff] %v6332_v24  ;;  %v5183_v24 = vld [vmem:[#allocation2 + $0x110] sm:$0xff] }
 0x656   : > { %v6061_v61 = vpop.f32.mrf.mxu2 }
 0x657   : > { %v6174_v40 = vpop.f32.mrf.mxu3  ;;  %v6062_v22 = vadd.f32 %v6061_v61, %v5949_v27 }
 0x659   : > { %v5838_v35 = vpop.f32.mrf.mxu0  ;;  %v6175_v12 = vadd.f32 %v6174_v40, %v6062_v22  ;;  %v16206_v22 = vld [vmem:[#allocation113_spill] sm:$0xff] }
 0x65a   : > { %v5951_v28 = vpop.f32.mrf.mxu1 }
 0x65b   : > { %5888 = vmatmul.f32.gmra.mxu0 %v16197_v43  ;;  %v6271_v63 = vadd.f32 %v6175_v12, %v5175_v62  ;;  %v5952_v53 = vadd.f32 %v5951_v28, %v5838_v35  ;;  %v16207_v62 = vld [vmem:[#allocation114_spill] sm:$0xff]  ;;  %v16208_v35 = vld [vmem:[#allocation81_spill] sm:$0xff]  ;;  %v16209_v28 = vld [vmem:[#allocation83_spill] sm:$0xff] }
 0x65c   : > { %6001 = vmatmul.f32.gmra.mxu1 %v16198_v11 }
 0x65d   : > { %6114 = vmatmul.f32.gmra.mxu2 %v16199_v60  ;;  %6227 = vmatmul.f32.gmra.mxu3 %v16200_v38  ;;  %6335 = vst [vmem:[#allocation2 + $0x1b0] sm:$0xff] %v6271_v63  ;;  %v5185_v63 = vld [vmem:[#allocation2 + $0x98] sm:$0xff] }
 0x65e   : > { %v6064_v3 = vpop.f32.mrf.mxu2 }
 0x65f   : > { %v6177_v7 = vpop.f32.mrf.mxu3  ;;  %v6065_v36 = vadd.f32 %v6064_v3, %v5952_v53  ;;  %v16210_v3 = vld [vmem:[#allocation116_spill] sm:$0xff] }
 0x661   : > { %v5841_v15 = vpop.f32.mrf.mxu0  ;;  %v6178_v44 = vadd.f32 %v6177_v7, %v6065_v36  ;;  %v16211_v36 = vld [vmem:[#allocation64_spill] sm:$0xff] }
 0x662   : > { %v5954_v30 = vpop.f32.mrf.mxu1 }
 0x663   : > { %5891 = vmatmul.f32.gmra.mxu0 %v16115_v19  ;;  %v6273_v57 = vadd.f32 %v6178_v44, %v5177_v6  ;;  %v5955_v41 = vadd.f32 %v5954_v30, %v5841_v15  ;;  %v16212_v6 = vld [vmem:[#allocation54_spill] sm:$0xff] }
 0x664   : > { %6004 = vmatmul.f32.gmra.mxu1 %v16116_v20  ;;  %v16202_v20 = vld [vmem:[#allocation37_spill] sm:$0xff] }
 0x665   : > { %6117 = vmatmul.f32.gmra.mxu2 %v16117_v56  ;;  %6230 = vmatmul.f32.gmra.mxu3 %v16118_v58  ;;  %6337 = vst [vmem:[#allocation2 + $0x18] sm:$0xff] %v6273_v57 }
 0x666   : > { %v6067_v49 = vpop.f32.mrf.mxu2 }
 0x667   : > { %v6180_v29 = vpop.f32.mrf.mxu3  ;;  %v6068_v46 = vadd.f32 %v6067_v49, %v5955_v41  ;;  %v5187_v41 = vld [vmem:[#allocation2 + $0x150] sm:$0xff] }
 0x669   : > { %v5844_v52 = vpop.f32.mrf.mxu0  ;;  %v6181_v42 = vadd.f32 %v6180_v29, %v6068_v46 }
 0x66a   : > { %v5957_v16 = vpop.f32.mrf.mxu1 }
 0x66b   : > { %5894 = vmatmul.f32.gmra.mxu0 %v14461_v50  ;;  %v6275_v19 = vadd.f32 %v6181_v42, %v5179_v21  ;;  %v5958_v56 = vadd.f32 %v5957_v16, %v5844_v52  ;;  %v16213_v21 = vld [vmem:[#allocation39_spill] sm:$0xff]  ;;  %v16214_v52 = vld [vmem:[#allocation146_spill] sm:$0xff]  ;;  %v16215_v16 = vld [vmem:[#allocation57_spill] sm:$0xff] }
 0x66c   : > { %6007 = vmatmul.f32.gmra.mxu1 %v16201_v23 }
 0x66d   : > { %6120 = vmatmul.f32.gmra.mxu2 %v16202_v20  ;;  %6233 = vmatmul.f32.gmra.mxu3 %v16203_v51  ;;  %6339 = vst [vmem:[#allocation2 + $0x168] sm:$0xff] %v6275_v19  ;;  %v5189_v51 = vld [vmem:[#allocation2 + $0x60] sm:$0xff] }
 0x66e   : > { %v6070_v58 = vpop.f32.mrf.mxu2 }
 0x66f   : > { %v6183_v45 = vpop.f32.mrf.mxu3  ;;  %v6071_v59 = vadd.f32 %v6070_v58, %v5958_v56 }
 0x671   : > { %v5847_v13 = vpop.f32.mrf.mxu0  ;;  %v6184_v5 = vadd.f32 %v6183_v45, %v6071_v59  ;;  %v16216_v59 = vld [vmem:[#allocation44_spill] sm:$0xff] }
 0x672   : > { %v5960_v25 = vpop.f32.mrf.mxu1 }
 0x673   : > { %5897 = vmatmul.f32.gmra.mxu0 %v16123_v34  ;;  %v6277_v50 = vadd.f32 %v6184_v5, %v5181_v47  ;;  %v5961_v26 = vadd.f32 %v5960_v25, %v5847_v13  ;;  %v16217_v47 = vld [vmem:[#allocation58_spill] sm:$0xff] }
 0x674   : > { %6010 = vmatmul.f32.gmra.mxu1 %v16204_v2 }
 0x675   : > { %6123 = vmatmul.f32.gmra.mxu2 %v16125_v1  ;;  %6236 = vmatmul.f32.gmra.mxu3 %v16205_v37  ;;  %6341 = vst [vmem:[#allocation2 + $0x48] sm:$0xff] %v6277_v50  ;;  %v5191_v50 = vld [vmem:[#allocation2 + $0x188] sm:$0xff] }
 0x676   : > { %v6073_v33 = vpop.f32.mrf.mxu2 }
 0x677   : > { %v6186_v39 = vpop.f32.mrf.mxu3  ;;  %v6074_v31 = vadd.f32 %v6073_v33, %v5961_v26 }
 0x679   : > { %v5850_v27 = vpop.f32.mrf.mxu0  ;;  %v6187_v40 = vadd.f32 %v6186_v39, %v6074_v31  ;;  %v16218_v39 = vld [vmem:[#allocation49_spill] sm:$0xff]  ;;  %v16219_v31 = vld [vmem:[#allocation148_spill] sm:$0xff] }
 0x67a   : > { %v5963_v61 = vpop.f32.mrf.mxu1 }
 0x67b   : > { %5900 = vmatmul.f32.gmra.mxu0 %v16206_v22  ;;  %v6279_v34 = vadd.f32 %v6187_v40, %v5183_v24  ;;  %v5964_v1 = vadd.f32 %v5963_v61, %v5850_v27  ;;  %v5193_v40 = vld [vmem:[#allocation2 + $0x140] sm:$0xff] }
 0x67c   : > { %6013 = vmatmul.f32.gmra.mxu1 %v16207_v62 }
 0x67d   : > { %6126 = vmatmul.f32.gmra.mxu2 %v16208_v35  ;;  %6239 = vmatmul.f32.gmra.mxu3 %v16209_v28  ;;  %6343 = vst [vmem:[#allocation2 + $0x110] sm:$0xff] %v6279_v34  ;;  %v16220_v35 = vld [vmem:[#allocation118_spill] sm:$0xff]  ;;  %v16221_v28 = vld [vmem:[#allocation72_spill] sm:$0xff] }
 0x67e   : > { %v6076_v12 = vpop.f32.mrf.mxu2 }
 0x67f   : > { %v6189_v43 = vpop.f32.mrf.mxu3  ;;  %v6077_v11 = vadd.f32 %v6076_v12, %v5964_v1  ;;  %v16222_v1 = vld [vmem:[#allocation59_spill] sm:$0xff] }
 0x681   : > { %v5853_v60 = vpop.f32.mrf.mxu0  ;;  %v6190_v53 = vadd.f32 %v6189_v43, %v6077_v11 }
 0x682   : > { %v5966_v38 = vpop.f32.mrf.mxu1 }
 0x683   : > { %5903 = vmatmul.f32.gmra.mxu0 %v16128_v0  ;;  %v6281_v7 = vadd.f32 %v6190_v53, %v5185_v63  ;;  %v5967_v15 = vadd.f32 %v5966_v38, %v5853_v60  ;;  %v5195_v63 = vld [vmem:[#allocation2 + $0x1a8] sm:$0xff] }
 0x684   : > { %6016 = vmatmul.f32.gmra.mxu1 %v16210_v3  ;;  %v16223_v3 = vld [vmem:[#allocation119_spill] sm:$0xff] }
 0x685   : > { %6129 = vmatmul.f32.gmra.mxu2 %v16211_v36  ;;  %6242 = vmatmul.f32.gmra.mxu3 %v16212_v6  ;;  %6345 = vst [vmem:[#allocation2 + $0x98] sm:$0xff] %v6281_v7  ;;  %v16224_v7 = vld [vmem:[#allocation60_spill] sm:$0xff]  ;;  %v16225_v36 = vld [vmem:[#allocation61_spill] sm:$0xff] }
 0x686   : > { %v6079_v30 = vpop.f32.mrf.mxu2 }
 0x687   : > { %v6192_v44 = vpop.f32.mrf.mxu3  ;;  %v6080_v57 = vadd.f32 %v6079_v30, %v5967_v15 }
 0x689   : > { %v5856_v49 = vpop.f32.mrf.mxu0  ;;  %v6193_v46 = vadd.f32 %v6192_v44, %v6080_v57  ;;  %v5197_v57 = vld [vmem:[#allocation2 + $0x28] sm:$0xff] }
 0x68a   : > { %v5969_v29 = vpop.f32.mrf.mxu1 }
 0x68b   : > { %5906 = vmatmul.f32.gmra.mxu0 %v16132_v8  ;;  %v6283_v0 = vadd.f32 %v6193_v46, %v5187_v41  ;;  %v5970_v42 = vadd.f32 %v5969_v29, %v5856_v49 }
 0x68c   : > { %6019 = vmatmul.f32.gmra.mxu1 %v16213_v21  ;;  %v16227_v21 = vld [vmem:[#allocation126_spill] sm:$0xff] }
 0x68d   : > { %6132 = vmatmul.f32.gmra.mxu2 %v16214_v52  ;;  %6245 = vmatmul.f32.gmra.mxu3 %v16215_v16  ;;  %6347 = vst [vmem:[#allocation2 + $0x150] sm:$0xff] %v6283_v0 }
 0x68e   : > { %v6082_v23 = vpop.f32.mrf.mxu2 }
 0x68f   : > { %v6195_v19 = vpop.f32.mrf.mxu3  ;;  %v6083_v20 = vadd.f32 %v6082_v23, %v5970_v42  ;;  %v5199_v23 = vld [vmem:[#allocation2 + $0xf8] sm:$0xff] }
 0x691   : > { %v5859_v56 = vpop.f32.mrf.mxu0  ;;  %v6196_v45 = vadd.f32 %v6195_v19, %v6083_v20 }
 0x692   : > { %v5972_v58 = vpop.f32.mrf.mxu1 }
 0x693   : > { %5909 = vmatmul.f32.gmra.mxu0 %v16135_v32  ;;  %v6285_v8 = vadd.f32 %v6196_v45, %v5189_v51  ;;  %v5973_v13 = vadd.f32 %v5972_v58, %v5859_v56  ;;  %v16229_v56 = vld [vmem:[#allocation135_spill] sm:$0xff] }
 0x694   : > { %6022 = vmatmul.f32.gmra.mxu1 %v16216_v59 }
 0x695   : > { %6135 = vmatmul.f32.gmra.mxu2 %v14116_v17  ;;  %6248 = vmatmul.f32.gmra.mxu3 %v16217_v47  ;;  %6349 = vst [vmem:[#allocation2 + $0x60] sm:$0xff] %v6285_v8  ;;  %v5201_v47 = vld [vmem:[#allocation2 + $0x30] sm:$0xff] }
 0x696   : > { %v6085_v25 = vpop.f32.mrf.mxu2 }
 0x697   : > { %v6198_v5 = vpop.f32.mrf.mxu3  ;;  %v6086_v2 = vadd.f32 %v6085_v25, %v5973_v13 }
 0x699   : > { %v5862_v37 = vpop.f32.mrf.mxu0  ;;  %v6199_v33 = vadd.f32 %v6198_v5, %v6086_v2  ;;  %v16230_v2 = vld [vmem:[#allocation51_spill] sm:$0xff] }
 0x69a   : > { %v5975_v26 = vpop.f32.mrf.mxu1 }
 0x69b   : > { %5912 = vmatmul.f32.gmra.mxu0 %v16138_v9  ;;  %v6287_v32 = vadd.f32 %v6199_v33, %v5191_v50  ;;  %v5976_v17 = vadd.f32 %v5975_v26, %v5862_v37  ;;  %v16231_v50 = vld [vmem:[#allocation52_spill] sm:$0xff]  ;;  %v16233_v37 = vld [vmem:[#allocation151_spill] sm:$0xff] }
 0x69c   : > { %6025 = vmatmul.f32.gmra.mxu1 %v16218_v39 }
 0x69d   : > { %6138 = vmatmul.f32.gmra.mxu2 %v14181_v55  ;;  %6251 = vmatmul.f32.gmra.mxu3 %v16219_v31  ;;  %6351 = vst [vmem:[#allocation2 + $0x188] sm:$0xff] %v6287_v32  ;;  %v5203_v31 = vld [vmem:[#allocation2] sm:$0xff] }
 0x69e   : > { %v6088_v24 = vpop.f32.mrf.mxu2 }
 0x69f   : > { %v6201_v27 = vpop.f32.mrf.mxu3  ;;  %v6089_v61 = vadd.f32 %v6088_v24, %v5976_v17 }
 0x6a1   : > { %v5865_v22 = vpop.f32.mrf.mxu0  ;;  %v6202_v34 = vadd.f32 %v6201_v27, %v6089_v61 }
 0x6a2   : > { %v5978_v62 = vpop.f32.mrf.mxu1 }
 0x6a3   : > { %5915 = vmatmul.f32.gmra.mxu0 %v16140_v10  ;;  %v6289_v9 = vadd.f32 %v6202_v34, %v5193_v40  ;;  %v5979_v55 = vadd.f32 %v5978_v62, %v5865_v22 }
 0x6a4   : > { %6028 = vmatmul.f32.gmra.mxu1 %v16220_v35  ;;  %v5205_v35 = vld [vmem:[#allocation2 + $0x8] sm:$0xff] }
 0x6a5   : > { %6141 = vmatmul.f32.gmra.mxu2 %v16221_v28  ;;  %6254 = vmatmul.f32.gmra.mxu3 %v16222_v1  ;;  %6353 = vst [vmem:[#allocation2 + $0x140] sm:$0xff] %v6289_v9 }
 0x6a6   : > { %v6091_v12 = vpop.f32.mrf.mxu2 }
 0x6a7   : > { %v6204_v43 = vpop.f32.mrf.mxu3  ;;  %v6092_v11 = vadd.f32 %v6091_v12, %v5979_v55 }
 0x6a9   : > { %v5868_v60 = vpop.f32.mrf.mxu0  ;;  %v6205_v53 = vadd.f32 %v6204_v43, %v6092_v11 }
 0x6aa   : > { %v5981_v38 = vpop.f32.mrf.mxu1 }
 0x6ab   : > { %5918 = vmatmul.f32.gmra.mxu0 %v16223_v3  ;;  %v6291_v10 = vadd.f32 %v6205_v53, %v5195_v63  ;;  %v5982_v6 = vadd.f32 %v5981_v38, %v5868_v60  ;;  %v5207_v60 = vld [vmem:[#allocation2 + $0x1d0] sm:$0xff] }
 0x6ac   : > { %6031 = vmatmul.f32.gmra.mxu1 %v16143_v4  ;;  %v16226_v4 = vld [vmem:[#allocation131_spill] sm:$0xff] }
 0x6ad   : > { %6144 = vmatmul.f32.gmra.mxu2 %v16224_v7  ;;  %6257 = vmatmul.f32.gmra.mxu3 %v16225_v36  ;;  %6355 = vst [vmem:[#allocation2 + $0x1a8] sm:$0xff] %v6291_v10 }
 0x6ae   : > { %v6094_v15 = vpop.f32.mrf.mxu2 }
 0x6af   : > { %v6207_v30 = vpop.f32.mrf.mxu3  ;;  %v6095_v44 = vadd.f32 %v6094_v15, %v5982_v6 }
 0x6b1   : > { %v5871_v41 = vpop.f32.mrf.mxu0  ;;  %v6208_v29 = vadd.f32 %v6207_v30, %v6095_v44  ;;  %v5209_v30 = vld [vmem:[#allocation2 + $0xc8] sm:$0xff] }
 0x6b2   : > { %v5984_v49 = vpop.f32.mrf.mxu1 }
 0x6b3   : > { %5921 = vmatmul.f32.gmra.mxu0 %v16144_v48  ;;  %v6293_v46 = vadd.f32 %v6208_v29, %v5197_v57  ;;  %v5985_v0 = vadd.f32 %v5984_v49, %v5871_v41 }
 0x6b4   : > { %6034 = vmatmul.f32.gmra.mxu1 %v16145_v18  ;;  %v16228_v18 = vld [vmem:[#allocation67_spill] sm:$0xff] }
 0x6b5   : > { %6147 = vmatmul.f32.gmra.mxu2 %v16226_v4  ;;  %6260 = vmatmul.f32.gmra.mxu3 %v16227_v21  ;;  %6357 = vst [vmem:[#allocation2 + $0x28] sm:$0xff] %v6293_v46 }
 0x6b6   : > { %v6097_v52 = vpop.f32.mrf.mxu2 }
 0x6b7   : > { %v6210_v16 = vpop.f32.mrf.mxu3  ;;  %v6098_v42 = vadd.f32 %v6097_v52, %v5985_v0  ;;  %v5211_v0 = vld [vmem:[#allocation2 + $0x1f8] sm:$0xff] }
 0x6b9   : > { %v5874_v19 = vpop.f32.mrf.mxu0  ;;  %v6211_v51 = vadd.f32 %v6210_v16, %v6098_v42 }
 0x6ba   : > { %v5987_v20 = vpop.f32.mrf.mxu1 }
 0x6bb   : > { %5924 = vmatmul.f32.gmra.mxu0 %v16146_v14  ;;  %v6295_v48 = vadd.f32 %v6211_v51, %v5199_v23  ;;  %v5988_v58 = vadd.f32 %v5987_v20, %v5874_v19 }
 0x6bc   : > { %6037 = vmatmul.f32.gmra.mxu1 %v16147_v54  ;;  %v16232_v54 = vld [vmem:[#allocation152_spill] sm:$0xff] }
 0x6bd   : > { %6150 = vmatmul.f32.gmra.mxu2 %v16228_v18  ;;  %6263 = vmatmul.f32.gmra.mxu3 %v16229_v56  ;;  %6359 = vst [vmem:[#allocation2 + $0xf8] sm:$0xff] %v6295_v48  ;;  %v5213_v18 = vld [vmem:[#allocation2 + $0x128] sm:$0xff] }
 0x6be   : > { %v6100_v45 = vpop.f32.mrf.mxu2 }
 0x6bf   : > { %v6213_v59 = vpop.f32.mrf.mxu3  ;;  %v6101_v8 = vadd.f32 %v6100_v45, %v5988_v58 }
 0x6c1   : > { %v5877_v13 = vpop.f32.mrf.mxu0  ;;  %v6214_v5 = vadd.f32 %v6213_v59, %v6101_v8 }
 0x6c2   : > { %v5990_v25 = vpop.f32.mrf.mxu1 }
 0x6c3   : > { %5927 = vmatmul.f32.gmra.mxu0 %v16230_v2  ;;  %v6297_v14 = vadd.f32 %v6214_v5, %v5201_v47  ;;  %v5991_v26 = vadd.f32 %v5990_v25, %v5877_v13  ;;  %v5215_v5 = vld [vmem:[#allocation2 + $0x1f0] sm:$0xff] }
 0x6c4   : > { %6040 = vmatmul.f32.gmra.mxu1 %v16231_v50 }
 0x6c5   : > { %6153 = vmatmul.f32.gmra.mxu2 %v16232_v54  ;;  %6266 = vmatmul.f32.gmra.mxu3 %v16233_v37  ;;  %6361 = vst [vmem:[#allocation2 + $0x30] sm:$0xff] %v6297_v14 }
 0x6c6   : > { %v6103_v33 = vpop.f32.mrf.mxu2 }
 0x6c7   : > { %v6216_v39 = vpop.f32.mrf.mxu3  ;;  %v6104_v32 = vadd.f32 %v6103_v33, %v5991_v26 }
 0x6c9   : > { %v5880_v17 = vpop.f32.mrf.mxu0  ;;  %v6217_v27 = vadd.f32 %v6216_v39, %v6104_v32  ;;  %v5217_v32 = vld [vmem:[#allocation2 + $0x78] sm:$0xff] }
 0x6ca   : > { %v5993_v24 = vpop.f32.mrf.mxu1 }
 0x6cb   : > { %v6299_v61 = vadd.f32 %v6217_v27, %v5203_v31  ;;  %v5994_v40 = vadd.f32 %v5993_v24, %v5880_v17 }
 0x6cd   : > { %6363 = vst [vmem:[#allocation2] sm:$0xff] %v6299_v61 }
 0x6ce   : > { %v6106_v22 = vpop.f32.mrf.mxu2 }
 0x6cf   : > { %v6219_v62 = vpop.f32.mrf.mxu3  ;;  %v6107_v34 = vadd.f32 %v6106_v22, %v5994_v40 }
 0x6d1   : > { %v5883_v9 = vpop.f32.mrf.mxu0  ;;  %v6220_v1 = vadd.f32 %v6219_v62, %v6107_v34  ;;  %v5219_v34 = vld [vmem:[#allocation2 + $0x90] sm:$0xff] }
 0x6d2   : > { %v5996_v28 = vpop.f32.mrf.mxu1 }
 0x6d3   : > { %v6301_v55 = vadd.f32 %v6220_v1, %v5205_v35  ;;  %v5997_v12 = vadd.f32 %v5996_v28, %v5883_v9 }
 0x6d5   : > { %6365 = vst [vmem:[#allocation2 + $0x8] sm:$0xff] %v6301_v55 }
 0x6d6   : > { %v6109_v43 = vpop.f32.mrf.mxu2 }
 0x6d7   : > { %v6222_v11 = vpop.f32.mrf.mxu3  ;;  %v6110_v63 = vadd.f32 %v6109_v43, %v5997_v12 }
 0x6d9   : > { %v5886_v38 = vpop.f32.mrf.mxu0  ;;  %v6223_v3 = vadd.f32 %v6222_v11, %v6110_v63  ;;  %v5221_v63 = vld [vmem:[#allocation2 + $0xd0] sm:$0xff] }
 0x6da   : > { %v5999_v53 = vpop.f32.mrf.mxu1 }
 0x6db   : > { %v6303_v10 = vadd.f32 %v6223_v3, %v5207_v60  ;;  %v6000_v7 = vadd.f32 %v5999_v53, %v5886_v38 }
 0x6dd   : > { %6367 = vst [vmem:[#allocation2 + $0x1d0] sm:$0xff] %v6303_v10 }
 0x6de   : > { %v6112_v36 = vpop.f32.mrf.mxu2 }
 0x6df   : > { %v6225_v6 = vpop.f32.mrf.mxu3  ;;  %v6113_v15 = vadd.f32 %v6112_v36, %v6000_v7 }
 0x6e1   : > { %v5889_v44 = vpop.f32.mrf.mxu0  ;;  %v6226_v41 = vadd.f32 %v6225_v6, %v6113_v15  ;;  %v5223_v15 = vld [vmem:[#allocation2 + $0x88] sm:$0xff] }
 0x6e2   : > { %v6002_v57 = vpop.f32.mrf.mxu1 }
 0x6e3   : > { %v6305_v49 = vadd.f32 %v6226_v41, %v5209_v30  ;;  %v6003_v29 = vadd.f32 %v6002_v57, %v5889_v44 }
 0x6e5   : > { %6369 = vst [vmem:[#allocation2 + $0xc8] sm:$0xff] %v6305_v49 }
 0x6e6   : > { %v6115_v46 = vpop.f32.mrf.mxu2 }
 0x6e7   : > { %v6228_v4 = vpop.f32.mrf.mxu3  ;;  %v6116_v21 = vadd.f32 %v6115_v46, %v6003_v29 }
 0x6e9   : > { %v5892_v52 = vpop.f32.mrf.mxu0  ;;  %v6229_v42 = vadd.f32 %v6228_v4, %v6116_v21  ;;  %v5225_v21 = vld [vmem:[#allocation2 + $0x1c8] sm:$0xff] }
 0x6ea   : > { %v6005_v16 = vpop.f32.mrf.mxu1 }
 0x6eb   : > { %v6307_v23 = vadd.f32 %v6229_v42, %v5211_v0  ;;  %v6006_v19 = vadd.f32 %v6005_v16, %v5892_v52 }
 0x6ed   : > { %6371 = vst [vmem:[#allocation2 + $0x1f8] sm:$0xff] %v6307_v23 }
 0x6ee   : > { %v6118_v20 = vpop.f32.mrf.mxu2 }
 0x6ef   : > { %v6231_v51 = vpop.f32.mrf.mxu3  ;;  %v6119_v48 = vadd.f32 %v6118_v20, %v6006_v19 }
 0x6f1   : > { %v5895_v56 = vpop.f32.mrf.mxu0  ;;  %v6232_v45 = vadd.f32 %v6231_v51, %v6119_v48  ;;  %v5227_v48 = vld [vmem:[#allocation2 + $0x178] sm:$0xff] }
 0x6f2   : > { %v6008_v58 = vpop.f32.mrf.mxu1 }
 0x6f3   : > { %v6309_v59 = vadd.f32 %v6232_v45, %v5213_v18  ;;  %v6009_v8 = vadd.f32 %v6008_v58, %v5895_v56 }
 0x6f5   : > { %6373 = vst [vmem:[#allocation2 + $0x128] sm:$0xff] %v6309_v59 }
 0x6f6   : > { %v6121_v47 = vpop.f32.mrf.mxu2 }
 0x6f7   : > { %v6234_v13 = vpop.f32.mrf.mxu3  ;;  %v6122_v25 = vadd.f32 %v6121_v47, %v6009_v8 }
 0x6f9   : > { %v5898_v2 = vpop.f32.mrf.mxu0  ;;  %v6235_v14 = vadd.f32 %v6234_v13, %v6122_v25  ;;  %v5229_v25 = vld [vmem:[#allocation2 + $0x190] sm:$0xff] }
 0x6fa   : > { %v6011_v50 = vpop.f32.mrf.mxu1 }
 0x6fb   : > { %v6311_v54 = vadd.f32 %v6235_v14, %v5215_v5  ;;  %v6012_v37 = vadd.f32 %v6011_v50, %v5898_v2 }
 0x6fd   : > { %6375 = vst [vmem:[#allocation2 + $0x1f0] sm:$0xff] %v6311_v54 }
 0x6fe   : > { %v6124_v26 = vpop.f32.mrf.mxu2 }
 0x6ff   : > { %v6237_v33 = vpop.f32.mrf.mxu3  ;;  %v6125_v39 = vadd.f32 %v6124_v26, %v6012_v37 }
 0x701   : > { %v5901_v31 = vpop.f32.mrf.mxu0  ;;  %v6238_v24 = vadd.f32 %v6237_v33, %v6125_v39  ;;  %v5231_v39 = vld [vmem:[#allocation2 + $0x38] sm:$0xff] }
 0x702   : > { %v6014_v17 = vpop.f32.mrf.mxu1 }
 0x703   : > { %v6313_v27 = vadd.f32 %v6238_v24, %v5217_v32  ;;  %v6015_v61 = vadd.f32 %v6014_v17, %v5901_v31 }
 0x705   : > { %6377 = vst [vmem:[#allocation2 + $0x78] sm:$0xff] %v6313_v27 }
 0x706   : > { %v6127_v40 = vpop.f32.mrf.mxu2 }
 0x707   : > { %v6240_v22 = vpop.f32.mrf.mxu3  ;;  %v6128_v62 = vadd.f32 %v6127_v40, %v6015_v61 }
 0x709   : > { %v5904_v35 = vpop.f32.mrf.mxu0  ;;  %v6241_v28 = vadd.f32 %v6240_v22, %v6128_v62  ;;  %v5233_v62 = vld [vmem:[#allocation2 + $0x1c0] sm:$0xff] }
 0x70a   : > { %v6017_v9 = vpop.f32.mrf.mxu1 }
 0x70b   : > { %v6315_v1 = vadd.f32 %v6241_v28, %v5219_v34  ;;  %v6018_v55 = vadd.f32 %v6017_v9, %v5904_v35 }
 0x70d   : > { %6379 = vst [vmem:[#allocation2 + $0x90] sm:$0xff] %v6315_v1 }
 0x70e   : > { %v6130_v12 = vpop.f32.mrf.mxu2 }
 0x70f   : > { %v6243_v43 = vpop.f32.mrf.mxu3  ;;  %v6131_v11 = vadd.f32 %v6130_v12, %v6018_v55 }
 0x711   : > { %v5907_v60 = vpop.f32.mrf.mxu0  ;;  %v6244_v53 = vadd.f32 %v6243_v43, %v6131_v11  ;;  %v5235_v11 = vld [vmem:[#allocation2 + $0x10] sm:$0xff] }
 0x712   : > { %v6020_v38 = vpop.f32.mrf.mxu1 }
 0x713   : > { %v6317_v3 = vadd.f32 %v6244_v53, %v5221_v63  ;;  %v6021_v10 = vadd.f32 %v6020_v38, %v5907_v60 }
 0x715   : > { %6381 = vst [vmem:[#allocation2 + $0xd0] sm:$0xff] %v6317_v3 }
 0x716   : > { %v6133_v7 = vpop.f32.mrf.mxu2 }
 0x717   : > { %v6246_v36 = vpop.f32.mrf.mxu3  ;;  %v6134_v6 = vadd.f32 %v6133_v7, %v6021_v10 }
 0x719   : > { %v5910_v30 = vpop.f32.mrf.mxu0  ;;  %v6247_v57 = vadd.f32 %v6246_v36, %v6134_v6  ;;  %v5237_v36 = vld [vmem:[#allocation2 + $0xa0] sm:$0xff] }
 0x71a   : > { %v6023_v44 = vpop.f32.mrf.mxu1 }
 0x71b   : > { %v6319_v41 = vadd.f32 %v6247_v57, %v5223_v15  ;;  %v6024_v49 = vadd.f32 %v6023_v44, %v5910_v30 }
 0x71d   : > { %6383 = vst [vmem:[#allocation2 + $0x88] sm:$0xff] %v6319_v41 }
 0x71e   : > { %v6136_v29 = vpop.f32.mrf.mxu2 }
 0x71f   : > { %v6249_v46 = vpop.f32.mrf.mxu3  ;;  %v6137_v4 = vadd.f32 %v6136_v29, %v6024_v49 }
 0x721   : > { %v5913_v0 = vpop.f32.mrf.mxu0  ;;  %v6250_v16 = vadd.f32 %v6249_v46, %v6137_v4 }
 0x722   : > { %v6026_v52 = vpop.f32.mrf.mxu1 }
 0x723   : > { %v6321_v42 = vadd.f32 %v6250_v16, %v5225_v21  ;;  %v6027_v23 = vadd.f32 %v6026_v52, %v5913_v0 }
 0x725   : > { %6385 = vst [vmem:[#allocation2 + $0x1c8] sm:$0xff] %v6321_v42 }
 0x726   : > { %v6139_v19 = vpop.f32.mrf.mxu2 }
 0x727   : > { %v6252_v20 = vpop.f32.mrf.mxu3  ;;  %v6140_v51 = vadd.f32 %v6139_v19, %v6027_v23 }
 0x729   : > { %v5916_v18 = vpop.f32.mrf.mxu0  ;;  %v6253_v58 = vadd.f32 %v6252_v20, %v6140_v51 }
 0x72a   : > { %v6029_v56 = vpop.f32.mrf.mxu1 }
 0x72b   : > { %v6323_v45 = vadd.f32 %v6253_v58, %v5227_v48  ;;  %v6030_v59 = vadd.f32 %v6029_v56, %v5916_v18 }
 0x72d   : > { %6387 = vst [vmem:[#allocation2 + $0x178] sm:$0xff] %v6323_v45 }
 0x72e   : > { %v6142_v8 = vpop.f32.mrf.mxu2 }
 0x72f   : > { %v6255_v47 = vpop.f32.mrf.mxu3  ;;  %v6143_v13 = vadd.f32 %v6142_v8, %v6030_v59 }
 0x731   : > { %v5919_v5 = vpop.f32.mrf.mxu0  ;;  %v6256_v50 = vadd.f32 %v6255_v47, %v6143_v13 }
 0x732   : > { %v6032_v2 = vpop.f32.mrf.mxu1 }
 0x733   : > { %v6325_v14 = vadd.f32 %v6256_v50, %v5229_v25  ;;  %v6033_v54 = vadd.f32 %v6032_v2, %v5919_v5 }
 0x735   : > { %6389 = vst [vmem:[#allocation2 + $0x190] sm:$0xff] %v6325_v14 }
 0x736   : > { %v6145_v37 = vpop.f32.mrf.mxu2 }
 0x737   : > { %v6258_v26 = vpop.f32.mrf.mxu3  ;;  %v6146_v33 = vadd.f32 %v6145_v37, %v6033_v54 }
 0x739   : > { %v5922_v32 = vpop.f32.mrf.mxu0  ;;  %v6259_v17 = vadd.f32 %v6258_v26, %v6146_v33 }
 0x73a   : > { %v6035_v31 = vpop.f32.mrf.mxu1 }
 0x73b   : > { %v6327_v24 = vadd.f32 %v6259_v17, %v5231_v39  ;;  %v6036_v27 = vadd.f32 %v6035_v31, %v5922_v32 }
 0x73d   : > { %6391 = vst [vmem:[#allocation2 + $0x38] sm:$0xff] %v6327_v24 }
 0x73e   : > { %v6148_v61 = vpop.f32.mrf.mxu2 }
 0x73f   : > { %v6261_v40 = vpop.f32.mrf.mxu3  ;;  %v6149_v22 = vadd.f32 %v6148_v61, %v6036_v27 }
 0x741   : > { %v5925_v34 = vpop.f32.mrf.mxu0  ;;  %v6262_v9 = vadd.f32 %v6261_v40, %v6149_v22 }
 0x742   : > { %v6038_v35 = vpop.f32.mrf.mxu1 }
 0x743   : > { %v6329_v28 = vadd.f32 %v6262_v9, %v5233_v62  ;;  %v6039_v1 = vadd.f32 %v6038_v35, %v5925_v34 }
 0x745   : > { %6393 = vst [vmem:[#allocation2 + $0x1c0] sm:$0xff] %v6329_v28 }
 0x746   : > { %v6151_v55 = vpop.f32.mrf.mxu2 }
 0x747   : > { %v6264_v12 = vpop.f32.mrf.mxu3  ;;  %v6152_v43 = vadd.f32 %v6151_v55, %v6039_v1 }
 0x749   : > { %v6265_v63 = vadd.f32 %v6264_v12, %v6152_v43  ;;  %v5928_v60 = vpop.f32.mrf.mxu0 }
 0x74a   : > { %v6041_v38 = vpop.f32.mrf.mxu1 }
 0x74b   : > { %v6331_v53 = vadd.f32 %v6265_v63, %v5235_v11  ;;  %v6042_v3 = vadd.f32 %v6041_v38, %v5928_v60 }
 0x74d   : > { %6395 = vst [vmem:[#allocation2 + $0x10] sm:$0xff] %v6331_v53 }
 0x74e   : > { %v6154_v10 = vpop.f32.mrf.mxu2 }
 0x74f   : > { %v6155_v7 = vadd.f32 %v6154_v10, %v6042_v3  ;;  %v6267_v6 = vpop.f32.mrf.mxu3 }
 0x751   : > { %v6268_v15 = vadd.f32 %v6267_v6, %v6155_v7  ;;  %6401 = sbr.rel (%p6823_p7) target bundleno = 1943 (0x797), region = 52 }
 0x753   : > { %v6333_v30 = vadd.f32 %v6268_v15, %v5237_v36 }
 0x755   : > { %6397 = vst [vmem:[#allocation2 + $0xa0] sm:$0xff] %v6333_v30 }
 0x756   : > { %v6402_v44 = vld [vmem:[#allocation2 + $0xb0] sm:$0xff]  ;;  %v6404_v41 = vld [vmem:[#allocation2 + $0xd8] sm:$0xff]  ;;  %v6407_v46 = vld [vmem:[#allocation2 + $0x168] sm:$0xff] }
 0x757   : > { %v6403_v57 = vld [vmem:[#allocation2 + $0x1b0] sm:$0xff]  ;;  %6466 = vst [vmem:[%s8046_s12] sm:$0xff] %v6402_v44  ;;  %v6405_v49 = vld [vmem:[#allocation2 + $0x18] sm:$0xff]  ;;  %v6409_v21 = vld [vmem:[#allocation2 + $0x48] sm:$0xff] }
 0x758   : > { %6467 = vst [vmem:[%s8046_s12 + $0x8] sm:$0xff] %v6403_v57  ;;  %v6406_v29 = vld [vmem:[#allocation2 + $0x50] sm:$0xff]  ;;  %v6410_v0 = vld [vmem:[#allocation2 + $0x180] sm:$0xff]  ;;  %v6412_v16 = vld [vmem:[#allocation2 + $0x118] sm:$0xff] }
 0x759   : > { %6468 = vst [vmem:[%s8046_s12 + $0x10] sm:$0xff] %v6404_v41  ;;  %v6408_v4 = vld [vmem:[#allocation2 + $0x130] sm:$0xff]  ;;  %v6413_v42 = vld [vmem:[#allocation2 + $0x98] sm:$0xff]  ;;  %v6414_v23 = vld [vmem:[#allocation2 + $0x120] sm:$0xff] }
 0x75a   : > { %6469 = vst [vmem:[%s8046_s12 + $0x18] sm:$0xff] %v6405_v49  ;;  %v6411_v52 = vld [vmem:[#allocation2 + $0x110] sm:$0xff]  ;;  %v6416_v20 = vld [vmem:[#allocation2 + $0x108] sm:$0xff]  ;;  %v6417_v51 = vld [vmem:[#allocation2 + $0x60] sm:$0xff] }
 0x75b   : > { %6470 = vst [vmem:[%s8046_s12 + $0x20] sm:$0xff] %v6406_v29  ;;  %v6415_v19 = vld [vmem:[#allocation2 + $0x150] sm:$0xff]  ;;  %v6418_v48 = vld [vmem:[#allocation2 + $0xe0] sm:$0xff]  ;;  %v6419_v18 = vld [vmem:[#allocation2 + $0x188] sm:$0xff] }
 0x75c   : > { %6471 = vst [vmem:[%s8046_s12 + $0x28] sm:$0xff] %v6407_v46  ;;  %v6420_v56 = vld [vmem:[#allocation2 + $0x138] sm:$0xff]  ;;  %v6421_v58 = vld [vmem:[#allocation2 + $0x140] sm:$0xff]  ;;  %v6423_v59 = vld [vmem:[#allocation2 + $0x1a8] sm:$0xff] }
 0x75d   : > { %6472 = vst [vmem:[%s8046_s12 + $0x30] sm:$0xff] %v6408_v4  ;;  %v6422_v45 = vld [vmem:[#allocation2 + $0x80] sm:$0xff]  ;;  %v6424_v8 = vld [vmem:[#allocation2 + $0x1b8] sm:$0xff]  ;;  %v6425_v47 = vld [vmem:[#allocation2 + $0x28] sm:$0xff] }
 0x75e   : > { %6473 = vst [vmem:[%s8046_s12 + $0x38] sm:$0xff] %v6409_v21  ;;  %v6426_v13 = vld [vmem:[#allocation2 + $0x1e8] sm:$0xff]  ;;  %v6427_v25 = vld [vmem:[#allocation2 + $0xf8] sm:$0xff]  ;;  %v6428_v5 = vld [vmem:[#allocation2 + $0x160] sm:$0xff] }
 0x75f   : > { %6474 = vst [vmem:[%s8046_s12 + $0x40] sm:$0xff] %v6410_v0  ;;  %v6429_v2 = vld [vmem:[#allocation2 + $0x30] sm:$0xff]  ;;  %v6430_v50 = vld [vmem:[#allocation2 + $0x1e0] sm:$0xff]  ;;  %v6433_v37 = vld [vmem:[#allocation2 + $0x8] sm:$0xff] }
 0x760   : > { %6475 = vst [vmem:[%s8046_s12 + $0x48] sm:$0xff] %v6411_v52  ;;  %v6431_v14 = vld [vmem:[#allocation2] sm:$0xff]  ;;  %v6432_v54 = vld [vmem:[#allocation2 + $0xf0] sm:$0xff]  ;;  %v6434_v26 = vld [vmem:[#allocation2 + $0x148] sm:$0xff] }
 0x761   : > { %6476 = vst [vmem:[%s8046_s12 + $0x50] sm:$0xff] %v6412_v16  ;;  %v6435_v33 = vld [vmem:[#allocation2 + $0x1d0] sm:$0xff]  ;;  %v6436_v39 = vld [vmem:[#allocation2 + $0x100] sm:$0xff]  ;;  %v6437_v32 = vld [vmem:[#allocation2 + $0xc8] sm:$0xff] }
 0x762   : > { %6477 = vst [vmem:[%s8046_s12 + $0x58] sm:$0xff] %v6413_v42  ;;  %v6438_v31 = vld [vmem:[#allocation2 + $0x40] sm:$0xff]  ;;  %v6439_v17 = vld [vmem:[#allocation2 + $0x1f8] sm:$0xff]  ;;  %v6441_v27 = vld [vmem:[#allocation2 + $0x128] sm:$0xff] }
 0x763   : > { %6478 = vst [vmem:[%s8046_s12 + $0x60] sm:$0xff] %v6414_v23  ;;  %v6440_v24 = vld [vmem:[#allocation2 + $0x20] sm:$0xff]  ;;  %v6443_v40 = vld [vmem:[#allocation2 + $0x1f0] sm:$0xff]  ;;  %v6444_v22 = vld [vmem:[#allocation2 + $0xe8] sm:$0xff] }
 0x764   : > { %6479 = vst [vmem:[%s8046_s12 + $0x68] sm:$0xff] %v6415_v19  ;;  %v6442_v61 = vld [vmem:[#allocation2 + $0x1a0] sm:$0xff]  ;;  %v6445_v62 = vld [vmem:[#allocation2 + $0x78] sm:$0xff]  ;;  %v6446_v34 = vld [vmem:[#allocation2 + $0x70] sm:$0xff] }
 0x765   : > { %6480 = vst [vmem:[%s8046_s12 + $0x70] sm:$0xff] %v6416_v20  ;;  %v6447_v35 = vld [vmem:[#allocation2 + $0x90] sm:$0xff]  ;;  %v6448_v9 = vld [vmem:[#allocation2 + $0x1d8] sm:$0xff]  ;;  %v6451_v55 = vld [vmem:[#allocation2 + $0x88] sm:$0xff] }
 0x766   : > { %6481 = vst [vmem:[%s8046_s12 + $0x78] sm:$0xff] %v6417_v51  ;;  %v6449_v28 = vld [vmem:[#allocation2 + $0xd0] sm:$0xff]  ;;  %v6450_v1 = vld [vmem:[#allocation2 + $0xb8] sm:$0xff]  ;;  %v6452_v12 = vld [vmem:[#allocation2 + $0xa8] sm:$0xff] }
 0x767   : > { %6482 = vst [vmem:[%s8046_s12 + $0x80] sm:$0xff] %v6418_v48  ;;  %v6453_v43 = vld [vmem:[#allocation2 + $0x1c8] sm:$0xff]  ;;  %v6454_v11 = vld [vmem:[#allocation2 + $0x170] sm:$0xff]  ;;  %v6455_v63 = vld [vmem:[#allocation2 + $0x178] sm:$0xff] }
 0x768   : > { %6483 = vst [vmem:[%s8046_s12 + $0x88] sm:$0xff] %v6419_v18  ;;  %v6456_v60 = vld [vmem:[#allocation2 + $0x68] sm:$0xff]  ;;  %v6457_v38 = vld [vmem:[#allocation2 + $0x190] sm:$0xff]  ;;  %v6458_v53 = vld [vmem:[#allocation2 + $0x198] sm:$0xff] }
 0x769   : > { %6484 = vst [vmem:[%s8046_s12 + $0x90] sm:$0xff] %v6420_v56  ;;  %v6459_v3 = vld [vmem:[#allocation2 + $0x38] sm:$0xff]  ;;  %v6460_v10 = vld [vmem:[#allocation2 + $0xc0] sm:$0xff]  ;;  %v6463_v6 = vld [vmem:[#allocation2 + $0x10] sm:$0xff] }
 0x76a   : > { %6485 = vst [vmem:[%s8046_s12 + $0x98] sm:$0xff] %v6421_v58  ;;  %v6461_v7 = vld [vmem:[#allocation2 + $0x1c0] sm:$0xff]  ;;  %v6462_v36 = vld [vmem:[#allocation2 + $0x158] sm:$0xff] }
 0x76b   : > { %6486 = vst [vmem:[%s8046_s12 + $0xa0] sm:$0xff] %v6422_v45  ;;  %v6464_v15 = vld [vmem:[#allocation2 + $0x58] sm:$0xff]  ;;  %v6465_v30 = vld [vmem:[#allocation2 + $0xa0] sm:$0xff] }
 0x76c   : > { %6487 = vst [vmem:[%s8046_s12 + $0xa8] sm:$0xff] %v6423_v59 }
 0x76d   : > { %6488 = vst [vmem:[%s8046_s12 + $0xb0] sm:$0xff] %v6424_v8 }
 0x76e   : > { %6489 = vst [vmem:[%s8046_s12 + $0xb8] sm:$0xff] %v6425_v47 }
 0x76f   : > { %6490 = vst [vmem:[%s8046_s12 + $0xc0] sm:$0xff] %v6426_v13 }
 0x770   : > { %6491 = vst [vmem:[%s8046_s12 + $0xc8] sm:$0xff] %v6427_v25 }
 0x771   : > { %6492 = vst [vmem:[%s8046_s12 + $0xd0] sm:$0xff] %v6428_v5 }
 0x772   : > { %6493 = vst [vmem:[%s8046_s12 + $0xd8] sm:$0xff] %v6429_v2 }
 0x773   : > { %6494 = vst [vmem:[%s8046_s12 + $0xe0] sm:$0xff] %v6430_v50 }
 0x774   : > { %6495 = vst [vmem:[%s8046_s12 + $0xe8] sm:$0xff] %v6431_v14 }
 0x775   : > { %6496 = vst [vmem:[%s8046_s12 + $0xf0] sm:$0xff] %v6432_v54 }
 0x776   : > { %6497 = vst [vmem:[%s8046_s12 + $0xf8] sm:$0xff] %v6433_v37 }
 0x777   : > { %6498 = vst [vmem:[%s8046_s12 + $0x100] sm:$0xff] %v6434_v26 }
 0x778   : > { %6499 = vst [vmem:[%s8046_s12 + $0x108] sm:$0xff] %v6435_v33 }
 0x779   : > { %6500 = vst [vmem:[%s8046_s12 + $0x110] sm:$0xff] %v6436_v39 }
 0x77a   : > { %6501 = vst [vmem:[%s8046_s12 + $0x118] sm:$0xff] %v6437_v32 }
 0x77b   : > { %6502 = vst [vmem:[%s8046_s12 + $0x120] sm:$0xff] %v6438_v31 }
 0x77c   : > { %6503 = vst [vmem:[%s8046_s12 + $0x128] sm:$0xff] %v6439_v17 }
 0x77d   : > { %6504 = vst [vmem:[%s8046_s12 + $0x130] sm:$0xff] %v6440_v24 }
 0x77e   : > { %6505 = vst [vmem:[%s8046_s12 + $0x138] sm:$0xff] %v6441_v27 }
 0x77f   : > { %6506 = vst [vmem:[%s8046_s12 + $0x140] sm:$0xff] %v6442_v61 }
 0x780   : > { %6507 = vst [vmem:[%s8046_s12 + $0x148] sm:$0xff] %v6443_v40 }
 0x781   : > { %6508 = vst [vmem:[%s8046_s12 + $0x150] sm:$0xff] %v6444_v22 }
 0x782   : > { %6509 = vst [vmem:[%s8046_s12 + $0x158] sm:$0xff] %v6445_v62 }
 0x783   : > { %6510 = vst [vmem:[%s8046_s12 + $0x160] sm:$0xff] %v6446_v34 }
 0x784   : > { %6511 = vst [vmem:[%s8046_s12 + $0x168] sm:$0xff] %v6447_v35 }
 0x785   : > { %6512 = vst [vmem:[%s8046_s12 + $0x170] sm:$0xff] %v6448_v9 }
 0x786   : > { %6513 = vst [vmem:[%s8046_s12 + $0x178] sm:$0xff] %v6449_v28 }
 0x787   : > { %6514 = vst [vmem:[%s8046_s12 + $0x180] sm:$0xff] %v6450_v1 }
 0x788   : > { %6515 = vst [vmem:[%s8046_s12 + $0x188] sm:$0xff] %v6451_v55 }
 0x789   : > { %6516 = vst [vmem:[%s8046_s12 + $0x190] sm:$0xff] %v6452_v12 }
 0x78a   : > { %6517 = vst [vmem:[%s8046_s12 + $0x198] sm:$0xff] %v6453_v43 }
 0x78b   : > { %6518 = vst [vmem:[%s8046_s12 + $0x1a0] sm:$0xff] %v6454_v11 }
 0x78c   : > { %6519 = vst [vmem:[%s8046_s12 + $0x1a8] sm:$0xff] %v6455_v63 }
 0x78d   : > { %6520 = vst [vmem:[%s8046_s12 + $0x1b0] sm:$0xff] %v6456_v60 }
 0x78e   : > { %6521 = vst [vmem:[%s8046_s12 + $0x1b8] sm:$0xff] %v6457_v38 }
 0x78f   : > { %6522 = vst [vmem:[%s8046_s12 + $0x1c0] sm:$0xff] %v6458_v53 }
 0x790   : > { %6523 = vst [vmem:[%s8046_s12 + $0x1c8] sm:$0xff] %v6459_v3 }
 0x791   : > { %6524 = vst [vmem:[%s8046_s12 + $0x1d0] sm:$0xff] %v6460_v10 }
 0x792   : > { %6525 = vst [vmem:[%s8046_s12 + $0x1d8] sm:$0xff] %v6461_v7 }
 0x793   : > { %6526 = vst [vmem:[%s8046_s12 + $0x1e0] sm:$0xff] %v6462_v36 }
 0x794   : > { %6527 = vst [vmem:[%s8046_s12 + $0x1e8] sm:$0xff] %v6463_v6 }
 0x795   : > { %6528 = vst [vmem:[%s8046_s12 + $0x1f0] sm:$0xff] %v6464_v15 }
 0x796   : > { %6529 = vst [vmem:[%s8046_s12 + $0x1f8] sm:$0xff] %v6465_v30 }
 0x797 PF: > { %s16234_s18 = sld [smem:[#allocation15_spill]]  ;;  %s6544_s30 = sshll.u32 %s8046_s12, 4  ;;  %s6545_s30 = int_to_ptr.vmem [resolvable:$true] %s6544_s30 }
 0x798   : > { %s16236_s10 = sld [smem:[#allocation154_spill]]  ;;  %s6531_s29 = scalar_lea.sflag [#allocation5], %s8026_s9 }
 0x79d   : > { %s6836_s24 = sshll.u32 %s16234_s18, 9 }
 0x79e   : > { %s6543_s4 = scalar_lea.hbm %s16236_s10, %s6836_s24  ;;  %s7707_s15 = scalar_lea.hbm %s16236_s10, 1024 }
 0x79f   : > { %s6546_s3 = sshll.u32 %s6543_s4, 4  ;;  %s6547_s3 = int_to_ptr.hbm [resolvable:$true] %s6546_s3 }
 0x7a0   : > { %s7701_s23 = sshra.s32 %s6547_s3, 4  ;;  %s7702_s23 = int_to_ptr.hbm [resolvable:$true] %s7701_s23 }
 0x7a1   : > { %s7703_s8 = scalar_lea.hbm %s7702_s23, 512  ;;  %p7708_p4 = scmp.lt.s32.totalorder %s7702_s23, %s16236_s10 }
 0x7a2   : > { %p7704_p10 = scmp.ne.s32.totalorder %s7702_s23, %s7703_s8  ;;  %p7709_p6 = scmp.lt.s32.totalorder %s7707_s15, %s7703_s8 }
 0x7a4   : > { %p7705_p12 = pnand %p7704_p10, %p7991_p0  ;;  %p7710_p8 = por %p7709_p6, %p7708_p4 }
 0x7a6   : > { %p7706_p2 = pneg %p7705_p12 }
 0x7a8   : > { %p7711_p1 = pnand %p7710_p8, %p7706_p2 }
 0x7aa   : > { %7714 = shalt.err (!%p7711_p1)
}
 0x7ab   : > { %s7821_s9 = smov 256   ;;  %s7822_s25 = smov 16  }
 0x7ac   : > { %6843 = dma.vmem_to_hbm [thread:$0]  (%p7991_p0), %s6545_s30, 8192, %s6547_s3, %s6531_s29, %s7821_s9, %s7821_s9, %s7822_s25  }
 0x7ad PF: > { %s16237_s27 = sld [smem:[#allocation13_spill]]  ;;  %p6860_p9 = scmp.ge.s32.totalorder %s7813_s22, 2 }
 0x7af   : > { %p6856_p13 = pnand %p6860_p9, %p8003_p3 }
 0x7b1   : > { %p6857_p11 = pneg %p6856_p13 }
 0x7b3   : > { %s6561_s5 = sand.u32 1, %s16237_s27  }
 0x7b4   : > { %s6562_s6 = scalar_lea.sflag [#allocation5], %s6561_s5 }
 0x7b5   : > { %7768 = dma.done.wait (%p6857_p11), %s6562_s6, 8192  }
 0x7b6   : > { %7770 = vsyncadd (%p6857_p11), %s6562_s6, 4294959104  ;;  %s22_s22 = sadd.s32 1, %s7813_s22   ;;  %s16239_s18 = sld [smem:[#allocation18_spill]] }
 0x7b7   : > { %p19_p5 = scmp.ge.s32.totalorder %s22_s22, 6   ;;  %s16240_s7 = sld [smem:[#allocation14_spill]] }
 0x7b8   : > { %s16241_s17 = sld [smem:[#allocation21_spill]]  ;;  %s16245_s12 = smov %s7777_s13 }
 0x7b9   : > { %s16242_s19 = sld [smem:[#allocation16_spill]]  ;;  %s16246_s13 = smov %s7781_s14 }
 0x7ba   : > { %s16243_s24 = sld [smem:[#allocation17_spill]]  ;;  %s16248_s15 = smov %s7789_s16 }
 0x7bb   : > { %s16244_s21 = sld [smem:[#allocation19_spill]] }
 0x7bc   : > { %s16247_s14 = smov %s16239_s18  ;;  %s16250_s18 = smov %s7805_s20 }
 0x7bd   : > { %s16249_s16 = smov %s16240_s7  ;;  %21 = sbr.rel (!%p19_p5) target bundleno = 14 (0xe), region = 109 }
 0x7c0   : > { %s16251_s20 = smov %s16243_s24 }
 0x7c2   :  { %6568 = vsyncpa [#allocation4], 1 }
 0x7c3   :  { %6570 = vsyncpa [#allocation4 + $0x1], 1 }
 0x7c4   :  { %6571 = vsyncpa [#allocation7], 1 }
 0x7c5   :  { %6573 = vsyncpa [#allocation7 + $0x1], 1 }
 0x7c6   :  { %6574 = vsyncpa [#allocation5], 1 }
 0x7c7   :  { %6576 = vsyncpa [#allocation5 + $0x1], 1 }

</bundles_post_ra>
